<compile_context>
chip_gen: v6e
topology: v6e:2x2x1
jax: 0.10.0
libtpu: 0.0.40
codegen_flags: <defaults>
</compile_context>

<pallas_src>
import functools
import math
import numpy as np
import jax
import jax.numpy as jnp
from jax.experimental import pallas as pl
from jax.experimental.pallas import tpu as pltpu

# ----------------------------- configs ------------------------------------
B = 2                    # batch
ENC_IN = 128             # n  (lane dim)
PRE_TRAIN = 32           # P  = num_group * block_len
PATCH_LEN = 8
NUM_GROUP = (max(PRE_TRAIN, PATCH_LEN) - PATCH_LEN) // PATCH_LEN + 1   # 4
BLOCK_LEN = PRE_TRAIN // NUM_GROUP                                     # 8
DILATION_RATES = (1, 2)


# --------------------------- kernel helpers --------------------------------
def _conv3x3(planes, w_ref, b_ref, w_base, b_base, d, G, L, W, rmask, cmask,
             init=None):
    """3x3 conv (stride 1, padding=d, dilation=d) over G lane-fused (L, W)
    planes, W = NB*N lanes.

    Loop order (i, ky, kx) outer / o inner: only one shifted plane is live at
    a time (low vreg pressure) and each weight scalar is read once per tap.
    `rmask`/`cmask` are hoisted boundary masks built once per dilation by the
    caller; the column masks are per-batch-element (cols % N), which also
    zeroes lanes where a roll crossed a batch boundary.  `init` lets a
    previous conv's output act as the accumulator (sum over dilation rates)."""
    accs = list(init) if init is not None else [None] * G

    for i in range(G):
        for ky in range(3):
            dy = (ky - 1) * d
            p_row = planes[i]
            if dy != 0:
                p_row = pltpu.roll(p_row, shift=(-dy) % L, axis=0)
                p_row = jnp.where(rmask[dy], p_row, 0.0)
            for kx in range(3):
                dx = (kx - 1) * d
                p = p_row
                if dx != 0:
                    p = pltpu.roll(p, shift=(-dx) % W, axis=1)
                    p = jnp.where(cmask[dx], p, 0.0)
                for o in range(G):
                    # TODO(synk): if the bundle dump shows VPU splats in front
                    # of these SMEM scalar reads, pre-replicate the weights
                    # into a small VMEM table and fetch each plane with a
                    # stride-0 sublane-broadcast load instead.
                    w = w_ref[w_base + ((o * G + i) * 3 + ky) * 3 + kx]
                    t = w * p
                    accs[o] = t if accs[o] is None else accs[o] + t

    for o in range(G):
        accs[o] = accs[o] + b_ref[b_base + o]
    return accs


# ------------------------------ kernel --------------------------------------
def encoder_kernel(x_ref, wb_ref, bb_ref, wd_ref, bd_ref, wf_ref, bf_ref,
                   wp_ref, bp_ref, o_ref, *, G, L, N, W, dil):
    # Hoisted boundary masks: iota + compares built exactly once per grid step
    # (JAX/Mosaic do not CSE broadcast/iota) and shared by all conv calls.
    rows = jax.lax.broadcasted_iota(jnp.int32, (L, W), 0)
    coln = jax.lax.broadcasted_iota(jnp.int32, (L, W), 1) % N  # within-batch lane
    rmasks, cmasks = {}, {}
    for d in sorted(set(dil) | {1}):
        rmasks[d] = {-d: rows >= d, d: rows < L - d}
        cmasks[d] = {-d: coln >= d, d: coln < N - d}

    # Lane-fused group planes: each is a single (L, W = NB*N) array.
    xg = [x_ref[g] for g in range(G)]

    # block_linear: Linear over the group (channel) dim == 1x1 channel mix.
    gi = [None] * G
    for o in range(G):
        acc = None
        for g in range(G):
            t = wb_ref[o * G + g] * xg[g]
            acc = t if acc is None else acc + t
        gi[o] = acc + bb_ref[o]

    # multi-dilation conv (stand-in for Multi_Def_Conv), summed over rates;
    # each call accumulates straight into the running result.
    mdc = None
    for di, d in enumerate(dil):
        mdc = _conv3x3(xg, wd_ref, bd_ref, di * G * G * 9, di * G, d,
                       G, L, W, rmasks[d], cmasks[d], init=mdc)

    # softmax over the group dim, then gated residual:
    #   repres = group_inner + group_inner * softmax(mdc, dim=1)
    #          = group_inner * (1 + softmax(mdc, dim=1))
    m = mdc[0]
    for v in mdc[1:]:
        m = jnp.maximum(m, v)
    ex = [jnp.exp(v - m) for v in mdc]
    s = ex[0]
    for e in ex[1:]:
        s = s + e
    inv = pl.reciprocal(s, approx=True)
    rep = [gi[o] * (1.0 + ex[o] * inv) for o in range(G)]

    # ff: Conv2d(G, G, 3, padding=1) (+ Dropout == identity in eval)
    ff = _conv3x3(rep, wf_ref, bf_ref, 0, 0, 1, G, L, W, rmasks[1], cmasks[1])

    # proj: Linear(pre_train, pre_train) along the flattened (G*L) axis.
    # One lane-dense (P, NB*N) MXU dot per step; proj bias arrives
    # pre-broadcast so no in-kernel lane broadcast is needed.
    # TODO(synk): on v6e/v7x the conv/gating planes could be packed to bf16
    # (VPU/EUP are bf16-native) for ~2x on the VALU-bound loops; kept in f32
    # here to stay generation-agnostic and inside the 1e-3 tolerance.
    slab = jnp.concatenate(ff, axis=0)                       # (P, W)
    out = jnp.dot(wp_ref[...], slab, preferred_element_type=jnp.float32)
    o_ref[...] = out + bp_ref[...]


# ------------------------------ wrapper --------------------------------------
def _default_elements_per_step(batch):
    """v7x has two TensorCores: split the batch across them (grid 'parallel'),
    each core fusing its share of the batch into one step.  v5e/v6e have one
    TC: fuse the whole batch into a single grid step to amortize the ~0.35us
    per-step overhead and the SMEM weight scalar reads."""
    try:
        kind = jax.devices()[0].device_kind.lower()
    except Exception:
        kind = ""
    if "v7" in kind:
        return max(1, batch // 2)
    return batch


def encoder_forward(x, params, dil=DILATION_RATES, elements_per_step=None):
    Bb, G, L, N = x.shape
    P = G * L
    assert all(0 < d < L and d < N for d in dil), "dilation must be < spatial dims"

    NB = (elements_per_step if elements_per_step is not None
          else _default_elements_per_step(Bb))
    NB = max(1, math.gcd(int(NB), Bb))   # must divide the batch
    S = Bb // NB
    W = NB * N

    # Lane-fuse NB batch elements per grid step: (B,G,L,N) -> (S,G,L,NB*N).
    x_fused = (x.reshape(S, NB, G, L, N)
                .transpose(0, 2, 3, 1, 4)
                .reshape(S, G, L, W))

    wb = params["wb"].reshape(-1)
    bb = params["bb"]
    wd = params["wd"].reshape(-1)
    bd = params["bd"].reshape(-1)
    wf = params["wf"].reshape(-1)
    bf = params["bf"]
    wp = params["wp"]
    bp = jnp.broadcast_to(params["bp"].reshape(P, 1), (P, W))   # pre-broadcast

    kernel = functools.partial(encoder_kernel, G=G, L=L, N=N, W=W,
                               dil=tuple(dil))
    smem = pl.BlockSpec(memory_space=pltpu.MemorySpace.SMEM)

    nd = len(dil)
    flops = Bb * (2 * G * G * L * N * (1 + 9 * (nd + 1)) + 2 * P * P * N)
    transcendentals = Bb * (G + 1) * L * N
    weight_elems = (wb.size + bb.size + wd.size + bd.size + wf.size + bf.size
                    + wp.size + P * W)
    bytes_accessed = 4 * (x.size + Bb * P * N + S * weight_elems)

    out_fused = pl.pallas_call(
        kernel,
        out_shape=jax.ShapeDtypeStruct((S, P, W), jnp.float32),
        grid=(S,),
        in_specs=[
            pl.BlockSpec((None, G, L, W), lambda b: (b, 0, 0, 0)),  # x (lane-fused)
            smem, smem,                                             # block_linear W, b
            smem, smem,                                             # multi-dilated conv W, b
            smem, smem,                                             # ff conv W, b
            pl.BlockSpec((P, P), lambda b: (0, 0)),                 # proj W
            pl.BlockSpec((P, W), lambda b: (0, 0)),                 # proj b (pre-broadcast)
        ],
        out_specs=pl.BlockSpec((None, P, W), lambda b: (b, 0, 0)),
        compiler_params=pltpu.CompilerParams(
            dimension_semantics=("parallel",)),
        cost_estimate=pl.CostEstimate(
            flops=int(flops), transcendentals=int(transcendentals),
            bytes_accessed=int(bytes_accessed)),
    )(x_fused, wb, bb, wd, bd, wf, bf, wp, bp)

    # Split the lane-fused batch back out: (S, P, NB*N) -> (B, P, N).
    return (out_fused.reshape(S, P, NB, N)
                     .transpose(0, 2, 1, 3)
                     .reshape(Bb, P, N))


# --------------------------- pure-JAX reference ------------------------------
def reference(x, params, dil=DILATION_RATES):
    Bb, G, L, N = x.shape
    hp = jax.lax.Precision.HIGHEST

    gi = jnp.einsum("og,bgln->boln", params["wb"], x, precision=hp)
    gi = gi + params["bb"][None, :, None, None]

    def conv(inp, Wc, bias, d):
        y = jax.lax.conv_general_dilated(
            inp, Wc, window_strides=(1, 1), padding=((d, d), (d, d)),
            rhs_dilation=(d, d), dimension_numbers=("NCHW", "OIHW", "NCHW"),
            precision=hp)
        return y + bias[None, :, None, None]

    mdc = None
    for di, d in enumerate(dil):
        c = conv(x, params["wd"][di], params["bd"][di], d)
        mdc = c if mdc is None else mdc + c

    sm = jax.nn.softmax(mdc, axis=1)
    rep = gi + gi * sm
    rep = conv(rep, params["wf"], params["bf"], 1)
    all_fea = rep.reshape(Bb, G * L, N)
    out = jnp.einsum("pq,bqn->bpn", params["wp"], all_fea, precision=hp)
    return out + params["bp"][None, :, None]


# --------------------------------- main ---------------------------------------
if __name__ == "__main__":
    G, L, N, P = NUM_GROUP, BLOCK_LEN, ENC_IN, PRE_TRAIN
    key = jax.random.PRNGKey(0)
    ks = jax.random.split(key, 9)
    params = {
        "wb": 0.1 * jax.random.normal(ks[0], (G, G), jnp.float32),
        "bb": 0.05 * jax.random.normal(ks[1], (G,), jnp.float32),
        "wd": 0.1 * jax.random.normal(ks[2], (len(DILATION_RATES), G, G, 3, 3), jnp.float32),
        "bd": 0.05 * jax.random.normal(ks[3], (len(DILATION_RATES), G), jnp.float32),
        "wf": 0.1 * jax.random.normal(ks[4], (G, G, 3, 3), jnp.float32),
        "bf": 0.05 * jax.random.normal(ks[5], (G,), jnp.float32),
        "wp": 0.1 * jax.random.normal(ks[6], (P, P), jnp.float32),
        "bp": 0.05 * jax.random.normal(ks[7], (P,), jnp.float32),
    }
    x_enc = jax.random.normal(ks[8], (B, G, L, N), jnp.float32)

    out = encoder_forward(x_enc, params)
    out = jax.block_until_ready(out)
    assert out.shape == (B, P, N), out.shape

    ref = jax.block_until_ready(reference(x_enc, params))
    np.testing.assert_allclose(np.asarray(out), np.asarray(ref), rtol=1e-3, atol=1e-3)

    print("KERNEL_OK")
</pallas_src>

<mosaic_0001>
module attributes {stable_mosaic.version = 11 : i64} {
  func.func @encoder_kernel(%arg0: i32, %arg1: memref<1x4x8x256xf32, #tpu.memory_space<vmem>>, %arg2: memref<16xf32, #tpu.memory_space<smem>>, %arg3: memref<4xf32, #tpu.memory_space<smem>>, %arg4: memref<288xf32, #tpu.memory_space<smem>>, %arg5: memref<8xf32, #tpu.memory_space<smem>>, %arg6: memref<144xf32, #tpu.memory_space<smem>>, %arg7: memref<4xf32, #tpu.memory_space<smem>>, %arg8: memref<32x32xf32, #tpu.memory_space<vmem>>, %arg9: memref<32x256xf32, #tpu.memory_space<vmem>>, %arg10: memref<1x32x256xf32, #tpu.memory_space<vmem>>) attributes {dimension_semantics = [#tpu.dimension_semantics<parallel>], iteration_bounds = array<i64: 1>, scalar_prefetch = 0 : i64, scratch_operands = 0 : i64, tpu.core_type = #tpu.core_type<tc>, window_params = [{transform_indices = @transform_0, window_bounds = array<i64: 1, 4, 8, 256>}, {transform_indices = @transform_1, window_bounds = array<i64: 16>}, {transform_indices = @transform_2, window_bounds = array<i64: 4>}, {transform_indices = @transform_3, window_bounds = array<i64: 288>}, {transform_indices = @transform_4, window_bounds = array<i64: 8>}, {transform_indices = @transform_5, window_bounds = array<i64: 144>}, {transform_indices = @transform_6, window_bounds = array<i64: 4>}, {pipeline_mode = #tpu.pipeline_mode<synchronous>, transform_indices = @transform_7, window_bounds = array<i64: 32, 32>}, {pipeline_mode = #tpu.pipeline_mode<synchronous>, transform_indices = @transform_8, window_bounds = array<i64: 32, 256>}, {transform_indices = @transform_9, window_bounds = array<i64: 1, 32, 256>}]} {
    %0 = tpu.iota {dimensions = array<i32: 0>} : vector<8x256xi32>
    %1 = tpu.iota {dimensions = array<i32: 1>} : vector<8x256xi32>
    %c128_i32 = arith.constant 128 : i32
    %c0_i32 = arith.constant 0 : i32
    %2 = arith.cmpi eq, %c128_i32, %c0_i32 : i32
    %c1_i32 = arith.constant 1 : i32
    %3 = arith.select %2, %c1_i32, %c128_i32 : i32
    %4 = vector.broadcast %3 : i32 to vector<8x256xi32>
    %5 = arith.remsi %1, %4 : vector<8x256xi32>
    %c0_i32_0 = arith.constant 0 : i32
    %6 = vector.broadcast %c0_i32_0 : i32 to vector<8x256xi32>
    %7 = arith.cmpi ne, %5, %6 : vector<8x256xi32>
    %c0_i32_1 = arith.constant 0 : i32
    %8 = vector.broadcast %c0_i32_1 : i32 to vector<8x256xi32>
    %9 = arith.cmpi slt, %5, %8 : vector<8x256xi32>
    %c0_i32_2 = arith.constant 0 : i32
    %10 = arith.cmpi slt, %3, %c0_i32_2 : i32
    %11 = vector.broadcast %10 : i1 to vector<8x256xi1>
    %12 = vector.broadcast %11 : vector<8x256xi1> to vector<8x256xi1>
    %13 = arith.xori %9, %12 : vector<8x256xi1>
    %14 = arith.andi %13, %7 : vector<8x256xi1>
    %15 = vector.broadcast %3 : i32 to vector<8x256xi32>
    %16 = arith.addi %5, %15 : vector<8x256xi32>
    %17 = arith.select %14, %16, %5 : vector<8x256xi1>, vector<8x256xi32>
    %c1_i32_3 = arith.constant 1 : i32
    %18 = vector.broadcast %c1_i32_3 : i32 to vector<8x256xi32>
    %19 = arith.cmpi sge, %0, %18 : vector<8x256xi32>
    %c7_i32 = arith.constant 7 : i32
    %20 = vector.broadcast %c7_i32 : i32 to vector<8x256xi32>
    %21 = arith.cmpi slt, %0, %20 : vector<8x256xi32>
    %c1_i32_4 = arith.constant 1 : i32
    %22 = vector.broadcast %c1_i32_4 : i32 to vector<8x256xi32>
    %23 = arith.cmpi sge, %17, %22 : vector<8x256xi32>
    %c127_i32 = arith.constant 127 : i32
    %24 = vector.broadcast %c127_i32 : i32 to vector<8x256xi32>
    %25 = arith.cmpi slt, %17, %24 : vector<8x256xi32>
    %c2_i32 = arith.constant 2 : i32
    %26 = vector.broadcast %c2_i32 : i32 to vector<8x256xi32>
    %27 = arith.cmpi sge, %0, %26 : vector<8x256xi32>
    %c6_i32 = arith.constant 6 : i32
    %28 = vector.broadcast %c6_i32 : i32 to vector<8x256xi32>
    %29 = arith.cmpi slt, %0, %28 : vector<8x256xi32>
    %c2_i32_5 = arith.constant 2 : i32
    %30 = vector.broadcast %c2_i32_5 : i32 to vector<8x256xi32>
    %31 = arith.cmpi sge, %17, %30 : vector<8x256xi32>
    %c126_i32 = arith.constant 126 : i32
    %32 = vector.broadcast %c126_i32 : i32 to vector<8x256xi32>
    %33 = arith.cmpi slt, %17, %32 : vector<8x256xi32>
    %c0 = arith.constant 0 : index
    %c0_6 = arith.constant 0 : index
    %c0_7 = arith.constant 0 : index
    %c0_8 = arith.constant 0 : index
    %34 = vector.load %arg1[%c0, %c0_6, %c0_7, %c0_8] : memref<1x4x8x256xf32, #tpu.memory_space<vmem>>, vector<1x1x8x256xf32>
    %35 = vector.shape_cast %34 : vector<1x1x8x256xf32> to vector<8x256xf32>
    %c0_9 = arith.constant 0 : index
    %c1 = arith.constant 1 : index
    %c0_10 = arith.constant 0 : index
    %c0_11 = arith.constant 0 : index
    %36 = vector.load %arg1[%c0_9, %c1, %c0_10, %c0_11] : memref<1x4x8x256xf32, #tpu.memory_space<vmem>>, vector<1x1x8x256xf32>
    %37 = vector.shape_cast %36 : vector<1x1x8x256xf32> to vector<8x256xf32>
    %c0_12 = arith.constant 0 : index
    %c2 = arith.constant 2 : index
    %c0_13 = arith.constant 0 : index
    %c0_14 = arith.constant 0 : index
    %38 = vector.load %arg1[%c0_12, %c2, %c0_13, %c0_14] : memref<1x4x8x256xf32, #tpu.memory_space<vmem>>, vector<1x1x8x256xf32>
    %39 = vector.shape_cast %38 : vector<1x1x8x256xf32> to vector<8x256xf32>
    %c0_15 = arith.constant 0 : index
    %c3 = arith.constant 3 : index
    %c0_16 = arith.constant 0 : index
    %c0_17 = arith.constant 0 : index
    %40 = vector.load %arg1[%c0_15, %c3, %c0_16, %c0_17] : memref<1x4x8x256xf32, #tpu.memory_space<vmem>>, vector<1x1x8x256xf32>
    %41 = vector.shape_cast %40 : vector<1x1x8x256xf32> to vector<8x256xf32>
    %c0_18 = arith.constant 0 : index
    %42 = memref.load %arg2[%c0_18] : memref<16xf32, #tpu.memory_space<smem>>
    %43 = vector.broadcast %42 : f32 to vector<8x256xf32>
    %44 = arith.mulf %43, %35 : vector<8x256xf32>
    %c1_19 = arith.constant 1 : index
    %45 = memref.load %arg2[%c1_19] : memref<16xf32, #tpu.memory_space<smem>>
    %46 = vector.broadcast %45 : f32 to vector<8x256xf32>
    %47 = arith.mulf %46, %37 : vector<8x256xf32>
    %48 = arith.addf %44, %47 : vector<8x256xf32>
    %c2_20 = arith.constant 2 : index
    %49 = memref.load %arg2[%c2_20] : memref<16xf32, #tpu.memory_space<smem>>
    %50 = vector.broadcast %49 : f32 to vector<8x256xf32>
    %51 = arith.mulf %50, %39 : vector<8x256xf32>
    %52 = arith.addf %48, %51 : vector<8x256xf32>
    %c3_21 = arith.constant 3 : index
    %53 = memref.load %arg2[%c3_21] : memref<16xf32, #tpu.memory_space<smem>>
    %54 = vector.broadcast %53 : f32 to vector<8x256xf32>
    %55 = arith.mulf %54, %41 : vector<8x256xf32>
    %56 = arith.addf %52, %55 : vector<8x256xf32>
    %c0_22 = arith.constant 0 : index
    %57 = memref.load %arg3[%c0_22] : memref<4xf32, #tpu.memory_space<smem>>
    %58 = vector.broadcast %57 : f32 to vector<8x256xf32>
    %59 = arith.addf %56, %58 : vector<8x256xf32>
    %c4 = arith.constant 4 : index
    %60 = memref.load %arg2[%c4] : memref<16xf32, #tpu.memory_space<smem>>
    %61 = vector.broadcast %60 : f32 to vector<8x256xf32>
    %62 = arith.mulf %61, %35 : vector<8x256xf32>
    %c5 = arith.constant 5 : index
    %63 = memref.load %arg2[%c5] : memref<16xf32, #tpu.memory_space<smem>>
    %64 = vector.broadcast %63 : f32 to vector<8x256xf32>
    %65 = arith.mulf %64, %37 : vector<8x256xf32>
    %66 = arith.addf %62, %65 : vector<8x256xf32>
    %c6 = arith.constant 6 : index
    %67 = memref.load %arg2[%c6] : memref<16xf32, #tpu.memory_space<smem>>
    %68 = vector.broadcast %67 : f32 to vector<8x256xf32>
    %69 = arith.mulf %68, %39 : vector<8x256xf32>
    %70 = arith.addf %66, %69 : vector<8x256xf32>
    %c7 = arith.constant 7 : index
    %71 = memref.load %arg2[%c7] : memref<16xf32, #tpu.memory_space<smem>>
    %72 = vector.broadcast %71 : f32 to vector<8x256xf32>
    %73 = arith.mulf %72, %41 : vector<8x256xf32>
    %74 = arith.addf %70, %73 : vector<8x256xf32>
    %c1_23 = arith.constant 1 : index
    %75 = memref.load %arg3[%c1_23] : memref<4xf32, #tpu.memory_space<smem>>
    %76 = vector.broadcast %75 : f32 to vector<8x256xf32>
    %77 = arith.addf %74, %76 : vector<8x256xf32>
    %c8 = arith.constant 8 : index
    %78 = memref.load %arg2[%c8] : memref<16xf32, #tpu.memory_space<smem>>
    %79 = vector.broadcast %78 : f32 to vector<8x256xf32>
    %80 = arith.mulf %79, %35 : vector<8x256xf32>
    %c9 = arith.constant 9 : index
    %81 = memref.load %arg2[%c9] : memref<16xf32, #tpu.memory_space<smem>>
    %82 = vector.broadcast %81 : f32 to vector<8x256xf32>
    %83 = arith.mulf %82, %37 : vector<8x256xf32>
    %84 = arith.addf %80, %83 : vector<8x256xf32>
    %c10 = arith.constant 10 : index
    %85 = memref.load %arg2[%c10] : memref<16xf32, #tpu.memory_space<smem>>
    %86 = vector.broadcast %85 : f32 to vector<8x256xf32>
    %87 = arith.mulf %86, %39 : vector<8x256xf32>
    %88 = arith.addf %84, %87 : vector<8x256xf32>
    %c11 = arith.constant 11 : index
    %89 = memref.load %arg2[%c11] : memref<16xf32, #tpu.memory_space<smem>>
    %90 = vector.broadcast %89 : f32 to vector<8x256xf32>
    %91 = arith.mulf %90, %41 : vector<8x256xf32>
    %92 = arith.addf %88, %91 : vector<8x256xf32>
    %c2_24 = arith.constant 2 : index
    %93 = memref.load %arg3[%c2_24] : memref<4xf32, #tpu.memory_space<smem>>
    %94 = vector.broadcast %93 : f32 to vector<8x256xf32>
    %95 = arith.addf %92, %94 : vector<8x256xf32>
    %c12 = arith.constant 12 : index
    %96 = memref.load %arg2[%c12] : memref<16xf32, #tpu.memory_space<smem>>
    %97 = vector.broadcast %96 : f32 to vector<8x256xf32>
    %98 = arith.mulf %97, %35 : vector<8x256xf32>
    %c13 = arith.constant 13 : index
    %99 = memref.load %arg2[%c13] : memref<16xf32, #tpu.memory_space<smem>>
    %100 = vector.broadcast %99 : f32 to vector<8x256xf32>
    %101 = arith.mulf %100, %37 : vector<8x256xf32>
    %102 = arith.addf %98, %101 : vector<8x256xf32>
    %c14 = arith.constant 14 : index
    %103 = memref.load %arg2[%c14] : memref<16xf32, #tpu.memory_space<smem>>
    %104 = vector.broadcast %103 : f32 to vector<8x256xf32>
    %105 = arith.mulf %104, %39 : vector<8x256xf32>
    %106 = arith.addf %102, %105 : vector<8x256xf32>
    %c15 = arith.constant 15 : index
    %107 = memref.load %arg2[%c15] : memref<16xf32, #tpu.memory_space<smem>>
    %108 = vector.broadcast %107 : f32 to vector<8x256xf32>
    %109 = arith.mulf %108, %41 : vector<8x256xf32>
    %110 = arith.addf %106, %109 : vector<8x256xf32>
    %c3_25 = arith.constant 3 : index
    %111 = memref.load %arg3[%c3_25] : memref<4xf32, #tpu.memory_space<smem>>
    %112 = vector.broadcast %111 : f32 to vector<8x256xf32>
    %113 = arith.addf %110, %112 : vector<8x256xf32>
    %c1_i32_26 = arith.constant 1 : i32
    %114 = tpu.dynamic_rotate %35 by %c1_i32_26 dim 0 : vector<8x256xf32>, i32 -> vector<8x256xf32>
    %cst = arith.constant 0.000000e+00 : f32
    %115 = vector.broadcast %cst : f32 to vector<8x256xf32>
    %116 = arith.select %19, %114, %115 : vector<8x256xi1>, vector<8x256xf32>
    %c1_i32_27 = arith.constant 1 : i32
    %117 = tpu.dynamic_rotate %116 by %c1_i32_27 dim 1 : vector<8x256xf32>, i32 -> vector<8x256xf32>
    %cst_28 = arith.constant 0.000000e+00 : f32
    %118 = vector.broadcast %cst_28 : f32 to vector<8x256xf32>
    %119 = arith.select %23, %117, %118 : vector<8x256xi1>, vector<8x256xf32>
    %c0_29 = arith.constant 0 : index
    %120 = memref.load %arg4[%c0_29] : memref<288xf32, #tpu.memory_space<smem>>
    %121 = vector.broadcast %120 : f32 to vector<8x256xf32>
    %122 = arith.mulf %121, %119 : vector<8x256xf32>
    %c36 = arith.constant 36 : index
    %123 = memref.load %arg4[%c36] : memref<288xf32, #tpu.memory_space<smem>>
    %124 = vector.broadcast %123 : f32 to vector<8x256xf32>
    %125 = arith.mulf %124, %119 : vector<8x256xf32>
    %c72 = arith.constant 72 : index
    %126 = memref.load %arg4[%c72] : memref<288xf32, #tpu.memory_space<smem>>
    %127 = vector.broadcast %126 : f32 to vector<8x256xf32>
    %128 = arith.mulf %127, %119 : vector<8x256xf32>
    %c108 = arith.constant 108 : index
    %129 = memref.load %arg4[%c108] : memref<288xf32, #tpu.memory_space<smem>>
    %130 = vector.broadcast %129 : f32 to vector<8x256xf32>
    %131 = arith.mulf %130, %119 : vector<8x256xf32>
    %c1_30 = arith.constant 1 : index
    %132 = memref.load %arg4[%c1_30] : memref<288xf32, #tpu.memory_space<smem>>
    %133 = vector.broadcast %132 : f32 to vector<8x256xf32>
    %134 = arith.mulf %133, %116 : vector<8x256xf32>
    %135 = arith.addf %122, %134 : vector<8x256xf32>
    %c37 = arith.constant 37 : index
    %136 = memref.load %arg4[%c37] : memref<288xf32, #tpu.memory_space<smem>>
    %137 = vector.broadcast %136 : f32 to vector<8x256xf32>
    %138 = arith.mulf %137, %116 : vector<8x256xf32>
    %139 = arith.addf %125, %138 : vector<8x256xf32>
    %c73 = arith.constant 73 : index
    %140 = memref.load %arg4[%c73] : memref<288xf32, #tpu.memory_space<smem>>
    %141 = vector.broadcast %140 : f32 to vector<8x256xf32>
    %142 = arith.mulf %141, %116 : vector<8x256xf32>
    %143 = arith.addf %128, %142 : vector<8x256xf32>
    %c109 = arith.constant 109 : index
    %144 = memref.load %arg4[%c109] : memref<288xf32, #tpu.memory_space<smem>>
    %145 = vector.broadcast %144 : f32 to vector<8x256xf32>
    %146 = arith.mulf %145, %116 : vector<8x256xf32>
    %147 = arith.addf %131, %146 : vector<8x256xf32>
    %c255_i32 = arith.constant 255 : i32
    %148 = tpu.dynamic_rotate %116 by %c255_i32 dim 1 : vector<8x256xf32>, i32 -> vector<8x256xf32>
    %cst_31 = arith.constant 0.000000e+00 : f32
    %149 = vector.broadcast %cst_31 : f32 to vector<8x256xf32>
    %150 = arith.select %25, %148, %149 : vector<8x256xi1>, vector<8x256xf32>
    %c2_32 = arith.constant 2 : index
    %151 = memref.load %arg4[%c2_32] : memref<288xf32, #tpu.memory_space<smem>>
    %152 = vector.broadcast %151 : f32 to vector<8x256xf32>
    %153 = arith.mulf %152, %150 : vector<8x256xf32>
    %154 = arith.addf %135, %153 : vector<8x256xf32>
    %c38 = arith.constant 38 : index
    %155 = memref.load %arg4[%c38] : memref<288xf32, #tpu.memory_space<smem>>
    %156 = vector.broadcast %155 : f32 to vector<8x256xf32>
    %157 = arith.mulf %156, %150 : vector<8x256xf32>
    %158 = arith.addf %139, %157 : vector<8x256xf32>
    %c74 = arith.constant 74 : index
    %159 = memref.load %arg4[%c74] : memref<288xf32, #tpu.memory_space<smem>>
    %160 = vector.broadcast %159 : f32 to vector<8x256xf32>
    %161 = arith.mulf %160, %150 : vector<8x256xf32>
    %162 = arith.addf %143, %161 : vector<8x256xf32>
    %c110 = arith.constant 110 : index
    %163 = memref.load %arg4[%c110] : memref<288xf32, #tpu.memory_space<smem>>
    %164 = vector.broadcast %163 : f32 to vector<8x256xf32>
    %165 = arith.mulf %164, %150 : vector<8x256xf32>
    %166 = arith.addf %147, %165 : vector<8x256xf32>
    %c1_i32_33 = arith.constant 1 : i32
    %167 = tpu.dynamic_rotate %35 by %c1_i32_33 dim 1 : vector<8x256xf32>, i32 -> vector<8x256xf32>
    %cst_34 = arith.constant 0.000000e+00 : f32
    %168 = vector.broadcast %cst_34 : f32 to vector<8x256xf32>
    %169 = arith.select %23, %167, %168 : vector<8x256xi1>, vector<8x256xf32>
    %c3_35 = arith.constant 3 : index
    %170 = memref.load %arg4[%c3_35] : memref<288xf32, #tpu.memory_space<smem>>
    %171 = vector.broadcast %170 : f32 to vector<8x256xf32>
    %172 = arith.mulf %171, %169 : vector<8x256xf32>
    %173 = arith.addf %154, %172 : vector<8x256xf32>
    %c39 = arith.constant 39 : index
    %174 = memref.load %arg4[%c39] : memref<288xf32, #tpu.memory_space<smem>>
    %175 = vector.broadcast %174 : f32 to vector<8x256xf32>
    %176 = arith.mulf %175, %169 : vector<8x256xf32>
    %177 = arith.addf %158, %176 : vector<8x256xf32>
    %c75 = arith.constant 75 : index
    %178 = memref.load %arg4[%c75] : memref<288xf32, #tpu.memory_space<smem>>
    %179 = vector.broadcast %178 : f32 to vector<8x256xf32>
    %180 = arith.mulf %179, %169 : vector<8x256xf32>
    %181 = arith.addf %162, %180 : vector<8x256xf32>
    %c111 = arith.constant 111 : index
    %182 = memref.load %arg4[%c111] : memref<288xf32, #tpu.memory_space<smem>>
    %183 = vector.broadcast %182 : f32 to vector<8x256xf32>
    %184 = arith.mulf %183, %169 : vector<8x256xf32>
    %185 = arith.addf %166, %184 : vector<8x256xf32>
    %c4_36 = arith.constant 4 : index
    %186 = memref.load %arg4[%c4_36] : memref<288xf32, #tpu.memory_space<smem>>
    %187 = vector.broadcast %186 : f32 to vector<8x256xf32>
    %188 = arith.mulf %187, %35 : vector<8x256xf32>
    %189 = arith.addf %173, %188 : vector<8x256xf32>
    %c40 = arith.constant 40 : index
    %190 = memref.load %arg4[%c40] : memref<288xf32, #tpu.memory_space<smem>>
    %191 = vector.broadcast %190 : f32 to vector<8x256xf32>
    %192 = arith.mulf %191, %35 : vector<8x256xf32>
    %193 = arith.addf %177, %192 : vector<8x256xf32>
    %c76 = arith.constant 76 : index
    %194 = memref.load %arg4[%c76] : memref<288xf32, #tpu.memory_space<smem>>
    %195 = vector.broadcast %194 : f32 to vector<8x256xf32>
    %196 = arith.mulf %195, %35 : vector<8x256xf32>
    %197 = arith.addf %181, %196 : vector<8x256xf32>
    %c112 = arith.constant 112 : index
    %198 = memref.load %arg4[%c112] : memref<288xf32, #tpu.memory_space<smem>>
    %199 = vector.broadcast %198 : f32 to vector<8x256xf32>
    %200 = arith.mulf %199, %35 : vector<8x256xf32>
    %201 = arith.addf %185, %200 : vector<8x256xf32>
    %c255_i32_37 = arith.constant 255 : i32
    %202 = tpu.dynamic_rotate %35 by %c255_i32_37 dim 1 : vector<8x256xf32>, i32 -> vector<8x256xf32>
    %cst_38 = arith.constant 0.000000e+00 : f32
    %203 = vector.broadcast %cst_38 : f32 to vector<8x256xf32>
    %204 = arith.select %25, %202, %203 : vector<8x256xi1>, vector<8x256xf32>
    %c5_39 = arith.constant 5 : index
    %205 = memref.load %arg4[%c5_39] : memref<288xf32, #tpu.memory_space<smem>>
    %206 = vector.broadcast %205 : f32 to vector<8x256xf32>
    %207 = arith.mulf %206, %204 : vector<8x256xf32>
    %208 = arith.addf %189, %207 : vector<8x256xf32>
    %c41 = arith.constant 41 : index
    %209 = memref.load %arg4[%c41] : memref<288xf32, #tpu.memory_space<smem>>
    %210 = vector.broadcast %209 : f32 to vector<8x256xf32>
    %211 = arith.mulf %210, %204 : vector<8x256xf32>
    %212 = arith.addf %193, %211 : vector<8x256xf32>
    %c77 = arith.constant 77 : index
    %213 = memref.load %arg4[%c77] : memref<288xf32, #tpu.memory_space<smem>>
    %214 = vector.broadcast %213 : f32 to vector<8x256xf32>
    %215 = arith.mulf %214, %204 : vector<8x256xf32>
    %216 = arith.addf %197, %215 : vector<8x256xf32>
    %c113 = arith.constant 113 : index
    %217 = memref.load %arg4[%c113] : memref<288xf32, #tpu.memory_space<smem>>
    %218 = vector.broadcast %217 : f32 to vector<8x256xf32>
    %219 = arith.mulf %218, %204 : vector<8x256xf32>
    %220 = arith.addf %201, %219 : vector<8x256xf32>
    %c7_i32_40 = arith.constant 7 : i32
    %221 = tpu.dynamic_rotate %35 by %c7_i32_40 dim 0 : vector<8x256xf32>, i32 -> vector<8x256xf32>
    %cst_41 = arith.constant 0.000000e+00 : f32
    %222 = vector.broadcast %cst_41 : f32 to vector<8x256xf32>
    %223 = arith.select %21, %221, %222 : vector<8x256xi1>, vector<8x256xf32>
    %c1_i32_42 = arith.constant 1 : i32
    %224 = tpu.dynamic_rotate %223 by %c1_i32_42 dim 1 : vector<8x256xf32>, i32 -> vector<8x256xf32>
    %cst_43 = arith.constant 0.000000e+00 : f32
    %225 = vector.broadcast %cst_43 : f32 to vector<8x256xf32>
    %226 = arith.select %23, %224, %225 : vector<8x256xi1>, vector<8x256xf32>
    %c6_44 = arith.constant 6 : index
    %227 = memref.load %arg4[%c6_44] : memref<288xf32, #tpu.memory_space<smem>>
    %228 = vector.broadcast %227 : f32 to vector<8x256xf32>
    %229 = arith.mulf %228, %226 : vector<8x256xf32>
    %230 = arith.addf %208, %229 : vector<8x256xf32>
    %c42 = arith.constant 42 : index
    %231 = memref.load %arg4[%c42] : memref<288xf32, #tpu.memory_space<smem>>
    %232 = vector.broadcast %231 : f32 to vector<8x256xf32>
    %233 = arith.mulf %232, %226 : vector<8x256xf32>
    %234 = arith.addf %212, %233 : vector<8x256xf32>
    %c78 = arith.constant 78 : index
    %235 = memref.load %arg4[%c78] : memref<288xf32, #tpu.memory_space<smem>>
    %236 = vector.broadcast %235 : f32 to vector<8x256xf32>
    %237 = arith.mulf %236, %226 : vector<8x256xf32>
    %238 = arith.addf %216, %237 : vector<8x256xf32>
    %c114 = arith.constant 114 : index
    %239 = memref.load %arg4[%c114] : memref<288xf32, #tpu.memory_space<smem>>
    %240 = vector.broadcast %239 : f32 to vector<8x256xf32>
    %241 = arith.mulf %240, %226 : vector<8x256xf32>
    %242 = arith.addf %220, %241 : vector<8x256xf32>
    %c7_45 = arith.constant 7 : index
    %243 = memref.load %arg4[%c7_45] : memref<288xf32, #tpu.memory_space<smem>>
    %244 = vector.broadcast %243 : f32 to vector<8x256xf32>
    %245 = arith.mulf %244, %223 : vector<8x256xf32>
    %246 = arith.addf %230, %245 : vector<8x256xf32>
    %c43 = arith.constant 43 : index
    %247 = memref.load %arg4[%c43] : memref<288xf32, #tpu.memory_space<smem>>
    %248 = vector.broadcast %247 : f32 to vector<8x256xf32>
    %249 = arith.mulf %248, %223 : vector<8x256xf32>
    %250 = arith.addf %234, %249 : vector<8x256xf32>
    %c79 = arith.constant 79 : index
    %251 = memref.load %arg4[%c79] : memref<288xf32, #tpu.memory_space<smem>>
    %252 = vector.broadcast %251 : f32 to vector<8x256xf32>
    %253 = arith.mulf %252, %223 : vector<8x256xf32>
    %254 = arith.addf %238, %253 : vector<8x256xf32>
    %c115 = arith.constant 115 : index
    %255 = memref.load %arg4[%c115] : memref<288xf32, #tpu.memory_space<smem>>
    %256 = vector.broadcast %255 : f32 to vector<8x256xf32>
    %257 = arith.mulf %256, %223 : vector<8x256xf32>
    %258 = arith.addf %242, %257 : vector<8x256xf32>
    %c255_i32_46 = arith.constant 255 : i32
    %259 = tpu.dynamic_rotate %223 by %c255_i32_46 dim 1 : vector<8x256xf32>, i32 -> vector<8x256xf32>
    %cst_47 = arith.constant 0.000000e+00 : f32
    %260 = vector.broadcast %cst_47 : f32 to vector<8x256xf32>
    %261 = arith.select %25, %259, %260 : vector<8x256xi1>, vector<8x256xf32>
    %c8_48 = arith.constant 8 : index
    %262 = memref.load %arg4[%c8_48] : memref<288xf32, #tpu.memory_space<smem>>
    %263 = vector.broadcast %262 : f32 to vector<8x256xf32>
    %264 = arith.mulf %263, %261 : vector<8x256xf32>
    %265 = arith.addf %246, %264 : vector<8x256xf32>
    %c44 = arith.constant 44 : index
    %266 = memref.load %arg4[%c44] : memref<288xf32, #tpu.memory_space<smem>>
    %267 = vector.broadcast %266 : f32 to vector<8x256xf32>
    %268 = arith.mulf %267, %261 : vector<8x256xf32>
    %269 = arith.addf %250, %268 : vector<8x256xf32>
    %c80 = arith.constant 80 : index
    %270 = memref.load %arg4[%c80] : memref<288xf32, #tpu.memory_space<smem>>
    %271 = vector.broadcast %270 : f32 to vector<8x256xf32>
    %272 = arith.mulf %271, %261 : vector<8x256xf32>
    %273 = arith.addf %254, %272 : vector<8x256xf32>
    %c116 = arith.constant 116 : index
    %274 = memref.load %arg4[%c116] : memref<288xf32, #tpu.memory_space<smem>>
    %275 = vector.broadcast %274 : f32 to vector<8x256xf32>
    %276 = arith.mulf %275, %261 : vector<8x256xf32>
    %277 = arith.addf %258, %276 : vector<8x256xf32>
    %c1_i32_49 = arith.constant 1 : i32
    %278 = tpu.dynamic_rotate %37 by %c1_i32_49 dim 0 : vector<8x256xf32>, i32 -> vector<8x256xf32>
    %cst_50 = arith.constant 0.000000e+00 : f32
    %279 = vector.broadcast %cst_50 : f32 to vector<8x256xf32>
    %280 = arith.select %19, %278, %279 : vector<8x256xi1>, vector<8x256xf32>
    %c1_i32_51 = arith.constant 1 : i32
    %281 = tpu.dynamic_rotate %280 by %c1_i32_51 dim 1 : vector<8x256xf32>, i32 -> vector<8x256xf32>
    %cst_52 = arith.constant 0.000000e+00 : f32
    %282 = vector.broadcast %cst_52 : f32 to vector<8x256xf32>
    %283 = arith.select %23, %281, %282 : vector<8x256xi1>, vector<8x256xf32>
    %c9_53 = arith.constant 9 : index
    %284 = memref.load %arg4[%c9_53] : memref<288xf32, #tpu.memory_space<smem>>
    %285 = vector.broadcast %284 : f32 to vector<8x256xf32>
    %286 = arith.mulf %285, %283 : vector<8x256xf32>
    %287 = arith.addf %265, %286 : vector<8x256xf32>
    %c45 = arith.constant 45 : index
    %288 = memref.load %arg4[%c45] : memref<288xf32, #tpu.memory_space<smem>>
    %289 = vector.broadcast %288 : f32 to vector<8x256xf32>
    %290 = arith.mulf %289, %283 : vector<8x256xf32>
    %291 = arith.addf %269, %290 : vector<8x256xf32>
    %c81 = arith.constant 81 : index
    %292 = memref.load %arg4[%c81] : memref<288xf32, #tpu.memory_space<smem>>
    %293 = vector.broadcast %292 : f32 to vector<8x256xf32>
    %294 = arith.mulf %293, %283 : vector<8x256xf32>
    %295 = arith.addf %273, %294 : vector<8x256xf32>
    %c117 = arith.constant 117 : index
    %296 = memref.load %arg4[%c117] : memref<288xf32, #tpu.memory_space<smem>>
    %297 = vector.broadcast %296 : f32 to vector<8x256xf32>
    %298 = arith.mulf %297, %283 : vector<8x256xf32>
    %299 = arith.addf %277, %298 : vector<8x256xf32>
    %c10_54 = arith.constant 10 : index
    %300 = memref.load %arg4[%c10_54] : memref<288xf32, #tpu.memory_space<smem>>
    %301 = vector.broadcast %300 : f32 to vector<8x256xf32>
    %302 = arith.mulf %301, %280 : vector<8x256xf32>
    %303 = arith.addf %287, %302 : vector<8x256xf32>
    %c46 = arith.constant 46 : index
    %304 = memref.load %arg4[%c46] : memref<288xf32, #tpu.memory_space<smem>>
    %305 = vector.broadcast %304 : f32 to vector<8x256xf32>
    %306 = arith.mulf %305, %280 : vector<8x256xf32>
    %307 = arith.addf %291, %306 : vector<8x256xf32>
    %c82 = arith.constant 82 : index
    %308 = memref.load %arg4[%c82] : memref<288xf32, #tpu.memory_space<smem>>
    %309 = vector.broadcast %308 : f32 to vector<8x256xf32>
    %310 = arith.mulf %309, %280 : vector<8x256xf32>
    %311 = arith.addf %295, %310 : vector<8x256xf32>
    %c118 = arith.constant 118 : index
    %312 = memref.load %arg4[%c118] : memref<288xf32, #tpu.memory_space<smem>>
    %313 = vector.broadcast %312 : f32 to vector<8x256xf32>
    %314 = arith.mulf %313, %280 : vector<8x256xf32>
    %315 = arith.addf %299, %314 : vector<8x256xf32>
    %c255_i32_55 = arith.constant 255 : i32
    %316 = tpu.dynamic_rotate %280 by %c255_i32_55 dim 1 : vector<8x256xf32>, i32 -> vector<8x256xf32>
    %cst_56 = arith.constant 0.000000e+00 : f32
    %317 = vector.broadcast %cst_56 : f32 to vector<8x256xf32>
    %318 = arith.select %25, %316, %317 : vector<8x256xi1>, vector<8x256xf32>
    %c11_57 = arith.constant 11 : index
    %319 = memref.load %arg4[%c11_57] : memref<288xf32, #tpu.memory_space<smem>>
    %320 = vector.broadcast %319 : f32 to vector<8x256xf32>
    %321 = arith.mulf %320, %318 : vector<8x256xf32>
    %322 = arith.addf %303, %321 : vector<8x256xf32>
    %c47 = arith.constant 47 : index
    %323 = memref.load %arg4[%c47] : memref<288xf32, #tpu.memory_space<smem>>
    %324 = vector.broadcast %323 : f32 to vector<8x256xf32>
    %325 = arith.mulf %324, %318 : vector<8x256xf32>
    %326 = arith.addf %307, %325 : vector<8x256xf32>
    %c83 = arith.constant 83 : index
    %327 = memref.load %arg4[%c83] : memref<288xf32, #tpu.memory_space<smem>>
    %328 = vector.broadcast %327 : f32 to vector<8x256xf32>
    %329 = arith.mulf %328, %318 : vector<8x256xf32>
    %330 = arith.addf %311, %329 : vector<8x256xf32>
    %c119 = arith.constant 119 : index
    %331 = memref.load %arg4[%c119] : memref<288xf32, #tpu.memory_space<smem>>
    %332 = vector.broadcast %331 : f32 to vector<8x256xf32>
    %333 = arith.mulf %332, %318 : vector<8x256xf32>
    %334 = arith.addf %315, %333 : vector<8x256xf32>
    %c1_i32_58 = arith.constant 1 : i32
    %335 = tpu.dynamic_rotate %37 by %c1_i32_58 dim 1 : vector<8x256xf32>, i32 -> vector<8x256xf32>
    %cst_59 = arith.constant 0.000000e+00 : f32
    %336 = vector.broadcast %cst_59 : f32 to vector<8x256xf32>
    %337 = arith.select %23, %335, %336 : vector<8x256xi1>, vector<8x256xf32>
    %c12_60 = arith.constant 12 : index
    %338 = memref.load %arg4[%c12_60] : memref<288xf32, #tpu.memory_space<smem>>
    %339 = vector.broadcast %338 : f32 to vector<8x256xf32>
    %340 = arith.mulf %339, %337 : vector<8x256xf32>
    %341 = arith.addf %322, %340 : vector<8x256xf32>
    %c48 = arith.constant 48 : index
    %342 = memref.load %arg4[%c48] : memref<288xf32, #tpu.memory_space<smem>>
    %343 = vector.broadcast %342 : f32 to vector<8x256xf32>
    %344 = arith.mulf %343, %337 : vector<8x256xf32>
    %345 = arith.addf %326, %344 : vector<8x256xf32>
    %c84 = arith.constant 84 : index
    %346 = memref.load %arg4[%c84] : memref<288xf32, #tpu.memory_space<smem>>
    %347 = vector.broadcast %346 : f32 to vector<8x256xf32>
    %348 = arith.mulf %347, %337 : vector<8x256xf32>
    %349 = arith.addf %330, %348 : vector<8x256xf32>
    %c120 = arith.constant 120 : index
    %350 = memref.load %arg4[%c120] : memref<288xf32, #tpu.memory_space<smem>>
    %351 = vector.broadcast %350 : f32 to vector<8x256xf32>
    %352 = arith.mulf %351, %337 : vector<8x256xf32>
    %353 = arith.addf %334, %352 : vector<8x256xf32>
    %c13_61 = arith.constant 13 : index
    %354 = memref.load %arg4[%c13_61] : memref<288xf32, #tpu.memory_space<smem>>
    %355 = vector.broadcast %354 : f32 to vector<8x256xf32>
    %356 = arith.mulf %355, %37 : vector<8x256xf32>
    %357 = arith.addf %341, %356 : vector<8x256xf32>
    %c49 = arith.constant 49 : index
    %358 = memref.load %arg4[%c49] : memref<288xf32, #tpu.memory_space<smem>>
    %359 = vector.broadcast %358 : f32 to vector<8x256xf32>
    %360 = arith.mulf %359, %37 : vector<8x256xf32>
    %361 = arith.addf %345, %360 : vector<8x256xf32>
    %c85 = arith.constant 85 : index
    %362 = memref.load %arg4[%c85] : memref<288xf32, #tpu.memory_space<smem>>
    %363 = vector.broadcast %362 : f32 to vector<8x256xf32>
    %364 = arith.mulf %363, %37 : vector<8x256xf32>
    %365 = arith.addf %349, %364 : vector<8x256xf32>
    %c121 = arith.constant 121 : index
    %366 = memref.load %arg4[%c121] : memref<288xf32, #tpu.memory_space<smem>>
    %367 = vector.broadcast %366 : f32 to vector<8x256xf32>
    %368 = arith.mulf %367, %37 : vector<8x256xf32>
    %369 = arith.addf %353, %368 : vector<8x256xf32>
    %c255_i32_62 = arith.constant 255 : i32
    %370 = tpu.dynamic_rotate %37 by %c255_i32_62 dim 1 : vector<8x256xf32>, i32 -> vector<8x256xf32>
    %cst_63 = arith.constant 0.000000e+00 : f32
    %371 = vector.broadcast %cst_63 : f32 to vector<8x256xf32>
    %372 = arith.select %25, %370, %371 : vector<8x256xi1>, vector<8x256xf32>
    %c14_64 = arith.constant 14 : index
    %373 = memref.load %arg4[%c14_64] : memref<288xf32, #tpu.memory_space<smem>>
    %374 = vector.broadcast %373 : f32 to vector<8x256xf32>
    %375 = arith.mulf %374, %372 : vector<8x256xf32>
    %376 = arith.addf %357, %375 : vector<8x256xf32>
    %c50 = arith.constant 50 : index
    %377 = memref.load %arg4[%c50] : memref<288xf32, #tpu.memory_space<smem>>
    %378 = vector.broadcast %377 : f32 to vector<8x256xf32>
    %379 = arith.mulf %378, %372 : vector<8x256xf32>
    %380 = arith.addf %361, %379 : vector<8x256xf32>
    %c86 = arith.constant 86 : index
    %381 = memref.load %arg4[%c86] : memref<288xf32, #tpu.memory_space<smem>>
    %382 = vector.broadcast %381 : f32 to vector<8x256xf32>
    %383 = arith.mulf %382, %372 : vector<8x256xf32>
    %384 = arith.addf %365, %383 : vector<8x256xf32>
    %c122 = arith.constant 122 : index
    %385 = memref.load %arg4[%c122] : memref<288xf32, #tpu.memory_space<smem>>
    %386 = vector.broadcast %385 : f32 to vector<8x256xf32>
    %387 = arith.mulf %386, %372 : vector<8x256xf32>
    %388 = arith.addf %369, %387 : vector<8x256xf32>
    %c7_i32_65 = arith.constant 7 : i32
    %389 = tpu.dynamic_rotate %37 by %c7_i32_65 dim 0 : vector<8x256xf32>, i32 -> vector<8x256xf32>
    %cst_66 = arith.constant 0.000000e+00 : f32
    %390 = vector.broadcast %cst_66 : f32 to vector<8x256xf32>
    %391 = arith.select %21, %389, %390 : vector<8x256xi1>, vector<8x256xf32>
    %c1_i32_67 = arith.constant 1 : i32
    %392 = tpu.dynamic_rotate %391 by %c1_i32_67 dim 1 : vector<8x256xf32>, i32 -> vector<8x256xf32>
    %cst_68 = arith.constant 0.000000e+00 : f32
    %393 = vector.broadcast %cst_68 : f32 to vector<8x256xf32>
    %394 = arith.select %23, %392, %393 : vector<8x256xi1>, vector<8x256xf32>
    %c15_69 = arith.constant 15 : index
    %395 = memref.load %arg4[%c15_69] : memref<288xf32, #tpu.memory_space<smem>>
    %396 = vector.broadcast %395 : f32 to vector<8x256xf32>
    %397 = arith.mulf %396, %394 : vector<8x256xf32>
    %398 = arith.addf %376, %397 : vector<8x256xf32>
    %c51 = arith.constant 51 : index
    %399 = memref.load %arg4[%c51] : memref<288xf32, #tpu.memory_space<smem>>
    %400 = vector.broadcast %399 : f32 to vector<8x256xf32>
    %401 = arith.mulf %400, %394 : vector<8x256xf32>
    %402 = arith.addf %380, %401 : vector<8x256xf32>
    %c87 = arith.constant 87 : index
    %403 = memref.load %arg4[%c87] : memref<288xf32, #tpu.memory_space<smem>>
    %404 = vector.broadcast %403 : f32 to vector<8x256xf32>
    %405 = arith.mulf %404, %394 : vector<8x256xf32>
    %406 = arith.addf %384, %405 : vector<8x256xf32>
    %c123 = arith.constant 123 : index
    %407 = memref.load %arg4[%c123] : memref<288xf32, #tpu.memory_space<smem>>
    %408 = vector.broadcast %407 : f32 to vector<8x256xf32>
    %409 = arith.mulf %408, %394 : vector<8x256xf32>
    %410 = arith.addf %388, %409 : vector<8x256xf32>
    %c16 = arith.constant 16 : index
    %411 = memref.load %arg4[%c16] : memref<288xf32, #tpu.memory_space<smem>>
    %412 = vector.broadcast %411 : f32 to vector<8x256xf32>
    %413 = arith.mulf %412, %391 : vector<8x256xf32>
    %414 = arith.addf %398, %413 : vector<8x256xf32>
    %c52 = arith.constant 52 : index
    %415 = memref.load %arg4[%c52] : memref<288xf32, #tpu.memory_space<smem>>
    %416 = vector.broadcast %415 : f32 to vector<8x256xf32>
    %417 = arith.mulf %416, %391 : vector<8x256xf32>
    %418 = arith.addf %402, %417 : vector<8x256xf32>
    %c88 = arith.constant 88 : index
    %419 = memref.load %arg4[%c88] : memref<288xf32, #tpu.memory_space<smem>>
    %420 = vector.broadcast %419 : f32 to vector<8x256xf32>
    %421 = arith.mulf %420, %391 : vector<8x256xf32>
    %422 = arith.addf %406, %421 : vector<8x256xf32>
    %c124 = arith.constant 124 : index
    %423 = memref.load %arg4[%c124] : memref<288xf32, #tpu.memory_space<smem>>
    %424 = vector.broadcast %423 : f32 to vector<8x256xf32>
    %425 = arith.mulf %424, %391 : vector<8x256xf32>
    %426 = arith.addf %410, %425 : vector<8x256xf32>
    %c255_i32_70 = arith.constant 255 : i32
    %427 = tpu.dynamic_rotate %391 by %c255_i32_70 dim 1 : vector<8x256xf32>, i32 -> vector<8x256xf32>
    %cst_71 = arith.constant 0.000000e+00 : f32
    %428 = vector.broadcast %cst_71 : f32 to vector<8x256xf32>
    %429 = arith.select %25, %427, %428 : vector<8x256xi1>, vector<8x256xf32>
    %c17 = arith.constant 17 : index
    %430 = memref.load %arg4[%c17] : memref<288xf32, #tpu.memory_space<smem>>
    %431 = vector.broadcast %430 : f32 to vector<8x256xf32>
    %432 = arith.mulf %431, %429 : vector<8x256xf32>
    %433 = arith.addf %414, %432 : vector<8x256xf32>
    %c53 = arith.constant 53 : index
    %434 = memref.load %arg4[%c53] : memref<288xf32, #tpu.memory_space<smem>>
    %435 = vector.broadcast %434 : f32 to vector<8x256xf32>
    %436 = arith.mulf %435, %429 : vector<8x256xf32>
    %437 = arith.addf %418, %436 : vector<8x256xf32>
    %c89 = arith.constant 89 : index
    %438 = memref.load %arg4[%c89] : memref<288xf32, #tpu.memory_space<smem>>
    %439 = vector.broadcast %438 : f32 to vector<8x256xf32>
    %440 = arith.mulf %439, %429 : vector<8x256xf32>
    %441 = arith.addf %422, %440 : vector<8x256xf32>
    %c125 = arith.constant 125 : index
    %442 = memref.load %arg4[%c125] : memref<288xf32, #tpu.memory_space<smem>>
    %443 = vector.broadcast %442 : f32 to vector<8x256xf32>
    %444 = arith.mulf %443, %429 : vector<8x256xf32>
    %445 = arith.addf %426, %444 : vector<8x256xf32>
    %c1_i32_72 = arith.constant 1 : i32
    %446 = tpu.dynamic_rotate %39 by %c1_i32_72 dim 0 : vector<8x256xf32>, i32 -> vector<8x256xf32>
    %cst_73 = arith.constant 0.000000e+00 : f32
    %447 = vector.broadcast %cst_73 : f32 to vector<8x256xf32>
    %448 = arith.select %19, %446, %447 : vector<8x256xi1>, vector<8x256xf32>
    %c1_i32_74 = arith.constant 1 : i32
    %449 = tpu.dynamic_rotate %448 by %c1_i32_74 dim 1 : vector<8x256xf32>, i32 -> vector<8x256xf32>
    %cst_75 = arith.constant 0.000000e+00 : f32
    %450 = vector.broadcast %cst_75 : f32 to vector<8x256xf32>
    %451 = arith.select %23, %449, %450 : vector<8x256xi1>, vector<8x256xf32>
    %c18 = arith.constant 18 : index
    %452 = memref.load %arg4[%c18] : memref<288xf32, #tpu.memory_space<smem>>
    %453 = vector.broadcast %452 : f32 to vector<8x256xf32>
    %454 = arith.mulf %453, %451 : vector<8x256xf32>
    %455 = arith.addf %433, %454 : vector<8x256xf32>
    %c54 = arith.constant 54 : index
    %456 = memref.load %arg4[%c54] : memref<288xf32, #tpu.memory_space<smem>>
    %457 = vector.broadcast %456 : f32 to vector<8x256xf32>
    %458 = arith.mulf %457, %451 : vector<8x256xf32>
    %459 = arith.addf %437, %458 : vector<8x256xf32>
    %c90 = arith.constant 90 : index
    %460 = memref.load %arg4[%c90] : memref<288xf32, #tpu.memory_space<smem>>
    %461 = vector.broadcast %460 : f32 to vector<8x256xf32>
    %462 = arith.mulf %461, %451 : vector<8x256xf32>
    %463 = arith.addf %441, %462 : vector<8x256xf32>
    %c126 = arith.constant 126 : index
    %464 = memref.load %arg4[%c126] : memref<288xf32, #tpu.memory_space<smem>>
    %465 = vector.broadcast %464 : f32 to vector<8x256xf32>
    %466 = arith.mulf %465, %451 : vector<8x256xf32>
    %467 = arith.addf %445, %466 : vector<8x256xf32>
    %c19 = arith.constant 19 : index
    %468 = memref.load %arg4[%c19] : memref<288xf32, #tpu.memory_space<smem>>
    %469 = vector.broadcast %468 : f32 to vector<8x256xf32>
    %470 = arith.mulf %469, %448 : vector<8x256xf32>
    %471 = arith.addf %455, %470 : vector<8x256xf32>
    %c55 = arith.constant 55 : index
    %472 = memref.load %arg4[%c55] : memref<288xf32, #tpu.memory_space<smem>>
    %473 = vector.broadcast %472 : f32 to vector<8x256xf32>
    %474 = arith.mulf %473, %448 : vector<8x256xf32>
    %475 = arith.addf %459, %474 : vector<8x256xf32>
    %c91 = arith.constant 91 : index
    %476 = memref.load %arg4[%c91] : memref<288xf32, #tpu.memory_space<smem>>
    %477 = vector.broadcast %476 : f32 to vector<8x256xf32>
    %478 = arith.mulf %477, %448 : vector<8x256xf32>
    %479 = arith.addf %463, %478 : vector<8x256xf32>
    %c127 = arith.constant 127 : index
    %480 = memref.load %arg4[%c127] : memref<288xf32, #tpu.memory_space<smem>>
    %481 = vector.broadcast %480 : f32 to vector<8x256xf32>
    %482 = arith.mulf %481, %448 : vector<8x256xf32>
    %483 = arith.addf %467, %482 : vector<8x256xf32>
    %c255_i32_76 = arith.constant 255 : i32
    %484 = tpu.dynamic_rotate %448 by %c255_i32_76 dim 1 : vector<8x256xf32>, i32 -> vector<8x256xf32>
    %cst_77 = arith.constant 0.000000e+00 : f32
    %485 = vector.broadcast %cst_77 : f32 to vector<8x256xf32>
    %486 = arith.select %25, %484, %485 : vector<8x256xi1>, vector<8x256xf32>
    %c20 = arith.constant 20 : index
    %487 = memref.load %arg4[%c20] : memref<288xf32, #tpu.memory_space<smem>>
    %488 = vector.broadcast %487 : f32 to vector<8x256xf32>
    %489 = arith.mulf %488, %486 : vector<8x256xf32>
    %490 = arith.addf %471, %489 : vector<8x256xf32>
    %c56 = arith.constant 56 : index
    %491 = memref.load %arg4[%c56] : memref<288xf32, #tpu.memory_space<smem>>
    %492 = vector.broadcast %491 : f32 to vector<8x256xf32>
    %493 = arith.mulf %492, %486 : vector<8x256xf32>
    %494 = arith.addf %475, %493 : vector<8x256xf32>
    %c92 = arith.constant 92 : index
    %495 = memref.load %arg4[%c92] : memref<288xf32, #tpu.memory_space<smem>>
    %496 = vector.broadcast %495 : f32 to vector<8x256xf32>
    %497 = arith.mulf %496, %486 : vector<8x256xf32>
    %498 = arith.addf %479, %497 : vector<8x256xf32>
    %c128 = arith.constant 128 : index
    %499 = memref.load %arg4[%c128] : memref<288xf32, #tpu.memory_space<smem>>
    %500 = vector.broadcast %499 : f32 to vector<8x256xf32>
    %501 = arith.mulf %500, %486 : vector<8x256xf32>
    %502 = arith.addf %483, %501 : vector<8x256xf32>
    %c1_i32_78 = arith.constant 1 : i32
    %503 = tpu.dynamic_rotate %39 by %c1_i32_78 dim 1 : vector<8x256xf32>, i32 -> vector<8x256xf32>
    %cst_79 = arith.constant 0.000000e+00 : f32
    %504 = vector.broadcast %cst_79 : f32 to vector<8x256xf32>
    %505 = arith.select %23, %503, %504 : vector<8x256xi1>, vector<8x256xf32>
    %c21 = arith.constant 21 : index
    %506 = memref.load %arg4[%c21] : memref<288xf32, #tpu.memory_space<smem>>
    %507 = vector.broadcast %506 : f32 to vector<8x256xf32>
    %508 = arith.mulf %507, %505 : vector<8x256xf32>
    %509 = arith.addf %490, %508 : vector<8x256xf32>
    %c57 = arith.constant 57 : index
    %510 = memref.load %arg4[%c57] : memref<288xf32, #tpu.memory_space<smem>>
    %511 = vector.broadcast %510 : f32 to vector<8x256xf32>
    %512 = arith.mulf %511, %505 : vector<8x256xf32>
    %513 = arith.addf %494, %512 : vector<8x256xf32>
    %c93 = arith.constant 93 : index
    %514 = memref.load %arg4[%c93] : memref<288xf32, #tpu.memory_space<smem>>
    %515 = vector.broadcast %514 : f32 to vector<8x256xf32>
    %516 = arith.mulf %515, %505 : vector<8x256xf32>
    %517 = arith.addf %498, %516 : vector<8x256xf32>
    %c129 = arith.constant 129 : index
    %518 = memref.load %arg4[%c129] : memref<288xf32, #tpu.memory_space<smem>>
    %519 = vector.broadcast %518 : f32 to vector<8x256xf32>
    %520 = arith.mulf %519, %505 : vector<8x256xf32>
    %521 = arith.addf %502, %520 : vector<8x256xf32>
    %c22 = arith.constant 22 : index
    %522 = memref.load %arg4[%c22] : memref<288xf32, #tpu.memory_space<smem>>
    %523 = vector.broadcast %522 : f32 to vector<8x256xf32>
    %524 = arith.mulf %523, %39 : vector<8x256xf32>
    %525 = arith.addf %509, %524 : vector<8x256xf32>
    %c58 = arith.constant 58 : index
    %526 = memref.load %arg4[%c58] : memref<288xf32, #tpu.memory_space<smem>>
    %527 = vector.broadcast %526 : f32 to vector<8x256xf32>
    %528 = arith.mulf %527, %39 : vector<8x256xf32>
    %529 = arith.addf %513, %528 : vector<8x256xf32>
    %c94 = arith.constant 94 : index
    %530 = memref.load %arg4[%c94] : memref<288xf32, #tpu.memory_space<smem>>
    %531 = vector.broadcast %530 : f32 to vector<8x256xf32>
    %532 = arith.mulf %531, %39 : vector<8x256xf32>
    %533 = arith.addf %517, %532 : vector<8x256xf32>
    %c130 = arith.constant 130 : index
    %534 = memref.load %arg4[%c130] : memref<288xf32, #tpu.memory_space<smem>>
    %535 = vector.broadcast %534 : f32 to vector<8x256xf32>
    %536 = arith.mulf %535, %39 : vector<8x256xf32>
    %537 = arith.addf %521, %536 : vector<8x256xf32>
    %c255_i32_80 = arith.constant 255 : i32
    %538 = tpu.dynamic_rotate %39 by %c255_i32_80 dim 1 : vector<8x256xf32>, i32 -> vector<8x256xf32>
    %cst_81 = arith.constant 0.000000e+00 : f32
    %539 = vector.broadcast %cst_81 : f32 to vector<8x256xf32>
    %540 = arith.select %25, %538, %539 : vector<8x256xi1>, vector<8x256xf32>
    %c23 = arith.constant 23 : index
    %541 = memref.load %arg4[%c23] : memref<288xf32, #tpu.memory_space<smem>>
    %542 = vector.broadcast %541 : f32 to vector<8x256xf32>
    %543 = arith.mulf %542, %540 : vector<8x256xf32>
    %544 = arith.addf %525, %543 : vector<8x256xf32>
    %c59 = arith.constant 59 : index
    %545 = memref.load %arg4[%c59] : memref<288xf32, #tpu.memory_space<smem>>
    %546 = vector.broadcast %545 : f32 to vector<8x256xf32>
    %547 = arith.mulf %546, %540 : vector<8x256xf32>
    %548 = arith.addf %529, %547 : vector<8x256xf32>
    %c95 = arith.constant 95 : index
    %549 = memref.load %arg4[%c95] : memref<288xf32, #tpu.memory_space<smem>>
    %550 = vector.broadcast %549 : f32 to vector<8x256xf32>
    %551 = arith.mulf %550, %540 : vector<8x256xf32>
    %552 = arith.addf %533, %551 : vector<8x256xf32>
    %c131 = arith.constant 131 : index
    %553 = memref.load %arg4[%c131] : memref<288xf32, #tpu.memory_space<smem>>
    %554 = vector.broadcast %553 : f32 to vector<8x256xf32>
    %555 = arith.mulf %554, %540 : vector<8x256xf32>
    %556 = arith.addf %537, %555 : vector<8x256xf32>
    %c7_i32_82 = arith.constant 7 : i32
    %557 = tpu.dynamic_rotate %39 by %c7_i32_82 dim 0 : vector<8x256xf32>, i32 -> vector<8x256xf32>
    %cst_83 = arith.constant 0.000000e+00 : f32
    %558 = vector.broadcast %cst_83 : f32 to vector<8x256xf32>
    %559 = arith.select %21, %557, %558 : vector<8x256xi1>, vector<8x256xf32>
    %c1_i32_84 = arith.constant 1 : i32
    %560 = tpu.dynamic_rotate %559 by %c1_i32_84 dim 1 : vector<8x256xf32>, i32 -> vector<8x256xf32>
    %cst_85 = arith.constant 0.000000e+00 : f32
    %561 = vector.broadcast %cst_85 : f32 to vector<8x256xf32>
    %562 = arith.select %23, %560, %561 : vector<8x256xi1>, vector<8x256xf32>
    %c24 = arith.constant 24 : index
    %563 = memref.load %arg4[%c24] : memref<288xf32, #tpu.memory_space<smem>>
    %564 = vector.broadcast %563 : f32 to vector<8x256xf32>
    %565 = arith.mulf %564, %562 : vector<8x256xf32>
    %566 = arith.addf %544, %565 : vector<8x256xf32>
    %c60 = arith.constant 60 : index
    %567 = memref.load %arg4[%c60] : memref<288xf32, #tpu.memory_space<smem>>
    %568 = vector.broadcast %567 : f32 to vector<8x256xf32>
    %569 = arith.mulf %568, %562 : vector<8x256xf32>
    %570 = arith.addf %548, %569 : vector<8x256xf32>
    %c96 = arith.constant 96 : index
    %571 = memref.load %arg4[%c96] : memref<288xf32, #tpu.memory_space<smem>>
    %572 = vector.broadcast %571 : f32 to vector<8x256xf32>
    %573 = arith.mulf %572, %562 : vector<8x256xf32>
    %574 = arith.addf %552, %573 : vector<8x256xf32>
    %c132 = arith.constant 132 : index
    %575 = memref.load %arg4[%c132] : memref<288xf32, #tpu.memory_space<smem>>
    %576 = vector.broadcast %575 : f32 to vector<8x256xf32>
    %577 = arith.mulf %576, %562 : vector<8x256xf32>
    %578 = arith.addf %556, %577 : vector<8x256xf32>
    %c25 = arith.constant 25 : index
    %579 = memref.load %arg4[%c25] : memref<288xf32, #tpu.memory_space<smem>>
    %580 = vector.broadcast %579 : f32 to vector<8x256xf32>
    %581 = arith.mulf %580, %559 : vector<8x256xf32>
    %582 = arith.addf %566, %581 : vector<8x256xf32>
    %c61 = arith.constant 61 : index
    %583 = memref.load %arg4[%c61] : memref<288xf32, #tpu.memory_space<smem>>
    %584 = vector.broadcast %583 : f32 to vector<8x256xf32>
    %585 = arith.mulf %584, %559 : vector<8x256xf32>
    %586 = arith.addf %570, %585 : vector<8x256xf32>
    %c97 = arith.constant 97 : index
    %587 = memref.load %arg4[%c97] : memref<288xf32, #tpu.memory_space<smem>>
    %588 = vector.broadcast %587 : f32 to vector<8x256xf32>
    %589 = arith.mulf %588, %559 : vector<8x256xf32>
    %590 = arith.addf %574, %589 : vector<8x256xf32>
    %c133 = arith.constant 133 : index
    %591 = memref.load %arg4[%c133] : memref<288xf32, #tpu.memory_space<smem>>
    %592 = vector.broadcast %591 : f32 to vector<8x256xf32>
    %593 = arith.mulf %592, %559 : vector<8x256xf32>
    %594 = arith.addf %578, %593 : vector<8x256xf32>
    %c255_i32_86 = arith.constant 255 : i32
    %595 = tpu.dynamic_rotate %559 by %c255_i32_86 dim 1 : vector<8x256xf32>, i32 -> vector<8x256xf32>
    %cst_87 = arith.constant 0.000000e+00 : f32
    %596 = vector.broadcast %cst_87 : f32 to vector<8x256xf32>
    %597 = arith.select %25, %595, %596 : vector<8x256xi1>, vector<8x256xf32>
    %c26 = arith.constant 26 : index
    %598 = memref.load %arg4[%c26] : memref<288xf32, #tpu.memory_space<smem>>
    %599 = vector.broadcast %598 : f32 to vector<8x256xf32>
    %600 = arith.mulf %599, %597 : vector<8x256xf32>
    %601 = arith.addf %582, %600 : vector<8x256xf32>
    %c62 = arith.constant 62 : index
    %602 = memref.load %arg4[%c62] : memref<288xf32, #tpu.memory_space<smem>>
    %603 = vector.broadcast %602 : f32 to vector<8x256xf32>
    %604 = arith.mulf %603, %597 : vector<8x256xf32>
    %605 = arith.addf %586, %604 : vector<8x256xf32>
    %c98 = arith.constant 98 : index
    %606 = memref.load %arg4[%c98] : memref<288xf32, #tpu.memory_space<smem>>
    %607 = vector.broadcast %606 : f32 to vector<8x256xf32>
    %608 = arith.mulf %607, %597 : vector<8x256xf32>
    %609 = arith.addf %590, %608 : vector<8x256xf32>
    %c134 = arith.constant 134 : index
    %610 = memref.load %arg4[%c134] : memref<288xf32, #tpu.memory_space<smem>>
    %611 = vector.broadcast %610 : f32 to vector<8x256xf32>
    %612 = arith.mulf %611, %597 : vector<8x256xf32>
    %613 = arith.addf %594, %612 : vector<8x256xf32>
    %c1_i32_88 = arith.constant 1 : i32
    %614 = tpu.dynamic_rotate %41 by %c1_i32_88 dim 0 : vector<8x256xf32>, i32 -> vector<8x256xf32>
    %cst_89 = arith.constant 0.000000e+00 : f32
    %615 = vector.broadcast %cst_89 : f32 to vector<8x256xf32>
    %616 = arith.select %19, %614, %615 : vector<8x256xi1>, vector<8x256xf32>
    %c1_i32_90 = arith.constant 1 : i32
    %617 = tpu.dynamic_rotate %616 by %c1_i32_90 dim 1 : vector<8x256xf32>, i32 -> vector<8x256xf32>
    %cst_91 = arith.constant 0.000000e+00 : f32
    %618 = vector.broadcast %cst_91 : f32 to vector<8x256xf32>
    %619 = arith.select %23, %617, %618 : vector<8x256xi1>, vector<8x256xf32>
    %c27 = arith.constant 27 : index
    %620 = memref.load %arg4[%c27] : memref<288xf32, #tpu.memory_space<smem>>
    %621 = vector.broadcast %620 : f32 to vector<8x256xf32>
    %622 = arith.mulf %621, %619 : vector<8x256xf32>
    %623 = arith.addf %601, %622 : vector<8x256xf32>
    %c63 = arith.constant 63 : index
    %624 = memref.load %arg4[%c63] : memref<288xf32, #tpu.memory_space<smem>>
    %625 = vector.broadcast %624 : f32 to vector<8x256xf32>
    %626 = arith.mulf %625, %619 : vector<8x256xf32>
    %627 = arith.addf %605, %626 : vector<8x256xf32>
    %c99 = arith.constant 99 : index
    %628 = memref.load %arg4[%c99] : memref<288xf32, #tpu.memory_space<smem>>
    %629 = vector.broadcast %628 : f32 to vector<8x256xf32>
    %630 = arith.mulf %629, %619 : vector<8x256xf32>
    %631 = arith.addf %609, %630 : vector<8x256xf32>
    %c135 = arith.constant 135 : index
    %632 = memref.load %arg4[%c135] : memref<288xf32, #tpu.memory_space<smem>>
    %633 = vector.broadcast %632 : f32 to vector<8x256xf32>
    %634 = arith.mulf %633, %619 : vector<8x256xf32>
    %635 = arith.addf %613, %634 : vector<8x256xf32>
    %c28 = arith.constant 28 : index
    %636 = memref.load %arg4[%c28] : memref<288xf32, #tpu.memory_space<smem>>
    %637 = vector.broadcast %636 : f32 to vector<8x256xf32>
    %638 = arith.mulf %637, %616 : vector<8x256xf32>
    %639 = arith.addf %623, %638 : vector<8x256xf32>
    %c64 = arith.constant 64 : index
    %640 = memref.load %arg4[%c64] : memref<288xf32, #tpu.memory_space<smem>>
    %641 = vector.broadcast %640 : f32 to vector<8x256xf32>
    %642 = arith.mulf %641, %616 : vector<8x256xf32>
    %643 = arith.addf %627, %642 : vector<8x256xf32>
    %c100 = arith.constant 100 : index
    %644 = memref.load %arg4[%c100] : memref<288xf32, #tpu.memory_space<smem>>
    %645 = vector.broadcast %644 : f32 to vector<8x256xf32>
    %646 = arith.mulf %645, %616 : vector<8x256xf32>
    %647 = arith.addf %631, %646 : vector<8x256xf32>
    %c136 = arith.constant 136 : index
    %648 = memref.load %arg4[%c136] : memref<288xf32, #tpu.memory_space<smem>>
    %649 = vector.broadcast %648 : f32 to vector<8x256xf32>
    %650 = arith.mulf %649, %616 : vector<8x256xf32>
    %651 = arith.addf %635, %650 : vector<8x256xf32>
    %c255_i32_92 = arith.constant 255 : i32
    %652 = tpu.dynamic_rotate %616 by %c255_i32_92 dim 1 : vector<8x256xf32>, i32 -> vector<8x256xf32>
    %cst_93 = arith.constant 0.000000e+00 : f32
    %653 = vector.broadcast %cst_93 : f32 to vector<8x256xf32>
    %654 = arith.select %25, %652, %653 : vector<8x256xi1>, vector<8x256xf32>
    %c29 = arith.constant 29 : index
    %655 = memref.load %arg4[%c29] : memref<288xf32, #tpu.memory_space<smem>>
    %656 = vector.broadcast %655 : f32 to vector<8x256xf32>
    %657 = arith.mulf %656, %654 : vector<8x256xf32>
    %658 = arith.addf %639, %657 : vector<8x256xf32>
    %c65 = arith.constant 65 : index
    %659 = memref.load %arg4[%c65] : memref<288xf32, #tpu.memory_space<smem>>
    %660 = vector.broadcast %659 : f32 to vector<8x256xf32>
    %661 = arith.mulf %660, %654 : vector<8x256xf32>
    %662 = arith.addf %643, %661 : vector<8x256xf32>
    %c101 = arith.constant 101 : index
    %663 = memref.load %arg4[%c101] : memref<288xf32, #tpu.memory_space<smem>>
    %664 = vector.broadcast %663 : f32 to vector<8x256xf32>
    %665 = arith.mulf %664, %654 : vector<8x256xf32>
    %666 = arith.addf %647, %665 : vector<8x256xf32>
    %c137 = arith.constant 137 : index
    %667 = memref.load %arg4[%c137] : memref<288xf32, #tpu.memory_space<smem>>
    %668 = vector.broadcast %667 : f32 to vector<8x256xf32>
    %669 = arith.mulf %668, %654 : vector<8x256xf32>
    %670 = arith.addf %651, %669 : vector<8x256xf32>
    %c1_i32_94 = arith.constant 1 : i32
    %671 = tpu.dynamic_rotate %41 by %c1_i32_94 dim 1 : vector<8x256xf32>, i32 -> vector<8x256xf32>
    %cst_95 = arith.constant 0.000000e+00 : f32
    %672 = vector.broadcast %cst_95 : f32 to vector<8x256xf32>
    %673 = arith.select %23, %671, %672 : vector<8x256xi1>, vector<8x256xf32>
    %c30 = arith.constant 30 : index
    %674 = memref.load %arg4[%c30] : memref<288xf32, #tpu.memory_space<smem>>
    %675 = vector.broadcast %674 : f32 to vector<8x256xf32>
    %676 = arith.mulf %675, %673 : vector<8x256xf32>
    %677 = arith.addf %658, %676 : vector<8x256xf32>
    %c66 = arith.constant 66 : index
    %678 = memref.load %arg4[%c66] : memref<288xf32, #tpu.memory_space<smem>>
    %679 = vector.broadcast %678 : f32 to vector<8x256xf32>
    %680 = arith.mulf %679, %673 : vector<8x256xf32>
    %681 = arith.addf %662, %680 : vector<8x256xf32>
    %c102 = arith.constant 102 : index
    %682 = memref.load %arg4[%c102] : memref<288xf32, #tpu.memory_space<smem>>
    %683 = vector.broadcast %682 : f32 to vector<8x256xf32>
    %684 = arith.mulf %683, %673 : vector<8x256xf32>
    %685 = arith.addf %666, %684 : vector<8x256xf32>
    %c138 = arith.constant 138 : index
    %686 = memref.load %arg4[%c138] : memref<288xf32, #tpu.memory_space<smem>>
    %687 = vector.broadcast %686 : f32 to vector<8x256xf32>
    %688 = arith.mulf %687, %673 : vector<8x256xf32>
    %689 = arith.addf %670, %688 : vector<8x256xf32>
    %c31 = arith.constant 31 : index
    %690 = memref.load %arg4[%c31] : memref<288xf32, #tpu.memory_space<smem>>
    %691 = vector.broadcast %690 : f32 to vector<8x256xf32>
    %692 = arith.mulf %691, %41 : vector<8x256xf32>
    %693 = arith.addf %677, %692 : vector<8x256xf32>
    %c67 = arith.constant 67 : index
    %694 = memref.load %arg4[%c67] : memref<288xf32, #tpu.memory_space<smem>>
    %695 = vector.broadcast %694 : f32 to vector<8x256xf32>
    %696 = arith.mulf %695, %41 : vector<8x256xf32>
    %697 = arith.addf %681, %696 : vector<8x256xf32>
    %c103 = arith.constant 103 : index
    %698 = memref.load %arg4[%c103] : memref<288xf32, #tpu.memory_space<smem>>
    %699 = vector.broadcast %698 : f32 to vector<8x256xf32>
    %700 = arith.mulf %699, %41 : vector<8x256xf32>
    %701 = arith.addf %685, %700 : vector<8x256xf32>
    %c139 = arith.constant 139 : index
    %702 = memref.load %arg4[%c139] : memref<288xf32, #tpu.memory_space<smem>>
    %703 = vector.broadcast %702 : f32 to vector<8x256xf32>
    %704 = arith.mulf %703, %41 : vector<8x256xf32>
    %705 = arith.addf %689, %704 : vector<8x256xf32>
    %c255_i32_96 = arith.constant 255 : i32
    %706 = tpu.dynamic_rotate %41 by %c255_i32_96 dim 1 : vector<8x256xf32>, i32 -> vector<8x256xf32>
    %cst_97 = arith.constant 0.000000e+00 : f32
    %707 = vector.broadcast %cst_97 : f32 to vector<8x256xf32>
    %708 = arith.select %25, %706, %707 : vector<8x256xi1>, vector<8x256xf32>
    %c32 = arith.constant 32 : index
    %709 = memref.load %arg4[%c32] : memref<288xf32, #tpu.memory_space<smem>>
    %710 = vector.broadcast %709 : f32 to vector<8x256xf32>
    %711 = arith.mulf %710, %708 : vector<8x256xf32>
    %712 = arith.addf %693, %711 : vector<8x256xf32>
    %c68 = arith.constant 68 : index
    %713 = memref.load %arg4[%c68] : memref<288xf32, #tpu.memory_space<smem>>
    %714 = vector.broadcast %713 : f32 to vector<8x256xf32>
    %715 = arith.mulf %714, %708 : vector<8x256xf32>
    %716 = arith.addf %697, %715 : vector<8x256xf32>
    %c104 = arith.constant 104 : index
    %717 = memref.load %arg4[%c104] : memref<288xf32, #tpu.memory_space<smem>>
    %718 = vector.broadcast %717 : f32 to vector<8x256xf32>
    %719 = arith.mulf %718, %708 : vector<8x256xf32>
    %720 = arith.addf %701, %719 : vector<8x256xf32>
    %c140 = arith.constant 140 : index
    %721 = memref.load %arg4[%c140] : memref<288xf32, #tpu.memory_space<smem>>
    %722 = vector.broadcast %721 : f32 to vector<8x256xf32>
    %723 = arith.mulf %722, %708 : vector<8x256xf32>
    %724 = arith.addf %705, %723 : vector<8x256xf32>
    %c7_i32_98 = arith.constant 7 : i32
    %725 = tpu.dynamic_rotate %41 by %c7_i32_98 dim 0 : vector<8x256xf32>, i32 -> vector<8x256xf32>
    %cst_99 = arith.constant 0.000000e+00 : f32
    %726 = vector.broadcast %cst_99 : f32 to vector<8x256xf32>
    %727 = arith.select %21, %725, %726 : vector<8x256xi1>, vector<8x256xf32>
    %c1_i32_100 = arith.constant 1 : i32
    %728 = tpu.dynamic_rotate %727 by %c1_i32_100 dim 1 : vector<8x256xf32>, i32 -> vector<8x256xf32>
    %cst_101 = arith.constant 0.000000e+00 : f32
    %729 = vector.broadcast %cst_101 : f32 to vector<8x256xf32>
    %730 = arith.select %23, %728, %729 : vector<8x256xi1>, vector<8x256xf32>
    %c33 = arith.constant 33 : index
    %731 = memref.load %arg4[%c33] : memref<288xf32, #tpu.memory_space<smem>>
    %732 = vector.broadcast %731 : f32 to vector<8x256xf32>
    %733 = arith.mulf %732, %730 : vector<8x256xf32>
    %734 = arith.addf %712, %733 : vector<8x256xf32>
    %c69 = arith.constant 69 : index
    %735 = memref.load %arg4[%c69] : memref<288xf32, #tpu.memory_space<smem>>
    %736 = vector.broadcast %735 : f32 to vector<8x256xf32>
    %737 = arith.mulf %736, %730 : vector<8x256xf32>
    %738 = arith.addf %716, %737 : vector<8x256xf32>
    %c105 = arith.constant 105 : index
    %739 = memref.load %arg4[%c105] : memref<288xf32, #tpu.memory_space<smem>>
    %740 = vector.broadcast %739 : f32 to vector<8x256xf32>
    %741 = arith.mulf %740, %730 : vector<8x256xf32>
    %742 = arith.addf %720, %741 : vector<8x256xf32>
    %c141 = arith.constant 141 : index
    %743 = memref.load %arg4[%c141] : memref<288xf32, #tpu.memory_space<smem>>
    %744 = vector.broadcast %743 : f32 to vector<8x256xf32>
    %745 = arith.mulf %744, %730 : vector<8x256xf32>
    %746 = arith.addf %724, %745 : vector<8x256xf32>
    %c34 = arith.constant 34 : index
    %747 = memref.load %arg4[%c34] : memref<288xf32, #tpu.memory_space<smem>>
    %748 = vector.broadcast %747 : f32 to vector<8x256xf32>
    %749 = arith.mulf %748, %727 : vector<8x256xf32>
    %750 = arith.addf %734, %749 : vector<8x256xf32>
    %c70 = arith.constant 70 : index
    %751 = memref.load %arg4[%c70] : memref<288xf32, #tpu.memory_space<smem>>
    %752 = vector.broadcast %751 : f32 to vector<8x256xf32>
    %753 = arith.mulf %752, %727 : vector<8x256xf32>
    %754 = arith.addf %738, %753 : vector<8x256xf32>
    %c106 = arith.constant 106 : index
    %755 = memref.load %arg4[%c106] : memref<288xf32, #tpu.memory_space<smem>>
    %756 = vector.broadcast %755 : f32 to vector<8x256xf32>
    %757 = arith.mulf %756, %727 : vector<8x256xf32>
    %758 = arith.addf %742, %757 : vector<8x256xf32>
    %c142 = arith.constant 142 : index
    %759 = memref.load %arg4[%c142] : memref<288xf32, #tpu.memory_space<smem>>
    %760 = vector.broadcast %759 : f32 to vector<8x256xf32>
    %761 = arith.mulf %760, %727 : vector<8x256xf32>
    %762 = arith.addf %746, %761 : vector<8x256xf32>
    %c255_i32_102 = arith.constant 255 : i32
    %763 = tpu.dynamic_rotate %727 by %c255_i32_102 dim 1 : vector<8x256xf32>, i32 -> vector<8x256xf32>
    %cst_103 = arith.constant 0.000000e+00 : f32
    %764 = vector.broadcast %cst_103 : f32 to vector<8x256xf32>
    %765 = arith.select %25, %763, %764 : vector<8x256xi1>, vector<8x256xf32>
    %c35 = arith.constant 35 : index
    %766 = memref.load %arg4[%c35] : memref<288xf32, #tpu.memory_space<smem>>
    %767 = vector.broadcast %766 : f32 to vector<8x256xf32>
    %768 = arith.mulf %767, %765 : vector<8x256xf32>
    %769 = arith.addf %750, %768 : vector<8x256xf32>
    %c71 = arith.constant 71 : index
    %770 = memref.load %arg4[%c71] : memref<288xf32, #tpu.memory_space<smem>>
    %771 = vector.broadcast %770 : f32 to vector<8x256xf32>
    %772 = arith.mulf %771, %765 : vector<8x256xf32>
    %773 = arith.addf %754, %772 : vector<8x256xf32>
    %c107 = arith.constant 107 : index
    %774 = memref.load %arg4[%c107] : memref<288xf32, #tpu.memory_space<smem>>
    %775 = vector.broadcast %774 : f32 to vector<8x256xf32>
    %776 = arith.mulf %775, %765 : vector<8x256xf32>
    %777 = arith.addf %758, %776 : vector<8x256xf32>
    %c143 = arith.constant 143 : index
    %778 = memref.load %arg4[%c143] : memref<288xf32, #tpu.memory_space<smem>>
    %779 = vector.broadcast %778 : f32 to vector<8x256xf32>
    %780 = arith.mulf %779, %765 : vector<8x256xf32>
    %781 = arith.addf %762, %780 : vector<8x256xf32>
    %c0_104 = arith.constant 0 : index
    %782 = memref.load %arg5[%c0_104] : memref<8xf32, #tpu.memory_space<smem>>
    %783 = vector.broadcast %782 : f32 to vector<8x256xf32>
    %784 = arith.addf %769, %783 : vector<8x256xf32>
    %c1_105 = arith.constant 1 : index
    %785 = memref.load %arg5[%c1_105] : memref<8xf32, #tpu.memory_space<smem>>
    %786 = vector.broadcast %785 : f32 to vector<8x256xf32>
    %787 = arith.addf %773, %786 : vector<8x256xf32>
    %c2_106 = arith.constant 2 : index
    %788 = memref.load %arg5[%c2_106] : memref<8xf32, #tpu.memory_space<smem>>
    %789 = vector.broadcast %788 : f32 to vector<8x256xf32>
    %790 = arith.addf %777, %789 : vector<8x256xf32>
    %c3_107 = arith.constant 3 : index
    %791 = memref.load %arg5[%c3_107] : memref<8xf32, #tpu.memory_space<smem>>
    %792 = vector.broadcast %791 : f32 to vector<8x256xf32>
    %793 = arith.addf %781, %792 : vector<8x256xf32>
    %c2_i32_108 = arith.constant 2 : i32
    %794 = tpu.dynamic_rotate %35 by %c2_i32_108 dim 0 : vector<8x256xf32>, i32 -> vector<8x256xf32>
    %cst_109 = arith.constant 0.000000e+00 : f32
    %795 = vector.broadcast %cst_109 : f32 to vector<8x256xf32>
    %796 = arith.select %27, %794, %795 : vector<8x256xi1>, vector<8x256xf32>
    %c2_i32_110 = arith.constant 2 : i32
    %797 = tpu.dynamic_rotate %796 by %c2_i32_110 dim 1 : vector<8x256xf32>, i32 -> vector<8x256xf32>
    %cst_111 = arith.constant 0.000000e+00 : f32
    %798 = vector.broadcast %cst_111 : f32 to vector<8x256xf32>
    %799 = arith.select %31, %797, %798 : vector<8x256xi1>, vector<8x256xf32>
    %c144 = arith.constant 144 : index
    %800 = memref.load %arg4[%c144] : memref<288xf32, #tpu.memory_space<smem>>
    %801 = vector.broadcast %800 : f32 to vector<8x256xf32>
    %802 = arith.mulf %801, %799 : vector<8x256xf32>
    %803 = arith.addf %784, %802 : vector<8x256xf32>
    %c180 = arith.constant 180 : index
    %804 = memref.load %arg4[%c180] : memref<288xf32, #tpu.memory_space<smem>>
    %805 = vector.broadcast %804 : f32 to vector<8x256xf32>
    %806 = arith.mulf %805, %799 : vector<8x256xf32>
    %807 = arith.addf %787, %806 : vector<8x256xf32>
    %c216 = arith.constant 216 : index
    %808 = memref.load %arg4[%c216] : memref<288xf32, #tpu.memory_space<smem>>
    %809 = vector.broadcast %808 : f32 to vector<8x256xf32>
    %810 = arith.mulf %809, %799 : vector<8x256xf32>
    %811 = arith.addf %790, %810 : vector<8x256xf32>
    %c252 = arith.constant 252 : index
    %812 = memref.load %arg4[%c252] : memref<288xf32, #tpu.memory_space<smem>>
    %813 = vector.broadcast %812 : f32 to vector<8x256xf32>
    %814 = arith.mulf %813, %799 : vector<8x256xf32>
    %815 = arith.addf %793, %814 : vector<8x256xf32>
    %c145 = arith.constant 145 : index
    %816 = memref.load %arg4[%c145] : memref<288xf32, #tpu.memory_space<smem>>
    %817 = vector.broadcast %816 : f32 to vector<8x256xf32>
    %818 = arith.mulf %817, %796 : vector<8x256xf32>
    %819 = arith.addf %803, %818 : vector<8x256xf32>
    %c181 = arith.constant 181 : index
    %820 = memref.load %arg4[%c181] : memref<288xf32, #tpu.memory_space<smem>>
    %821 = vector.broadcast %820 : f32 to vector<8x256xf32>
    %822 = arith.mulf %821, %796 : vector<8x256xf32>
    %823 = arith.addf %807, %822 : vector<8x256xf32>
    %c217 = arith.constant 217 : index
    %824 = memref.load %arg4[%c217] : memref<288xf32, #tpu.memory_space<smem>>
    %825 = vector.broadcast %824 : f32 to vector<8x256xf32>
    %826 = arith.mulf %825, %796 : vector<8x256xf32>
    %827 = arith.addf %811, %826 : vector<8x256xf32>
    %c253 = arith.constant 253 : index
    %828 = memref.load %arg4[%c253] : memref<288xf32, #tpu.memory_space<smem>>
    %829 = vector.broadcast %828 : f32 to vector<8x256xf32>
    %830 = arith.mulf %829, %796 : vector<8x256xf32>
    %831 = arith.addf %815, %830 : vector<8x256xf32>
    %c254_i32 = arith.constant 254 : i32
    %832 = tpu.dynamic_rotate %796 by %c254_i32 dim 1 : vector<8x256xf32>, i32 -> vector<8x256xf32>
    %cst_112 = arith.constant 0.000000e+00 : f32
    %833 = vector.broadcast %cst_112 : f32 to vector<8x256xf32>
    %834 = arith.select %33, %832, %833 : vector<8x256xi1>, vector<8x256xf32>
    %c146 = arith.constant 146 : index
    %835 = memref.load %arg4[%c146] : memref<288xf32, #tpu.memory_space<smem>>
    %836 = vector.broadcast %835 : f32 to vector<8x256xf32>
    %837 = arith.mulf %836, %834 : vector<8x256xf32>
    %838 = arith.addf %819, %837 : vector<8x256xf32>
    %c182 = arith.constant 182 : index
    %839 = memref.load %arg4[%c182] : memref<288xf32, #tpu.memory_space<smem>>
    %840 = vector.broadcast %839 : f32 to vector<8x256xf32>
    %841 = arith.mulf %840, %834 : vector<8x256xf32>
    %842 = arith.addf %823, %841 : vector<8x256xf32>
    %c218 = arith.constant 218 : index
    %843 = memref.load %arg4[%c218] : memref<288xf32, #tpu.memory_space<smem>>
    %844 = vector.broadcast %843 : f32 to vector<8x256xf32>
    %845 = arith.mulf %844, %834 : vector<8x256xf32>
    %846 = arith.addf %827, %845 : vector<8x256xf32>
    %c254 = arith.constant 254 : index
    %847 = memref.load %arg4[%c254] : memref<288xf32, #tpu.memory_space<smem>>
    %848 = vector.broadcast %847 : f32 to vector<8x256xf32>
    %849 = arith.mulf %848, %834 : vector<8x256xf32>
    %850 = arith.addf %831, %849 : vector<8x256xf32>
    %c2_i32_113 = arith.constant 2 : i32
    %851 = tpu.dynamic_rotate %35 by %c2_i32_113 dim 1 : vector<8x256xf32>, i32 -> vector<8x256xf32>
    %cst_114 = arith.constant 0.000000e+00 : f32
    %852 = vector.broadcast %cst_114 : f32 to vector<8x256xf32>
    %853 = arith.select %31, %851, %852 : vector<8x256xi1>, vector<8x256xf32>
    %c147 = arith.constant 147 : index
    %854 = memref.load %arg4[%c147] : memref<288xf32, #tpu.memory_space<smem>>
    %855 = vector.broadcast %854 : f32 to vector<8x256xf32>
    %856 = arith.mulf %855, %853 : vector<8x256xf32>
    %857 = arith.addf %838, %856 : vector<8x256xf32>
    %c183 = arith.constant 183 : index
    %858 = memref.load %arg4[%c183] : memref<288xf32, #tpu.memory_space<smem>>
    %859 = vector.broadcast %858 : f32 to vector<8x256xf32>
    %860 = arith.mulf %859, %853 : vector<8x256xf32>
    %861 = arith.addf %842, %860 : vector<8x256xf32>
    %c219 = arith.constant 219 : index
    %862 = memref.load %arg4[%c219] : memref<288xf32, #tpu.memory_space<smem>>
    %863 = vector.broadcast %862 : f32 to vector<8x256xf32>
    %864 = arith.mulf %863, %853 : vector<8x256xf32>
    %865 = arith.addf %846, %864 : vector<8x256xf32>
    %c255 = arith.constant 255 : index
    %866 = memref.load %arg4[%c255] : memref<288xf32, #tpu.memory_space<smem>>
    %867 = vector.broadcast %866 : f32 to vector<8x256xf32>
    %868 = arith.mulf %867, %853 : vector<8x256xf32>
    %869 = arith.addf %850, %868 : vector<8x256xf32>
    %c148 = arith.constant 148 : index
    %870 = memref.load %arg4[%c148] : memref<288xf32, #tpu.memory_space<smem>>
    %871 = vector.broadcast %870 : f32 to vector<8x256xf32>
    %872 = arith.mulf %871, %35 : vector<8x256xf32>
    %873 = arith.addf %857, %872 : vector<8x256xf32>
    %c184 = arith.constant 184 : index
    %874 = memref.load %arg4[%c184] : memref<288xf32, #tpu.memory_space<smem>>
    %875 = vector.broadcast %874 : f32 to vector<8x256xf32>
    %876 = arith.mulf %875, %35 : vector<8x256xf32>
    %877 = arith.addf %861, %876 : vector<8x256xf32>
    %c220 = arith.constant 220 : index
    %878 = memref.load %arg4[%c220] : memref<288xf32, #tpu.memory_space<smem>>
    %879 = vector.broadcast %878 : f32 to vector<8x256xf32>
    %880 = arith.mulf %879, %35 : vector<8x256xf32>
    %881 = arith.addf %865, %880 : vector<8x256xf32>
    %c256 = arith.constant 256 : index
    %882 = memref.load %arg4[%c256] : memref<288xf32, #tpu.memory_space<smem>>
    %883 = vector.broadcast %882 : f32 to vector<8x256xf32>
    %884 = arith.mulf %883, %35 : vector<8x256xf32>
    %885 = arith.addf %869, %884 : vector<8x256xf32>
    %c254_i32_115 = arith.constant 254 : i32
    %886 = tpu.dynamic_rotate %35 by %c254_i32_115 dim 1 : vector<8x256xf32>, i32 -> vector<8x256xf32>
    %cst_116 = arith.constant 0.000000e+00 : f32
    %887 = vector.broadcast %cst_116 : f32 to vector<8x256xf32>
    %888 = arith.select %33, %886, %887 : vector<8x256xi1>, vector<8x256xf32>
    %c149 = arith.constant 149 : index
    %889 = memref.load %arg4[%c149] : memref<288xf32, #tpu.memory_space<smem>>
    %890 = vector.broadcast %889 : f32 to vector<8x256xf32>
    %891 = arith.mulf %890, %888 : vector<8x256xf32>
    %892 = arith.addf %873, %891 : vector<8x256xf32>
    %c185 = arith.constant 185 : index
    %893 = memref.load %arg4[%c185] : memref<288xf32, #tpu.memory_space<smem>>
    %894 = vector.broadcast %893 : f32 to vector<8x256xf32>
    %895 = arith.mulf %894, %888 : vector<8x256xf32>
    %896 = arith.addf %877, %895 : vector<8x256xf32>
    %c221 = arith.constant 221 : index
    %897 = memref.load %arg4[%c221] : memref<288xf32, #tpu.memory_space<smem>>
    %898 = vector.broadcast %897 : f32 to vector<8x256xf32>
    %899 = arith.mulf %898, %888 : vector<8x256xf32>
    %900 = arith.addf %881, %899 : vector<8x256xf32>
    %c257 = arith.constant 257 : index
    %901 = memref.load %arg4[%c257] : memref<288xf32, #tpu.memory_space<smem>>
    %902 = vector.broadcast %901 : f32 to vector<8x256xf32>
    %903 = arith.mulf %902, %888 : vector<8x256xf32>
    %904 = arith.addf %885, %903 : vector<8x256xf32>
    %c6_i32_117 = arith.constant 6 : i32
    %905 = tpu.dynamic_rotate %35 by %c6_i32_117 dim 0 : vector<8x256xf32>, i32 -> vector<8x256xf32>
    %cst_118 = arith.constant 0.000000e+00 : f32
    %906 = vector.broadcast %cst_118 : f32 to vector<8x256xf32>
    %907 = arith.select %29, %905, %906 : vector<8x256xi1>, vector<8x256xf32>
    %c2_i32_119 = arith.constant 2 : i32
    %908 = tpu.dynamic_rotate %907 by %c2_i32_119 dim 1 : vector<8x256xf32>, i32 -> vector<8x256xf32>
    %cst_120 = arith.constant 0.000000e+00 : f32
    %909 = vector.broadcast %cst_120 : f32 to vector<8x256xf32>
    %910 = arith.select %31, %908, %909 : vector<8x256xi1>, vector<8x256xf32>
    %c150 = arith.constant 150 : index
    %911 = memref.load %arg4[%c150] : memref<288xf32, #tpu.memory_space<smem>>
    %912 = vector.broadcast %911 : f32 to vector<8x256xf32>
    %913 = arith.mulf %912, %910 : vector<8x256xf32>
    %914 = arith.addf %892, %913 : vector<8x256xf32>
    %c186 = arith.constant 186 : index
    %915 = memref.load %arg4[%c186] : memref<288xf32, #tpu.memory_space<smem>>
    %916 = vector.broadcast %915 : f32 to vector<8x256xf32>
    %917 = arith.mulf %916, %910 : vector<8x256xf32>
    %918 = arith.addf %896, %917 : vector<8x256xf32>
    %c222 = arith.constant 222 : index
    %919 = memref.load %arg4[%c222] : memref<288xf32, #tpu.memory_space<smem>>
    %920 = vector.broadcast %919 : f32 to vector<8x256xf32>
    %921 = arith.mulf %920, %910 : vector<8x256xf32>
    %922 = arith.addf %900, %921 : vector<8x256xf32>
    %c258 = arith.constant 258 : index
    %923 = memref.load %arg4[%c258] : memref<288xf32, #tpu.memory_space<smem>>
    %924 = vector.broadcast %923 : f32 to vector<8x256xf32>
    %925 = arith.mulf %924, %910 : vector<8x256xf32>
    %926 = arith.addf %904, %925 : vector<8x256xf32>
    %c151 = arith.constant 151 : index
    %927 = memref.load %arg4[%c151] : memref<288xf32, #tpu.memory_space<smem>>
    %928 = vector.broadcast %927 : f32 to vector<8x256xf32>
    %929 = arith.mulf %928, %907 : vector<8x256xf32>
    %930 = arith.addf %914, %929 : vector<8x256xf32>
    %c187 = arith.constant 187 : index
    %931 = memref.load %arg4[%c187] : memref<288xf32, #tpu.memory_space<smem>>
    %932 = vector.broadcast %931 : f32 to vector<8x256xf32>
    %933 = arith.mulf %932, %907 : vector<8x256xf32>
    %934 = arith.addf %918, %933 : vector<8x256xf32>
    %c223 = arith.constant 223 : index
    %935 = memref.load %arg4[%c223] : memref<288xf32, #tpu.memory_space<smem>>
    %936 = vector.broadcast %935 : f32 to vector<8x256xf32>
    %937 = arith.mulf %936, %907 : vector<8x256xf32>
    %938 = arith.addf %922, %937 : vector<8x256xf32>
    %c259 = arith.constant 259 : index
    %939 = memref.load %arg4[%c259] : memref<288xf32, #tpu.memory_space<smem>>
    %940 = vector.broadcast %939 : f32 to vector<8x256xf32>
    %941 = arith.mulf %940, %907 : vector<8x256xf32>
    %942 = arith.addf %926, %941 : vector<8x256xf32>
    %c254_i32_121 = arith.constant 254 : i32
    %943 = tpu.dynamic_rotate %907 by %c254_i32_121 dim 1 : vector<8x256xf32>, i32 -> vector<8x256xf32>
    %cst_122 = arith.constant 0.000000e+00 : f32
    %944 = vector.broadcast %cst_122 : f32 to vector<8x256xf32>
    %945 = arith.select %33, %943, %944 : vector<8x256xi1>, vector<8x256xf32>
    %c152 = arith.constant 152 : index
    %946 = memref.load %arg4[%c152] : memref<288xf32, #tpu.memory_space<smem>>
    %947 = vector.broadcast %946 : f32 to vector<8x256xf32>
    %948 = arith.mulf %947, %945 : vector<8x256xf32>
    %949 = arith.addf %930, %948 : vector<8x256xf32>
    %c188 = arith.constant 188 : index
    %950 = memref.load %arg4[%c188] : memref<288xf32, #tpu.memory_space<smem>>
    %951 = vector.broadcast %950 : f32 to vector<8x256xf32>
    %952 = arith.mulf %951, %945 : vector<8x256xf32>
    %953 = arith.addf %934, %952 : vector<8x256xf32>
    %c224 = arith.constant 224 : index
    %954 = memref.load %arg4[%c224] : memref<288xf32, #tpu.memory_space<smem>>
    %955 = vector.broadcast %954 : f32 to vector<8x256xf32>
    %956 = arith.mulf %955, %945 : vector<8x256xf32>
    %957 = arith.addf %938, %956 : vector<8x256xf32>
    %c260 = arith.constant 260 : index
    %958 = memref.load %arg4[%c260] : memref<288xf32, #tpu.memory_space<smem>>
    %959 = vector.broadcast %958 : f32 to vector<8x256xf32>
    %960 = arith.mulf %959, %945 : vector<8x256xf32>
    %961 = arith.addf %942, %960 : vector<8x256xf32>
    %c2_i32_123 = arith.constant 2 : i32
    %962 = tpu.dynamic_rotate %37 by %c2_i32_123 dim 0 : vector<8x256xf32>, i32 -> vector<8x256xf32>
    %cst_124 = arith.constant 0.000000e+00 : f32
    %963 = vector.broadcast %cst_124 : f32 to vector<8x256xf32>
    %964 = arith.select %27, %962, %963 : vector<8x256xi1>, vector<8x256xf32>
    %c2_i32_125 = arith.constant 2 : i32
    %965 = tpu.dynamic_rotate %964 by %c2_i32_125 dim 1 : vector<8x256xf32>, i32 -> vector<8x256xf32>
    %cst_126 = arith.constant 0.000000e+00 : f32
    %966 = vector.broadcast %cst_126 : f32 to vector<8x256xf32>
    %967 = arith.select %31, %965, %966 : vector<8x256xi1>, vector<8x256xf32>
    %c153 = arith.constant 153 : index
    %968 = memref.load %arg4[%c153] : memref<288xf32, #tpu.memory_space<smem>>
    %969 = vector.broadcast %968 : f32 to vector<8x256xf32>
    %970 = arith.mulf %969, %967 : vector<8x256xf32>
    %971 = arith.addf %949, %970 : vector<8x256xf32>
    %c189 = arith.constant 189 : index
    %972 = memref.load %arg4[%c189] : memref<288xf32, #tpu.memory_space<smem>>
    %973 = vector.broadcast %972 : f32 to vector<8x256xf32>
    %974 = arith.mulf %973, %967 : vector<8x256xf32>
    %975 = arith.addf %953, %974 : vector<8x256xf32>
    %c225 = arith.constant 225 : index
    %976 = memref.load %arg4[%c225] : memref<288xf32, #tpu.memory_space<smem>>
    %977 = vector.broadcast %976 : f32 to vector<8x256xf32>
    %978 = arith.mulf %977, %967 : vector<8x256xf32>
    %979 = arith.addf %957, %978 : vector<8x256xf32>
    %c261 = arith.constant 261 : index
    %980 = memref.load %arg4[%c261] : memref<288xf32, #tpu.memory_space<smem>>
    %981 = vector.broadcast %980 : f32 to vector<8x256xf32>
    %982 = arith.mulf %981, %967 : vector<8x256xf32>
    %983 = arith.addf %961, %982 : vector<8x256xf32>
    %c154 = arith.constant 154 : index
    %984 = memref.load %arg4[%c154] : memref<288xf32, #tpu.memory_space<smem>>
    %985 = vector.broadcast %984 : f32 to vector<8x256xf32>
    %986 = arith.mulf %985, %964 : vector<8x256xf32>
    %987 = arith.addf %971, %986 : vector<8x256xf32>
    %c190 = arith.constant 190 : index
    %988 = memref.load %arg4[%c190] : memref<288xf32, #tpu.memory_space<smem>>
    %989 = vector.broadcast %988 : f32 to vector<8x256xf32>
    %990 = arith.mulf %989, %964 : vector<8x256xf32>
    %991 = arith.addf %975, %990 : vector<8x256xf32>
    %c226 = arith.constant 226 : index
    %992 = memref.load %arg4[%c226] : memref<288xf32, #tpu.memory_space<smem>>
    %993 = vector.broadcast %992 : f32 to vector<8x256xf32>
    %994 = arith.mulf %993, %964 : vector<8x256xf32>
    %995 = arith.addf %979, %994 : vector<8x256xf32>
    %c262 = arith.constant 262 : index
    %996 = memref.load %arg4[%c262] : memref<288xf32, #tpu.memory_space<smem>>
    %997 = vector.broadcast %996 : f32 to vector<8x256xf32>
    %998 = arith.mulf %997, %964 : vector<8x256xf32>
    %999 = arith.addf %983, %998 : vector<8x256xf32>
    %c254_i32_127 = arith.constant 254 : i32
    %1000 = tpu.dynamic_rotate %964 by %c254_i32_127 dim 1 : vector<8x256xf32>, i32 -> vector<8x256xf32>
    %cst_128 = arith.constant 0.000000e+00 : f32
    %1001 = vector.broadcast %cst_128 : f32 to vector<8x256xf32>
    %1002 = arith.select %33, %1000, %1001 : vector<8x256xi1>, vector<8x256xf32>
    %c155 = arith.constant 155 : index
    %1003 = memref.load %arg4[%c155] : memref<288xf32, #tpu.memory_space<smem>>
    %1004 = vector.broadcast %1003 : f32 to vector<8x256xf32>
    %1005 = arith.mulf %1004, %1002 : vector<8x256xf32>
    %1006 = arith.addf %987, %1005 : vector<8x256xf32>
    %c191 = arith.constant 191 : index
    %1007 = memref.load %arg4[%c191] : memref<288xf32, #tpu.memory_space<smem>>
    %1008 = vector.broadcast %1007 : f32 to vector<8x256xf32>
    %1009 = arith.mulf %1008, %1002 : vector<8x256xf32>
    %1010 = arith.addf %991, %1009 : vector<8x256xf32>
    %c227 = arith.constant 227 : index
    %1011 = memref.load %arg4[%c227] : memref<288xf32, #tpu.memory_space<smem>>
    %1012 = vector.broadcast %1011 : f32 to vector<8x256xf32>
    %1013 = arith.mulf %1012, %1002 : vector<8x256xf32>
    %1014 = arith.addf %995, %1013 : vector<8x256xf32>
    %c263 = arith.constant 263 : index
    %1015 = memref.load %arg4[%c263] : memref<288xf32, #tpu.memory_space<smem>>
    %1016 = vector.broadcast %1015 : f32 to vector<8x256xf32>
    %1017 = arith.mulf %1016, %1002 : vector<8x256xf32>
    %1018 = arith.addf %999, %1017 : vector<8x256xf32>
    %c2_i32_129 = arith.constant 2 : i32
    %1019 = tpu.dynamic_rotate %37 by %c2_i32_129 dim 1 : vector<8x256xf32>, i32 -> vector<8x256xf32>
    %cst_130 = arith.constant 0.000000e+00 : f32
    %1020 = vector.broadcast %cst_130 : f32 to vector<8x256xf32>
    %1021 = arith.select %31, %1019, %1020 : vector<8x256xi1>, vector<8x256xf32>
    %c156 = arith.constant 156 : index
    %1022 = memref.load %arg4[%c156] : memref<288xf32, #tpu.memory_space<smem>>
    %1023 = vector.broadcast %1022 : f32 to vector<8x256xf32>
    %1024 = arith.mulf %1023, %1021 : vector<8x256xf32>
    %1025 = arith.addf %1006, %1024 : vector<8x256xf32>
    %c192 = arith.constant 192 : index
    %1026 = memref.load %arg4[%c192] : memref<288xf32, #tpu.memory_space<smem>>
    %1027 = vector.broadcast %1026 : f32 to vector<8x256xf32>
    %1028 = arith.mulf %1027, %1021 : vector<8x256xf32>
    %1029 = arith.addf %1010, %1028 : vector<8x256xf32>
    %c228 = arith.constant 228 : index
    %1030 = memref.load %arg4[%c228] : memref<288xf32, #tpu.memory_space<smem>>
    %1031 = vector.broadcast %1030 : f32 to vector<8x256xf32>
    %1032 = arith.mulf %1031, %1021 : vector<8x256xf32>
    %1033 = arith.addf %1014, %1032 : vector<8x256xf32>
    %c264 = arith.constant 264 : index
    %1034 = memref.load %arg4[%c264] : memref<288xf32, #tpu.memory_space<smem>>
    %1035 = vector.broadcast %1034 : f32 to vector<8x256xf32>
    %1036 = arith.mulf %1035, %1021 : vector<8x256xf32>
    %1037 = arith.addf %1018, %1036 : vector<8x256xf32>
    %c157 = arith.constant 157 : index
    %1038 = memref.load %arg4[%c157] : memref<288xf32, #tpu.memory_space<smem>>
    %1039 = vector.broadcast %1038 : f32 to vector<8x256xf32>
    %1040 = arith.mulf %1039, %37 : vector<8x256xf32>
    %1041 = arith.addf %1025, %1040 : vector<8x256xf32>
    %c193 = arith.constant 193 : index
    %1042 = memref.load %arg4[%c193] : memref<288xf32, #tpu.memory_space<smem>>
    %1043 = vector.broadcast %1042 : f32 to vector<8x256xf32>
    %1044 = arith.mulf %1043, %37 : vector<8x256xf32>
    %1045 = arith.addf %1029, %1044 : vector<8x256xf32>
    %c229 = arith.constant 229 : index
    %1046 = memref.load %arg4[%c229] : memref<288xf32, #tpu.memory_space<smem>>
    %1047 = vector.broadcast %1046 : f32 to vector<8x256xf32>
    %1048 = arith.mulf %1047, %37 : vector<8x256xf32>
    %1049 = arith.addf %1033, %1048 : vector<8x256xf32>
    %c265 = arith.constant 265 : index
    %1050 = memref.load %arg4[%c265] : memref<288xf32, #tpu.memory_space<smem>>
    %1051 = vector.broadcast %1050 : f32 to vector<8x256xf32>
    %1052 = arith.mulf %1051, %37 : vector<8x256xf32>
    %1053 = arith.addf %1037, %1052 : vector<8x256xf32>
    %c254_i32_131 = arith.constant 254 : i32
    %1054 = tpu.dynamic_rotate %37 by %c254_i32_131 dim 1 : vector<8x256xf32>, i32 -> vector<8x256xf32>
    %cst_132 = arith.constant 0.000000e+00 : f32
    %1055 = vector.broadcast %cst_132 : f32 to vector<8x256xf32>
    %1056 = arith.select %33, %1054, %1055 : vector<8x256xi1>, vector<8x256xf32>
    %c158 = arith.constant 158 : index
    %1057 = memref.load %arg4[%c158] : memref<288xf32, #tpu.memory_space<smem>>
    %1058 = vector.broadcast %1057 : f32 to vector<8x256xf32>
    %1059 = arith.mulf %1058, %1056 : vector<8x256xf32>
    %1060 = arith.addf %1041, %1059 : vector<8x256xf32>
    %c194 = arith.constant 194 : index
    %1061 = memref.load %arg4[%c194] : memref<288xf32, #tpu.memory_space<smem>>
    %1062 = vector.broadcast %1061 : f32 to vector<8x256xf32>
    %1063 = arith.mulf %1062, %1056 : vector<8x256xf32>
    %1064 = arith.addf %1045, %1063 : vector<8x256xf32>
    %c230 = arith.constant 230 : index
    %1065 = memref.load %arg4[%c230] : memref<288xf32, #tpu.memory_space<smem>>
    %1066 = vector.broadcast %1065 : f32 to vector<8x256xf32>
    %1067 = arith.mulf %1066, %1056 : vector<8x256xf32>
    %1068 = arith.addf %1049, %1067 : vector<8x256xf32>
    %c266 = arith.constant 266 : index
    %1069 = memref.load %arg4[%c266] : memref<288xf32, #tpu.memory_space<smem>>
    %1070 = vector.broadcast %1069 : f32 to vector<8x256xf32>
    %1071 = arith.mulf %1070, %1056 : vector<8x256xf32>
    %1072 = arith.addf %1053, %1071 : vector<8x256xf32>
    %c6_i32_133 = arith.constant 6 : i32
    %1073 = tpu.dynamic_rotate %37 by %c6_i32_133 dim 0 : vector<8x256xf32>, i32 -> vector<8x256xf32>
    %cst_134 = arith.constant 0.000000e+00 : f32
    %1074 = vector.broadcast %cst_134 : f32 to vector<8x256xf32>
    %1075 = arith.select %29, %1073, %1074 : vector<8x256xi1>, vector<8x256xf32>
    %c2_i32_135 = arith.constant 2 : i32
    %1076 = tpu.dynamic_rotate %1075 by %c2_i32_135 dim 1 : vector<8x256xf32>, i32 -> vector<8x256xf32>
    %cst_136 = arith.constant 0.000000e+00 : f32
    %1077 = vector.broadcast %cst_136 : f32 to vector<8x256xf32>
    %1078 = arith.select %31, %1076, %1077 : vector<8x256xi1>, vector<8x256xf32>
    %c159 = arith.constant 159 : index
    %1079 = memref.load %arg4[%c159] : memref<288xf32, #tpu.memory_space<smem>>
    %1080 = vector.broadcast %1079 : f32 to vector<8x256xf32>
    %1081 = arith.mulf %1080, %1078 : vector<8x256xf32>
    %1082 = arith.addf %1060, %1081 : vector<8x256xf32>
    %c195 = arith.constant 195 : index
    %1083 = memref.load %arg4[%c195] : memref<288xf32, #tpu.memory_space<smem>>
    %1084 = vector.broadcast %1083 : f32 to vector<8x256xf32>
    %1085 = arith.mulf %1084, %1078 : vector<8x256xf32>
    %1086 = arith.addf %1064, %1085 : vector<8x256xf32>
    %c231 = arith.constant 231 : index
    %1087 = memref.load %arg4[%c231] : memref<288xf32, #tpu.memory_space<smem>>
    %1088 = vector.broadcast %1087 : f32 to vector<8x256xf32>
    %1089 = arith.mulf %1088, %1078 : vector<8x256xf32>
    %1090 = arith.addf %1068, %1089 : vector<8x256xf32>
    %c267 = arith.constant 267 : index
    %1091 = memref.load %arg4[%c267] : memref<288xf32, #tpu.memory_space<smem>>
    %1092 = vector.broadcast %1091 : f32 to vector<8x256xf32>
    %1093 = arith.mulf %1092, %1078 : vector<8x256xf32>
    %1094 = arith.addf %1072, %1093 : vector<8x256xf32>
    %c160 = arith.constant 160 : index
    %1095 = memref.load %arg4[%c160] : memref<288xf32, #tpu.memory_space<smem>>
    %1096 = vector.broadcast %1095 : f32 to vector<8x256xf32>
    %1097 = arith.mulf %1096, %1075 : vector<8x256xf32>
    %1098 = arith.addf %1082, %1097 : vector<8x256xf32>
    %c196 = arith.constant 196 : index
    %1099 = memref.load %arg4[%c196] : memref<288xf32, #tpu.memory_space<smem>>
    %1100 = vector.broadcast %1099 : f32 to vector<8x256xf32>
    %1101 = arith.mulf %1100, %1075 : vector<8x256xf32>
    %1102 = arith.addf %1086, %1101 : vector<8x256xf32>
    %c232 = arith.constant 232 : index
    %1103 = memref.load %arg4[%c232] : memref<288xf32, #tpu.memory_space<smem>>
    %1104 = vector.broadcast %1103 : f32 to vector<8x256xf32>
    %1105 = arith.mulf %1104, %1075 : vector<8x256xf32>
    %1106 = arith.addf %1090, %1105 : vector<8x256xf32>
    %c268 = arith.constant 268 : index
    %1107 = memref.load %arg4[%c268] : memref<288xf32, #tpu.memory_space<smem>>
    %1108 = vector.broadcast %1107 : f32 to vector<8x256xf32>
    %1109 = arith.mulf %1108, %1075 : vector<8x256xf32>
    %1110 = arith.addf %1094, %1109 : vector<8x256xf32>
    %c254_i32_137 = arith.constant 254 : i32
    %1111 = tpu.dynamic_rotate %1075 by %c254_i32_137 dim 1 : vector<8x256xf32>, i32 -> vector<8x256xf32>
    %cst_138 = arith.constant 0.000000e+00 : f32
    %1112 = vector.broadcast %cst_138 : f32 to vector<8x256xf32>
    %1113 = arith.select %33, %1111, %1112 : vector<8x256xi1>, vector<8x256xf32>
    %c161 = arith.constant 161 : index
    %1114 = memref.load %arg4[%c161] : memref<288xf32, #tpu.memory_space<smem>>
    %1115 = vector.broadcast %1114 : f32 to vector<8x256xf32>
    %1116 = arith.mulf %1115, %1113 : vector<8x256xf32>
    %1117 = arith.addf %1098, %1116 : vector<8x256xf32>
    %c197 = arith.constant 197 : index
    %1118 = memref.load %arg4[%c197] : memref<288xf32, #tpu.memory_space<smem>>
    %1119 = vector.broadcast %1118 : f32 to vector<8x256xf32>
    %1120 = arith.mulf %1119, %1113 : vector<8x256xf32>
    %1121 = arith.addf %1102, %1120 : vector<8x256xf32>
    %c233 = arith.constant 233 : index
    %1122 = memref.load %arg4[%c233] : memref<288xf32, #tpu.memory_space<smem>>
    %1123 = vector.broadcast %1122 : f32 to vector<8x256xf32>
    %1124 = arith.mulf %1123, %1113 : vector<8x256xf32>
    %1125 = arith.addf %1106, %1124 : vector<8x256xf32>
    %c269 = arith.constant 269 : index
    %1126 = memref.load %arg4[%c269] : memref<288xf32, #tpu.memory_space<smem>>
    %1127 = vector.broadcast %1126 : f32 to vector<8x256xf32>
    %1128 = arith.mulf %1127, %1113 : vector<8x256xf32>
    %1129 = arith.addf %1110, %1128 : vector<8x256xf32>
    %c2_i32_139 = arith.constant 2 : i32
    %1130 = tpu.dynamic_rotate %39 by %c2_i32_139 dim 0 : vector<8x256xf32>, i32 -> vector<8x256xf32>
    %cst_140 = arith.constant 0.000000e+00 : f32
    %1131 = vector.broadcast %cst_140 : f32 to vector<8x256xf32>
    %1132 = arith.select %27, %1130, %1131 : vector<8x256xi1>, vector<8x256xf32>
    %c2_i32_141 = arith.constant 2 : i32
    %1133 = tpu.dynamic_rotate %1132 by %c2_i32_141 dim 1 : vector<8x256xf32>, i32 -> vector<8x256xf32>
    %cst_142 = arith.constant 0.000000e+00 : f32
    %1134 = vector.broadcast %cst_142 : f32 to vector<8x256xf32>
    %1135 = arith.select %31, %1133, %1134 : vector<8x256xi1>, vector<8x256xf32>
    %c162 = arith.constant 162 : index
    %1136 = memref.load %arg4[%c162] : memref<288xf32, #tpu.memory_space<smem>>
    %1137 = vector.broadcast %1136 : f32 to vector<8x256xf32>
    %1138 = arith.mulf %1137, %1135 : vector<8x256xf32>
    %1139 = arith.addf %1117, %1138 : vector<8x256xf32>
    %c198 = arith.constant 198 : index
    %1140 = memref.load %arg4[%c198] : memref<288xf32, #tpu.memory_space<smem>>
    %1141 = vector.broadcast %1140 : f32 to vector<8x256xf32>
    %1142 = arith.mulf %1141, %1135 : vector<8x256xf32>
    %1143 = arith.addf %1121, %1142 : vector<8x256xf32>
    %c234 = arith.constant 234 : index
    %1144 = memref.load %arg4[%c234] : memref<288xf32, #tpu.memory_space<smem>>
    %1145 = vector.broadcast %1144 : f32 to vector<8x256xf32>
    %1146 = arith.mulf %1145, %1135 : vector<8x256xf32>
    %1147 = arith.addf %1125, %1146 : vector<8x256xf32>
    %c270 = arith.constant 270 : index
    %1148 = memref.load %arg4[%c270] : memref<288xf32, #tpu.memory_space<smem>>
    %1149 = vector.broadcast %1148 : f32 to vector<8x256xf32>
    %1150 = arith.mulf %1149, %1135 : vector<8x256xf32>
    %1151 = arith.addf %1129, %1150 : vector<8x256xf32>
    %c163 = arith.constant 163 : index
    %1152 = memref.load %arg4[%c163] : memref<288xf32, #tpu.memory_space<smem>>
    %1153 = vector.broadcast %1152 : f32 to vector<8x256xf32>
    %1154 = arith.mulf %1153, %1132 : vector<8x256xf32>
    %1155 = arith.addf %1139, %1154 : vector<8x256xf32>
    %c199 = arith.constant 199 : index
    %1156 = memref.load %arg4[%c199] : memref<288xf32, #tpu.memory_space<smem>>
    %1157 = vector.broadcast %1156 : f32 to vector<8x256xf32>
    %1158 = arith.mulf %1157, %1132 : vector<8x256xf32>
    %1159 = arith.addf %1143, %1158 : vector<8x256xf32>
    %c235 = arith.constant 235 : index
    %1160 = memref.load %arg4[%c235] : memref<288xf32, #tpu.memory_space<smem>>
    %1161 = vector.broadcast %1160 : f32 to vector<8x256xf32>
    %1162 = arith.mulf %1161, %1132 : vector<8x256xf32>
    %1163 = arith.addf %1147, %1162 : vector<8x256xf32>
    %c271 = arith.constant 271 : index
    %1164 = memref.load %arg4[%c271] : memref<288xf32, #tpu.memory_space<smem>>
    %1165 = vector.broadcast %1164 : f32 to vector<8x256xf32>
    %1166 = arith.mulf %1165, %1132 : vector<8x256xf32>
    %1167 = arith.addf %1151, %1166 : vector<8x256xf32>
    %c254_i32_143 = arith.constant 254 : i32
    %1168 = tpu.dynamic_rotate %1132 by %c254_i32_143 dim 1 : vector<8x256xf32>, i32 -> vector<8x256xf32>
    %cst_144 = arith.constant 0.000000e+00 : f32
    %1169 = vector.broadcast %cst_144 : f32 to vector<8x256xf32>
    %1170 = arith.select %33, %1168, %1169 : vector<8x256xi1>, vector<8x256xf32>
    %c164 = arith.constant 164 : index
    %1171 = memref.load %arg4[%c164] : memref<288xf32, #tpu.memory_space<smem>>
    %1172 = vector.broadcast %1171 : f32 to vector<8x256xf32>
    %1173 = arith.mulf %1172, %1170 : vector<8x256xf32>
    %1174 = arith.addf %1155, %1173 : vector<8x256xf32>
    %c200 = arith.constant 200 : index
    %1175 = memref.load %arg4[%c200] : memref<288xf32, #tpu.memory_space<smem>>
    %1176 = vector.broadcast %1175 : f32 to vector<8x256xf32>
    %1177 = arith.mulf %1176, %1170 : vector<8x256xf32>
    %1178 = arith.addf %1159, %1177 : vector<8x256xf32>
    %c236 = arith.constant 236 : index
    %1179 = memref.load %arg4[%c236] : memref<288xf32, #tpu.memory_space<smem>>
    %1180 = vector.broadcast %1179 : f32 to vector<8x256xf32>
    %1181 = arith.mulf %1180, %1170 : vector<8x256xf32>
    %1182 = arith.addf %1163, %1181 : vector<8x256xf32>
    %c272 = arith.constant 272 : index
    %1183 = memref.load %arg4[%c272] : memref<288xf32, #tpu.memory_space<smem>>
    %1184 = vector.broadcast %1183 : f32 to vector<8x256xf32>
    %1185 = arith.mulf %1184, %1170 : vector<8x256xf32>
    %1186 = arith.addf %1167, %1185 : vector<8x256xf32>
    %c2_i32_145 = arith.constant 2 : i32
    %1187 = tpu.dynamic_rotate %39 by %c2_i32_145 dim 1 : vector<8x256xf32>, i32 -> vector<8x256xf32>
    %cst_146 = arith.constant 0.000000e+00 : f32
    %1188 = vector.broadcast %cst_146 : f32 to vector<8x256xf32>
    %1189 = arith.select %31, %1187, %1188 : vector<8x256xi1>, vector<8x256xf32>
    %c165 = arith.constant 165 : index
    %1190 = memref.load %arg4[%c165] : memref<288xf32, #tpu.memory_space<smem>>
    %1191 = vector.broadcast %1190 : f32 to vector<8x256xf32>
    %1192 = arith.mulf %1191, %1189 : vector<8x256xf32>
    %1193 = arith.addf %1174, %1192 : vector<8x256xf32>
    %c201 = arith.constant 201 : index
    %1194 = memref.load %arg4[%c201] : memref<288xf32, #tpu.memory_space<smem>>
    %1195 = vector.broadcast %1194 : f32 to vector<8x256xf32>
    %1196 = arith.mulf %1195, %1189 : vector<8x256xf32>
    %1197 = arith.addf %1178, %1196 : vector<8x256xf32>
    %c237 = arith.constant 237 : index
    %1198 = memref.load %arg4[%c237] : memref<288xf32, #tpu.memory_space<smem>>
    %1199 = vector.broadcast %1198 : f32 to vector<8x256xf32>
    %1200 = arith.mulf %1199, %1189 : vector<8x256xf32>
    %1201 = arith.addf %1182, %1200 : vector<8x256xf32>
    %c273 = arith.constant 273 : index
    %1202 = memref.load %arg4[%c273] : memref<288xf32, #tpu.memory_space<smem>>
    %1203 = vector.broadcast %1202 : f32 to vector<8x256xf32>
    %1204 = arith.mulf %1203, %1189 : vector<8x256xf32>
    %1205 = arith.addf %1186, %1204 : vector<8x256xf32>
    %c166 = arith.constant 166 : index
    %1206 = memref.load %arg4[%c166] : memref<288xf32, #tpu.memory_space<smem>>
    %1207 = vector.broadcast %1206 : f32 to vector<8x256xf32>
    %1208 = arith.mulf %1207, %39 : vector<8x256xf32>
    %1209 = arith.addf %1193, %1208 : vector<8x256xf32>
    %c202 = arith.constant 202 : index
    %1210 = memref.load %arg4[%c202] : memref<288xf32, #tpu.memory_space<smem>>
    %1211 = vector.broadcast %1210 : f32 to vector<8x256xf32>
    %1212 = arith.mulf %1211, %39 : vector<8x256xf32>
    %1213 = arith.addf %1197, %1212 : vector<8x256xf32>
    %c238 = arith.constant 238 : index
    %1214 = memref.load %arg4[%c238] : memref<288xf32, #tpu.memory_space<smem>>
    %1215 = vector.broadcast %1214 : f32 to vector<8x256xf32>
    %1216 = arith.mulf %1215, %39 : vector<8x256xf32>
    %1217 = arith.addf %1201, %1216 : vector<8x256xf32>
    %c274 = arith.constant 274 : index
    %1218 = memref.load %arg4[%c274] : memref<288xf32, #tpu.memory_space<smem>>
    %1219 = vector.broadcast %1218 : f32 to vector<8x256xf32>
    %1220 = arith.mulf %1219, %39 : vector<8x256xf32>
    %1221 = arith.addf %1205, %1220 : vector<8x256xf32>
    %c254_i32_147 = arith.constant 254 : i32
    %1222 = tpu.dynamic_rotate %39 by %c254_i32_147 dim 1 : vector<8x256xf32>, i32 -> vector<8x256xf32>
    %cst_148 = arith.constant 0.000000e+00 : f32
    %1223 = vector.broadcast %cst_148 : f32 to vector<8x256xf32>
    %1224 = arith.select %33, %1222, %1223 : vector<8x256xi1>, vector<8x256xf32>
    %c167 = arith.constant 167 : index
    %1225 = memref.load %arg4[%c167] : memref<288xf32, #tpu.memory_space<smem>>
    %1226 = vector.broadcast %1225 : f32 to vector<8x256xf32>
    %1227 = arith.mulf %1226, %1224 : vector<8x256xf32>
    %1228 = arith.addf %1209, %1227 : vector<8x256xf32>
    %c203 = arith.constant 203 : index
    %1229 = memref.load %arg4[%c203] : memref<288xf32, #tpu.memory_space<smem>>
    %1230 = vector.broadcast %1229 : f32 to vector<8x256xf32>
    %1231 = arith.mulf %1230, %1224 : vector<8x256xf32>
    %1232 = arith.addf %1213, %1231 : vector<8x256xf32>
    %c239 = arith.constant 239 : index
    %1233 = memref.load %arg4[%c239] : memref<288xf32, #tpu.memory_space<smem>>
    %1234 = vector.broadcast %1233 : f32 to vector<8x256xf32>
    %1235 = arith.mulf %1234, %1224 : vector<8x256xf32>
    %1236 = arith.addf %1217, %1235 : vector<8x256xf32>
    %c275 = arith.constant 275 : index
    %1237 = memref.load %arg4[%c275] : memref<288xf32, #tpu.memory_space<smem>>
    %1238 = vector.broadcast %1237 : f32 to vector<8x256xf32>
    %1239 = arith.mulf %1238, %1224 : vector<8x256xf32>
    %1240 = arith.addf %1221, %1239 : vector<8x256xf32>
    %c6_i32_149 = arith.constant 6 : i32
    %1241 = tpu.dynamic_rotate %39 by %c6_i32_149 dim 0 : vector<8x256xf32>, i32 -> vector<8x256xf32>
    %cst_150 = arith.constant 0.000000e+00 : f32
    %1242 = vector.broadcast %cst_150 : f32 to vector<8x256xf32>
    %1243 = arith.select %29, %1241, %1242 : vector<8x256xi1>, vector<8x256xf32>
    %c2_i32_151 = arith.constant 2 : i32
    %1244 = tpu.dynamic_rotate %1243 by %c2_i32_151 dim 1 : vector<8x256xf32>, i32 -> vector<8x256xf32>
    %cst_152 = arith.constant 0.000000e+00 : f32
    %1245 = vector.broadcast %cst_152 : f32 to vector<8x256xf32>
    %1246 = arith.select %31, %1244, %1245 : vector<8x256xi1>, vector<8x256xf32>
    %c168 = arith.constant 168 : index
    %1247 = memref.load %arg4[%c168] : memref<288xf32, #tpu.memory_space<smem>>
    %1248 = vector.broadcast %1247 : f32 to vector<8x256xf32>
    %1249 = arith.mulf %1248, %1246 : vector<8x256xf32>
    %1250 = arith.addf %1228, %1249 : vector<8x256xf32>
    %c204 = arith.constant 204 : index
    %1251 = memref.load %arg4[%c204] : memref<288xf32, #tpu.memory_space<smem>>
    %1252 = vector.broadcast %1251 : f32 to vector<8x256xf32>
    %1253 = arith.mulf %1252, %1246 : vector<8x256xf32>
    %1254 = arith.addf %1232, %1253 : vector<8x256xf32>
    %c240 = arith.constant 240 : index
    %1255 = memref.load %arg4[%c240] : memref<288xf32, #tpu.memory_space<smem>>
    %1256 = vector.broadcast %1255 : f32 to vector<8x256xf32>
    %1257 = arith.mulf %1256, %1246 : vector<8x256xf32>
    %1258 = arith.addf %1236, %1257 : vector<8x256xf32>
    %c276 = arith.constant 276 : index
    %1259 = memref.load %arg4[%c276] : memref<288xf32, #tpu.memory_space<smem>>
    %1260 = vector.broadcast %1259 : f32 to vector<8x256xf32>
    %1261 = arith.mulf %1260, %1246 : vector<8x256xf32>
    %1262 = arith.addf %1240, %1261 : vector<8x256xf32>
    %c169 = arith.constant 169 : index
    %1263 = memref.load %arg4[%c169] : memref<288xf32, #tpu.memory_space<smem>>
    %1264 = vector.broadcast %1263 : f32 to vector<8x256xf32>
    %1265 = arith.mulf %1264, %1243 : vector<8x256xf32>
    %1266 = arith.addf %1250, %1265 : vector<8x256xf32>
    %c205 = arith.constant 205 : index
    %1267 = memref.load %arg4[%c205] : memref<288xf32, #tpu.memory_space<smem>>
    %1268 = vector.broadcast %1267 : f32 to vector<8x256xf32>
    %1269 = arith.mulf %1268, %1243 : vector<8x256xf32>
    %1270 = arith.addf %1254, %1269 : vector<8x256xf32>
    %c241 = arith.constant 241 : index
    %1271 = memref.load %arg4[%c241] : memref<288xf32, #tpu.memory_space<smem>>
    %1272 = vector.broadcast %1271 : f32 to vector<8x256xf32>
    %1273 = arith.mulf %1272, %1243 : vector<8x256xf32>
    %1274 = arith.addf %1258, %1273 : vector<8x256xf32>
    %c277 = arith.constant 277 : index
    %1275 = memref.load %arg4[%c277] : memref<288xf32, #tpu.memory_space<smem>>
    %1276 = vector.broadcast %1275 : f32 to vector<8x256xf32>
    %1277 = arith.mulf %1276, %1243 : vector<8x256xf32>
    %1278 = arith.addf %1262, %1277 : vector<8x256xf32>
    %c254_i32_153 = arith.constant 254 : i32
    %1279 = tpu.dynamic_rotate %1243 by %c254_i32_153 dim 1 : vector<8x256xf32>, i32 -> vector<8x256xf32>
    %cst_154 = arith.constant 0.000000e+00 : f32
    %1280 = vector.broadcast %cst_154 : f32 to vector<8x256xf32>
    %1281 = arith.select %33, %1279, %1280 : vector<8x256xi1>, vector<8x256xf32>
    %c170 = arith.constant 170 : index
    %1282 = memref.load %arg4[%c170] : memref<288xf32, #tpu.memory_space<smem>>
    %1283 = vector.broadcast %1282 : f32 to vector<8x256xf32>
    %1284 = arith.mulf %1283, %1281 : vector<8x256xf32>
    %1285 = arith.addf %1266, %1284 : vector<8x256xf32>
    %c206 = arith.constant 206 : index
    %1286 = memref.load %arg4[%c206] : memref<288xf32, #tpu.memory_space<smem>>
    %1287 = vector.broadcast %1286 : f32 to vector<8x256xf32>
    %1288 = arith.mulf %1287, %1281 : vector<8x256xf32>
    %1289 = arith.addf %1270, %1288 : vector<8x256xf32>
    %c242 = arith.constant 242 : index
    %1290 = memref.load %arg4[%c242] : memref<288xf32, #tpu.memory_space<smem>>
    %1291 = vector.broadcast %1290 : f32 to vector<8x256xf32>
    %1292 = arith.mulf %1291, %1281 : vector<8x256xf32>
    %1293 = arith.addf %1274, %1292 : vector<8x256xf32>
    %c278 = arith.constant 278 : index
    %1294 = memref.load %arg4[%c278] : memref<288xf32, #tpu.memory_space<smem>>
    %1295 = vector.broadcast %1294 : f32 to vector<8x256xf32>
    %1296 = arith.mulf %1295, %1281 : vector<8x256xf32>
    %1297 = arith.addf %1278, %1296 : vector<8x256xf32>
    %c2_i32_155 = arith.constant 2 : i32
    %1298 = tpu.dynamic_rotate %41 by %c2_i32_155 dim 0 : vector<8x256xf32>, i32 -> vector<8x256xf32>
    %cst_156 = arith.constant 0.000000e+00 : f32
    %1299 = vector.broadcast %cst_156 : f32 to vector<8x256xf32>
    %1300 = arith.select %27, %1298, %1299 : vector<8x256xi1>, vector<8x256xf32>
    %c2_i32_157 = arith.constant 2 : i32
    %1301 = tpu.dynamic_rotate %1300 by %c2_i32_157 dim 1 : vector<8x256xf32>, i32 -> vector<8x256xf32>
    %cst_158 = arith.constant 0.000000e+00 : f32
    %1302 = vector.broadcast %cst_158 : f32 to vector<8x256xf32>
    %1303 = arith.select %31, %1301, %1302 : vector<8x256xi1>, vector<8x256xf32>
    %c171 = arith.constant 171 : index
    %1304 = memref.load %arg4[%c171] : memref<288xf32, #tpu.memory_space<smem>>
    %1305 = vector.broadcast %1304 : f32 to vector<8x256xf32>
    %1306 = arith.mulf %1305, %1303 : vector<8x256xf32>
    %1307 = arith.addf %1285, %1306 : vector<8x256xf32>
    %c207 = arith.constant 207 : index
    %1308 = memref.load %arg4[%c207] : memref<288xf32, #tpu.memory_space<smem>>
    %1309 = vector.broadcast %1308 : f32 to vector<8x256xf32>
    %1310 = arith.mulf %1309, %1303 : vector<8x256xf32>
    %1311 = arith.addf %1289, %1310 : vector<8x256xf32>
    %c243 = arith.constant 243 : index
    %1312 = memref.load %arg4[%c243] : memref<288xf32, #tpu.memory_space<smem>>
    %1313 = vector.broadcast %1312 : f32 to vector<8x256xf32>
    %1314 = arith.mulf %1313, %1303 : vector<8x256xf32>
    %1315 = arith.addf %1293, %1314 : vector<8x256xf32>
    %c279 = arith.constant 279 : index
    %1316 = memref.load %arg4[%c279] : memref<288xf32, #tpu.memory_space<smem>>
    %1317 = vector.broadcast %1316 : f32 to vector<8x256xf32>
    %1318 = arith.mulf %1317, %1303 : vector<8x256xf32>
    %1319 = arith.addf %1297, %1318 : vector<8x256xf32>
    %c172 = arith.constant 172 : index
    %1320 = memref.load %arg4[%c172] : memref<288xf32, #tpu.memory_space<smem>>
    %1321 = vector.broadcast %1320 : f32 to vector<8x256xf32>
    %1322 = arith.mulf %1321, %1300 : vector<8x256xf32>
    %1323 = arith.addf %1307, %1322 : vector<8x256xf32>
    %c208 = arith.constant 208 : index
    %1324 = memref.load %arg4[%c208] : memref<288xf32, #tpu.memory_space<smem>>
    %1325 = vector.broadcast %1324 : f32 to vector<8x256xf32>
    %1326 = arith.mulf %1325, %1300 : vector<8x256xf32>
    %1327 = arith.addf %1311, %1326 : vector<8x256xf32>
    %c244 = arith.constant 244 : index
    %1328 = memref.load %arg4[%c244] : memref<288xf32, #tpu.memory_space<smem>>
    %1329 = vector.broadcast %1328 : f32 to vector<8x256xf32>
    %1330 = arith.mulf %1329, %1300 : vector<8x256xf32>
    %1331 = arith.addf %1315, %1330 : vector<8x256xf32>
    %c280 = arith.constant 280 : index
    %1332 = memref.load %arg4[%c280] : memref<288xf32, #tpu.memory_space<smem>>
    %1333 = vector.broadcast %1332 : f32 to vector<8x256xf32>
    %1334 = arith.mulf %1333, %1300 : vector<8x256xf32>
    %1335 = arith.addf %1319, %1334 : vector<8x256xf32>
    %c254_i32_159 = arith.constant 254 : i32
    %1336 = tpu.dynamic_rotate %1300 by %c254_i32_159 dim 1 : vector<8x256xf32>, i32 -> vector<8x256xf32>
    %cst_160 = arith.constant 0.000000e+00 : f32
    %1337 = vector.broadcast %cst_160 : f32 to vector<8x256xf32>
    %1338 = arith.select %33, %1336, %1337 : vector<8x256xi1>, vector<8x256xf32>
    %c173 = arith.constant 173 : index
    %1339 = memref.load %arg4[%c173] : memref<288xf32, #tpu.memory_space<smem>>
    %1340 = vector.broadcast %1339 : f32 to vector<8x256xf32>
    %1341 = arith.mulf %1340, %1338 : vector<8x256xf32>
    %1342 = arith.addf %1323, %1341 : vector<8x256xf32>
    %c209 = arith.constant 209 : index
    %1343 = memref.load %arg4[%c209] : memref<288xf32, #tpu.memory_space<smem>>
    %1344 = vector.broadcast %1343 : f32 to vector<8x256xf32>
    %1345 = arith.mulf %1344, %1338 : vector<8x256xf32>
    %1346 = arith.addf %1327, %1345 : vector<8x256xf32>
    %c245 = arith.constant 245 : index
    %1347 = memref.load %arg4[%c245] : memref<288xf32, #tpu.memory_space<smem>>
    %1348 = vector.broadcast %1347 : f32 to vector<8x256xf32>
    %1349 = arith.mulf %1348, %1338 : vector<8x256xf32>
    %1350 = arith.addf %1331, %1349 : vector<8x256xf32>
    %c281 = arith.constant 281 : index
    %1351 = memref.load %arg4[%c281] : memref<288xf32, #tpu.memory_space<smem>>
    %1352 = vector.broadcast %1351 : f32 to vector<8x256xf32>
    %1353 = arith.mulf %1352, %1338 : vector<8x256xf32>
    %1354 = arith.addf %1335, %1353 : vector<8x256xf32>
    %c2_i32_161 = arith.constant 2 : i32
    %1355 = tpu.dynamic_rotate %41 by %c2_i32_161 dim 1 : vector<8x256xf32>, i32 -> vector<8x256xf32>
    %cst_162 = arith.constant 0.000000e+00 : f32
    %1356 = vector.broadcast %cst_162 : f32 to vector<8x256xf32>
    %1357 = arith.select %31, %1355, %1356 : vector<8x256xi1>, vector<8x256xf32>
    %c174 = arith.constant 174 : index
    %1358 = memref.load %arg4[%c174] : memref<288xf32, #tpu.memory_space<smem>>
    %1359 = vector.broadcast %1358 : f32 to vector<8x256xf32>
    %1360 = arith.mulf %1359, %1357 : vector<8x256xf32>
    %1361 = arith.addf %1342, %1360 : vector<8x256xf32>
    %c210 = arith.constant 210 : index
    %1362 = memref.load %arg4[%c210] : memref<288xf32, #tpu.memory_space<smem>>
    %1363 = vector.broadcast %1362 : f32 to vector<8x256xf32>
    %1364 = arith.mulf %1363, %1357 : vector<8x256xf32>
    %1365 = arith.addf %1346, %1364 : vector<8x256xf32>
    %c246 = arith.constant 246 : index
    %1366 = memref.load %arg4[%c246] : memref<288xf32, #tpu.memory_space<smem>>
    %1367 = vector.broadcast %1366 : f32 to vector<8x256xf32>
    %1368 = arith.mulf %1367, %1357 : vector<8x256xf32>
    %1369 = arith.addf %1350, %1368 : vector<8x256xf32>
    %c282 = arith.constant 282 : index
    %1370 = memref.load %arg4[%c282] : memref<288xf32, #tpu.memory_space<smem>>
    %1371 = vector.broadcast %1370 : f32 to vector<8x256xf32>
    %1372 = arith.mulf %1371, %1357 : vector<8x256xf32>
    %1373 = arith.addf %1354, %1372 : vector<8x256xf32>
    %c175 = arith.constant 175 : index
    %1374 = memref.load %arg4[%c175] : memref<288xf32, #tpu.memory_space<smem>>
    %1375 = vector.broadcast %1374 : f32 to vector<8x256xf32>
    %1376 = arith.mulf %1375, %41 : vector<8x256xf32>
    %1377 = arith.addf %1361, %1376 : vector<8x256xf32>
    %c211 = arith.constant 211 : index
    %1378 = memref.load %arg4[%c211] : memref<288xf32, #tpu.memory_space<smem>>
    %1379 = vector.broadcast %1378 : f32 to vector<8x256xf32>
    %1380 = arith.mulf %1379, %41 : vector<8x256xf32>
    %1381 = arith.addf %1365, %1380 : vector<8x256xf32>
    %c247 = arith.constant 247 : index
    %1382 = memref.load %arg4[%c247] : memref<288xf32, #tpu.memory_space<smem>>
    %1383 = vector.broadcast %1382 : f32 to vector<8x256xf32>
    %1384 = arith.mulf %1383, %41 : vector<8x256xf32>
    %1385 = arith.addf %1369, %1384 : vector<8x256xf32>
    %c283 = arith.constant 283 : index
    %1386 = memref.load %arg4[%c283] : memref<288xf32, #tpu.memory_space<smem>>
    %1387 = vector.broadcast %1386 : f32 to vector<8x256xf32>
    %1388 = arith.mulf %1387, %41 : vector<8x256xf32>
    %1389 = arith.addf %1373, %1388 : vector<8x256xf32>
    %c254_i32_163 = arith.constant 254 : i32
    %1390 = tpu.dynamic_rotate %41 by %c254_i32_163 dim 1 : vector<8x256xf32>, i32 -> vector<8x256xf32>
    %cst_164 = arith.constant 0.000000e+00 : f32
    %1391 = vector.broadcast %cst_164 : f32 to vector<8x256xf32>
    %1392 = arith.select %33, %1390, %1391 : vector<8x256xi1>, vector<8x256xf32>
    %c176 = arith.constant 176 : index
    %1393 = memref.load %arg4[%c176] : memref<288xf32, #tpu.memory_space<smem>>
    %1394 = vector.broadcast %1393 : f32 to vector<8x256xf32>
    %1395 = arith.mulf %1394, %1392 : vector<8x256xf32>
    %1396 = arith.addf %1377, %1395 : vector<8x256xf32>
    %c212 = arith.constant 212 : index
    %1397 = memref.load %arg4[%c212] : memref<288xf32, #tpu.memory_space<smem>>
    %1398 = vector.broadcast %1397 : f32 to vector<8x256xf32>
    %1399 = arith.mulf %1398, %1392 : vector<8x256xf32>
    %1400 = arith.addf %1381, %1399 : vector<8x256xf32>
    %c248 = arith.constant 248 : index
    %1401 = memref.load %arg4[%c248] : memref<288xf32, #tpu.memory_space<smem>>
    %1402 = vector.broadcast %1401 : f32 to vector<8x256xf32>
    %1403 = arith.mulf %1402, %1392 : vector<8x256xf32>
    %1404 = arith.addf %1385, %1403 : vector<8x256xf32>
    %c284 = arith.constant 284 : index
    %1405 = memref.load %arg4[%c284] : memref<288xf32, #tpu.memory_space<smem>>
    %1406 = vector.broadcast %1405 : f32 to vector<8x256xf32>
    %1407 = arith.mulf %1406, %1392 : vector<8x256xf32>
    %1408 = arith.addf %1389, %1407 : vector<8x256xf32>
    %c6_i32_165 = arith.constant 6 : i32
    %1409 = tpu.dynamic_rotate %41 by %c6_i32_165 dim 0 : vector<8x256xf32>, i32 -> vector<8x256xf32>
    %cst_166 = arith.constant 0.000000e+00 : f32
    %1410 = vector.broadcast %cst_166 : f32 to vector<8x256xf32>
    %1411 = arith.select %29, %1409, %1410 : vector<8x256xi1>, vector<8x256xf32>
    %c2_i32_167 = arith.constant 2 : i32
    %1412 = tpu.dynamic_rotate %1411 by %c2_i32_167 dim 1 : vector<8x256xf32>, i32 -> vector<8x256xf32>
    %cst_168 = arith.constant 0.000000e+00 : f32
    %1413 = vector.broadcast %cst_168 : f32 to vector<8x256xf32>
    %1414 = arith.select %31, %1412, %1413 : vector<8x256xi1>, vector<8x256xf32>
    %c177 = arith.constant 177 : index
    %1415 = memref.load %arg4[%c177] : memref<288xf32, #tpu.memory_space<smem>>
    %1416 = vector.broadcast %1415 : f32 to vector<8x256xf32>
    %1417 = arith.mulf %1416, %1414 : vector<8x256xf32>
    %1418 = arith.addf %1396, %1417 : vector<8x256xf32>
    %c213 = arith.constant 213 : index
    %1419 = memref.load %arg4[%c213] : memref<288xf32, #tpu.memory_space<smem>>
    %1420 = vector.broadcast %1419 : f32 to vector<8x256xf32>
    %1421 = arith.mulf %1420, %1414 : vector<8x256xf32>
    %1422 = arith.addf %1400, %1421 : vector<8x256xf32>
    %c249 = arith.constant 249 : index
    %1423 = memref.load %arg4[%c249] : memref<288xf32, #tpu.memory_space<smem>>
    %1424 = vector.broadcast %1423 : f32 to vector<8x256xf32>
    %1425 = arith.mulf %1424, %1414 : vector<8x256xf32>
    %1426 = arith.addf %1404, %1425 : vector<8x256xf32>
    %c285 = arith.constant 285 : index
    %1427 = memref.load %arg4[%c285] : memref<288xf32, #tpu.memory_space<smem>>
    %1428 = vector.broadcast %1427 : f32 to vector<8x256xf32>
    %1429 = arith.mulf %1428, %1414 : vector<8x256xf32>
    %1430 = arith.addf %1408, %1429 : vector<8x256xf32>
    %c178 = arith.constant 178 : index
    %1431 = memref.load %arg4[%c178] : memref<288xf32, #tpu.memory_space<smem>>
    %1432 = vector.broadcast %1431 : f32 to vector<8x256xf32>
    %1433 = arith.mulf %1432, %1411 : vector<8x256xf32>
    %1434 = arith.addf %1418, %1433 : vector<8x256xf32>
    %c214 = arith.constant 214 : index
    %1435 = memref.load %arg4[%c214] : memref<288xf32, #tpu.memory_space<smem>>
    %1436 = vector.broadcast %1435 : f32 to vector<8x256xf32>
    %1437 = arith.mulf %1436, %1411 : vector<8x256xf32>
    %1438 = arith.addf %1422, %1437 : vector<8x256xf32>
    %c250 = arith.constant 250 : index
    %1439 = memref.load %arg4[%c250] : memref<288xf32, #tpu.memory_space<smem>>
    %1440 = vector.broadcast %1439 : f32 to vector<8x256xf32>
    %1441 = arith.mulf %1440, %1411 : vector<8x256xf32>
    %1442 = arith.addf %1426, %1441 : vector<8x256xf32>
    %c286 = arith.constant 286 : index
    %1443 = memref.load %arg4[%c286] : memref<288xf32, #tpu.memory_space<smem>>
    %1444 = vector.broadcast %1443 : f32 to vector<8x256xf32>
    %1445 = arith.mulf %1444, %1411 : vector<8x256xf32>
    %1446 = arith.addf %1430, %1445 : vector<8x256xf32>
    %c254_i32_169 = arith.constant 254 : i32
    %1447 = tpu.dynamic_rotate %1411 by %c254_i32_169 dim 1 : vector<8x256xf32>, i32 -> vector<8x256xf32>
    %cst_170 = arith.constant 0.000000e+00 : f32
    %1448 = vector.broadcast %cst_170 : f32 to vector<8x256xf32>
    %1449 = arith.select %33, %1447, %1448 : vector<8x256xi1>, vector<8x256xf32>
    %c179 = arith.constant 179 : index
    %1450 = memref.load %arg4[%c179] : memref<288xf32, #tpu.memory_space<smem>>
    %1451 = vector.broadcast %1450 : f32 to vector<8x256xf32>
    %1452 = arith.mulf %1451, %1449 : vector<8x256xf32>
    %1453 = arith.addf %1434, %1452 : vector<8x256xf32>
    %c215 = arith.constant 215 : index
    %1454 = memref.load %arg4[%c215] : memref<288xf32, #tpu.memory_space<smem>>
    %1455 = vector.broadcast %1454 : f32 to vector<8x256xf32>
    %1456 = arith.mulf %1455, %1449 : vector<8x256xf32>
    %1457 = arith.addf %1438, %1456 : vector<8x256xf32>
    %c251 = arith.constant 251 : index
    %1458 = memref.load %arg4[%c251] : memref<288xf32, #tpu.memory_space<smem>>
    %1459 = vector.broadcast %1458 : f32 to vector<8x256xf32>
    %1460 = arith.mulf %1459, %1449 : vector<8x256xf32>
    %1461 = arith.addf %1442, %1460 : vector<8x256xf32>
    %c287 = arith.constant 287 : index
    %1462 = memref.load %arg4[%c287] : memref<288xf32, #tpu.memory_space<smem>>
    %1463 = vector.broadcast %1462 : f32 to vector<8x256xf32>
    %1464 = arith.mulf %1463, %1449 : vector<8x256xf32>
    %1465 = arith.addf %1446, %1464 : vector<8x256xf32>
    %c4_171 = arith.constant 4 : index
    %1466 = memref.load %arg5[%c4_171] : memref<8xf32, #tpu.memory_space<smem>>
    %1467 = vector.broadcast %1466 : f32 to vector<8x256xf32>
    %1468 = arith.addf %1453, %1467 : vector<8x256xf32>
    %c5_172 = arith.constant 5 : index
    %1469 = memref.load %arg5[%c5_172] : memref<8xf32, #tpu.memory_space<smem>>
    %1470 = vector.broadcast %1469 : f32 to vector<8x256xf32>
    %1471 = arith.addf %1457, %1470 : vector<8x256xf32>
    %c6_173 = arith.constant 6 : index
    %1472 = memref.load %arg5[%c6_173] : memref<8xf32, #tpu.memory_space<smem>>
    %1473 = vector.broadcast %1472 : f32 to vector<8x256xf32>
    %1474 = arith.addf %1461, %1473 : vector<8x256xf32>
    %c7_174 = arith.constant 7 : index
    %1475 = memref.load %arg5[%c7_174] : memref<8xf32, #tpu.memory_space<smem>>
    %1476 = vector.broadcast %1475 : f32 to vector<8x256xf32>
    %1477 = arith.addf %1465, %1476 : vector<8x256xf32>
    %1478 = arith.maximumf %1468, %1471 : vector<8x256xf32>
    %1479 = arith.maximumf %1478, %1474 : vector<8x256xf32>
    %1480 = arith.maximumf %1479, %1477 : vector<8x256xf32>
    %1481 = arith.subf %1468, %1480 : vector<8x256xf32>
    %1482 = math.exp %1481 : vector<8x256xf32>
    %1483 = arith.subf %1471, %1480 : vector<8x256xf32>
    %1484 = math.exp %1483 : vector<8x256xf32>
    %1485 = arith.subf %1474, %1480 : vector<8x256xf32>
    %1486 = math.exp %1485 : vector<8x256xf32>
    %1487 = arith.subf %1477, %1480 : vector<8x256xf32>
    %1488 = math.exp %1487 : vector<8x256xf32>
    %1489 = arith.addf %1482, %1484 : vector<8x256xf32>
    %1490 = arith.addf %1489, %1486 : vector<8x256xf32>
    %1491 = arith.addf %1490, %1488 : vector<8x256xf32>
    %1492 = tpu.reciprocal %1491 {approx = true} : vector<8x256xf32> -> vector<8x256xf32>
    %1493 = arith.mulf %1482, %1492 : vector<8x256xf32>
    %cst_175 = arith.constant 1.000000e+00 : f32
    %1494 = vector.broadcast %cst_175 : f32 to vector<8x256xf32>
    %1495 = arith.addf %1494, %1493 : vector<8x256xf32>
    %1496 = arith.mulf %59, %1495 : vector<8x256xf32>
    %1497 = arith.mulf %1484, %1492 : vector<8x256xf32>
    %cst_176 = arith.constant 1.000000e+00 : f32
    %1498 = vector.broadcast %cst_176 : f32 to vector<8x256xf32>
    %1499 = arith.addf %1498, %1497 : vector<8x256xf32>
    %1500 = arith.mulf %77, %1499 : vector<8x256xf32>
    %1501 = arith.mulf %1486, %1492 : vector<8x256xf32>
    %cst_177 = arith.constant 1.000000e+00 : f32
    %1502 = vector.broadcast %cst_177 : f32 to vector<8x256xf32>
    %1503 = arith.addf %1502, %1501 : vector<8x256xf32>
    %1504 = arith.mulf %95, %1503 : vector<8x256xf32>
    %1505 = arith.mulf %1488, %1492 : vector<8x256xf32>
    %cst_178 = arith.constant 1.000000e+00 : f32
    %1506 = vector.broadcast %cst_178 : f32 to vector<8x256xf32>
    %1507 = arith.addf %1506, %1505 : vector<8x256xf32>
    %1508 = arith.mulf %113, %1507 : vector<8x256xf32>
    %c1_i32_179 = arith.constant 1 : i32
    %1509 = tpu.dynamic_rotate %1496 by %c1_i32_179 dim 0 : vector<8x256xf32>, i32 -> vector<8x256xf32>
    %cst_180 = arith.constant 0.000000e+00 : f32
    %1510 = vector.broadcast %cst_180 : f32 to vector<8x256xf32>
    %1511 = arith.select %19, %1509, %1510 : vector<8x256xi1>, vector<8x256xf32>
    %c1_i32_181 = arith.constant 1 : i32
    %1512 = tpu.dynamic_rotate %1511 by %c1_i32_181 dim 1 : vector<8x256xf32>, i32 -> vector<8x256xf32>
    %cst_182 = arith.constant 0.000000e+00 : f32
    %1513 = vector.broadcast %cst_182 : f32 to vector<8x256xf32>
    %1514 = arith.select %23, %1512, %1513 : vector<8x256xi1>, vector<8x256xf32>
    %c0_183 = arith.constant 0 : index
    %1515 = memref.load %arg6[%c0_183] : memref<144xf32, #tpu.memory_space<smem>>
    %1516 = vector.broadcast %1515 : f32 to vector<8x256xf32>
    %1517 = arith.mulf %1516, %1514 : vector<8x256xf32>
    %c36_184 = arith.constant 36 : index
    %1518 = memref.load %arg6[%c36_184] : memref<144xf32, #tpu.memory_space<smem>>
    %1519 = vector.broadcast %1518 : f32 to vector<8x256xf32>
    %1520 = arith.mulf %1519, %1514 : vector<8x256xf32>
    %c72_185 = arith.constant 72 : index
    %1521 = memref.load %arg6[%c72_185] : memref<144xf32, #tpu.memory_space<smem>>
    %1522 = vector.broadcast %1521 : f32 to vector<8x256xf32>
    %1523 = arith.mulf %1522, %1514 : vector<8x256xf32>
    %c108_186 = arith.constant 108 : index
    %1524 = memref.load %arg6[%c108_186] : memref<144xf32, #tpu.memory_space<smem>>
    %1525 = vector.broadcast %1524 : f32 to vector<8x256xf32>
    %1526 = arith.mulf %1525, %1514 : vector<8x256xf32>
    %c1_187 = arith.constant 1 : index
    %1527 = memref.load %arg6[%c1_187] : memref<144xf32, #tpu.memory_space<smem>>
    %1528 = vector.broadcast %1527 : f32 to vector<8x256xf32>
    %1529 = arith.mulf %1528, %1511 : vector<8x256xf32>
    %1530 = arith.addf %1517, %1529 : vector<8x256xf32>
    %c37_188 = arith.constant 37 : index
    %1531 = memref.load %arg6[%c37_188] : memref<144xf32, #tpu.memory_space<smem>>
    %1532 = vector.broadcast %1531 : f32 to vector<8x256xf32>
    %1533 = arith.mulf %1532, %1511 : vector<8x256xf32>
    %1534 = arith.addf %1520, %1533 : vector<8x256xf32>
    %c73_189 = arith.constant 73 : index
    %1535 = memref.load %arg6[%c73_189] : memref<144xf32, #tpu.memory_space<smem>>
    %1536 = vector.broadcast %1535 : f32 to vector<8x256xf32>
    %1537 = arith.mulf %1536, %1511 : vector<8x256xf32>
    %1538 = arith.addf %1523, %1537 : vector<8x256xf32>
    %c109_190 = arith.constant 109 : index
    %1539 = memref.load %arg6[%c109_190] : memref<144xf32, #tpu.memory_space<smem>>
    %1540 = vector.broadcast %1539 : f32 to vector<8x256xf32>
    %1541 = arith.mulf %1540, %1511 : vector<8x256xf32>
    %1542 = arith.addf %1526, %1541 : vector<8x256xf32>
    %c255_i32_191 = arith.constant 255 : i32
    %1543 = tpu.dynamic_rotate %1511 by %c255_i32_191 dim 1 : vector<8x256xf32>, i32 -> vector<8x256xf32>
    %cst_192 = arith.constant 0.000000e+00 : f32
    %1544 = vector.broadcast %cst_192 : f32 to vector<8x256xf32>
    %1545 = arith.select %25, %1543, %1544 : vector<8x256xi1>, vector<8x256xf32>
    %c2_193 = arith.constant 2 : index
    %1546 = memref.load %arg6[%c2_193] : memref<144xf32, #tpu.memory_space<smem>>
    %1547 = vector.broadcast %1546 : f32 to vector<8x256xf32>
    %1548 = arith.mulf %1547, %1545 : vector<8x256xf32>
    %1549 = arith.addf %1530, %1548 : vector<8x256xf32>
    %c38_194 = arith.constant 38 : index
    %1550 = memref.load %arg6[%c38_194] : memref<144xf32, #tpu.memory_space<smem>>
    %1551 = vector.broadcast %1550 : f32 to vector<8x256xf32>
    %1552 = arith.mulf %1551, %1545 : vector<8x256xf32>
    %1553 = arith.addf %1534, %1552 : vector<8x256xf32>
    %c74_195 = arith.constant 74 : index
    %1554 = memref.load %arg6[%c74_195] : memref<144xf32, #tpu.memory_space<smem>>
    %1555 = vector.broadcast %1554 : f32 to vector<8x256xf32>
    %1556 = arith.mulf %1555, %1545 : vector<8x256xf32>
    %1557 = arith.addf %1538, %1556 : vector<8x256xf32>
    %c110_196 = arith.constant 110 : index
    %1558 = memref.load %arg6[%c110_196] : memref<144xf32, #tpu.memory_space<smem>>
    %1559 = vector.broadcast %1558 : f32 to vector<8x256xf32>
    %1560 = arith.mulf %1559, %1545 : vector<8x256xf32>
    %1561 = arith.addf %1542, %1560 : vector<8x256xf32>
    %c1_i32_197 = arith.constant 1 : i32
    %1562 = tpu.dynamic_rotate %1496 by %c1_i32_197 dim 1 : vector<8x256xf32>, i32 -> vector<8x256xf32>
    %cst_198 = arith.constant 0.000000e+00 : f32
    %1563 = vector.broadcast %cst_198 : f32 to vector<8x256xf32>
    %1564 = arith.select %23, %1562, %1563 : vector<8x256xi1>, vector<8x256xf32>
    %c3_199 = arith.constant 3 : index
    %1565 = memref.load %arg6[%c3_199] : memref<144xf32, #tpu.memory_space<smem>>
    %1566 = vector.broadcast %1565 : f32 to vector<8x256xf32>
    %1567 = arith.mulf %1566, %1564 : vector<8x256xf32>
    %1568 = arith.addf %1549, %1567 : vector<8x256xf32>
    %c39_200 = arith.constant 39 : index
    %1569 = memref.load %arg6[%c39_200] : memref<144xf32, #tpu.memory_space<smem>>
    %1570 = vector.broadcast %1569 : f32 to vector<8x256xf32>
    %1571 = arith.mulf %1570, %1564 : vector<8x256xf32>
    %1572 = arith.addf %1553, %1571 : vector<8x256xf32>
    %c75_201 = arith.constant 75 : index
    %1573 = memref.load %arg6[%c75_201] : memref<144xf32, #tpu.memory_space<smem>>
    %1574 = vector.broadcast %1573 : f32 to vector<8x256xf32>
    %1575 = arith.mulf %1574, %1564 : vector<8x256xf32>
    %1576 = arith.addf %1557, %1575 : vector<8x256xf32>
    %c111_202 = arith.constant 111 : index
    %1577 = memref.load %arg6[%c111_202] : memref<144xf32, #tpu.memory_space<smem>>
    %1578 = vector.broadcast %1577 : f32 to vector<8x256xf32>
    %1579 = arith.mulf %1578, %1564 : vector<8x256xf32>
    %1580 = arith.addf %1561, %1579 : vector<8x256xf32>
    %c4_203 = arith.constant 4 : index
    %1581 = memref.load %arg6[%c4_203] : memref<144xf32, #tpu.memory_space<smem>>
    %1582 = vector.broadcast %1581 : f32 to vector<8x256xf32>
    %1583 = arith.mulf %1582, %1496 : vector<8x256xf32>
    %1584 = arith.addf %1568, %1583 : vector<8x256xf32>
    %c40_204 = arith.constant 40 : index
    %1585 = memref.load %arg6[%c40_204] : memref<144xf32, #tpu.memory_space<smem>>
    %1586 = vector.broadcast %1585 : f32 to vector<8x256xf32>
    %1587 = arith.mulf %1586, %1496 : vector<8x256xf32>
    %1588 = arith.addf %1572, %1587 : vector<8x256xf32>
    %c76_205 = arith.constant 76 : index
    %1589 = memref.load %arg6[%c76_205] : memref<144xf32, #tpu.memory_space<smem>>
    %1590 = vector.broadcast %1589 : f32 to vector<8x256xf32>
    %1591 = arith.mulf %1590, %1496 : vector<8x256xf32>
    %1592 = arith.addf %1576, %1591 : vector<8x256xf32>
    %c112_206 = arith.constant 112 : index
    %1593 = memref.load %arg6[%c112_206] : memref<144xf32, #tpu.memory_space<smem>>
    %1594 = vector.broadcast %1593 : f32 to vector<8x256xf32>
    %1595 = arith.mulf %1594, %1496 : vector<8x256xf32>
    %1596 = arith.addf %1580, %1595 : vector<8x256xf32>
    %c255_i32_207 = arith.constant 255 : i32
    %1597 = tpu.dynamic_rotate %1496 by %c255_i32_207 dim 1 : vector<8x256xf32>, i32 -> vector<8x256xf32>
    %cst_208 = arith.constant 0.000000e+00 : f32
    %1598 = vector.broadcast %cst_208 : f32 to vector<8x256xf32>
    %1599 = arith.select %25, %1597, %1598 : vector<8x256xi1>, vector<8x256xf32>
    %c5_209 = arith.constant 5 : index
    %1600 = memref.load %arg6[%c5_209] : memref<144xf32, #tpu.memory_space<smem>>
    %1601 = vector.broadcast %1600 : f32 to vector<8x256xf32>
    %1602 = arith.mulf %1601, %1599 : vector<8x256xf32>
    %1603 = arith.addf %1584, %1602 : vector<8x256xf32>
    %c41_210 = arith.constant 41 : index
    %1604 = memref.load %arg6[%c41_210] : memref<144xf32, #tpu.memory_space<smem>>
    %1605 = vector.broadcast %1604 : f32 to vector<8x256xf32>
    %1606 = arith.mulf %1605, %1599 : vector<8x256xf32>
    %1607 = arith.addf %1588, %1606 : vector<8x256xf32>
    %c77_211 = arith.constant 77 : index
    %1608 = memref.load %arg6[%c77_211] : memref<144xf32, #tpu.memory_space<smem>>
    %1609 = vector.broadcast %1608 : f32 to vector<8x256xf32>
    %1610 = arith.mulf %1609, %1599 : vector<8x256xf32>
    %1611 = arith.addf %1592, %1610 : vector<8x256xf32>
    %c113_212 = arith.constant 113 : index
    %1612 = memref.load %arg6[%c113_212] : memref<144xf32, #tpu.memory_space<smem>>
    %1613 = vector.broadcast %1612 : f32 to vector<8x256xf32>
    %1614 = arith.mulf %1613, %1599 : vector<8x256xf32>
    %1615 = arith.addf %1596, %1614 : vector<8x256xf32>
    %c7_i32_213 = arith.constant 7 : i32
    %1616 = tpu.dynamic_rotate %1496 by %c7_i32_213 dim 0 : vector<8x256xf32>, i32 -> vector<8x256xf32>
    %cst_214 = arith.constant 0.000000e+00 : f32
    %1617 = vector.broadcast %cst_214 : f32 to vector<8x256xf32>
    %1618 = arith.select %21, %1616, %1617 : vector<8x256xi1>, vector<8x256xf32>
    %c1_i32_215 = arith.constant 1 : i32
    %1619 = tpu.dynamic_rotate %1618 by %c1_i32_215 dim 1 : vector<8x256xf32>, i32 -> vector<8x256xf32>
    %cst_216 = arith.constant 0.000000e+00 : f32
    %1620 = vector.broadcast %cst_216 : f32 to vector<8x256xf32>
    %1621 = arith.select %23, %1619, %1620 : vector<8x256xi1>, vector<8x256xf32>
    %c6_217 = arith.constant 6 : index
    %1622 = memref.load %arg6[%c6_217] : memref<144xf32, #tpu.memory_space<smem>>
    %1623 = vector.broadcast %1622 : f32 to vector<8x256xf32>
    %1624 = arith.mulf %1623, %1621 : vector<8x256xf32>
    %1625 = arith.addf %1603, %1624 : vector<8x256xf32>
    %c42_218 = arith.constant 42 : index
    %1626 = memref.load %arg6[%c42_218] : memref<144xf32, #tpu.memory_space<smem>>
    %1627 = vector.broadcast %1626 : f32 to vector<8x256xf32>
    %1628 = arith.mulf %1627, %1621 : vector<8x256xf32>
    %1629 = arith.addf %1607, %1628 : vector<8x256xf32>
    %c78_219 = arith.constant 78 : index
    %1630 = memref.load %arg6[%c78_219] : memref<144xf32, #tpu.memory_space<smem>>
    %1631 = vector.broadcast %1630 : f32 to vector<8x256xf32>
    %1632 = arith.mulf %1631, %1621 : vector<8x256xf32>
    %1633 = arith.addf %1611, %1632 : vector<8x256xf32>
    %c114_220 = arith.constant 114 : index
    %1634 = memref.load %arg6[%c114_220] : memref<144xf32, #tpu.memory_space<smem>>
    %1635 = vector.broadcast %1634 : f32 to vector<8x256xf32>
    %1636 = arith.mulf %1635, %1621 : vector<8x256xf32>
    %1637 = arith.addf %1615, %1636 : vector<8x256xf32>
    %c7_221 = arith.constant 7 : index
    %1638 = memref.load %arg6[%c7_221] : memref<144xf32, #tpu.memory_space<smem>>
    %1639 = vector.broadcast %1638 : f32 to vector<8x256xf32>
    %1640 = arith.mulf %1639, %1618 : vector<8x256xf32>
    %1641 = arith.addf %1625, %1640 : vector<8x256xf32>
    %c43_222 = arith.constant 43 : index
    %1642 = memref.load %arg6[%c43_222] : memref<144xf32, #tpu.memory_space<smem>>
    %1643 = vector.broadcast %1642 : f32 to vector<8x256xf32>
    %1644 = arith.mulf %1643, %1618 : vector<8x256xf32>
    %1645 = arith.addf %1629, %1644 : vector<8x256xf32>
    %c79_223 = arith.constant 79 : index
    %1646 = memref.load %arg6[%c79_223] : memref<144xf32, #tpu.memory_space<smem>>
    %1647 = vector.broadcast %1646 : f32 to vector<8x256xf32>
    %1648 = arith.mulf %1647, %1618 : vector<8x256xf32>
    %1649 = arith.addf %1633, %1648 : vector<8x256xf32>
    %c115_224 = arith.constant 115 : index
    %1650 = memref.load %arg6[%c115_224] : memref<144xf32, #tpu.memory_space<smem>>
    %1651 = vector.broadcast %1650 : f32 to vector<8x256xf32>
    %1652 = arith.mulf %1651, %1618 : vector<8x256xf32>
    %1653 = arith.addf %1637, %1652 : vector<8x256xf32>
    %c255_i32_225 = arith.constant 255 : i32
    %1654 = tpu.dynamic_rotate %1618 by %c255_i32_225 dim 1 : vector<8x256xf32>, i32 -> vector<8x256xf32>
    %cst_226 = arith.constant 0.000000e+00 : f32
    %1655 = vector.broadcast %cst_226 : f32 to vector<8x256xf32>
    %1656 = arith.select %25, %1654, %1655 : vector<8x256xi1>, vector<8x256xf32>
    %c8_227 = arith.constant 8 : index
    %1657 = memref.load %arg6[%c8_227] : memref<144xf32, #tpu.memory_space<smem>>
    %1658 = vector.broadcast %1657 : f32 to vector<8x256xf32>
    %1659 = arith.mulf %1658, %1656 : vector<8x256xf32>
    %1660 = arith.addf %1641, %1659 : vector<8x256xf32>
    %c44_228 = arith.constant 44 : index
    %1661 = memref.load %arg6[%c44_228] : memref<144xf32, #tpu.memory_space<smem>>
    %1662 = vector.broadcast %1661 : f32 to vector<8x256xf32>
    %1663 = arith.mulf %1662, %1656 : vector<8x256xf32>
    %1664 = arith.addf %1645, %1663 : vector<8x256xf32>
    %c80_229 = arith.constant 80 : index
    %1665 = memref.load %arg6[%c80_229] : memref<144xf32, #tpu.memory_space<smem>>
    %1666 = vector.broadcast %1665 : f32 to vector<8x256xf32>
    %1667 = arith.mulf %1666, %1656 : vector<8x256xf32>
    %1668 = arith.addf %1649, %1667 : vector<8x256xf32>
    %c116_230 = arith.constant 116 : index
    %1669 = memref.load %arg6[%c116_230] : memref<144xf32, #tpu.memory_space<smem>>
    %1670 = vector.broadcast %1669 : f32 to vector<8x256xf32>
    %1671 = arith.mulf %1670, %1656 : vector<8x256xf32>
    %1672 = arith.addf %1653, %1671 : vector<8x256xf32>
    %c1_i32_231 = arith.constant 1 : i32
    %1673 = tpu.dynamic_rotate %1500 by %c1_i32_231 dim 0 : vector<8x256xf32>, i32 -> vector<8x256xf32>
    %cst_232 = arith.constant 0.000000e+00 : f32
    %1674 = vector.broadcast %cst_232 : f32 to vector<8x256xf32>
    %1675 = arith.select %19, %1673, %1674 : vector<8x256xi1>, vector<8x256xf32>
    %c1_i32_233 = arith.constant 1 : i32
    %1676 = tpu.dynamic_rotate %1675 by %c1_i32_233 dim 1 : vector<8x256xf32>, i32 -> vector<8x256xf32>
    %cst_234 = arith.constant 0.000000e+00 : f32
    %1677 = vector.broadcast %cst_234 : f32 to vector<8x256xf32>
    %1678 = arith.select %23, %1676, %1677 : vector<8x256xi1>, vector<8x256xf32>
    %c9_235 = arith.constant 9 : index
    %1679 = memref.load %arg6[%c9_235] : memref<144xf32, #tpu.memory_space<smem>>
    %1680 = vector.broadcast %1679 : f32 to vector<8x256xf32>
    %1681 = arith.mulf %1680, %1678 : vector<8x256xf32>
    %1682 = arith.addf %1660, %1681 : vector<8x256xf32>
    %c45_236 = arith.constant 45 : index
    %1683 = memref.load %arg6[%c45_236] : memref<144xf32, #tpu.memory_space<smem>>
    %1684 = vector.broadcast %1683 : f32 to vector<8x256xf32>
    %1685 = arith.mulf %1684, %1678 : vector<8x256xf32>
    %1686 = arith.addf %1664, %1685 : vector<8x256xf32>
    %c81_237 = arith.constant 81 : index
    %1687 = memref.load %arg6[%c81_237] : memref<144xf32, #tpu.memory_space<smem>>
    %1688 = vector.broadcast %1687 : f32 to vector<8x256xf32>
    %1689 = arith.mulf %1688, %1678 : vector<8x256xf32>
    %1690 = arith.addf %1668, %1689 : vector<8x256xf32>
    %c117_238 = arith.constant 117 : index
    %1691 = memref.load %arg6[%c117_238] : memref<144xf32, #tpu.memory_space<smem>>
    %1692 = vector.broadcast %1691 : f32 to vector<8x256xf32>
    %1693 = arith.mulf %1692, %1678 : vector<8x256xf32>
    %1694 = arith.addf %1672, %1693 : vector<8x256xf32>
    %c10_239 = arith.constant 10 : index
    %1695 = memref.load %arg6[%c10_239] : memref<144xf32, #tpu.memory_space<smem>>
    %1696 = vector.broadcast %1695 : f32 to vector<8x256xf32>
    %1697 = arith.mulf %1696, %1675 : vector<8x256xf32>
    %1698 = arith.addf %1682, %1697 : vector<8x256xf32>
    %c46_240 = arith.constant 46 : index
    %1699 = memref.load %arg6[%c46_240] : memref<144xf32, #tpu.memory_space<smem>>
    %1700 = vector.broadcast %1699 : f32 to vector<8x256xf32>
    %1701 = arith.mulf %1700, %1675 : vector<8x256xf32>
    %1702 = arith.addf %1686, %1701 : vector<8x256xf32>
    %c82_241 = arith.constant 82 : index
    %1703 = memref.load %arg6[%c82_241] : memref<144xf32, #tpu.memory_space<smem>>
    %1704 = vector.broadcast %1703 : f32 to vector<8x256xf32>
    %1705 = arith.mulf %1704, %1675 : vector<8x256xf32>
    %1706 = arith.addf %1690, %1705 : vector<8x256xf32>
    %c118_242 = arith.constant 118 : index
    %1707 = memref.load %arg6[%c118_242] : memref<144xf32, #tpu.memory_space<smem>>
    %1708 = vector.broadcast %1707 : f32 to vector<8x256xf32>
    %1709 = arith.mulf %1708, %1675 : vector<8x256xf32>
    %1710 = arith.addf %1694, %1709 : vector<8x256xf32>
    %c255_i32_243 = arith.constant 255 : i32
    %1711 = tpu.dynamic_rotate %1675 by %c255_i32_243 dim 1 : vector<8x256xf32>, i32 -> vector<8x256xf32>
    %cst_244 = arith.constant 0.000000e+00 : f32
    %1712 = vector.broadcast %cst_244 : f32 to vector<8x256xf32>
    %1713 = arith.select %25, %1711, %1712 : vector<8x256xi1>, vector<8x256xf32>
    %c11_245 = arith.constant 11 : index
    %1714 = memref.load %arg6[%c11_245] : memref<144xf32, #tpu.memory_space<smem>>
    %1715 = vector.broadcast %1714 : f32 to vector<8x256xf32>
    %1716 = arith.mulf %1715, %1713 : vector<8x256xf32>
    %1717 = arith.addf %1698, %1716 : vector<8x256xf32>
    %c47_246 = arith.constant 47 : index
    %1718 = memref.load %arg6[%c47_246] : memref<144xf32, #tpu.memory_space<smem>>
    %1719 = vector.broadcast %1718 : f32 to vector<8x256xf32>
    %1720 = arith.mulf %1719, %1713 : vector<8x256xf32>
    %1721 = arith.addf %1702, %1720 : vector<8x256xf32>
    %c83_247 = arith.constant 83 : index
    %1722 = memref.load %arg6[%c83_247] : memref<144xf32, #tpu.memory_space<smem>>
    %1723 = vector.broadcast %1722 : f32 to vector<8x256xf32>
    %1724 = arith.mulf %1723, %1713 : vector<8x256xf32>
    %1725 = arith.addf %1706, %1724 : vector<8x256xf32>
    %c119_248 = arith.constant 119 : index
    %1726 = memref.load %arg6[%c119_248] : memref<144xf32, #tpu.memory_space<smem>>
    %1727 = vector.broadcast %1726 : f32 to vector<8x256xf32>
    %1728 = arith.mulf %1727, %1713 : vector<8x256xf32>
    %1729 = arith.addf %1710, %1728 : vector<8x256xf32>
    %c1_i32_249 = arith.constant 1 : i32
    %1730 = tpu.dynamic_rotate %1500 by %c1_i32_249 dim 1 : vector<8x256xf32>, i32 -> vector<8x256xf32>
    %cst_250 = arith.constant 0.000000e+00 : f32
    %1731 = vector.broadcast %cst_250 : f32 to vector<8x256xf32>
    %1732 = arith.select %23, %1730, %1731 : vector<8x256xi1>, vector<8x256xf32>
    %c12_251 = arith.constant 12 : index
    %1733 = memref.load %arg6[%c12_251] : memref<144xf32, #tpu.memory_space<smem>>
    %1734 = vector.broadcast %1733 : f32 to vector<8x256xf32>
    %1735 = arith.mulf %1734, %1732 : vector<8x256xf32>
    %1736 = arith.addf %1717, %1735 : vector<8x256xf32>
    %c48_252 = arith.constant 48 : index
    %1737 = memref.load %arg6[%c48_252] : memref<144xf32, #tpu.memory_space<smem>>
    %1738 = vector.broadcast %1737 : f32 to vector<8x256xf32>
    %1739 = arith.mulf %1738, %1732 : vector<8x256xf32>
    %1740 = arith.addf %1721, %1739 : vector<8x256xf32>
    %c84_253 = arith.constant 84 : index
    %1741 = memref.load %arg6[%c84_253] : memref<144xf32, #tpu.memory_space<smem>>
    %1742 = vector.broadcast %1741 : f32 to vector<8x256xf32>
    %1743 = arith.mulf %1742, %1732 : vector<8x256xf32>
    %1744 = arith.addf %1725, %1743 : vector<8x256xf32>
    %c120_254 = arith.constant 120 : index
    %1745 = memref.load %arg6[%c120_254] : memref<144xf32, #tpu.memory_space<smem>>
    %1746 = vector.broadcast %1745 : f32 to vector<8x256xf32>
    %1747 = arith.mulf %1746, %1732 : vector<8x256xf32>
    %1748 = arith.addf %1729, %1747 : vector<8x256xf32>
    %c13_255 = arith.constant 13 : index
    %1749 = memref.load %arg6[%c13_255] : memref<144xf32, #tpu.memory_space<smem>>
    %1750 = vector.broadcast %1749 : f32 to vector<8x256xf32>
    %1751 = arith.mulf %1750, %1500 : vector<8x256xf32>
    %1752 = arith.addf %1736, %1751 : vector<8x256xf32>
    %c49_256 = arith.constant 49 : index
    %1753 = memref.load %arg6[%c49_256] : memref<144xf32, #tpu.memory_space<smem>>
    %1754 = vector.broadcast %1753 : f32 to vector<8x256xf32>
    %1755 = arith.mulf %1754, %1500 : vector<8x256xf32>
    %1756 = arith.addf %1740, %1755 : vector<8x256xf32>
    %c85_257 = arith.constant 85 : index
    %1757 = memref.load %arg6[%c85_257] : memref<144xf32, #tpu.memory_space<smem>>
    %1758 = vector.broadcast %1757 : f32 to vector<8x256xf32>
    %1759 = arith.mulf %1758, %1500 : vector<8x256xf32>
    %1760 = arith.addf %1744, %1759 : vector<8x256xf32>
    %c121_258 = arith.constant 121 : index
    %1761 = memref.load %arg6[%c121_258] : memref<144xf32, #tpu.memory_space<smem>>
    %1762 = vector.broadcast %1761 : f32 to vector<8x256xf32>
    %1763 = arith.mulf %1762, %1500 : vector<8x256xf32>
    %1764 = arith.addf %1748, %1763 : vector<8x256xf32>
    %c255_i32_259 = arith.constant 255 : i32
    %1765 = tpu.dynamic_rotate %1500 by %c255_i32_259 dim 1 : vector<8x256xf32>, i32 -> vector<8x256xf32>
    %cst_260 = arith.constant 0.000000e+00 : f32
    %1766 = vector.broadcast %cst_260 : f32 to vector<8x256xf32>
    %1767 = arith.select %25, %1765, %1766 : vector<8x256xi1>, vector<8x256xf32>
    %c14_261 = arith.constant 14 : index
    %1768 = memref.load %arg6[%c14_261] : memref<144xf32, #tpu.memory_space<smem>>
    %1769 = vector.broadcast %1768 : f32 to vector<8x256xf32>
    %1770 = arith.mulf %1769, %1767 : vector<8x256xf32>
    %1771 = arith.addf %1752, %1770 : vector<8x256xf32>
    %c50_262 = arith.constant 50 : index
    %1772 = memref.load %arg6[%c50_262] : memref<144xf32, #tpu.memory_space<smem>>
    %1773 = vector.broadcast %1772 : f32 to vector<8x256xf32>
    %1774 = arith.mulf %1773, %1767 : vector<8x256xf32>
    %1775 = arith.addf %1756, %1774 : vector<8x256xf32>
    %c86_263 = arith.constant 86 : index
    %1776 = memref.load %arg6[%c86_263] : memref<144xf32, #tpu.memory_space<smem>>
    %1777 = vector.broadcast %1776 : f32 to vector<8x256xf32>
    %1778 = arith.mulf %1777, %1767 : vector<8x256xf32>
    %1779 = arith.addf %1760, %1778 : vector<8x256xf32>
    %c122_264 = arith.constant 122 : index
    %1780 = memref.load %arg6[%c122_264] : memref<144xf32, #tpu.memory_space<smem>>
    %1781 = vector.broadcast %1780 : f32 to vector<8x256xf32>
    %1782 = arith.mulf %1781, %1767 : vector<8x256xf32>
    %1783 = arith.addf %1764, %1782 : vector<8x256xf32>
    %c7_i32_265 = arith.constant 7 : i32
    %1784 = tpu.dynamic_rotate %1500 by %c7_i32_265 dim 0 : vector<8x256xf32>, i32 -> vector<8x256xf32>
    %cst_266 = arith.constant 0.000000e+00 : f32
    %1785 = vector.broadcast %cst_266 : f32 to vector<8x256xf32>
    %1786 = arith.select %21, %1784, %1785 : vector<8x256xi1>, vector<8x256xf32>
    %c1_i32_267 = arith.constant 1 : i32
    %1787 = tpu.dynamic_rotate %1786 by %c1_i32_267 dim 1 : vector<8x256xf32>, i32 -> vector<8x256xf32>
    %cst_268 = arith.constant 0.000000e+00 : f32
    %1788 = vector.broadcast %cst_268 : f32 to vector<8x256xf32>
    %1789 = arith.select %23, %1787, %1788 : vector<8x256xi1>, vector<8x256xf32>
    %c15_269 = arith.constant 15 : index
    %1790 = memref.load %arg6[%c15_269] : memref<144xf32, #tpu.memory_space<smem>>
    %1791 = vector.broadcast %1790 : f32 to vector<8x256xf32>
    %1792 = arith.mulf %1791, %1789 : vector<8x256xf32>
    %1793 = arith.addf %1771, %1792 : vector<8x256xf32>
    %c51_270 = arith.constant 51 : index
    %1794 = memref.load %arg6[%c51_270] : memref<144xf32, #tpu.memory_space<smem>>
    %1795 = vector.broadcast %1794 : f32 to vector<8x256xf32>
    %1796 = arith.mulf %1795, %1789 : vector<8x256xf32>
    %1797 = arith.addf %1775, %1796 : vector<8x256xf32>
    %c87_271 = arith.constant 87 : index
    %1798 = memref.load %arg6[%c87_271] : memref<144xf32, #tpu.memory_space<smem>>
    %1799 = vector.broadcast %1798 : f32 to vector<8x256xf32>
    %1800 = arith.mulf %1799, %1789 : vector<8x256xf32>
    %1801 = arith.addf %1779, %1800 : vector<8x256xf32>
    %c123_272 = arith.constant 123 : index
    %1802 = memref.load %arg6[%c123_272] : memref<144xf32, #tpu.memory_space<smem>>
    %1803 = vector.broadcast %1802 : f32 to vector<8x256xf32>
    %1804 = arith.mulf %1803, %1789 : vector<8x256xf32>
    %1805 = arith.addf %1783, %1804 : vector<8x256xf32>
    %c16_273 = arith.constant 16 : index
    %1806 = memref.load %arg6[%c16_273] : memref<144xf32, #tpu.memory_space<smem>>
    %1807 = vector.broadcast %1806 : f32 to vector<8x256xf32>
    %1808 = arith.mulf %1807, %1786 : vector<8x256xf32>
    %1809 = arith.addf %1793, %1808 : vector<8x256xf32>
    %c52_274 = arith.constant 52 : index
    %1810 = memref.load %arg6[%c52_274] : memref<144xf32, #tpu.memory_space<smem>>
    %1811 = vector.broadcast %1810 : f32 to vector<8x256xf32>
    %1812 = arith.mulf %1811, %1786 : vector<8x256xf32>
    %1813 = arith.addf %1797, %1812 : vector<8x256xf32>
    %c88_275 = arith.constant 88 : index
    %1814 = memref.load %arg6[%c88_275] : memref<144xf32, #tpu.memory_space<smem>>
    %1815 = vector.broadcast %1814 : f32 to vector<8x256xf32>
    %1816 = arith.mulf %1815, %1786 : vector<8x256xf32>
    %1817 = arith.addf %1801, %1816 : vector<8x256xf32>
    %c124_276 = arith.constant 124 : index
    %1818 = memref.load %arg6[%c124_276] : memref<144xf32, #tpu.memory_space<smem>>
    %1819 = vector.broadcast %1818 : f32 to vector<8x256xf32>
    %1820 = arith.mulf %1819, %1786 : vector<8x256xf32>
    %1821 = arith.addf %1805, %1820 : vector<8x256xf32>
    %c255_i32_277 = arith.constant 255 : i32
    %1822 = tpu.dynamic_rotate %1786 by %c255_i32_277 dim 1 : vector<8x256xf32>, i32 -> vector<8x256xf32>
    %cst_278 = arith.constant 0.000000e+00 : f32
    %1823 = vector.broadcast %cst_278 : f32 to vector<8x256xf32>
    %1824 = arith.select %25, %1822, %1823 : vector<8x256xi1>, vector<8x256xf32>
    %c17_279 = arith.constant 17 : index
    %1825 = memref.load %arg6[%c17_279] : memref<144xf32, #tpu.memory_space<smem>>
    %1826 = vector.broadcast %1825 : f32 to vector<8x256xf32>
    %1827 = arith.mulf %1826, %1824 : vector<8x256xf32>
    %1828 = arith.addf %1809, %1827 : vector<8x256xf32>
    %c53_280 = arith.constant 53 : index
    %1829 = memref.load %arg6[%c53_280] : memref<144xf32, #tpu.memory_space<smem>>
    %1830 = vector.broadcast %1829 : f32 to vector<8x256xf32>
    %1831 = arith.mulf %1830, %1824 : vector<8x256xf32>
    %1832 = arith.addf %1813, %1831 : vector<8x256xf32>
    %c89_281 = arith.constant 89 : index
    %1833 = memref.load %arg6[%c89_281] : memref<144xf32, #tpu.memory_space<smem>>
    %1834 = vector.broadcast %1833 : f32 to vector<8x256xf32>
    %1835 = arith.mulf %1834, %1824 : vector<8x256xf32>
    %1836 = arith.addf %1817, %1835 : vector<8x256xf32>
    %c125_282 = arith.constant 125 : index
    %1837 = memref.load %arg6[%c125_282] : memref<144xf32, #tpu.memory_space<smem>>
    %1838 = vector.broadcast %1837 : f32 to vector<8x256xf32>
    %1839 = arith.mulf %1838, %1824 : vector<8x256xf32>
    %1840 = arith.addf %1821, %1839 : vector<8x256xf32>
    %c1_i32_283 = arith.constant 1 : i32
    %1841 = tpu.dynamic_rotate %1504 by %c1_i32_283 dim 0 : vector<8x256xf32>, i32 -> vector<8x256xf32>
    %cst_284 = arith.constant 0.000000e+00 : f32
    %1842 = vector.broadcast %cst_284 : f32 to vector<8x256xf32>
    %1843 = arith.select %19, %1841, %1842 : vector<8x256xi1>, vector<8x256xf32>
    %c1_i32_285 = arith.constant 1 : i32
    %1844 = tpu.dynamic_rotate %1843 by %c1_i32_285 dim 1 : vector<8x256xf32>, i32 -> vector<8x256xf32>
    %cst_286 = arith.constant 0.000000e+00 : f32
    %1845 = vector.broadcast %cst_286 : f32 to vector<8x256xf32>
    %1846 = arith.select %23, %1844, %1845 : vector<8x256xi1>, vector<8x256xf32>
    %c18_287 = arith.constant 18 : index
    %1847 = memref.load %arg6[%c18_287] : memref<144xf32, #tpu.memory_space<smem>>
    %1848 = vector.broadcast %1847 : f32 to vector<8x256xf32>
    %1849 = arith.mulf %1848, %1846 : vector<8x256xf32>
    %1850 = arith.addf %1828, %1849 : vector<8x256xf32>
    %c54_288 = arith.constant 54 : index
    %1851 = memref.load %arg6[%c54_288] : memref<144xf32, #tpu.memory_space<smem>>
    %1852 = vector.broadcast %1851 : f32 to vector<8x256xf32>
    %1853 = arith.mulf %1852, %1846 : vector<8x256xf32>
    %1854 = arith.addf %1832, %1853 : vector<8x256xf32>
    %c90_289 = arith.constant 90 : index
    %1855 = memref.load %arg6[%c90_289] : memref<144xf32, #tpu.memory_space<smem>>
    %1856 = vector.broadcast %1855 : f32 to vector<8x256xf32>
    %1857 = arith.mulf %1856, %1846 : vector<8x256xf32>
    %1858 = arith.addf %1836, %1857 : vector<8x256xf32>
    %c126_290 = arith.constant 126 : index
    %1859 = memref.load %arg6[%c126_290] : memref<144xf32, #tpu.memory_space<smem>>
    %1860 = vector.broadcast %1859 : f32 to vector<8x256xf32>
    %1861 = arith.mulf %1860, %1846 : vector<8x256xf32>
    %1862 = arith.addf %1840, %1861 : vector<8x256xf32>
    %c19_291 = arith.constant 19 : index
    %1863 = memref.load %arg6[%c19_291] : memref<144xf32, #tpu.memory_space<smem>>
    %1864 = vector.broadcast %1863 : f32 to vector<8x256xf32>
    %1865 = arith.mulf %1864, %1843 : vector<8x256xf32>
    %1866 = arith.addf %1850, %1865 : vector<8x256xf32>
    %c55_292 = arith.constant 55 : index
    %1867 = memref.load %arg6[%c55_292] : memref<144xf32, #tpu.memory_space<smem>>
    %1868 = vector.broadcast %1867 : f32 to vector<8x256xf32>
    %1869 = arith.mulf %1868, %1843 : vector<8x256xf32>
    %1870 = arith.addf %1854, %1869 : vector<8x256xf32>
    %c91_293 = arith.constant 91 : index
    %1871 = memref.load %arg6[%c91_293] : memref<144xf32, #tpu.memory_space<smem>>
    %1872 = vector.broadcast %1871 : f32 to vector<8x256xf32>
    %1873 = arith.mulf %1872, %1843 : vector<8x256xf32>
    %1874 = arith.addf %1858, %1873 : vector<8x256xf32>
    %c127_294 = arith.constant 127 : index
    %1875 = memref.load %arg6[%c127_294] : memref<144xf32, #tpu.memory_space<smem>>
    %1876 = vector.broadcast %1875 : f32 to vector<8x256xf32>
    %1877 = arith.mulf %1876, %1843 : vector<8x256xf32>
    %1878 = arith.addf %1862, %1877 : vector<8x256xf32>
    %c255_i32_295 = arith.constant 255 : i32
    %1879 = tpu.dynamic_rotate %1843 by %c255_i32_295 dim 1 : vector<8x256xf32>, i32 -> vector<8x256xf32>
    %cst_296 = arith.constant 0.000000e+00 : f32
    %1880 = vector.broadcast %cst_296 : f32 to vector<8x256xf32>
    %1881 = arith.select %25, %1879, %1880 : vector<8x256xi1>, vector<8x256xf32>
    %c20_297 = arith.constant 20 : index
    %1882 = memref.load %arg6[%c20_297] : memref<144xf32, #tpu.memory_space<smem>>
    %1883 = vector.broadcast %1882 : f32 to vector<8x256xf32>
    %1884 = arith.mulf %1883, %1881 : vector<8x256xf32>
    %1885 = arith.addf %1866, %1884 : vector<8x256xf32>
    %c56_298 = arith.constant 56 : index
    %1886 = memref.load %arg6[%c56_298] : memref<144xf32, #tpu.memory_space<smem>>
    %1887 = vector.broadcast %1886 : f32 to vector<8x256xf32>
    %1888 = arith.mulf %1887, %1881 : vector<8x256xf32>
    %1889 = arith.addf %1870, %1888 : vector<8x256xf32>
    %c92_299 = arith.constant 92 : index
    %1890 = memref.load %arg6[%c92_299] : memref<144xf32, #tpu.memory_space<smem>>
    %1891 = vector.broadcast %1890 : f32 to vector<8x256xf32>
    %1892 = arith.mulf %1891, %1881 : vector<8x256xf32>
    %1893 = arith.addf %1874, %1892 : vector<8x256xf32>
    %c128_300 = arith.constant 128 : index
    %1894 = memref.load %arg6[%c128_300] : memref<144xf32, #tpu.memory_space<smem>>
    %1895 = vector.broadcast %1894 : f32 to vector<8x256xf32>
    %1896 = arith.mulf %1895, %1881 : vector<8x256xf32>
    %1897 = arith.addf %1878, %1896 : vector<8x256xf32>
    %c1_i32_301 = arith.constant 1 : i32
    %1898 = tpu.dynamic_rotate %1504 by %c1_i32_301 dim 1 : vector<8x256xf32>, i32 -> vector<8x256xf32>
    %cst_302 = arith.constant 0.000000e+00 : f32
    %1899 = vector.broadcast %cst_302 : f32 to vector<8x256xf32>
    %1900 = arith.select %23, %1898, %1899 : vector<8x256xi1>, vector<8x256xf32>
    %c21_303 = arith.constant 21 : index
    %1901 = memref.load %arg6[%c21_303] : memref<144xf32, #tpu.memory_space<smem>>
    %1902 = vector.broadcast %1901 : f32 to vector<8x256xf32>
    %1903 = arith.mulf %1902, %1900 : vector<8x256xf32>
    %1904 = arith.addf %1885, %1903 : vector<8x256xf32>
    %c57_304 = arith.constant 57 : index
    %1905 = memref.load %arg6[%c57_304] : memref<144xf32, #tpu.memory_space<smem>>
    %1906 = vector.broadcast %1905 : f32 to vector<8x256xf32>
    %1907 = arith.mulf %1906, %1900 : vector<8x256xf32>
    %1908 = arith.addf %1889, %1907 : vector<8x256xf32>
    %c93_305 = arith.constant 93 : index
    %1909 = memref.load %arg6[%c93_305] : memref<144xf32, #tpu.memory_space<smem>>
    %1910 = vector.broadcast %1909 : f32 to vector<8x256xf32>
    %1911 = arith.mulf %1910, %1900 : vector<8x256xf32>
    %1912 = arith.addf %1893, %1911 : vector<8x256xf32>
    %c129_306 = arith.constant 129 : index
    %1913 = memref.load %arg6[%c129_306] : memref<144xf32, #tpu.memory_space<smem>>
    %1914 = vector.broadcast %1913 : f32 to vector<8x256xf32>
    %1915 = arith.mulf %1914, %1900 : vector<8x256xf32>
    %1916 = arith.addf %1897, %1915 : vector<8x256xf32>
    %c22_307 = arith.constant 22 : index
    %1917 = memref.load %arg6[%c22_307] : memref<144xf32, #tpu.memory_space<smem>>
    %1918 = vector.broadcast %1917 : f32 to vector<8x256xf32>
    %1919 = arith.mulf %1918, %1504 : vector<8x256xf32>
    %1920 = arith.addf %1904, %1919 : vector<8x256xf32>
    %c58_308 = arith.constant 58 : index
    %1921 = memref.load %arg6[%c58_308] : memref<144xf32, #tpu.memory_space<smem>>
    %1922 = vector.broadcast %1921 : f32 to vector<8x256xf32>
    %1923 = arith.mulf %1922, %1504 : vector<8x256xf32>
    %1924 = arith.addf %1908, %1923 : vector<8x256xf32>
    %c94_309 = arith.constant 94 : index
    %1925 = memref.load %arg6[%c94_309] : memref<144xf32, #tpu.memory_space<smem>>
    %1926 = vector.broadcast %1925 : f32 to vector<8x256xf32>
    %1927 = arith.mulf %1926, %1504 : vector<8x256xf32>
    %1928 = arith.addf %1912, %1927 : vector<8x256xf32>
    %c130_310 = arith.constant 130 : index
    %1929 = memref.load %arg6[%c130_310] : memref<144xf32, #tpu.memory_space<smem>>
    %1930 = vector.broadcast %1929 : f32 to vector<8x256xf32>
    %1931 = arith.mulf %1930, %1504 : vector<8x256xf32>
    %1932 = arith.addf %1916, %1931 : vector<8x256xf32>
    %c255_i32_311 = arith.constant 255 : i32
    %1933 = tpu.dynamic_rotate %1504 by %c255_i32_311 dim 1 : vector<8x256xf32>, i32 -> vector<8x256xf32>
    %cst_312 = arith.constant 0.000000e+00 : f32
    %1934 = vector.broadcast %cst_312 : f32 to vector<8x256xf32>
    %1935 = arith.select %25, %1933, %1934 : vector<8x256xi1>, vector<8x256xf32>
    %c23_313 = arith.constant 23 : index
    %1936 = memref.load %arg6[%c23_313] : memref<144xf32, #tpu.memory_space<smem>>
    %1937 = vector.broadcast %1936 : f32 to vector<8x256xf32>
    %1938 = arith.mulf %1937, %1935 : vector<8x256xf32>
    %1939 = arith.addf %1920, %1938 : vector<8x256xf32>
    %c59_314 = arith.constant 59 : index
    %1940 = memref.load %arg6[%c59_314] : memref<144xf32, #tpu.memory_space<smem>>
    %1941 = vector.broadcast %1940 : f32 to vector<8x256xf32>
    %1942 = arith.mulf %1941, %1935 : vector<8x256xf32>
    %1943 = arith.addf %1924, %1942 : vector<8x256xf32>
    %c95_315 = arith.constant 95 : index
    %1944 = memref.load %arg6[%c95_315] : memref<144xf32, #tpu.memory_space<smem>>
    %1945 = vector.broadcast %1944 : f32 to vector<8x256xf32>
    %1946 = arith.mulf %1945, %1935 : vector<8x256xf32>
    %1947 = arith.addf %1928, %1946 : vector<8x256xf32>
    %c131_316 = arith.constant 131 : index
    %1948 = memref.load %arg6[%c131_316] : memref<144xf32, #tpu.memory_space<smem>>
    %1949 = vector.broadcast %1948 : f32 to vector<8x256xf32>
    %1950 = arith.mulf %1949, %1935 : vector<8x256xf32>
    %1951 = arith.addf %1932, %1950 : vector<8x256xf32>
    %c7_i32_317 = arith.constant 7 : i32
    %1952 = tpu.dynamic_rotate %1504 by %c7_i32_317 dim 0 : vector<8x256xf32>, i32 -> vector<8x256xf32>
    %cst_318 = arith.constant 0.000000e+00 : f32
    %1953 = vector.broadcast %cst_318 : f32 to vector<8x256xf32>
    %1954 = arith.select %21, %1952, %1953 : vector<8x256xi1>, vector<8x256xf32>
    %c1_i32_319 = arith.constant 1 : i32
    %1955 = tpu.dynamic_rotate %1954 by %c1_i32_319 dim 1 : vector<8x256xf32>, i32 -> vector<8x256xf32>
    %cst_320 = arith.constant 0.000000e+00 : f32
    %1956 = vector.broadcast %cst_320 : f32 to vector<8x256xf32>
    %1957 = arith.select %23, %1955, %1956 : vector<8x256xi1>, vector<8x256xf32>
    %c24_321 = arith.constant 24 : index
    %1958 = memref.load %arg6[%c24_321] : memref<144xf32, #tpu.memory_space<smem>>
    %1959 = vector.broadcast %1958 : f32 to vector<8x256xf32>
    %1960 = arith.mulf %1959, %1957 : vector<8x256xf32>
    %1961 = arith.addf %1939, %1960 : vector<8x256xf32>
    %c60_322 = arith.constant 60 : index
    %1962 = memref.load %arg6[%c60_322] : memref<144xf32, #tpu.memory_space<smem>>
    %1963 = vector.broadcast %1962 : f32 to vector<8x256xf32>
    %1964 = arith.mulf %1963, %1957 : vector<8x256xf32>
    %1965 = arith.addf %1943, %1964 : vector<8x256xf32>
    %c96_323 = arith.constant 96 : index
    %1966 = memref.load %arg6[%c96_323] : memref<144xf32, #tpu.memory_space<smem>>
    %1967 = vector.broadcast %1966 : f32 to vector<8x256xf32>
    %1968 = arith.mulf %1967, %1957 : vector<8x256xf32>
    %1969 = arith.addf %1947, %1968 : vector<8x256xf32>
    %c132_324 = arith.constant 132 : index
    %1970 = memref.load %arg6[%c132_324] : memref<144xf32, #tpu.memory_space<smem>>
    %1971 = vector.broadcast %1970 : f32 to vector<8x256xf32>
    %1972 = arith.mulf %1971, %1957 : vector<8x256xf32>
    %1973 = arith.addf %1951, %1972 : vector<8x256xf32>
    %c25_325 = arith.constant 25 : index
    %1974 = memref.load %arg6[%c25_325] : memref<144xf32, #tpu.memory_space<smem>>
    %1975 = vector.broadcast %1974 : f32 to vector<8x256xf32>
    %1976 = arith.mulf %1975, %1954 : vector<8x256xf32>
    %1977 = arith.addf %1961, %1976 : vector<8x256xf32>
    %c61_326 = arith.constant 61 : index
    %1978 = memref.load %arg6[%c61_326] : memref<144xf32, #tpu.memory_space<smem>>
    %1979 = vector.broadcast %1978 : f32 to vector<8x256xf32>
    %1980 = arith.mulf %1979, %1954 : vector<8x256xf32>
    %1981 = arith.addf %1965, %1980 : vector<8x256xf32>
    %c97_327 = arith.constant 97 : index
    %1982 = memref.load %arg6[%c97_327] : memref<144xf32, #tpu.memory_space<smem>>
    %1983 = vector.broadcast %1982 : f32 to vector<8x256xf32>
    %1984 = arith.mulf %1983, %1954 : vector<8x256xf32>
    %1985 = arith.addf %1969, %1984 : vector<8x256xf32>
    %c133_328 = arith.constant 133 : index
    %1986 = memref.load %arg6[%c133_328] : memref<144xf32, #tpu.memory_space<smem>>
    %1987 = vector.broadcast %1986 : f32 to vector<8x256xf32>
    %1988 = arith.mulf %1987, %1954 : vector<8x256xf32>
    %1989 = arith.addf %1973, %1988 : vector<8x256xf32>
    %c255_i32_329 = arith.constant 255 : i32
    %1990 = tpu.dynamic_rotate %1954 by %c255_i32_329 dim 1 : vector<8x256xf32>, i32 -> vector<8x256xf32>
    %cst_330 = arith.constant 0.000000e+00 : f32
    %1991 = vector.broadcast %cst_330 : f32 to vector<8x256xf32>
    %1992 = arith.select %25, %1990, %1991 : vector<8x256xi1>, vector<8x256xf32>
    %c26_331 = arith.constant 26 : index
    %1993 = memref.load %arg6[%c26_331] : memref<144xf32, #tpu.memory_space<smem>>
    %1994 = vector.broadcast %1993 : f32 to vector<8x256xf32>
    %1995 = arith.mulf %1994, %1992 : vector<8x256xf32>
    %1996 = arith.addf %1977, %1995 : vector<8x256xf32>
    %c62_332 = arith.constant 62 : index
    %1997 = memref.load %arg6[%c62_332] : memref<144xf32, #tpu.memory_space<smem>>
    %1998 = vector.broadcast %1997 : f32 to vector<8x256xf32>
    %1999 = arith.mulf %1998, %1992 : vector<8x256xf32>
    %2000 = arith.addf %1981, %1999 : vector<8x256xf32>
    %c98_333 = arith.constant 98 : index
    %2001 = memref.load %arg6[%c98_333] : memref<144xf32, #tpu.memory_space<smem>>
    %2002 = vector.broadcast %2001 : f32 to vector<8x256xf32>
    %2003 = arith.mulf %2002, %1992 : vector<8x256xf32>
    %2004 = arith.addf %1985, %2003 : vector<8x256xf32>
    %c134_334 = arith.constant 134 : index
    %2005 = memref.load %arg6[%c134_334] : memref<144xf32, #tpu.memory_space<smem>>
    %2006 = vector.broadcast %2005 : f32 to vector<8x256xf32>
    %2007 = arith.mulf %2006, %1992 : vector<8x256xf32>
    %2008 = arith.addf %1989, %2007 : vector<8x256xf32>
    %c1_i32_335 = arith.constant 1 : i32
    %2009 = tpu.dynamic_rotate %1508 by %c1_i32_335 dim 0 : vector<8x256xf32>, i32 -> vector<8x256xf32>
    %cst_336 = arith.constant 0.000000e+00 : f32
    %2010 = vector.broadcast %cst_336 : f32 to vector<8x256xf32>
    %2011 = arith.select %19, %2009, %2010 : vector<8x256xi1>, vector<8x256xf32>
    %c1_i32_337 = arith.constant 1 : i32
    %2012 = tpu.dynamic_rotate %2011 by %c1_i32_337 dim 1 : vector<8x256xf32>, i32 -> vector<8x256xf32>
    %cst_338 = arith.constant 0.000000e+00 : f32
    %2013 = vector.broadcast %cst_338 : f32 to vector<8x256xf32>
    %2014 = arith.select %23, %2012, %2013 : vector<8x256xi1>, vector<8x256xf32>
    %c27_339 = arith.constant 27 : index
    %2015 = memref.load %arg6[%c27_339] : memref<144xf32, #tpu.memory_space<smem>>
    %2016 = vector.broadcast %2015 : f32 to vector<8x256xf32>
    %2017 = arith.mulf %2016, %2014 : vector<8x256xf32>
    %2018 = arith.addf %1996, %2017 : vector<8x256xf32>
    %c63_340 = arith.constant 63 : index
    %2019 = memref.load %arg6[%c63_340] : memref<144xf32, #tpu.memory_space<smem>>
    %2020 = vector.broadcast %2019 : f32 to vector<8x256xf32>
    %2021 = arith.mulf %2020, %2014 : vector<8x256xf32>
    %2022 = arith.addf %2000, %2021 : vector<8x256xf32>
    %c99_341 = arith.constant 99 : index
    %2023 = memref.load %arg6[%c99_341] : memref<144xf32, #tpu.memory_space<smem>>
    %2024 = vector.broadcast %2023 : f32 to vector<8x256xf32>
    %2025 = arith.mulf %2024, %2014 : vector<8x256xf32>
    %2026 = arith.addf %2004, %2025 : vector<8x256xf32>
    %c135_342 = arith.constant 135 : index
    %2027 = memref.load %arg6[%c135_342] : memref<144xf32, #tpu.memory_space<smem>>
    %2028 = vector.broadcast %2027 : f32 to vector<8x256xf32>
    %2029 = arith.mulf %2028, %2014 : vector<8x256xf32>
    %2030 = arith.addf %2008, %2029 : vector<8x256xf32>
    %c28_343 = arith.constant 28 : index
    %2031 = memref.load %arg6[%c28_343] : memref<144xf32, #tpu.memory_space<smem>>
    %2032 = vector.broadcast %2031 : f32 to vector<8x256xf32>
    %2033 = arith.mulf %2032, %2011 : vector<8x256xf32>
    %2034 = arith.addf %2018, %2033 : vector<8x256xf32>
    %c64_344 = arith.constant 64 : index
    %2035 = memref.load %arg6[%c64_344] : memref<144xf32, #tpu.memory_space<smem>>
    %2036 = vector.broadcast %2035 : f32 to vector<8x256xf32>
    %2037 = arith.mulf %2036, %2011 : vector<8x256xf32>
    %2038 = arith.addf %2022, %2037 : vector<8x256xf32>
    %c100_345 = arith.constant 100 : index
    %2039 = memref.load %arg6[%c100_345] : memref<144xf32, #tpu.memory_space<smem>>
    %2040 = vector.broadcast %2039 : f32 to vector<8x256xf32>
    %2041 = arith.mulf %2040, %2011 : vector<8x256xf32>
    %2042 = arith.addf %2026, %2041 : vector<8x256xf32>
    %c136_346 = arith.constant 136 : index
    %2043 = memref.load %arg6[%c136_346] : memref<144xf32, #tpu.memory_space<smem>>
    %2044 = vector.broadcast %2043 : f32 to vector<8x256xf32>
    %2045 = arith.mulf %2044, %2011 : vector<8x256xf32>
    %2046 = arith.addf %2030, %2045 : vector<8x256xf32>
    %c255_i32_347 = arith.constant 255 : i32
    %2047 = tpu.dynamic_rotate %2011 by %c255_i32_347 dim 1 : vector<8x256xf32>, i32 -> vector<8x256xf32>
    %cst_348 = arith.constant 0.000000e+00 : f32
    %2048 = vector.broadcast %cst_348 : f32 to vector<8x256xf32>
    %2049 = arith.select %25, %2047, %2048 : vector<8x256xi1>, vector<8x256xf32>
    %c29_349 = arith.constant 29 : index
    %2050 = memref.load %arg6[%c29_349] : memref<144xf32, #tpu.memory_space<smem>>
    %2051 = vector.broadcast %2050 : f32 to vector<8x256xf32>
    %2052 = arith.mulf %2051, %2049 : vector<8x256xf32>
    %2053 = arith.addf %2034, %2052 : vector<8x256xf32>
    %c65_350 = arith.constant 65 : index
    %2054 = memref.load %arg6[%c65_350] : memref<144xf32, #tpu.memory_space<smem>>
    %2055 = vector.broadcast %2054 : f32 to vector<8x256xf32>
    %2056 = arith.mulf %2055, %2049 : vector<8x256xf32>
    %2057 = arith.addf %2038, %2056 : vector<8x256xf32>
    %c101_351 = arith.constant 101 : index
    %2058 = memref.load %arg6[%c101_351] : memref<144xf32, #tpu.memory_space<smem>>
    %2059 = vector.broadcast %2058 : f32 to vector<8x256xf32>
    %2060 = arith.mulf %2059, %2049 : vector<8x256xf32>
    %2061 = arith.addf %2042, %2060 : vector<8x256xf32>
    %c137_352 = arith.constant 137 : index
    %2062 = memref.load %arg6[%c137_352] : memref<144xf32, #tpu.memory_space<smem>>
    %2063 = vector.broadcast %2062 : f32 to vector<8x256xf32>
    %2064 = arith.mulf %2063, %2049 : vector<8x256xf32>
    %2065 = arith.addf %2046, %2064 : vector<8x256xf32>
    %c1_i32_353 = arith.constant 1 : i32
    %2066 = tpu.dynamic_rotate %1508 by %c1_i32_353 dim 1 : vector<8x256xf32>, i32 -> vector<8x256xf32>
    %cst_354 = arith.constant 0.000000e+00 : f32
    %2067 = vector.broadcast %cst_354 : f32 to vector<8x256xf32>
    %2068 = arith.select %23, %2066, %2067 : vector<8x256xi1>, vector<8x256xf32>
    %c30_355 = arith.constant 30 : index
    %2069 = memref.load %arg6[%c30_355] : memref<144xf32, #tpu.memory_space<smem>>
    %2070 = vector.broadcast %2069 : f32 to vector<8x256xf32>
    %2071 = arith.mulf %2070, %2068 : vector<8x256xf32>
    %2072 = arith.addf %2053, %2071 : vector<8x256xf32>
    %c66_356 = arith.constant 66 : index
    %2073 = memref.load %arg6[%c66_356] : memref<144xf32, #tpu.memory_space<smem>>
    %2074 = vector.broadcast %2073 : f32 to vector<8x256xf32>
    %2075 = arith.mulf %2074, %2068 : vector<8x256xf32>
    %2076 = arith.addf %2057, %2075 : vector<8x256xf32>
    %c102_357 = arith.constant 102 : index
    %2077 = memref.load %arg6[%c102_357] : memref<144xf32, #tpu.memory_space<smem>>
    %2078 = vector.broadcast %2077 : f32 to vector<8x256xf32>
    %2079 = arith.mulf %2078, %2068 : vector<8x256xf32>
    %2080 = arith.addf %2061, %2079 : vector<8x256xf32>
    %c138_358 = arith.constant 138 : index
    %2081 = memref.load %arg6[%c138_358] : memref<144xf32, #tpu.memory_space<smem>>
    %2082 = vector.broadcast %2081 : f32 to vector<8x256xf32>
    %2083 = arith.mulf %2082, %2068 : vector<8x256xf32>
    %2084 = arith.addf %2065, %2083 : vector<8x256xf32>
    %c31_359 = arith.constant 31 : index
    %2085 = memref.load %arg6[%c31_359] : memref<144xf32, #tpu.memory_space<smem>>
    %2086 = vector.broadcast %2085 : f32 to vector<8x256xf32>
    %2087 = arith.mulf %2086, %1508 : vector<8x256xf32>
    %2088 = arith.addf %2072, %2087 : vector<8x256xf32>
    %c67_360 = arith.constant 67 : index
    %2089 = memref.load %arg6[%c67_360] : memref<144xf32, #tpu.memory_space<smem>>
    %2090 = vector.broadcast %2089 : f32 to vector<8x256xf32>
    %2091 = arith.mulf %2090, %1508 : vector<8x256xf32>
    %2092 = arith.addf %2076, %2091 : vector<8x256xf32>
    %c103_361 = arith.constant 103 : index
    %2093 = memref.load %arg6[%c103_361] : memref<144xf32, #tpu.memory_space<smem>>
    %2094 = vector.broadcast %2093 : f32 to vector<8x256xf32>
    %2095 = arith.mulf %2094, %1508 : vector<8x256xf32>
    %2096 = arith.addf %2080, %2095 : vector<8x256xf32>
    %c139_362 = arith.constant 139 : index
    %2097 = memref.load %arg6[%c139_362] : memref<144xf32, #tpu.memory_space<smem>>
    %2098 = vector.broadcast %2097 : f32 to vector<8x256xf32>
    %2099 = arith.mulf %2098, %1508 : vector<8x256xf32>
    %2100 = arith.addf %2084, %2099 : vector<8x256xf32>
    %c255_i32_363 = arith.constant 255 : i32
    %2101 = tpu.dynamic_rotate %1508 by %c255_i32_363 dim 1 : vector<8x256xf32>, i32 -> vector<8x256xf32>
    %cst_364 = arith.constant 0.000000e+00 : f32
    %2102 = vector.broadcast %cst_364 : f32 to vector<8x256xf32>
    %2103 = arith.select %25, %2101, %2102 : vector<8x256xi1>, vector<8x256xf32>
    %c32_365 = arith.constant 32 : index
    %2104 = memref.load %arg6[%c32_365] : memref<144xf32, #tpu.memory_space<smem>>
    %2105 = vector.broadcast %2104 : f32 to vector<8x256xf32>
    %2106 = arith.mulf %2105, %2103 : vector<8x256xf32>
    %2107 = arith.addf %2088, %2106 : vector<8x256xf32>
    %c68_366 = arith.constant 68 : index
    %2108 = memref.load %arg6[%c68_366] : memref<144xf32, #tpu.memory_space<smem>>
    %2109 = vector.broadcast %2108 : f32 to vector<8x256xf32>
    %2110 = arith.mulf %2109, %2103 : vector<8x256xf32>
    %2111 = arith.addf %2092, %2110 : vector<8x256xf32>
    %c104_367 = arith.constant 104 : index
    %2112 = memref.load %arg6[%c104_367] : memref<144xf32, #tpu.memory_space<smem>>
    %2113 = vector.broadcast %2112 : f32 to vector<8x256xf32>
    %2114 = arith.mulf %2113, %2103 : vector<8x256xf32>
    %2115 = arith.addf %2096, %2114 : vector<8x256xf32>
    %c140_368 = arith.constant 140 : index
    %2116 = memref.load %arg6[%c140_368] : memref<144xf32, #tpu.memory_space<smem>>
    %2117 = vector.broadcast %2116 : f32 to vector<8x256xf32>
    %2118 = arith.mulf %2117, %2103 : vector<8x256xf32>
    %2119 = arith.addf %2100, %2118 : vector<8x256xf32>
    %c7_i32_369 = arith.constant 7 : i32
    %2120 = tpu.dynamic_rotate %1508 by %c7_i32_369 dim 0 : vector<8x256xf32>, i32 -> vector<8x256xf32>
    %cst_370 = arith.constant 0.000000e+00 : f32
    %2121 = vector.broadcast %cst_370 : f32 to vector<8x256xf32>
    %2122 = arith.select %21, %2120, %2121 : vector<8x256xi1>, vector<8x256xf32>
    %c1_i32_371 = arith.constant 1 : i32
    %2123 = tpu.dynamic_rotate %2122 by %c1_i32_371 dim 1 : vector<8x256xf32>, i32 -> vector<8x256xf32>
    %cst_372 = arith.constant 0.000000e+00 : f32
    %2124 = vector.broadcast %cst_372 : f32 to vector<8x256xf32>
    %2125 = arith.select %23, %2123, %2124 : vector<8x256xi1>, vector<8x256xf32>
    %c33_373 = arith.constant 33 : index
    %2126 = memref.load %arg6[%c33_373] : memref<144xf32, #tpu.memory_space<smem>>
    %2127 = vector.broadcast %2126 : f32 to vector<8x256xf32>
    %2128 = arith.mulf %2127, %2125 : vector<8x256xf32>
    %2129 = arith.addf %2107, %2128 : vector<8x256xf32>
    %c69_374 = arith.constant 69 : index
    %2130 = memref.load %arg6[%c69_374] : memref<144xf32, #tpu.memory_space<smem>>
    %2131 = vector.broadcast %2130 : f32 to vector<8x256xf32>
    %2132 = arith.mulf %2131, %2125 : vector<8x256xf32>
    %2133 = arith.addf %2111, %2132 : vector<8x256xf32>
    %c105_375 = arith.constant 105 : index
    %2134 = memref.load %arg6[%c105_375] : memref<144xf32, #tpu.memory_space<smem>>
    %2135 = vector.broadcast %2134 : f32 to vector<8x256xf32>
    %2136 = arith.mulf %2135, %2125 : vector<8x256xf32>
    %2137 = arith.addf %2115, %2136 : vector<8x256xf32>
    %c141_376 = arith.constant 141 : index
    %2138 = memref.load %arg6[%c141_376] : memref<144xf32, #tpu.memory_space<smem>>
    %2139 = vector.broadcast %2138 : f32 to vector<8x256xf32>
    %2140 = arith.mulf %2139, %2125 : vector<8x256xf32>
    %2141 = arith.addf %2119, %2140 : vector<8x256xf32>
    %c34_377 = arith.constant 34 : index
    %2142 = memref.load %arg6[%c34_377] : memref<144xf32, #tpu.memory_space<smem>>
    %2143 = vector.broadcast %2142 : f32 to vector<8x256xf32>
    %2144 = arith.mulf %2143, %2122 : vector<8x256xf32>
    %2145 = arith.addf %2129, %2144 : vector<8x256xf32>
    %c70_378 = arith.constant 70 : index
    %2146 = memref.load %arg6[%c70_378] : memref<144xf32, #tpu.memory_space<smem>>
    %2147 = vector.broadcast %2146 : f32 to vector<8x256xf32>
    %2148 = arith.mulf %2147, %2122 : vector<8x256xf32>
    %2149 = arith.addf %2133, %2148 : vector<8x256xf32>
    %c106_379 = arith.constant 106 : index
    %2150 = memref.load %arg6[%c106_379] : memref<144xf32, #tpu.memory_space<smem>>
    %2151 = vector.broadcast %2150 : f32 to vector<8x256xf32>
    %2152 = arith.mulf %2151, %2122 : vector<8x256xf32>
    %2153 = arith.addf %2137, %2152 : vector<8x256xf32>
    %c142_380 = arith.constant 142 : index
    %2154 = memref.load %arg6[%c142_380] : memref<144xf32, #tpu.memory_space<smem>>
    %2155 = vector.broadcast %2154 : f32 to vector<8x256xf32>
    %2156 = arith.mulf %2155, %2122 : vector<8x256xf32>
    %2157 = arith.addf %2141, %2156 : vector<8x256xf32>
    %c255_i32_381 = arith.constant 255 : i32
    %2158 = tpu.dynamic_rotate %2122 by %c255_i32_381 dim 1 : vector<8x256xf32>, i32 -> vector<8x256xf32>
    %cst_382 = arith.constant 0.000000e+00 : f32
    %2159 = vector.broadcast %cst_382 : f32 to vector<8x256xf32>
    %2160 = arith.select %25, %2158, %2159 : vector<8x256xi1>, vector<8x256xf32>
    %c35_383 = arith.constant 35 : index
    %2161 = memref.load %arg6[%c35_383] : memref<144xf32, #tpu.memory_space<smem>>
    %2162 = vector.broadcast %2161 : f32 to vector<8x256xf32>
    %2163 = arith.mulf %2162, %2160 : vector<8x256xf32>
    %2164 = arith.addf %2145, %2163 : vector<8x256xf32>
    %c71_384 = arith.constant 71 : index
    %2165 = memref.load %arg6[%c71_384] : memref<144xf32, #tpu.memory_space<smem>>
    %2166 = vector.broadcast %2165 : f32 to vector<8x256xf32>
    %2167 = arith.mulf %2166, %2160 : vector<8x256xf32>
    %2168 = arith.addf %2149, %2167 : vector<8x256xf32>
    %c107_385 = arith.constant 107 : index
    %2169 = memref.load %arg6[%c107_385] : memref<144xf32, #tpu.memory_space<smem>>
    %2170 = vector.broadcast %2169 : f32 to vector<8x256xf32>
    %2171 = arith.mulf %2170, %2160 : vector<8x256xf32>
    %2172 = arith.addf %2153, %2171 : vector<8x256xf32>
    %c143_386 = arith.constant 143 : index
    %2173 = memref.load %arg6[%c143_386] : memref<144xf32, #tpu.memory_space<smem>>
    %2174 = vector.broadcast %2173 : f32 to vector<8x256xf32>
    %2175 = arith.mulf %2174, %2160 : vector<8x256xf32>
    %2176 = arith.addf %2157, %2175 : vector<8x256xf32>
    %c0_387 = arith.constant 0 : index
    %2177 = memref.load %arg7[%c0_387] : memref<4xf32, #tpu.memory_space<smem>>
    %2178 = vector.broadcast %2177 : f32 to vector<8x256xf32>
    %2179 = arith.addf %2164, %2178 : vector<8x256xf32>
    %c1_388 = arith.constant 1 : index
    %2180 = memref.load %arg7[%c1_388] : memref<4xf32, #tpu.memory_space<smem>>
    %2181 = vector.broadcast %2180 : f32 to vector<8x256xf32>
    %2182 = arith.addf %2168, %2181 : vector<8x256xf32>
    %c2_389 = arith.constant 2 : index
    %2183 = memref.load %arg7[%c2_389] : memref<4xf32, #tpu.memory_space<smem>>
    %2184 = vector.broadcast %2183 : f32 to vector<8x256xf32>
    %2185 = arith.addf %2172, %2184 : vector<8x256xf32>
    %c3_390 = arith.constant 3 : index
    %2186 = memref.load %arg7[%c3_390] : memref<4xf32, #tpu.memory_space<smem>>
    %2187 = vector.broadcast %2186 : f32 to vector<8x256xf32>
    %2188 = arith.addf %2176, %2187 : vector<8x256xf32>
    %2189 = tpu.concatenate %2179, %2182, %2185, %2188 in 0 : vector<8x256xf32>, vector<8x256xf32>, vector<8x256xf32>, vector<8x256xf32> -> vector<32x256xf32>
    %c0_391 = arith.constant 0 : index
    %c0_392 = arith.constant 0 : index
    %2190 = vector.load %arg8[%c0_391, %c0_392] : memref<32x32xf32, #tpu.memory_space<vmem>>, vector<32x32xf32>
    %cst_393 = arith.constant dense<0.000000e+00> : vector<32x256xf32>
    %2191 = tpu.matmul %2190, %2189, %cst_393 {dimension_numbers = #tpu.dot_dimension_numbers<[1], [0], [0], [1], [0, 0, 1, 1], [], []>} : vector<32x32xf32>, vector<32x256xf32>, vector<32x256xf32> -> vector<32x256xf32>
    %c0_394 = arith.constant 0 : index
    %c0_395 = arith.constant 0 : index
    %2192 = vector.load %arg9[%c0_394, %c0_395] : memref<32x256xf32, #tpu.memory_space<vmem>>, vector<32x256xf32>
    %2193 = arith.addf %2191, %2192 : vector<32x256xf32>
    %c0_396 = arith.constant 0 : index
    %c0_397 = arith.constant 0 : index
    %c0_398 = arith.constant 0 : index
    %2194 = vector.load %arg10[%c0_396, %c0_397, %c0_398] : memref<1x32x256xf32, #tpu.memory_space<vmem>>, vector<1x32x256xf32>
    %2195 = vector.shape_cast %2194 : vector<1x32x256xf32> to vector<32x256xf32>
    %2196 = vector.shape_cast %2193 : vector<32x256xf32> to vector<1x32x256xf32>
    tpu.vector_store %arg10[%c0_396, %c0_397, %c0_398], %2196 {strides = array<i32>} : memref<1x32x256xf32, #tpu.memory_space<vmem>>, vector<1x32x256xf32>,
    return
  }
  func.func @transform_0(%arg0: i32) -> (i32, i32, i32, i32) {
    %c0_i32 = arith.constant 0 : i32
    %c0_i32_0 = arith.constant 0 : i32
    %c0_i32_1 = arith.constant 0 : i32
    %c0_i32_2 = arith.constant 0 : i32
    return %arg0, %c0_i32, %c0_i32_0, %c0_i32_1 : i32, i32, i32, i32
  }
  func.func @transform_1(%arg0: i32) -> i32 {
    %c0_i32 = arith.constant 0 : i32
    %c0_i32_0 = arith.constant 0 : i32
    return %c0_i32 : i32
  }
  func.func @transform_2(%arg0: i32) -> i32 {
    %c0_i32 = arith.constant 0 : i32
    %c0_i32_0 = arith.constant 0 : i32
    return %c0_i32 : i32
  }
  func.func @transform_3(%arg0: i32) -> i32 {
    %c0_i32 = arith.constant 0 : i32
    %c0_i32_0 = arith.constant 0 : i32
    return %c0_i32 : i32
  }
  func.func @transform_4(%arg0: i32) -> i32 {
    %c0_i32 = arith.constant 0 : i32
    %c0_i32_0 = arith.constant 0 : i32
    return %c0_i32 : i32
  }
  func.func @transform_5(%arg0: i32) -> i32 {
    %c0_i32 = arith.constant 0 : i32
    %c0_i32_0 = arith.constant 0 : i32
    return %c0_i32 : i32
  }
  func.func @transform_6(%arg0: i32) -> i32 {
    %c0_i32 = arith.constant 0 : i32
    %c0_i32_0 = arith.constant 0 : i32
    return %c0_i32 : i32
  }
  func.func @transform_7(%arg0: i32) -> (i32, i32) {
    %c0_i32 = arith.constant 0 : i32
    %c0_i32_0 = arith.constant 0 : i32
    %c0_i32_1 = arith.constant 0 : i32
    return %c0_i32, %c0_i32_0 : i32, i32
  }
  func.func @transform_8(%arg0: i32) -> (i32, i32) {
    %c0_i32 = arith.constant 0 : i32
    %c0_i32_0 = arith.constant 0 : i32
    %c0_i32_1 = arith.constant 0 : i32
    return %c0_i32, %c0_i32_0 : i32, i32
  }
  func.func @transform_9(%arg0: i32) -> (i32, i32, i32) {
    %c0_i32 = arith.constant 0 : i32
    %c0_i32_0 = arith.constant 0 : i32
    %c0_i32_1 = arith.constant 0 : i32
    return %arg0, %c0_i32, %c0_i32_0 : i32, i32, i32
  }
}

</mosaic_0001>

<bundles_post_ra>
// kernel: tpu_custom_call.1
= control target key start
LH: loop header
LB: loop body
LE: loop exit
PB: predicated region body
PF: predicated region fallthrough
CT: control target
= control target key end

     0   :  { %s9086_s0 = inlined_call_operand.hbm [shape: f32[1,4,8,256], index: 0, kind: input, shape index: {}]   ;;  %s9087_s1 = inlined_call_operand.vmem [shape: f32[16], index: 1, kind: input, shape index: {}]   ;;  %s9088_s2 = inlined_call_operand.hbm [shape: f32[4], index: 2, kind: input, shape index: {}]   ;;  %s9089_s3 = inlined_call_operand.vmem [shape: f32[288], index: 3, kind: input, shape index: {}]   ;;  %s9090_s4 = inlined_call_operand.hbm [shape: f32[8], index: 4, kind: input, shape index: {}]   ;;  %s9091_s5 = inlined_call_operand.vmem [shape: f32[144], index: 5, kind: input, shape index: {}]   ;;  %s9092_s6 = inlined_call_operand.vmem [shape: f32[4], index: 6, kind: input, shape index: {}]   ;;  %s9093_s7 = inlined_call_operand.hbm [shape: f32[32,32], index: 7, kind: input, shape index: {}]   ;;  %s9094_s8 = inlined_call_operand.hbm [shape: f32[32,256], index: 8, kind: input, shape index: {}]   ;;  %s9095_s9 = inlined_call_operand.hbm [shape: f32[1,32,256], index: 9, kind: output, shape index: {}]  }
   0x1   :  { %9391 = sst [smem:[#allocation217_spill]] %s9095_s9 }
   0x2   :  { %14 = vsyncpa [#allocation3], 0 }
   0x3   :  { %15 = vsyncpa [#allocation6], 0 }
   0x4   :  { %16 = vsyncpa [#allocation5], 0 }
   0x5   :  { %17 = vsyncpa [#allocation10], 0 }
   0x6   :  { %18 = vsyncpa [#allocation12], 0 }
   0x7   :  { %19 = vsyncpa [#allocation15], 0 }
   0x8   :  { %20 = vsyncpa [#allocation17], 0  ;;  %s58_s11 = sshll.u32 %s9089_s3, 4  ;;  %s59_s11 = int_to_ptr.vmem [resolvable:$true] %s58_s11 }
   0x9   :  { %21 = vsyncpa [#allocation4], 0  ;;  %s4332_s12 = scalar_lea.vmem %s59_s11, 48  ;;  %s4336_s13 = scalar_lea.vmem %s59_s11, 64 }
   0xa   :  { %p4333_p0 = scmp.ne.s32.totalorder %s59_s11, %s4332_s12  ;;  %p4337_p1 = scmp.lt.s32.totalorder %s59_s11, %s59_s11 }
   0xb   :  { %p4338_p2 = scmp.lt.s32.totalorder %s4336_s13, %s4332_s12 }
   0xd   :  { %p4339_p3 = por %p4338_p2, %p4337_p1 }
   0xf   :  { %p4340_p4 = pnand %p4339_p3, %p4333_p0 }
  0x11   :  { %4343 = shalt.err (!%p4340_p4)
}
  0x12   :  { %s4494_s14 = smov [#allocation9]   ;;  %s4495_s15 = smov [#allocation16]  }
  0x13   :  { %61 = dma.vmem_to_smem %s59_s11, 48, %s4494_s14, [#allocation10]  }
  0x14   :  { %s95_s16 = sshll.u32 %s4495_s15, 4  ;;  %s96_s16 = int_to_ptr.vmem [resolvable:$true] %s95_s16 }
  0x15   :  { %s4352_s17 = scalar_lea.vmem %s96_s16, 512  ;;  %p4357_p6 = scmp.lt.s32.totalorder %s96_s16, %s96_s16 }
  0x16   :  { %p4353_p5 = scmp.ne.s32.totalorder %s96_s16, %s4352_s17  ;;  %p4358_p7 = scmp.lt.s32.totalorder %s4352_s17, %s4352_s17 }
  0x18   :  { %p4359_p8 = por %p4358_p7, %p4357_p6 }
  0x1a   :  { %p4360_p9 = pnand %p4359_p8, %p4353_p5 }
  0x1c   :  { %4363 = shalt.err (!%p4360_p9)
}
  0x1d   :  { %s4496_s3 = smov 128   ;;  %s4497_s18 = smov 8  }
  0x1e   :  { %101 = dma.hbm_to_vmem [thread:$0]  %s9093_s7, 512, %s96_s16, [#allocation17], %s4496_s3, %s4496_s3, %s4497_s18  }
  0x1f   :  { %s4498_s21 = smov [#allocation2]   ;;  %s40_s25 = sshll.u32 %s9087_s1, 4  ;;  %s41_s25 = int_to_ptr.vmem [resolvable:$true] %s40_s25 }
  0x20   :  { %s27_s22 = sshll.u32 %s4498_s21, 4  ;;  %s28_s22 = int_to_ptr.vmem [resolvable:$true] %s27_s22 }
  0x21   :  { %s4372_s26 = scalar_lea.vmem %s28_s22, 1024  ;;  %p4377_p11 = scmp.lt.s32.totalorder %s28_s22, %s28_s22 }
  0x22   :  { %p4373_p10 = scmp.ne.s32.totalorder %s28_s22, %s4372_s26  ;;  %p4378_p12 = scmp.lt.s32.totalorder %s4372_s26, %s4372_s26 }
  0x24   :  { %p4379_p13 = por %p4378_p12, %p4377_p11 }
  0x26   :  { %p4380_p0 = pnand %p4379_p13, %p4373_p10 }
  0x28   :  { %4383 = shalt.err (!%p4380_p0)
}
  0x29   :  { %s9096_s27 = smov 256   ;;  %s9097_s28 = smov 16  }
  0x2a   :  { %33 = dma.hbm_to_vmem [thread:$0]  %s9086_s0, 1024, %s28_s22, [#allocation3], %s9096_s27, %s9096_s27, %s9097_s28  }
  0x2b   :  { %s4384_s30 = scalar_lea.vmem %s41_s25, 16  ;;  %p4389_p2 = scmp.lt.s32.totalorder %s41_s25, %s41_s25 }
  0x2c   :  { %p4385_p1 = scmp.ne.s32.totalorder %s41_s25, %s4384_s30  ;;  %p4390_p3 = scmp.lt.s32.totalorder %s4384_s30, %s4384_s30 }
  0x2e   :  { %p4391_p4 = por %p4390_p3, %p4389_p2 }
  0x30   :  { %p4392_p5 = pnand %p4391_p4, %p4385_p1 }
  0x32   :  { %4395 = shalt.err (!%p4392_p5)
}
  0x33   :  { %s4501_s1 = smov [#allocation7]   ;;  %s4502_s10 = smov [#allocation8]  }
  0x34   :  { %43 = dma.vmem_to_smem %s41_s25, 16, %s4501_s1, [#allocation6]  }
  0x35   :  { %51 = dma.hbm_to_smem %s9088_s2, 16, %s4502_s10, [#allocation5]  }
  0x36   :  { %s4503_s13 = smov [#allocation11]   ;;  %s76_s17 = sshll.u32 %s9091_s5, 4  ;;  %s77_s17 = int_to_ptr.vmem [resolvable:$true] %s76_s17 }
  0x37   :  { %69 = dma.hbm_to_smem %s9090_s4, 16, %s4503_s13, [#allocation12]  }
  0x38   :  { %s86_s19 = sshll.u32 %s9092_s6, 4  ;;  %s4412_s20 = scalar_lea.vmem %s77_s17, 32  ;;  %s87_s19 = int_to_ptr.vmem [resolvable:$true] %s86_s19 }
  0x39   :  { %p4413_p6 = scmp.ne.s32.totalorder %s77_s17, %s4412_s20  ;;  %p4417_p7 = scmp.lt.s32.totalorder %s77_s17, %s77_s17 }
  0x3a   :  { %p4418_p8 = scmp.lt.s32.totalorder %s4412_s20, %s4412_s20 }
  0x3c   :  { %p4419_p9 = por %p4418_p8, %p4417_p7 }
  0x3e   :  { %p4420_p10 = pnand %p4419_p9, %p4413_p6 }
  0x40   :  { %4423 = shalt.err (!%p4420_p10)
}
  0x41   :  { %s4504_s2 = smov [#allocation13]   ;;  %s4424_s4 = scalar_lea.vmem %s87_s19, 16 }
  0x42   :  { %79 = dma.vmem_to_smem %s77_s17, 32, %s4504_s2, [#allocation10]  }
  0x43   :  { %p4425_p11 = scmp.ne.s32.totalorder %s87_s19, %s4424_s4  ;;  %p4429_p12 = scmp.lt.s32.totalorder %s87_s19, %s87_s19 }
  0x44   :  { %p4430_p13 = scmp.lt.s32.totalorder %s4424_s4, %s4424_s4 }
  0x46   :  { %p4431_p0 = por %p4430_p13, %p4429_p12 }
  0x48   :  { %p4432_p1 = pnand %p4431_p0, %p4425_p11 }
  0x4a   :  { %4435 = shalt.err (!%p4432_p1)
}
  0x4b   :  { %s4505_s5 = smov [#allocation14]   ;;  %s4506_s6 = smov [#allocation18]  }
  0x4c   :  { %89 = dma.vmem_to_smem %s87_s19, 16, %s4505_s5, [#allocation15]  }
  0x4d   :  { %s107_s21 = sshll.u32 %s4506_s6, 4  ;;  %s108_s21 = int_to_ptr.vmem [resolvable:$true] %s107_s21 }
  0x4e   :  { %s4444_s22 = scalar_lea.vmem %s108_s21, 1024  ;;  %p4449_p3 = scmp.lt.s32.totalorder %s108_s21, %s108_s21 }
  0x4f   :  { %p4445_p2 = scmp.ne.s32.totalorder %s108_s21, %s4444_s22  ;;  %p4450_p4 = scmp.lt.s32.totalorder %s4444_s22, %s4444_s22 }
  0x51   :  { %p4451_p5 = por %p4450_p4, %p4449_p3 }
  0x53   :  { %p4452_p6 = pnand %p4451_p5, %p4445_p2 }
  0x55   :  { %4455 = shalt.err (!%p4452_p6)
}
  0x56   :  { %113 = dma.hbm_to_vmem [thread:$0]  %s9094_s8, 1024, %s108_s21, [#allocation17], %s9096_s27, %s9096_s27, %s9097_s28  }
  0x57   :  { %4476 = dma.done.wait [#allocation3], 1024  }
  0x58   :  { %4477 = vsyncadd [#allocation3], 4294966272 }
  0x59   :  { %4478 = dma.done.wait [#allocation6], 16  }
  0x5a   :  { %4479 = vsyncadd [#allocation6], 4294967280 }
  0x5b   :  { %4480 = dma.done.wait [#allocation5], 16  }
  0x5c   :  { %4481 = vsyncadd [#allocation5], 4294967280 }
  0x5d   :  { %4482 = dma.done.wait [#allocation10], 48  }
  0x5e   :  { %4483 = vsyncadd [#allocation10], 4294967248 }
  0x5f   :  { %4484 = dma.done.wait [#allocation12], 16  }
  0x60   :  { %4485 = vsyncadd [#allocation12], 4294967280 }
  0x61   :  { %4486 = dma.done.wait [#allocation10], 32  }
  0x62   :  { %4487 = vsyncadd [#allocation10], 4294967264 }
  0x63   :  { %4488 = dma.done.wait [#allocation15], 16  }
  0x64   :  { %4489 = vsyncadd [#allocation15], 4294967280 }
  0x65   :  { %4490 = dma.done.wait [#allocation17], 1536  }
  0x66   :  { %4491 = vsyncadd [#allocation17], 4294965760 }
  0x67   :  { %141 = sfence }
  0x68   :  { %v142_v0 = vlaneseq  ;;  %v4596_v1 = vld [vmem:[#allocation2] sm:$0xff]  ;;  %v4598_v2 = vld [vmem:[#allocation2 + $0x8] sm:$0xff]  ;;  %s4601_s8 = sld [smem:[#allocation9 + $0x1]]  ;;  %s9100_s30 = smov 127   ;;  %v4679_v12 = vld [vmem:[#allocation2 + $0x18] sm:$0xff]  ;;  %vm3672_vm14 = vcmask 261120  }
  0x69   :  { %v298_v3 = vrot.slane %v4596_v1, 7  ;;  %s4606_s25 = sld [smem:[#allocation9 + $0x25]]  ;;  %v299_v5 = vrot.slane %v4598_v2, 7  ;;  %s9098_s1 = smov 1   ;;  %v473_v8 = vrot.slane %v4598_v2, 1  ;;  %v472_v9 = vrot.slane %v4596_v1, 1 }
  0x6a   :  { %v4604_v4 = vshrl.u32 %v142_v0, 7  ;;  %s4608_s26 = sld [smem:[#allocation9 + $0x49]]  ;;  %v4681_v13 = vld [vmem:[#allocation2 + $0x10] sm:$0xff]  ;;  %v565_v14 = vrot.slane %v4679_v12, 7  ;;  %s9401_s9 = smov 1   ;;  %v745_v18 = vrot.slane %v4679_v12, 1 }
  0x6b   :  { %s4612_s7 = sld [smem:[#allocation9 + $0x6d]]  ;;  %v564_v15 = vrot.slane %v4681_v13, 7  ;;  %v744_v19 = vrot.slane %v4681_v13, 1  ;;  %v4775_v22 = vld [vmem:[#allocation2 + $0x28] sm:$0xff]  ;;  %v4777_v23 = vld [vmem:[#allocation2 + $0x20] sm:$0xff]  ;;  %v4896_v45 = vld [vmem:[#allocation2 + $0x38] sm:$0xff] }
  0x6c   :  { %9392 = vst [vmem:[#allocation29_spill] sm:$0xff] %v4604_v4  ;;  %vm171_vm0 = vcmp.ge.s32.totalorder %v4604_v4, 1  ;;  %s4618_s29 = sld [smem:[#allocation9 + $0x7]]  ;;  %vm172_vm1 = vcmp.lt.s32.totalorder %v4604_v4, 7  ;;  %v837_v24 = vrot.slane %v4775_v22, 7  ;;  %v836_v25 = vrot.slane %v4777_v23, 7 }
  0x6d   :  { %v4616_v6 = vsel %vm171_vm0, %v298_v3, 0.0  ;;  %s4624_s10 = sld [smem:[#allocation9 + $0x2b]]  ;;  %v4628_v7 = vsel %vm171_vm0, %v299_v5, 0.0  ;;  %v4671_v10 = vsel %vm172_vm1, %v473_v8, 0.0  ;;  %v4675_v11 = vsel %vm172_vm1, %v472_v9, 0.0  ;;  %v4898_v46 = vld [vmem:[#allocation2 + $0x30] sm:$0xff] }
  0x6e   :  { %351 = vrot.lane.b32.xlu1 %v4616_v6, %s9100_s30  ;;  %302 = vrot.lane.b32.xlu0 %v4616_v6, %s9098_s1  ;;  %s4630_s11 = sld [smem:[#allocation9 + $0x4f]]  ;;  %v4709_v16 = vsel %vm171_vm0, %v565_v14, 0.0  ;;  %v4713_v17 = vsel %vm171_vm0, %v564_v15, 0.0  ;;  %v4767_v20 = vsel %vm172_vm1, %v745_v18, 0.0  ;;  %v4771_v21 = vsel %vm172_vm1, %v744_v19, 0.0 }
  0x6f   :  { %s4632_s12 = sld [smem:[#allocation9 + $0x73]]  ;;  %v4805_v26 = vsel %vm171_vm0, %v837_v24, 0.0  ;;  %v4809_v27 = vsel %vm171_vm0, %v836_v25, 0.0  ;;  %v328_v28 = vstv %s4601_s8  ;;  %v1017_v29 = vrot.slane %v4775_v22, 1 }
  0x70   :  { %s4634_s13 = sld [smem:[#allocation9 + $0xa]]  ;;  %v1016_v30 = vrot.slane %v4777_v23, 1  ;;  %v334_v31 = vstv %s4606_s25  ;;  %v340_v32 = vstv %s4608_s26  ;;  %v4860_v34 = vmul.f32 %v328_v28, %v4616_v6 }
  0x71   :  { %s4640_s14 = sld [smem:[#allocation9 + $0x2e]]  ;;  %v346_v33 = vstv %s4612_s7  ;;  %v4863_v35 = vmul.f32 %v328_v28, %v4628_v7  ;;  %v4873_v37 = vmul.f32 %v334_v31, %v4616_v6  ;;  %v4878_v39 = vsel %vm172_vm1, %v1017_v29, 0.0 }
  0x72   :  { %353 = vrot.lane.b32.xlu1 %v4628_v7, %s9100_s30  ;;  %304 = vrot.lane.b32.xlu0 %v4628_v7, %s9098_s1  ;;  %s4642_s15 = sld [smem:[#allocation9 + $0x52]]  ;;  %v509_v36 = vstv %s4618_s29  ;;  %v4882_v40 = vsel %vm172_vm1, %v1016_v30, 0.0  ;;  %v4887_v41 = vmul.f32 %v340_v32, %v4616_v6  ;;  %v4890_v42 = vmul.f32 %v334_v31, %v4628_v7 }
  0x73   :  { %s4644_s0 = sld [smem:[#allocation9 + $0x76]]  ;;  %v515_v38 = vstv %s4624_s10  ;;  %v4893_v43 = vmul.f32 %v340_v32, %v4628_v7  ;;  %v4903_v47 = vmul.f32 %v346_v33, %v4616_v6  ;;  %v4906_v48 = vmul.f32 %v346_v33, %v4628_v7 }
  0x74   :  { %s4646_s16 = sld [smem:[#allocation9 + $0x10]]  ;;  %v521_v44 = vstv %s4630_s11  ;;  %v4909_v49 = vmul.f32 %v509_v36, %v4671_v10  ;;  %v4915_v51 = vmul.f32 %v515_v38, %v4671_v10  ;;  %v4918_v52 = vmul.f32 %v509_v36, %v4675_v11 }
  0x75   :  { %s4652_s17 = sld [smem:[#allocation9 + $0x34]]  ;;  %v527_v50 = vstv %s4632_s12  ;;  %v4929_v55 = vmul.f32 %v521_v44, %v4671_v10  ;;  %v4932_v56 = vmul.f32 %v515_v38, %v4675_v11  ;;  %v1109_v57 = vrot.slane %v4896_v45, 7 }
  0x76   :  { %386 = vrot.lane.b32.xlu1 %v4598_v2, %s9098_s1  ;;  %384 = vrot.lane.b32.xlu0 %v4596_v1, %s9098_s1  ;;  %s4656_s3 = sld [smem:[#allocation9 + $0x58]]  ;;  %v601_v53 = vstv %s4634_s13  ;;  %v1108_v58 = vrot.slane %v4898_v46, 7  ;;  %v4939_v59 = vmul.f32 %v527_v50, %v4671_v10  ;;  %v4942_v60 = vmul.f32 %v521_v44, %v4675_v11 }
  0x77   :  { %s4659_s18 = sld [smem:[#allocation9 + $0x7c]]  ;;  %v607_v54 = vstv %s4640_s14  ;;  %v4945_v61 = vmul.f32 %v527_v50, %v4675_v11  ;;  %v4951_v63 = vmul.f32 %v601_v53, %v4709_v16  ;;  %v4958_v6 = vmul.f32 %v601_v53, %v4713_v17 }
  0x78   :  { %s4661_s19 = sld [smem:[#allocation9 + $0x13]]  ;;  %9441 = vst [vmem:[#allocation76_spill] sm:$0xff] %v4939_v59  ;;  %v613_v62 = vstv %s4642_s15  ;;  %v4954_v3 = vmul.f32 %v607_v54, %v4709_v16  ;;  %v4963_v7 = vmul.f32 %v607_v54, %v4713_v17  ;;  %v4982_v15 = vsel %vm171_vm0, %v1109_v57, 0.0 }
  0x79   :  { %s4667_s20 = sld [smem:[#allocation9 + $0x37]]  ;;  %9443 = vst [vmem:[#allocation78_spill] sm:$0xff] %v4951_v63  ;;  %v619_v5 = vstv %s4644_s0  ;;  %9445 = vst [vmem:[#allocation80_spill] sm:$0xff] %v4958_v6  ;;  %v4978_v14 = vmul.f32 %v613_v62, %v4713_v17  ;;  %v4986_v18 = vsel %vm171_vm0, %v1108_v58, 0.0  ;;  %vm177_vm2 = vcmp.ge.s32.totalorder %v4604_v4, 2 }
  0x7a   :  { %442 = vrot.lane.b32.xlu1 %v4598_v2, %s9100_s30  ;;  %440 = vrot.lane.b32.xlu0 %v4596_v1, %s9100_s30  ;;  %s4677_s2 = sld [smem:[#allocation9 + $0x5b]]  ;;  %9444 = vst [vmem:[#allocation79_spill] sm:$0xff] %v4954_v3  ;;  %9447 = vst [vmem:[#allocation82_spill] sm:$0xff] %v4963_v7  ;;  %v781_v8 = vstv %s4646_s16  ;;  %v4991_v19 = vmul.f32 %v619_v5, %v4709_v16  ;;  %v4994_v24 = vmul.f32 %v619_v5, %v4713_v17 }
  0x7b   :  { %s4683_s4 = sld [smem:[#allocation9 + $0x7f]]  ;;  %v787_v9 = vstv %s4652_s17  ;;  %9450 = vst [vmem:[#allocation85_spill] sm:$0xff] %v4978_v14  ;;  %9451 = vst [vmem:[#allocation86_spill] sm:$0xff] %v4982_v15  ;;  %v5001_v29 = vmul.f32 %v781_v8, %v4767_v20  ;;  %v5007_v31 = vmul.f32 %v781_v8, %v4771_v21  ;;  %v1397_v58 = vrot.slane %v4598_v2, 6 }
  0x7c   :  { %s4685_s5 = sld [smem:[#allocation9 + $0x19]]  ;;  %9452 = vst [vmem:[#allocation87_spill] sm:$0xff] %v4986_v18  ;;  %9454 = vst [vmem:[#allocation89_spill] sm:$0xff] %v4991_v19  ;;  %v793_v25 = vstv %s4656_s3  ;;  %v5004_v30 = vmul.f32 %v787_v9, %v4767_v20  ;;  %vm178_vm3 = vcmp.lt.s32.totalorder %v4604_v4, 6  ;;  %v2214_v19 = vrot.slane %v4898_v46, 6 }
  0x7d   :  { %s4691_s6 = sld [smem:[#allocation9 + $0x3d]]  ;;  %9455 = vst [vmem:[#allocation90_spill] sm:$0xff] %v4994_v24  ;;  %v799_v28 = vstv %s4659_s18  ;;  %9457 = vst [vmem:[#allocation92_spill] sm:$0xff] %v5001_v29  ;;  %v5028_v38 = vmul.f32 %v793_v25, %v4767_v20  ;;  %v5034_v50 = vmul.f32 %v793_v25, %v4771_v21  ;;  %v1396_v25 = vrot.slane %v4596_v1, 6 }
  0x7e   :  { %478 = vrot.lane.b32.xlu1 %v4671_v10, %s9098_s1  ;;  %476 = vrot.lane.b32.xlu0 %v4675_v11, %s9098_s1  ;;  %s4695_s21 = sld [smem:[#allocation9 + $0x61]]  ;;  %9458 = vst [vmem:[#allocation93_spill] sm:$0xff] %v5004_v30  ;;  %9459 = vst [vmem:[#allocation94_spill] sm:$0xff] %v5007_v31  ;;  %v873_v32 = vstv %s4661_s19  ;;  %v5031_v44 = vmul.f32 %v799_v28, %v4767_v20  ;;  %v5040_v54 = vmul.f32 %v799_v28, %v4771_v21 }
  0x7f   :  { %s4697_s22 = sld [smem:[#allocation9 + $0x85]]  ;;  %v879_v33 = vstv %s4667_s20  ;;  %9464 = vst [vmem:[#allocation99_spill] sm:$0xff] %v5028_v38  ;;  %9466 = vst [vmem:[#allocation101_spill] sm:$0xff] %v5034_v50  ;;  %v5054_v5 = vmul.f32 %v873_v32, %v4809_v27 }
  0x80   :  { %s4699_s23 = sld [smem:[#allocation9 + $0x2]]  ;;  %9465 = vst [vmem:[#allocation100_spill] sm:$0xff] %v5031_v44  ;;  %v885_v53 = vstv %s4677_s2  ;;  %9468 = vst [vmem:[#allocation103_spill] sm:$0xff] %v5040_v54 }
  0x81   :  { %s4705_s24 = sld [smem:[#allocation9 + $0x26]]  ;;  %v891_v57 = vstv %s4683_s4  ;;  %9473 = vst [vmem:[#allocation106_spill] sm:$0xff] %v5054_v5  ;;  %v5063_v8 = vmul.f32 %v885_v53, %v4805_v26 }
  0x82   :  { %534 = vrot.lane.b32.xlu1 %v4671_v10, %s9100_s30  ;;  %532 = vrot.lane.b32.xlu0 %v4675_v11, %s9100_s30  ;;  %s4715_s27 = sld [smem:[#allocation9 + $0x4a]]  ;;  %v1289_v10 = vrot.slane %v4896_v45, 1  ;;  %v4975_v11 = vmul.f32 %v613_v62, %v4709_v16  ;;  %v5051_v62 = vmul.f32 %v879_v33, %v4805_v26  ;;  %v5077_v28 = vmul.f32 %v891_v57, %v4805_v26 }
  0x83   :  { %9393 = sst [smem:[#allocation30_spill]] %s4691_s6  ;;  %9477 = vst [vmem:[#allocation108_spill] sm:$0xff] %v5063_v8  ;;  %v5089_v8 = vmul.f32 %v891_v57, %v4809_v27 }
  0x84   :  { %9394 = sst [smem:[#allocation31_spill]] %s4695_s21  ;;  %s9406_s21 = smov 127   ;;  %9449 = vst [vmem:[#allocation84_spill] sm:$0xff] %v4975_v11  ;;  %v5023_v36 = vsel %vm172_vm1, %v1289_v10, 0.0  ;;  %9472 = vst [vmem:[#allocation105_spill] sm:$0xff] %v5051_v62  ;;  %v1053_v10 = vstv %s4685_s5 }
  0x85   :  { %9395 = sst [smem:[#allocation32_spill]] %s4697_s22  ;;  %9462 = vst [vmem:[#allocation97_spill] sm:$0xff] %v5023_v36  ;;  %9481 = vst [vmem:[#allocation110_spill] sm:$0xff] %v5077_v28  ;;  %v5111_v57 = vmul.f32 %v1053_v10, %v4882_v40 }
  0x86   :  { %9396 = sst [smem:[#allocation33_spill]] %s4699_s23  ;;  %570 = vrot.lane.b32.xlu1 %v4709_v16, %s9401_s9  ;;  %568 = vrot.lane.b32.xlu0 %v4713_v17, %s9401_s9  ;;  %9484 = vst [vmem:[#allocation113_spill] sm:$0xff] %v5089_v8 }
  0x87   :  { %9397 = sst [smem:[#allocation34_spill]] %s4705_s24  ;;  %9490 = vst [vmem:[#allocation119_spill] sm:$0xff] %v5111_v57 }
  0x88   :  { %9398 = sst [smem:[#allocation35_spill]] %s4715_s27 }
  0x89   :  { %s4717_s28 = sld [smem:[#allocation9 + $0x6e]] }
  0x8a   :  { %s4719_s1 = sld [smem:[#allocation9]]  ;;  %626 = vrot.lane.b32.xlu1 %v4709_v16, %s9406_s21  ;;  %624 = vrot.lane.b32.xlu0 %v4713_v17, %s9406_s21  ;;  %v1288_v16 = vrot.slane %v4898_v46, 1  ;;  %v5013_v17 = vmul.f32 %v787_v9, %v4771_v21  ;;  %v5066_v9 = vmul.f32 %v879_v33, %v4809_v27  ;;  %v5084_v33 = vand.u32 127, %v142_v0 }
  0x8b   :  { %s4725_s30 = sld [smem:[#allocation9 + $0x24]]  ;;  %v1578_v0 = vrot.slane %v4596_v1, 2 }
  0x8c   :  { %s4727_s24 = sld [smem:[#allocation9 + $0x48]]  ;;  %9461 = vst [vmem:[#allocation96_spill] sm:$0xff] %v5013_v17  ;;  %9478 = vst [vmem:[#allocation109_spill] sm:$0xff] %v5066_v9  ;;  %v5094_v9 = vsel %vm177_vm2, %v1397_v58, 0.0  ;;  %vm175_vm4 = vcmp.lt.s32.totalorder %v5084_v33, 127  ;;  %vm306_vm5 = vcmp.lt.s32.totalorder %v5084_v33, 1 }
  0x8d   :  { %s4729_s23 = sld [smem:[#allocation9 + $0x6c]]  ;;  %9485 = vst [vmem:[#allocation114_spill] sm:$0xff] %v5094_v9  ;;  %vm173_vm7 = vcmp.ge.s32.totalorder %v5084_v33, 1  ;;  %vm1404_vm9 = vcmp.lt.s32.totalorder %v5084_v33, 2  ;;  %vm179_vm10 = vcmp.ge.s32.totalorder %v5084_v33, 2  ;;  %vm181_vm12 = vcmp.lt.s32.totalorder %v5084_v33, 126 }
  0x8e   :  { %s4731_s22 = sld [smem:[#allocation9 + $0x3]]  ;;  %658 = vrot.lane.b32.xlu1 %v4679_v12, %s9401_s9  ;;  %656 = vrot.lane.b32.xlu0 %v4681_v13, %s9401_s9 }
  0x8f   :  { %9399 = sst [smem:[#allocation36_spill]] %s4717_s28 }
  0x90   :  { %9400 = sst [smem:[#allocation37_spill]] %s4719_s1 }
  0x91   :  { %9402 = sst [smem:[#allocation38_spill]] %s4725_s30 }
  0x92   :  { %9403 = sst [smem:[#allocation39_spill]] %s4727_s24  ;;  %714 = vrot.lane.b32.xlu1 %v4679_v12, %s9406_s21  ;;  %712 = vrot.lane.b32.xlu0 %v4681_v13, %s9406_s21 }
  0x93   :  { %9404 = sst [smem:[#allocation40_spill]] %s4729_s23 }
  0x94   :  { %9405 = sst [smem:[#allocation41_spill]] %s4731_s22 }
  0x95   :  { %s4737_s1 = sld [smem:[#allocation9 + $0x27]] }
  0x96   :  { %s4739_s28 = sld [smem:[#allocation9 + $0x4b]]  ;;  %750 = vrot.lane.b32.xlu1 %v4767_v20, %s9401_s9  ;;  %748 = vrot.lane.b32.xlu0 %v4771_v21, %s9401_s9 }
  0x97   :  { %s4741_s27 = sld [smem:[#allocation9 + $0x6f]] }
  0x98   :  { %s4743_s6 = sld [smem:[#allocation9 + $0x4]] }
  0x99   :  { %s4749_s22 = sld [smem:[#allocation9 + $0x28]] }
  0x9a   :  { %s4753_s23 = sld [smem:[#allocation9 + $0x4c]]  ;;  %806 = vrot.lane.b32.xlu1 %v4767_v20, %s9406_s21  ;;  %804 = vrot.lane.b32.xlu0 %v4771_v21, %s9406_s21  ;;  %v5048_v20 = vmul.f32 %v873_v32, %v4805_v26  ;;  %v5058_v21 = vsel %vm172_vm1, %v1288_v16, 0.0  ;;  %v5080_v16 = vmul.f32 %v885_v53, %v4809_v27  ;;  %v5100_v53 = vmul.f32 %v1053_v10, %v4878_v39 }
  0x9b   :  { %9407 = sst [smem:[#allocation42_spill]] %s4737_s1  ;;  %9475 = vst [vmem:[#allocation107_spill] sm:$0xff] %v5058_v21 }
  0x9c   :  { %9408 = sst [smem:[#allocation43_spill]] %s4739_s28  ;;  %9471 = vst [vmem:[#allocation104_spill] sm:$0xff] %v5048_v20  ;;  %9482 = vst [vmem:[#allocation111_spill] sm:$0xff] %v5080_v16 }
  0x9d   :  { %9409 = sst [smem:[#allocation44_spill]] %s4741_s27  ;;  %9487 = vst [vmem:[#allocation116_spill] sm:$0xff] %v5100_v53  ;;  %v5122_v53 = vsel %vm177_vm2, %v1396_v25, 0.0 }
  0x9e   :  { %9410 = sst [smem:[#allocation45_spill]] %s4743_s6  ;;  %842 = vrot.lane.b32.xlu1 %v4805_v26, %s9401_s9  ;;  %840 = vrot.lane.b32.xlu0 %v4809_v27, %s9401_s9  ;;  %9494 = vst [vmem:[#allocation121_spill] sm:$0xff] %v5122_v53 }
  0x9f   :  { %9411 = sst [smem:[#allocation46_spill]] %s4749_s22 }
  0xa0   :  { %9412 = sst [smem:[#allocation47_spill]] %s4753_s23 }
  0xa1   :  { %s4755_s1 = sld [smem:[#allocation9 + $0x70]] }
  0xa2   :  { %s4757_s28 = sld [smem:[#allocation9 + $0x5]]  ;;  %898 = vrot.lane.b32.xlu1 %v4805_v26, %s9406_s21  ;;  %896 = vrot.lane.b32.xlu0 %v4809_v27, %s9406_s21  ;;  %v1579_v26 = vrot.slane %v4598_v2, 2 }
  0xa3   :  { %s4763_s27 = sld [smem:[#allocation9 + $0x29]] }
  0xa4   :  { %s4773_s23 = sld [smem:[#allocation9 + $0x4d]] }
  0xa5   :  { %s4793_s22 = sld [smem:[#allocation9 + $0x72]] }
  0xa6   :  { %s4795_s6 = sld [smem:[#allocation9 + $0x8]]  ;;  %930 = vrot.lane.b32.xlu1 %v4775_v22, %s9401_s9  ;;  %928 = vrot.lane.b32.xlu0 %v4777_v23, %s9401_s9 }
  0xa7   :  { %9413 = sst [smem:[#allocation48_spill]] %s4755_s1 }
  0xa8   :  { %9414 = sst [smem:[#allocation49_spill]] %s4757_s28 }
  0xa9   :  { %9415 = sst [smem:[#allocation50_spill]] %s4763_s27 }
  0xaa   :  { %9416 = sst [smem:[#allocation51_spill]] %s4773_s23  ;;  %986 = vrot.lane.b32.xlu1 %v4775_v22, %s9406_s21  ;;  %984 = vrot.lane.b32.xlu0 %v4777_v23, %s9406_s21 }
  0xab   :  { %s4779_s28 = sld [smem:[#allocation9 + $0x71]] }
  0xac   :  { %s4781_s1 = sld [smem:[#allocation9 + $0x6]] }
  0xad   :  { %s4787_s27 = sld [smem:[#allocation9 + $0x2a]] }
  0xae   :  { %s4791_s23 = sld [smem:[#allocation9 + $0x4e]]  ;;  %1022 = vrot.lane.b32.xlu1 %v4878_v39, %s9401_s9  ;;  %1020 = vrot.lane.b32.xlu0 %v4882_v40, %s9401_s9 }
  0xaf   :  { %9421 = sst [smem:[#allocation56_spill]] %s4793_s22 }
  0xb0   :  { %9422 = sst [smem:[#allocation57_spill]] %s4795_s6 }
  0xb1   :  { %9417 = sst [smem:[#allocation52_spill]] %s4779_s28 }
  0xb2   :  { %9418 = sst [smem:[#allocation53_spill]] %s4781_s1  ;;  %1078 = vrot.lane.b32.xlu1 %v4878_v39, %s9406_s21  ;;  %1076 = vrot.lane.b32.xlu0 %v4882_v40, %s9406_s21 }
  0xb3   :  { %9419 = sst [smem:[#allocation54_spill]] %s4787_s27 }
  0xb4   :  { %9420 = sst [smem:[#allocation55_spill]] %s4791_s23 }
  0xb5   :  { %s4801_s1 = sld [smem:[#allocation9 + $0x2c]] }
  0xb6   :  { %s4811_s23 = sld [smem:[#allocation9 + $0x50]]  ;;  %1114 = vrot.lane.b32.xlu1 %v4982_v15, %s9401_s9  ;;  %1112 = vrot.lane.b32.xlu0 %v4986_v18, %s9401_s9 }
  0xb7   :  { %s4813_s22 = sld [smem:[#allocation9 + $0x74]] }
  0xb8   :  { %s4815_s6 = sld [smem:[#allocation9 + $0x9]] }
  0xb9   :  { %s4823_s27 = sld [smem:[#allocation9 + $0x51]] }
  0xba   :  { %s4825_s28 = sld [smem:[#allocation9 + $0x75]]  ;;  %1170 = vrot.lane.b32.xlu1 %v4982_v15, %s9406_s21  ;;  %1168 = vrot.lane.b32.xlu0 %v4986_v18, %s9406_s21 }
  0xbb   :  { %9423 = sst [smem:[#allocation58_spill]] %s4801_s1 }
  0xbc   :  { %9424 = sst [smem:[#allocation59_spill]] %s4811_s23  ;;  %s9563_s23 = smov 2  }
  0xbd   :  { %9425 = sst [smem:[#allocation60_spill]] %s4813_s22 }
  0xbe   :  { %9426 = sst [smem:[#allocation61_spill]] %s4815_s6  ;;  %1202 = vrot.lane.b32.xlu1 %v4896_v45, %s9401_s9  ;;  %1200 = vrot.lane.b32.xlu0 %v4898_v46, %s9401_s9 }
  0xbf   :  { %s4821_s1 = sld [smem:[#allocation9 + $0x2d]] }
  0xc0   :  { %9428 = sst [smem:[#allocation63_spill]] %s4823_s27 }
  0xc1   :  { %9429 = sst [smem:[#allocation64_spill]] %s4825_s28 }
  0xc2   :  { %s4827_s24 = sld [smem:[#allocation9 + $0xb]]  ;;  %1258 = vrot.lane.b32.xlu1 %v4896_v45, %s9406_s21  ;;  %1256 = vrot.lane.b32.xlu0 %v4898_v46, %s9406_s21 }
  0xc3   :  { %s4833_s6 = sld [smem:[#allocation9 + $0x2f]] }
  0xc4   :  { %s4835_s22 = sld [smem:[#allocation9 + $0x53]] }
  0xc5   :  { %9427 = sst [smem:[#allocation62_spill]] %s4821_s1 }
  0xc6   :  { %s4837_s1 = sld [smem:[#allocation9 + $0x77]]  ;;  %1294 = vrot.lane.b32.xlu1 %v5023_v36, %s9401_s9  ;;  %1292 = vrot.lane.b32.xlu0 %v5058_v21, %s9401_s9 }
  0xc7   :  { %s4839_s27 = sld [smem:[#allocation9 + $0xc]] }
  0xc8   :  { %9430 = sst [smem:[#allocation65_spill]] %s4827_s24 }
  0xc9   :  { %9431 = sst [smem:[#allocation66_spill]] %s4833_s6 }
  0xca   :  { %9432 = sst [smem:[#allocation67_spill]] %s4835_s22  ;;  %1350 = vrot.lane.b32.xlu1 %v5023_v36, %s9406_s21  ;;  %1348 = vrot.lane.b32.xlu0 %v5058_v21, %s9406_s21  ;;  %v2123_v36 = vrot.slane %v4775_v22, 2  ;;  %v2122_v21 = vrot.slane %v4777_v23, 2 }
  0xcb   :  { %s4845_s24 = sld [smem:[#allocation9 + $0x30]] }
  0xcc   :  { %9433 = sst [smem:[#allocation68_spill]] %s4837_s1  ;;  %v5291_v29 = vsel %vm178_vm3, %v2123_v36, 0.0  ;;  %v5295_v17 = vsel %vm178_vm3, %v2122_v21, 0.0 }
  0xcd   :  { %9434 = sst [smem:[#allocation69_spill]] %s4839_s27  ;;  %9544 = vst [vmem:[#allocation135_spill] sm:$0xff] %v5291_v29  ;;  %9545 = vst [vmem:[#allocation136_spill] sm:$0xff] %v5295_v17 }
  0xce   :  { %s4850_s22 = sld [smem:[#allocation9 + $0x54]] }
  0xcf   :  { %s4853_s1 = sld [smem:[#allocation9 + $0x78]] }
  0xd0   :  { %s4856_s27 = sld [smem:[#allocation9 + $0xd]] }
  0xd1   :  { %9435 = sst [smem:[#allocation70_spill]] %s4845_s24 }
  0xd2   :  { %s4870_s8 = sld [smem:[#allocation9 + $0x31]] }
  0xd3   :  { %s4884_s25 = sld [smem:[#allocation9 + $0x55]] }
  0xd4   :  { %9436 = sst [smem:[#allocation71_spill]] %s4850_s22 }
  0xd5   :  { %9437 = sst [smem:[#allocation72_spill]] %s4853_s1 }
  0xd6   :  { %s4900_s26 = sld [smem:[#allocation9 + $0x79]]  ;;  %v689_v30 = vstv %s4856_s27 }
  0xd7   :  { %s4912_s7 = sld [smem:[#allocation9 + $0xe]]  ;;  %v5309_v36 = vmul.f32 %v689_v30, %v4681_v13  ;;  %v5318_v21 = vmul.f32 %v689_v30, %v4679_v12 }
  0xd8   :  { %s4926_s29 = sld [smem:[#allocation9 + $0x32]] }
  0xd9   :  { %s4936_s10 = sld [smem:[#allocation9 + $0x56]]  ;;  %v701_v11 = vstv %s4884_s25  ;;  %9546 = vst [vmem:[#allocation137_spill] sm:$0xff] %v5309_v36  ;;  %9547 = vst [vmem:[#allocation138_spill] sm:$0xff] %v5318_v21 }
  0xda   :  { %s4948_s11 = sld [smem:[#allocation9 + $0x7a]]  ;;  %v5330_v24 = vmul.f32 %v701_v11, %v4681_v13 }
  0xdb   :  { %s4960_s12 = sld [smem:[#allocation9 + $0xf]] }
  0xdc   :  { %s4972_s13 = sld [smem:[#allocation9 + $0x33]]  ;;  %9552 = vst [vmem:[#allocation141_spill] sm:$0xff] %v5330_v24  ;;  %v707_v30 = vstv %s4900_s26 }
  0xdd   :  { %9438 = sst [smem:[#allocation73_spill]] %s4912_s7  ;;  %v5359_v24 = vmul.f32 %v707_v30, %v4679_v12 }
  0xde   :  { %9439 = sst [smem:[#allocation74_spill]] %s4926_s29 }
  0xdf   :  { %9440 = sst [smem:[#allocation75_spill]] %s4936_s10  ;;  %9567 = vst [vmem:[#allocation144_spill] sm:$0xff] %v5359_v24  ;;  %v5396_v24 = vsel %vm177_vm2, %v2214_v19, 0.0 }
  0xe0   :  { %9442 = sst [smem:[#allocation77_spill]] %s4948_s11  ;;  %9581 = vst [vmem:[#allocation146_spill] sm:$0xff] %v5396_v24 }
  0xe1   :  { %9446 = sst [smem:[#allocation81_spill]] %s4960_s12 }
  0xe2   :  { %9448 = sst [smem:[#allocation83_spill]] %s4972_s13 }
  0xe3   :  { %s4988_s14 = sld [smem:[#allocation9 + $0x57]] }
  0xe4   :  { %s4998_s15 = sld [smem:[#allocation9 + $0x7b]] }
  0xe5   :  { %s5010_s0 = sld [smem:[#allocation9 + $0x11]] }
  0xe6   :  { %s5025_s16 = sld [smem:[#allocation9 + $0x35]] }
  0xe7   :  { %s5037_s17 = sld [smem:[#allocation9 + $0x59]] }
  0xe8   :  { %s9469_s3 = sld [smem:[#allocation30_spill]] }
  0xe9   :  { %9453 = sst [smem:[#allocation88_spill]] %s4988_s14 }
  0xea   :  { %9456 = sst [smem:[#allocation91_spill]] %s4998_s15 }
  0xeb   :  { %9460 = sst [smem:[#allocation95_spill]] %s5010_s0 }
  0xec   :  { %9463 = sst [smem:[#allocation98_spill]] %s5025_s16 }
  0xed   :  { %9467 = sst [smem:[#allocation102_spill]] %s5037_s17 }
  0xee   :  { %s5045_s18 = sld [smem:[#allocation9 + $0x7d]]  ;;  %v1059_v32 = vstv %s9469_s3 }
  0xef   :  { %s9474_s19 = sld [smem:[#allocation31_spill]]  ;;  %v5108_v27 = vmul.f32 %v1059_v32, %v4878_v39  ;;  %v5114_v58 = vmul.f32 %v1059_v32, %v4882_v40 }
  0xf0   :  { %s5060_s20 = sld [smem:[#allocation9 + $0x12]] }
  0xf1   :  { %s9479_s2 = sld [smem:[#allocation32_spill]]  ;;  %9489 = vst [vmem:[#allocation118_spill] sm:$0xff] %v5108_v27  ;;  %9491 = vst [vmem:[#allocation120_spill] sm:$0xff] %v5114_v58  ;;  %v146_v27 = vadd.s32 128, %v5084_v33  ;;  %v1671_v58 = vrot.slane %v4679_v12, 6 }
  0xf2   :  { %s5074_s4 = sld [smem:[#allocation9 + $0x36]] }
  0xf3   :  { %s5086_s5 = sld [smem:[#allocation9 + $0x5a]]  ;;  %v5168_v8 = vand.u32 127, %v146_v27 }
  0xf4   :  { %9470 = sst [smem:[#allocation30_spill]] %s5045_s18 }
  0xf5   :  { %v1065_v62 = vstv %s9474_s19  ;;  %s5105_s3 = sld [smem:[#allocation9 + $0x14]]  ;;  %vm176_vm6 = vcmp.lt.s32.totalorder %v5168_v8, 127  ;;  %vm174_vm8 = vcmp.ge.s32.totalorder %v5168_v8, 1  ;;  %vm180_vm11 = vcmp.ge.s32.totalorder %v5168_v8, 2 }
  0xf6   :  { %9476 = sst [smem:[#allocation31_spill]] %s5060_s20  ;;  %v5127_v10 = vmul.f32 %v1065_v62, %v4878_v39  ;;  %v5130_v32 = vmul.f32 %v1065_v62, %v4882_v40  ;;  %v1670_v62 = vrot.slane %v4681_v13, 6  ;;  %vm182_vm13 = vcmp.lt.s32.totalorder %v5168_v8, 126 }
  0xf7   :  { %v1071_v28 = vstv %s9479_s2  ;;  %s5134_s20 = sld [smem:[#allocation9 + $0x5c]] }
  0xf8   :  { %9480 = sst [smem:[#allocation32_spill]] %s5074_s4  ;;  %9496 = vst [vmem:[#allocation123_spill] sm:$0xff] %v5127_v10  ;;  %9497 = vst [vmem:[#allocation124_spill] sm:$0xff] %v5130_v32  ;;  %v5137_v57 = vmul.f32 %v1071_v28, %v4878_v39  ;;  %v5140_v25 = vmul.f32 %v1071_v28, %v4882_v40  ;;  %v5144_v10 = vsel %vm178_vm3, %v1579_v26, 0.0  ;;  %v5151_v32 = vsel %vm178_vm3, %v1578_v0, 0.0 }
  0xf9   :  { %9483 = sst [smem:[#allocation112_spill]] %s5086_s5  ;;  %9503 = vst [vmem:[#allocation128_spill] sm:$0xff] %v5144_v10  ;;  %9506 = vst [vmem:[#allocation130_spill] sm:$0xff] %v5151_v32  ;;  %v1851_v40 = vrot.slane %v4679_v12, 2  ;;  %v1850_v0 = vrot.slane %v4681_v13, 2  ;;  %v1943_v39 = vrot.slane %v4775_v22, 6 }
  0xfa   :  { %s5097_s4 = sld [smem:[#allocation9 + $0x7e]]  ;;  %9501 = vst [vmem:[#allocation126_spill] sm:$0xff] %v5137_v57  ;;  %9502 = vst [vmem:[#allocation127_spill] sm:$0xff] %v5140_v25  ;;  %v5173_v25 = vsel %vm177_vm2, %v1671_v58, 0.0  ;;  %v1942_v28 = vrot.slane %v4777_v23, 6  ;;  %v5182_v20 = vsel %vm177_vm2, %v1670_v62, 0.0 }
  0xfb   :  { %9488 = sst [smem:[#allocation117_spill]] %s5105_s3  ;;  %v5192_v44 = vsel %vm178_vm3, %v1851_v40, 0.0  ;;  %v5204_v5 = vsel %vm178_vm3, %v1850_v0, 0.0  ;;  %v5208_v40 = vsel %vm177_vm2, %v1943_v39, 0.0 }
  0xfc   :  { %s5124_s3 = sld [smem:[#allocation9 + $0x38]]  ;;  %v5219_v16 = vsel %vm177_vm2, %v1942_v28, 0.0  ;;  %v2215_v28 = vrot.slane %v4896_v45, 6 }
  0xfd   :  { %9500 = sst [smem:[#allocation125_spill]] %s5134_s20 }
  0xfe   :  { %s5147_s18 = sld [smem:[#allocation9 + $0x80]] }
  0xff   :  { %s5156_s17 = sld [smem:[#allocation9 + $0x15]] }
 0x100   :  { %9486 = sst [smem:[#allocation115_spill]] %s5097_s4 }
 0x101   :  { %s9509_s16 = sld [smem:[#allocation45_spill]] }
 0x102   :  { %9495 = sst [smem:[#allocation122_spill]] %s5124_s3 }
 0x103   :  { %s9512_s19 = sld [smem:[#allocation46_spill]] }
 0x104   :  { %9505 = sst [smem:[#allocation129_spill]] %s5147_s18 }
 0x105   :  { %9508 = sst [smem:[#allocation131_spill]] %s5156_s17 }
 0x106   :  { %s5166_s2 = sld [smem:[#allocation9 + $0x39]] }
 0x107   :  { %s5176_s4 = sld [smem:[#allocation9 + $0x5d]]  ;;  %v417_v27 = vstv %s9509_s16 }
 0x108   :  { %s5185_s3 = sld [smem:[#allocation9 + $0x81]]  ;;  %v5214_v26 = vmul.f32 %v417_v27, %v4596_v1  ;;  %v5224_v0 = vmul.f32 %v417_v27, %v4598_v2 }
 0x109   :  { %v423_v58 = vstv %s9512_s19  ;;  %s5194_s14 = sld [smem:[#allocation9 + $0x16]] }
 0x10a   :  { %s9521_s20 = sld [smem:[#allocation48_spill]]  ;;  %v5227_v39 = vmul.f32 %v423_v58, %v4596_v1  ;;  %v5230_v57 = vmul.f32 %v423_v58, %v4598_v2 }
 0x10b   :  { %s5210_s18 = sld [smem:[#allocation9 + $0x3a]] }
 0x10c   :  { %9513 = sst [smem:[#allocation45_spill]] %s5166_s2 }
 0x10d   :  { %9516 = sst [smem:[#allocation46_spill]] %s5176_s4 }
 0x10e   :  { %s9518_s2 = sld [smem:[#allocation47_spill]] }
 0x10f   :  { %9519 = sst [smem:[#allocation47_spill]] %s5185_s3  ;;  %s9577_s3 = smov 126  }
 0x110   :  { %9520 = sst [smem:[#allocation132_spill]] %s5194_s14  ;;  %v435_v62 = vstv %s9521_s20 }
 0x111   :  { %9526 = sst [smem:[#allocation48_spill]] %s5210_s18  ;;  %v5278_v31 = vmul.f32 %v435_v62, %v4596_v1  ;;  %v5281_v38 = vmul.f32 %v435_v62, %v4598_v2  ;;  %v5333_v62 = vmul.f32 %v701_v11, %v4679_v12 }
 0x112   :  { %s5221_s15 = sld [smem:[#allocation9 + $0x5e]] }
 0x113   :  { %s9532_s4 = sld [smem:[#allocation57_spill]]  ;;  %9553 = vst [vmem:[#allocation142_spill] sm:$0xff] %v5333_v62 }
 0x114   :  { %v429_v54 = vstv %s9518_s2  ;;  %s5233_s2 = sld [smem:[#allocation9 + $0x82]] }
 0x115   :  { %s5239_s18 = sld [smem:[#allocation9 + $0x17]]  ;;  %v5246_v27 = vmul.f32 %v429_v54, %v4596_v1  ;;  %v5249_v58 = vmul.f32 %v429_v54, %v4598_v2  ;;  %v695_v54 = vstv %s4870_s8  ;;  %s9167_s8 = smov 126  }
 0x116   :  { %s5253_s0 = sld [smem:[#allocation9 + $0x3b]]  ;;  %v5321_v14 = vmul.f32 %v695_v54, %v4681_v13  ;;  %v5324_v50 = vmul.f32 %v695_v54, %v4679_v12 }
 0x117   :  { %s5259_s21 = sld [smem:[#allocation9 + $0x5f]] }
 0x118   :  { %9528 = sst [smem:[#allocation133_spill]] %s5221_s15  ;;  %9548 = vst [vmem:[#allocation139_spill] sm:$0xff] %v5321_v14  ;;  %9550 = vst [vmem:[#allocation140_spill] sm:$0xff] %v5324_v50  ;;  %v5356_v50 = vmul.f32 %v707_v30, %v4681_v13  ;;  %v2394_v30 = vrot.slane %v4898_v46, 2  ;;  %v5392_v46 = vsel %vm177_vm2, %v2215_v28, 0.0 }
 0x119   :  { %s5265_s9 = sld [smem:[#allocation9 + $0x83]]  ;;  %9580 = vst [vmem:[#allocation145_spill] sm:$0xff] %v5392_v46 }
 0x11a   :  { %s5271_s17 = sld [smem:[#allocation9 + $0x18]]  ;;  %9565 = vst [vmem:[#allocation143_spill] sm:$0xff] %v5356_v50  ;;  %v2395_v50 = vrot.slane %v4896_v45, 2  ;;  %v5420_v45 = vsel %vm178_vm3, %v2394_v30, 0.0 }
 0x11b   :  { %s5285_s28 = sld [smem:[#allocation9 + $0x3c]]  ;;  %9587 = vst [vmem:[#allocation149_spill] sm:$0xff] %v5420_v45 }
 0x11c   :  { %9538 = sst [smem:[#allocation57_spill]] %s5253_s0  ;;  %v5416_v36 = vsel %vm178_vm3, %v2395_v50, 0.0  ;;  %v979_v50 = vstv %s5233_s2 }
 0x11d   :  { %9539 = sst [smem:[#allocation134_spill]] %s5259_s21  ;;  %s9161_s21 = smov 2   ;;  %9586 = vst [vmem:[#allocation148_spill] sm:$0xff] %v5416_v36  ;;  %v5463_v4 = vmul.f32 %v979_v50, %v4777_v23 }
 0x11e   :  { %1402 = vrot.lane.b32.xlu1 %v5094_v9, %s9161_s21  ;;  %1400 = vrot.lane.b32.xlu0 %v5122_v53, %s9161_s21  ;;  %s5297_s21 = sld [smem:[#allocation9 + $0x60]] }
 0x11f   :  { %s5303_s16 = sld [smem:[#allocation9 + $0x84]]  ;;  %9593 = vst [vmem:[#allocation155_spill] sm:$0xff] %v5463_v4 }
 0x120   :  { %s5311_s27 = sld [smem:[#allocation9 + $0x1a]] }
 0x121   :  { %s5327_s22 = sld [smem:[#allocation9 + $0x3e]] }
 0x122   :  { %1459 = vrot.lane.b32.xlu1 %v5094_v9, %s9167_s8  ;;  %1457 = vrot.lane.b32.xlu0 %v5122_v53, %s9167_s8  ;;  %s9554_s8 = sld [smem:[#allocation95_spill]] }
 0x123   :  { %s5337_s24 = sld [smem:[#allocation9 + $0x62]] }
 0x124   :  { %s5343_s19 = sld [smem:[#allocation9 + $0x86]] }
 0x125   :  { %s5349_s14 = sld [smem:[#allocation9 + $0x1b]] }
 0x126   :  { %1492 = vrot.lane.b32.xlu1 %v4598_v2, %s9563_s23  ;;  %1490 = vrot.lane.b32.xlu0 %v4596_v1, %s9563_s23  ;;  %s9564_s11 = sld [smem:[#allocation117_spill]] }
 0x127   :  { %s9569_s25 = sld [smem:[#allocation132_spill]] }
 0x128   :  { %s5363_s1 = sld [smem:[#allocation9 + $0x3f]] }
 0x129   :  { %s5369_s29 = sld [smem:[#allocation9 + $0x63]] }
 0x12a   :  { %s9573_s7 = sld [smem:[#allocation48_spill]]  ;;  %1548 = vrot.lane.b32.xlu1 %v4598_v2, %s9577_s3  ;;  %1546 = vrot.lane.b32.xlu0 %v4596_v1, %s9577_s3 }
 0x12b   :  { %9562 = sst [smem:[#allocation95_spill]] %s5349_s14 }
 0x12c   :  { %s5375_s15 = sld [smem:[#allocation9 + $0x1c]] }
 0x12d   :  { %s9574_s0 = sld [smem:[#allocation131_spill]]  ;;  %v961_v9 = vstv %s9569_s25 }
 0x12e   :  { %9570 = sst [smem:[#allocation117_spill]] %s5363_s1  ;;  %v5412_v62 = vmul.f32 %v961_v9, %v4777_v23  ;;  %v5425_v2 = vmul.f32 %v961_v9, %v4775_v22  ;;  %1584 = vrot.lane.b32.xlu1 %v5144_v10, %s9563_s23  ;;  %1582 = vrot.lane.b32.xlu0 %v5151_v32, %s9563_s23 }
 0x12f   :  { %9572 = sst [smem:[#allocation132_spill]] %s5369_s29 }
 0x130   :  { %s9575_s5 = sld [smem:[#allocation45_spill]]  ;;  %v967_v14 = vstv %s9573_s7  ;;  %9585 = vst [vmem:[#allocation147_spill] sm:$0xff] %v5412_v62  ;;  %9588 = vst [vmem:[#allocation150_spill] sm:$0xff] %v5425_v2  ;;  %v5466_v2 = vmul.f32 %v979_v50, %v4775_v22 }
 0x131   :  { %s9576_s6 = sld [smem:[#allocation46_spill]]  ;;  %v5428_v19 = vmul.f32 %v967_v14, %v4777_v23  ;;  %v5431_v1 = vmul.f32 %v967_v14, %v4775_v22 }
 0x132   :  { %s5381_s30 = sld [smem:[#allocation9 + $0x40]]  ;;  %v1145_v45 = vstv %s5375_s15  ;;  %1640 = vrot.lane.b32.xlu1 %v5144_v10, %s9577_s3  ;;  %1638 = vrot.lane.b32.xlu0 %v5151_v32, %s9577_s3  ;;  %9594 = vst [vmem:[#allocation156_spill] sm:$0xff] %v5466_v2 }
 0x133   :  { %s9578_s20 = sld [smem:[#allocation133_spill]]  ;;  %9589 = vst [vmem:[#allocation151_spill] sm:$0xff] %v5428_v19  ;;  %9590 = vst [vmem:[#allocation152_spill] sm:$0xff] %v5431_v1  ;;  %v352_v1 = vpop.permute.xlu1 %351  ;;  %v303_v19 = vpop.permute.xlu0 %302  ;;  %v5476_v11 = vmul.f32 %v1145_v45, %v4982_v15 }
 0x134   :  { %s9579_s26 = sld [smem:[#allocation47_spill]] }
 0x135   :  { %s5399_s25 = sld [smem:[#allocation9 + $0x87]]  ;;  %9596 = vst [vmem:[#allocation158_spill] sm:$0xff] %v5476_v11 }
 0x136   :  { %s9583_s12 = sld [smem:[#allocation57_spill]]  ;;  %1676 = vrot.lane.b32.xlu1 %v5173_v25, %s9563_s23  ;;  %1674 = vrot.lane.b32.xlu0 %v5182_v20, %s9563_s23 }
 0x137   :  { %s5408_s13 = sld [smem:[#allocation9 + $0x64]]  ;;  %v354_v53 = vpop.permute.xlu1 %353  ;;  %v305_v54 = vpop.permute.xlu0 %304 }
 0x138   :  { %s9584_s10 = sld [smem:[#allocation134_spill]]  ;;  %v1151_v14 = vstv %s5381_s30  ;;  %v357_v36 = vsel %vm175_vm4, %v354_v53, %v352_v1  ;;  %v307_v62 = vsel %vm306_vm5, %v303_v19, %v305_v54 }
 0x139   :  { %v973_v28 = vstv %s9578_s20  ;;  %s5422_s7 = sld [smem:[#allocation9 + $0x88]] }
 0x13a   :  { %v5439_v9 = vmul.f32 %v973_v28, %v4777_v23  ;;  %v5442_v30 = vmul.f32 %v973_v28, %v4775_v22  ;;  %s9597_s30 = sld [smem:[#allocation33_spill]]  ;;  %v5479_v23 = vmul.f32 %v1151_v14, %v4986_v18  ;;  %v5482_v22 = vmul.f32 %v1151_v14, %v4982_v15  ;;  %1732 = vrot.lane.b32.xlu1 %v5173_v25, %s9577_s3 }
 0x13b   :  { %9582 = sst [smem:[#allocation48_spill]] %s5399_s25  ;;  %v308_v14 = vsel %vm306_vm5, %v305_v54, %v303_v19  ;;  %v359_v28 = vsel %vm176_vm6, %v357_v36, 0.0  ;;  %v387_v2 = vpop.permute.xlu1 %386  ;;  %v385_v4 = vpop.permute.xlu0 %384  ;;  %1730 = vrot.lane.b32.xlu0 %v5182_v20, %s9577_s3 }
 0x13c   :  { %9591 = vst [vmem:[#allocation153_spill] sm:$0xff] %v5439_v9  ;;  %9592 = vst [vmem:[#allocation154_spill] sm:$0xff] %v5442_v30  ;;  %v5473_v30 = vmul.f32 %v1145_v45, %v4986_v18  ;;  %s9599_s15 = sld [smem:[#allocation34_spill]]  ;;  %v356_v45 = vsel %vm175_vm4, %v352_v1, %v354_v53  ;;  %v309_v50 = vsel %vm173_vm7, %v308_v14, 0.0  ;;  %v310_v53 = vsel %vm174_vm8, %v307_v62, 0.0 }
 0x13d   :  { %9598 = vst [vmem:[#allocation159_spill] sm:$0xff] %v5479_v23  ;;  %9600 = vst [vmem:[#allocation160_spill] sm:$0xff] %v5482_v22  ;;  %s9601_s2 = sld [smem:[#allocation35_spill]]  ;;  %v358_v9 = vsel %vm175_vm4, %v356_v45, 0.0 }
 0x13e   :  { %9595 = vst [vmem:[#allocation157_spill] sm:$0xff] %v5473_v30  ;;  %s9602_s20 = sld [smem:[#allocation36_spill]]  ;;  %1764 = vrot.lane.b32.xlu1 %v4679_v12, %s9563_s23 }
 0x13f   :  { %s9603_s25 = sld [smem:[#allocation37_spill]]  ;;  %1762 = vrot.lane.b32.xlu0 %v4681_v13, %s9563_s23 }
 0x140   :  { %s9604_s29 = sld [smem:[#allocation38_spill]]  ;;  %v9606_v54 = vstv %s9597_s30 }
 0x141   :  { %s9605_s1 = sld [smem:[#allocation39_spill]]  ;;  %v362_v1 = vmul.f32 %v9606_v54, %v358_v9  ;;  %v9607_v36 = vmov %v9606_v54 }
 0x142   :  { %s9608_s14 = sld [smem:[#allocation40_spill]]  ;;  %v363_v19 = vmul.f32 %v9607_v36, %v359_v28  ;;  %v9609_v45 = vstv %s9599_s15  ;;  %1820 = vrot.lane.b32.xlu1 %v4679_v12, %s9577_s3 }
 0x143   :  { %v368_v14 = vmul.f32 %v9609_v45, %v358_v9  ;;  %v9610_v21 = vmov %v9609_v45  ;;  %v9611_v62 = vstv %s9601_s2  ;;  %s9635_s30 = sld [smem:[#allocation49_spill]]  ;;  %1818 = vrot.lane.b32.xlu0 %v4681_v13, %s9577_s3 }
 0x144   :  { %v369_v32 = vmul.f32 %v9610_v21, %v359_v28  ;;  %v374_v10 = vmul.f32 %v9611_v62, %v358_v9  ;;  %v9612_v23 = vmov %v9611_v62  ;;  %v9613_v22 = vstv %s9602_s20  ;;  %s9636_s15 = sld [smem:[#allocation50_spill]] }
 0x145   :  { %v375_v30 = vmul.f32 %v9612_v23, %v359_v28  ;;  %v380_v11 = vmul.f32 %v9613_v22, %v358_v9  ;;  %v9614_v15 = vmov %v9613_v22  ;;  %v9615_v24 = vstv %s9603_s25  ;;  %v441_v22 = vpop.permute.xlu0 %440  ;;  %s9626_s25 = sld [smem:[#allocation44_spill]] }
 0x146   :  { %v381_v18 = vmul.f32 %v9614_v15, %v359_v28  ;;  %v313_v54 = vmul.f32 %v9615_v24, %v309_v50  ;;  %v9616_v46 = vmov %v9615_v24  ;;  %v9617_v36 = vstv %s9604_s29  ;;  %s9624_s29 = sld [smem:[#allocation42_spill]]  ;;  %1856 = vrot.lane.b32.xlu1 %v5192_v44, %s9563_s23 }
 0x147   :  { %v314_v17 = vmul.f32 %v9616_v46, %v310_v53  ;;  %v317_v29 = vmul.f32 %v9617_v36, %v309_v50  ;;  %v9618_v3 = vmov %v9617_v36  ;;  %v9619_v7 = vstv %s9605_s1  ;;  %s9623_s1 = sld [smem:[#allocation41_spill]]  ;;  %1854 = vrot.lane.b32.xlu0 %v5204_v5, %s9563_s23 }
 0x148   :  { %v318_v45 = vmul.f32 %v9618_v3, %v310_v53  ;;  %v321_v21 = vmul.f32 %v9619_v7, %v309_v50  ;;  %v9620_v63 = vmov %v9619_v7  ;;  %v9621_v6 = vstv %s9608_s14  ;;  %v443_v7 = vpop.permute.xlu1 %442  ;;  %s9625_s14 = sld [smem:[#allocation43_spill]] }
 0x149   :  { %v322_v62 = vmul.f32 %v9620_v63, %v310_v53  ;;  %v325_v23 = vmul.f32 %v9621_v6, %v309_v50  ;;  %v9622_v59 = vmov %v9621_v6  ;;  %v331_v15 = vadd.f32 %v4860_v34, %v313_v54  ;;  %s9637_s2 = sld [smem:[#allocation51_spill]] }
 0x14a   :  { %v326_v9 = vmul.f32 %v9622_v59, %v310_v53  ;;  %v332_v24 = vadd.f32 %v4863_v35, %v314_v17  ;;  %v337_v46 = vadd.f32 %v4873_v37, %v317_v29  ;;  %v338_v28 = vadd.f32 %v4890_v42, %v318_v45  ;;  %s9638_s20 = sld [smem:[#allocation52_spill]]  ;;  %1912 = vrot.lane.b32.xlu1 %v5192_v44, %s9577_s3 }
 0x14b   :  { %v343_v63 = vadd.f32 %v4887_v41, %v321_v21  ;;  %v344_v3 = vadd.f32 %v4893_v43, %v322_v62  ;;  %v349_v59 = vadd.f32 %v4903_v47, %v325_v23  ;;  %v364_v34 = vadd.f32 %v362_v1, %v331_v15  ;;  %1910 = vrot.lane.b32.xlu0 %v5204_v5, %s9577_s3 }
 0x14c   :  { %v350_v6 = vadd.f32 %v4906_v48, %v326_v9  ;;  %v365_v50 = vadd.f32 %v363_v19, %v332_v24  ;;  %v370_v35 = vadd.f32 %v368_v14, %v337_v46  ;;  %v371_v37 = vadd.f32 %v369_v32, %v338_v28  ;;  %v479_v28 = vpop.permute.xlu1 %478 }
 0x14d   :  { %v376_v42 = vadd.f32 %v374_v10, %v343_v63  ;;  %v377_v29 = vadd.f32 %v375_v30, %v344_v3  ;;  %v382_v17 = vadd.f32 %v380_v11, %v349_v59  ;;  %v388_v43 = vsel %vm306_vm5, %v385_v4, %v387_v2  ;;  %v477_v63 = vpop.permute.xlu0 %476 }
 0x14e   :  { %v383_v41 = vadd.f32 %v381_v18, %v350_v6  ;;  %v389_v47 = vsel %vm306_vm5, %v387_v2, %v385_v4  ;;  %v444_v48 = vsel %vm175_vm4, %v441_v22, %v443_v7  ;;  %v445_v10 = vsel %vm175_vm4, %v443_v7, %v441_v22  ;;  %1948 = vrot.lane.b32.xlu1 %v5208_v40, %s9563_s23 }
 0x14f   :  { %v390_v18 = vsel %vm173_vm7, %v389_v47, 0.0  ;;  %v391_v32 = vsel %vm174_vm8, %v388_v43, 0.0  ;;  %v446_v11 = vsel %vm175_vm4, %v444_v48, 0.0  ;;  %v447_v4 = vsel %vm176_vm6, %v445_v10, 0.0  ;;  %1946 = vrot.lane.b32.xlu0 %v5219_v16, %s9563_s23 }
 0x150   :  { %v9627_v2 = vstv %s9623_s1  ;;  %v9629_v19 = vstv %s9624_s29  ;;  %v9631_v45 = vstv %s9625_s14  ;;  %v9633_v9 = vstv %s9626_s25  ;;  %s9647_s1 = sld [smem:[#allocation53_spill]] }
 0x151   :  { %v394_v30 = vmul.f32 %v9627_v2, %v390_v18  ;;  %v9628_v53 = vmov %v9627_v2  ;;  %v400_v14 = vmul.f32 %v9629_v19, %v390_v18  ;;  %v9630_v54 = vmov %v9629_v19  ;;  %v533_v19 = vpop.permute.xlu0 %532  ;;  %s9648_s29 = sld [smem:[#allocation54_spill]] }
 0x152   :  { %v395_v1 = vmul.f32 %v9628_v53, %v391_v32  ;;  %v401_v36 = vmul.f32 %v9630_v54, %v391_v32  ;;  %v406_v21 = vmul.f32 %v9631_v45, %v390_v18  ;;  %v9632_v62 = vmov %v9631_v45  ;;  %s9649_s14 = sld [smem:[#allocation55_spill]]  ;;  %2004 = vrot.lane.b32.xlu1 %v5208_v40, %s9577_s3 }
 0x153   :  { %v407_v23 = vmul.f32 %v9632_v62, %v391_v32  ;;  %v412_v15 = vmul.f32 %v9633_v9, %v390_v18  ;;  %v9634_v24 = vmov %v9633_v9  ;;  %v396_v3 = vadd.f32 %v394_v30, %v364_v34  ;;  %s9650_s25 = sld [smem:[#allocation56_spill]]  ;;  %2002 = vrot.lane.b32.xlu0 %v5219_v16, %s9577_s3 }
 0x154   :  { %v413_v46 = vmul.f32 %v9634_v24, %v391_v32  ;;  %v397_v59 = vadd.f32 %v395_v1, %v365_v50  ;;  %v402_v6 = vadd.f32 %v400_v14, %v370_v35  ;;  %v403_v7 = vadd.f32 %v401_v36, %v371_v37  ;;  %v535_v1 = vpop.permute.xlu1 %534 }
 0x155   :  { %v408_v22 = vadd.f32 %v406_v21, %v376_v42  ;;  %v409_v43 = vadd.f32 %v407_v23, %v377_v29  ;;  %v414_v47 = vadd.f32 %v412_v15, %v382_v17  ;;  %v420_v10 = vadd.f32 %v5214_v26, %v396_v3 }
 0x156   :  { %v415_v48 = vadd.f32 %v413_v46, %v383_v41  ;;  %v421_v12 = vadd.f32 %v5224_v0, %v397_v59  ;;  %v426_v34 = vadd.f32 %v5227_v39, %v402_v6  ;;  %v427_v50 = vadd.f32 %v5230_v57, %v403_v7 }
 0x157   :  { %v432_v13 = vadd.f32 %v5246_v27, %v408_v22  ;;  %v433_v35 = vadd.f32 %v5249_v58, %v409_v43  ;;  %v438_v37 = vadd.f32 %v5278_v31, %v414_v47  ;;  %v9639_v26 = vstv %s9635_s30  ;;  %s9659_s30 = sld [smem:[#allocation58_spill]] }
 0x158   :  { %v439_v42 = vadd.f32 %v5281_v38, %v415_v48  ;;  %v450_v29 = vmul.f32 %v9639_v26, %v446_v11  ;;  %v9640_v17 = vmov %v9639_v26  ;;  %v9641_v41 = vstv %s9636_s15  ;;  %s9660_s15 = sld [smem:[#allocation59_spill]] }
 0x159   :  { %v451_v0 = vmul.f32 %v9640_v17, %v447_v4  ;;  %v456_v18 = vmul.f32 %v9641_v41, %v446_v11  ;;  %v9642_v39 = vmov %v9641_v41  ;;  %v9643_v57 = vstv %s9637_s2  ;;  %v569_v17 = vpop.permute.xlu0 %568  ;;  %s9661_s2 = sld [smem:[#allocation60_spill]] }
 0x15a   :  { %v457_v32 = vmul.f32 %v9642_v39, %v447_v4  ;;  %v462_v27 = vmul.f32 %v9643_v57, %v446_v11  ;;  %v9644_v58 = vmov %v9643_v57  ;;  %v9645_v2 = vstv %s9638_s20  ;;  %s9672_s20 = sld [smem:[#allocation62_spill]] }
 0x15b   :  { %v463_v31 = vmul.f32 %v9644_v58, %v447_v4  ;;  %v468_v38 = vmul.f32 %v9645_v2, %v446_v11  ;;  %v9646_v30 = vmov %v9645_v2  ;;  %v452_v14 = vadd.f32 %v450_v29, %v420_v10  ;;  %v571_v29 = vpop.permute.xlu1 %570 }
 0x15c   :  { %v469_v53 = vmul.f32 %v9646_v30, %v447_v4  ;;  %v453_v54 = vadd.f32 %v451_v0, %v421_v12  ;;  %v458_v36 = vadd.f32 %v456_v18, %v426_v34  ;;  %v459_v45 = vadd.f32 %v457_v32, %v427_v50 }
 0x15d   :  { %v464_v21 = vadd.f32 %v462_v27, %v432_v13  ;;  %v465_v62 = vadd.f32 %v463_v31, %v433_v35  ;;  %v470_v23 = vadd.f32 %v468_v38, %v438_v37  ;;  %v480_v11 = vsel %vm306_vm5, %v477_v63, %v479_v28 }
 0x15e   :  { %v471_v9 = vadd.f32 %v469_v53, %v439_v42  ;;  %v481_v4 = vsel %vm306_vm5, %v479_v28, %v477_v63  ;;  %v536_v15 = vsel %vm175_vm4, %v533_v19, %v535_v1  ;;  %v537_v24 = vsel %vm175_vm4, %v535_v1, %v533_v19 }
 0x15f   :  { %v482_v46 = vsel %vm173_vm7, %v481_v4, 0.0  ;;  %v483_v3 = vsel %vm174_vm8, %v480_v11, 0.0  ;;  %v538_v59 = vsel %vm175_vm4, %v536_v15, 0.0  ;;  %v539_v28 = vsel %vm176_vm6, %v537_v24, 0.0  ;;  %v627_v24 = vpop.permute.xlu1 %626 }
 0x160   :  { %v9651_v63 = vstv %s9647_s1  ;;  %v9653_v43 = vstv %s9648_s29  ;;  %v9655_v12 = vstv %s9649_s14  ;;  %v9657_v35 = vstv %s9650_s25  ;;  %s9673_s1 = sld [smem:[#allocation63_spill]] }
 0x161   :  { %v486_v6 = vmul.f32 %v9651_v63, %v482_v46  ;;  %v9652_v7 = vmov %v9651_v63  ;;  %v492_v47 = vmul.f32 %v9653_v43, %v482_v46  ;;  %v9654_v48 = vmov %v9653_v43  ;;  %s9674_s29 = sld [smem:[#allocation64_spill]] }
 0x162   :  { %v487_v22 = vmul.f32 %v9652_v7, %v483_v3  ;;  %v493_v10 = vmul.f32 %v9654_v48, %v483_v3  ;;  %v498_v34 = vmul.f32 %v9655_v12, %v482_v46  ;;  %v9656_v50 = vmov %v9655_v12  ;;  %s9683_s14 = sld [smem:[#allocation65_spill]] }
 0x163   :  { %v499_v13 = vmul.f32 %v9656_v50, %v483_v3  ;;  %v504_v37 = vmul.f32 %v9657_v35, %v482_v46  ;;  %v9658_v42 = vmov %v9657_v35  ;;  %v488_v0 = vadd.f32 %v486_v6, %v452_v14  ;;  %v9662_v14 = vld [vmem:[#allocation76_spill] sm:$0xff]  ;;  %v625_v46 = vpop.permute.xlu0 %624  ;;  %v4315_v50 = vld [vmem:[#allocation2 + $0x20] sm:$0xff]  ;;  %s9684_s25 = sld [smem:[#allocation66_spill]] }
 0x164   :  { %v505_v26 = vmul.f32 %v9658_v42, %v483_v3  ;;  %v489_v41 = vadd.f32 %v487_v22, %v453_v54  ;;  %v494_v18 = vadd.f32 %v492_v47, %v458_v36  ;;  %v495_v39 = vadd.f32 %v493_v10, %v459_v45  ;;  %v4314_v10 = vld [vmem:[#allocation2 + $0x28] sm:$0xff]  ;;  %2034 = vrot.lane.b32.xlu0 %v4315_v50, %s9563_s23 }
 0x165   :  { %v500_v32 = vadd.f32 %v498_v34, %v464_v21  ;;  %v501_v57 = vadd.f32 %v499_v13, %v465_v62  ;;  %v506_v27 = vadd.f32 %v504_v37, %v470_v23  ;;  %v512_v31 = vadd.f32 %v4918_v52, %v488_v0  ;;  %2036 = vrot.lane.b32.xlu1 %v4314_v10, %s9563_s23 }
 0x166   :  { %v507_v58 = vadd.f32 %v505_v26, %v471_v9  ;;  %v513_v2 = vadd.f32 %v4909_v49, %v489_v41  ;;  %v518_v38 = vadd.f32 %v4932_v56, %v494_v18  ;;  %v519_v30 = vadd.f32 %v4915_v51, %v495_v39 }
 0x167   :  { %v524_v53 = vadd.f32 %v4942_v60, %v500_v32  ;;  %v525_v1 = vadd.f32 %v4929_v55, %v501_v57  ;;  %v530_v19 = vadd.f32 %v4945_v61, %v506_v27  ;;  %v9663_v52 = vstv %s9532_s4  ;;  %s9671_s4 = sld [smem:[#allocation61_spill]] }
 0x168   :  { %v531_v54 = vadd.f32 %v9662_v14, %v507_v58  ;;  %v542_v36 = vmul.f32 %v9663_v52, %v538_v59  ;;  %v9664_v45 = vmov %v9663_v52  ;;  %v9665_v21 = vstv %s9659_s30  ;;  %2090 = vrot.lane.b32.xlu0 %v4315_v50, %s9577_s3  ;;  %s9685_s30 = sld [smem:[#allocation67_spill]]  ;;  %v9700_v50 = vld [vmem:[#allocation136_spill] sm:$0xff] }
 0x169   :  { %v543_v49 = vmul.f32 %v9664_v45, %v539_v28  ;;  %v548_v62 = vmul.f32 %v9665_v21, %v538_v59  ;;  %v9666_v56 = vmov %v9665_v21  ;;  %v9667_v51 = vstv %s9660_s15  ;;  %2092 = vrot.lane.b32.xlu1 %v4314_v10, %s9577_s3  ;;  %s9688_s15 = sld [smem:[#allocation68_spill]] }
 0x16a   :  { %v549_v23 = vmul.f32 %v9666_v56, %v539_v28  ;;  %v554_v55 = vmul.f32 %v9667_v51, %v538_v59  ;;  %v9668_v60 = vmov %v9667_v51  ;;  %v9669_v9 = vstv %s9661_s2  ;;  %v9686_v56 = vld [vmem:[#allocation80_spill] sm:$0xff]  ;;  %v9687_v51 = vld [vmem:[#allocation78_spill] sm:$0xff]  ;;  %s9705_s2 = sld [smem:[#allocation69_spill]] }
 0x16b   :  { %v555_v61 = vmul.f32 %v9668_v60, %v539_v28  ;;  %v560_v11 = vmul.f32 %v9669_v9, %v538_v59  ;;  %v9670_v4 = vmov %v9669_v9  ;;  %v544_v3 = vadd.f32 %v542_v36, %v512_v31  ;;  %v9689_v60 = vld [vmem:[#allocation82_spill] sm:$0xff]  ;;  %v9690_v9 = vld [vmem:[#allocation79_spill] sm:$0xff] }
 0x16c   :  { %v561_v15 = vmul.f32 %v9670_v4, %v539_v28  ;;  %v545_v63 = vadd.f32 %v543_v49, %v513_v2  ;;  %v550_v6 = vadd.f32 %v548_v62, %v518_v38  ;;  %v551_v7 = vadd.f32 %v549_v23, %v519_v30  ;;  %v9691_v4 = vld [vmem:[#allocation85_spill] sm:$0xff]  ;;  %2126 = vrot.lane.b32.xlu0 %v9700_v50, %s9563_s23 }
 0x16d   :  { %v556_v22 = vadd.f32 %v554_v55, %v524_v53  ;;  %v557_v43 = vadd.f32 %v555_v61, %v525_v1  ;;  %v562_v47 = vadd.f32 %v560_v11, %v530_v19  ;;  %v572_v59 = vsel %vm306_vm5, %v569_v17, %v571_v29  ;;  %v659_v1 = vpop.permute.xlu1 %658  ;;  %v657_v19 = vpop.permute.xlu0 %656 }
 0x16e   :  { %v563_v48 = vadd.f32 %v561_v15, %v531_v54  ;;  %v573_v28 = vsel %vm306_vm5, %v571_v29, %v569_v17  ;;  %v628_v12 = vsel %vm175_vm4, %v625_v46, %v627_v24  ;;  %v629_v34 = vsel %vm175_vm4, %v627_v24, %v625_v46  ;;  %v9692_v24 = vld [vmem:[#allocation84_spill] sm:$0xff] }
 0x16f   :  { %v574_v13 = vsel %vm173_vm7, %v573_v28, 0.0  ;;  %v575_v35 = vsel %vm174_vm8, %v572_v59, 0.0  ;;  %v630_v37 = vsel %vm175_vm4, %v628_v12, 0.0  ;;  %v631_v42 = vsel %vm176_vm6, %v629_v34, 0.0 }
 0x170   :  { %v9675_v26 = vstv %s9671_s4  ;;  %v9677_v41 = vstv %s9672_s20  ;;  %v9679_v57 = vstv %s9673_s1  ;;  %v9681_v2 = vstv %s9674_s29  ;;  %s9706_s4 = sld [smem:[#allocation70_spill]] }
 0x171   :  { %v578_v29 = vmul.f32 %v9675_v26, %v574_v13  ;;  %v9676_v17 = vmov %v9675_v26  ;;  %v584_v18 = vmul.f32 %v9677_v41, %v574_v13  ;;  %v9678_v39 = vmov %v9677_v41  ;;  %s9707_s20 = sld [smem:[#allocation71_spill]]  ;;  %2182 = vrot.lane.b32.xlu0 %v9700_v50, %s9577_s3 }
 0x172   :  { %v579_v0 = vmul.f32 %v9676_v17, %v575_v35  ;;  %v585_v32 = vmul.f32 %v9678_v39, %v575_v35  ;;  %v590_v27 = vmul.f32 %v9679_v57, %v574_v13  ;;  %v9680_v58 = vmov %v9679_v57  ;;  %v715_v39 = vpop.permute.xlu1 %714  ;;  %s9708_s1 = sld [smem:[#allocation72_spill]] }
 0x173   :  { %v591_v31 = vmul.f32 %v9680_v58, %v575_v35  ;;  %v596_v38 = vmul.f32 %v9681_v2, %v574_v13  ;;  %v9682_v30 = vmov %v9681_v2  ;;  %v580_v14 = vadd.f32 %v578_v29, %v544_v3  ;;  %v9693_v3 = vld [vmem:[#allocation90_spill] sm:$0xff]  ;;  %s9718_s29 = sld [smem:[#allocation73_spill]] }
 0x174   :  { %v597_v53 = vmul.f32 %v9682_v30, %v575_v35  ;;  %v581_v54 = vadd.f32 %v579_v0, %v545_v63  ;;  %v586_v52 = vadd.f32 %v584_v18, %v550_v6  ;;  %v587_v36 = vadd.f32 %v585_v32, %v551_v7  ;;  %v9694_v6 = vld [vmem:[#allocation89_spill] sm:$0xff]  ;;  %v713_v32 = vpop.permute.xlu0 %712 }
 0x175   :  { %v592_v45 = vadd.f32 %v590_v27, %v556_v22  ;;  %v593_v49 = vadd.f32 %v591_v31, %v557_v43  ;;  %v598_v21 = vadd.f32 %v596_v38, %v562_v47  ;;  %v604_v23 = vadd.f32 %v9686_v56, %v580_v14  ;;  %v9695_v22 = vld [vmem:[#allocation135_spill] sm:$0xff] }
 0x176   :  { %v599_v62 = vadd.f32 %v597_v53, %v563_v48  ;;  %v605_v55 = vadd.f32 %v9687_v51, %v581_v54  ;;  %v610_v61 = vadd.f32 %v9689_v60, %v586_v52  ;;  %v611_v11 = vadd.f32 %v9690_v9, %v587_v36  ;;  %2128 = vrot.lane.b32.xlu1 %v9695_v22, %s9563_s23 }
 0x177   :  { %v616_v15 = vadd.f32 %v9691_v4, %v592_v45  ;;  %v617_v46 = vadd.f32 %v9692_v24, %v593_v49  ;;  %v622_v63 = vadd.f32 %v9693_v3, %v598_v21  ;;  %v9696_v43 = vstv %s9683_s14  ;;  %v751_v3 = vpop.permute.xlu1 %750  ;;  %s9720_s14 = sld [smem:[#allocation74_spill]] }
 0x178   :  { %v623_v7 = vadd.f32 %v9694_v6, %v599_v62  ;;  %v634_v47 = vmul.f32 %v9696_v43, %v630_v37  ;;  %v9697_v48 = vmov %v9696_v43  ;;  %v9698_v59 = vstv %s9684_s25  ;;  %v9717_v6 = vld [vmem:[#allocation145_spill] sm:$0xff]  ;;  %s9721_s25 = sld [smem:[#allocation75_spill]] }
 0x179   :  { %v635_v10 = vmul.f32 %v9697_v48, %v631_v42  ;;  %v640_v28 = vmul.f32 %v9698_v59, %v630_v37  ;;  %v9699_v12 = vmov %v9698_v59  ;;  %v9701_v13 = vstv %s9685_s30  ;;  %s9724_s30 = sld [smem:[#allocation77_spill]] }
 0x17a   :  { %v641_v34 = vmul.f32 %v9699_v12, %v631_v42  ;;  %v646_v35 = vmul.f32 %v9701_v13, %v630_v37  ;;  %v9702_v26 = vmov %v9701_v13  ;;  %v9703_v17 = vstv %s9688_s15  ;;  %2184 = vrot.lane.b32.xlu1 %v9695_v22, %s9577_s3  ;;  %v9722_v13 = vld [vmem:[#allocation137_spill] sm:$0xff]  ;;  %s9739_s15 = sld [smem:[#allocation81_spill]] }
 0x17b   :  { %v647_v29 = vmul.f32 %v9702_v26, %v631_v42  ;;  %v652_v0 = vmul.f32 %v9703_v17, %v630_v37  ;;  %v9704_v41 = vmov %v9703_v17  ;;  %v636_v57 = vadd.f32 %v634_v47, %v604_v23  ;;  %v9723_v26 = vld [vmem:[#allocation138_spill] sm:$0xff]  ;;  %v9725_v17 = vld [vmem:[#allocation139_spill] sm:$0xff] }
 0x17c   :  { %v653_v18 = vmul.f32 %v9704_v41, %v631_v42  ;;  %v637_v27 = vadd.f32 %v635_v10, %v605_v55  ;;  %v642_v58 = vadd.f32 %v640_v28, %v610_v61  ;;  %v643_v31 = vadd.f32 %v641_v34, %v611_v11  ;;  %v9719_v10 = vld [vmem:[#allocation146_spill] sm:$0xff]  ;;  %v9726_v41 = vld [vmem:[#allocation140_spill] sm:$0xff] }
 0x17d   :  { %v648_v2 = vadd.f32 %v646_v35, %v616_v15  ;;  %v649_v38 = vadd.f32 %v647_v29, %v617_v46  ;;  %v654_v30 = vadd.f32 %v652_v0, %v622_v63  ;;  %v660_v37 = vsel %vm306_vm5, %v657_v19, %v659_v1  ;;  %v749_v63 = vpop.permute.xlu0 %748  ;;  %2218 = vrot.lane.b32.xlu0 %v9719_v10, %s9563_s23 }
 0x17e   :  { %v655_v53 = vadd.f32 %v653_v18, %v623_v7  ;;  %v661_v42 = vsel %vm306_vm5, %v659_v1, %v657_v19  ;;  %v716_v14 = vsel %vm175_vm4, %v713_v32, %v715_v39  ;;  %v717_v54 = vsel %vm175_vm4, %v715_v39, %v713_v32  ;;  %2220 = vrot.lane.b32.xlu1 %v9717_v6, %s9563_s23  ;;  %v9727_v39 = vld [vmem:[#allocation141_spill] sm:$0xff] }
 0x17f   :  { %v662_v52 = vsel %vm173_vm7, %v661_v42, 0.0  ;;  %v663_v36 = vsel %vm174_vm8, %v660_v37, 0.0  ;;  %v718_v45 = vsel %vm175_vm4, %v716_v14, 0.0  ;;  %v719_v1 = vsel %vm176_vm6, %v717_v54, 0.0 }
 0x180   :  { %v9709_v19 = vstv %s9705_s2  ;;  %v9711_v56 = vstv %s9706_s4  ;;  %v9713_v60 = vstv %s9707_s20  ;;  %v9715_v4 = vstv %s9708_s1  ;;  %s9740_s2 = sld [smem:[#allocation83_spill]] }
 0x181   :  { %v666_v49 = vmul.f32 %v9709_v19, %v662_v52  ;;  %v9710_v21 = vmov %v9709_v19  ;;  %v672_v23 = vmul.f32 %v9711_v56, %v662_v52  ;;  %v9712_v51 = vmov %v9711_v56  ;;  %2274 = vrot.lane.b32.xlu0 %v9719_v10, %s9577_s3  ;;  %s9741_s4 = sld [smem:[#allocation88_spill]] }
 0x182   :  { %v667_v62 = vmul.f32 %v9710_v21, %v663_v36  ;;  %v673_v55 = vmul.f32 %v9712_v51, %v663_v36  ;;  %v678_v61 = vmul.f32 %v9713_v60, %v662_v52  ;;  %v9714_v9 = vmov %v9713_v60  ;;  %2276 = vrot.lane.b32.xlu1 %v9717_v6, %s9577_s3  ;;  %v807_v60 = vpop.permute.xlu1 %806  ;;  %s9742_s20 = sld [smem:[#allocation91_spill]] }
 0x183   :  { %v679_v11 = vmul.f32 %v9714_v9, %v663_v36  ;;  %v684_v15 = vmul.f32 %v9715_v4, %v662_v52  ;;  %v9716_v24 = vmov %v9715_v4  ;;  %v668_v7 = vadd.f32 %v666_v49, %v636_v57  ;;  %v9728_v57 = vld [vmem:[#allocation142_spill] sm:$0xff]  ;;  %s9751_s1 = sld [smem:[#allocation98_spill]] }
 0x184   :  { %v685_v46 = vmul.f32 %v9716_v24, %v663_v36  ;;  %v669_v43 = vadd.f32 %v667_v62, %v637_v27  ;;  %v674_v47 = vadd.f32 %v672_v23, %v642_v58  ;;  %v675_v48 = vadd.f32 %v673_v55, %v643_v31  ;;  %v9729_v58 = vld [vmem:[#allocation143_spill] sm:$0xff] }
 0x185   :  { %v680_v59 = vadd.f32 %v678_v61, %v648_v2  ;;  %v681_v28 = vadd.f32 %v679_v11, %v649_v38  ;;  %v686_v12 = vadd.f32 %v684_v15, %v654_v30  ;;  %v692_v35 = vadd.f32 %v9722_v13, %v668_v7  ;;  %v9730_v2 = vld [vmem:[#allocation144_spill] sm:$0xff]  ;;  %v805_v61 = vpop.permute.xlu0 %804 }
 0x186   :  { %v687_v34 = vadd.f32 %v685_v46, %v655_v53  ;;  %v693_v29 = vadd.f32 %v9723_v26, %v669_v43  ;;  %v698_v0 = vadd.f32 %v9725_v17, %v674_v47  ;;  %v699_v18 = vadd.f32 %v9726_v41, %v675_v48  ;;  %v5818_v47 = vld [vmem:[#allocation2 + $0x38] sm:$0xff] }
 0x187   :  { %v704_v32 = vadd.f32 %v9727_v39, %v680_v59  ;;  %v705_v27 = vadd.f32 %v9728_v57, %v681_v28  ;;  %v710_v31 = vadd.f32 %v9729_v58, %v686_v12  ;;  %v9731_v30 = vstv %s9718_s29  ;;  %2308 = vrot.lane.b32.xlu1 %v5818_v47, %s9563_s23  ;;  %v5830_v28 = vld [vmem:[#allocation2 + $0x30] sm:$0xff]  ;;  %s9752_s29 = sld [smem:[#allocation102_spill]] }
 0x188   :  { %v711_v38 = vadd.f32 %v9730_v2, %v687_v34  ;;  %v722_v53 = vmul.f32 %v9731_v30, %v718_v45  ;;  %v9732_v37 = vmov %v9731_v30  ;;  %v9733_v14 = vstv %s9720_s14  ;;  %2306 = vrot.lane.b32.xlu0 %v5830_v28, %s9563_s23  ;;  %v843_v30 = vpop.permute.xlu1 %842  ;;  %s9755_s14 = sld [smem:[#allocation30_spill]] }
 0x189   :  { %v723_v42 = vmul.f32 %v9732_v37, %v719_v1  ;;  %v728_v54 = vmul.f32 %v9733_v14, %v718_v45  ;;  %v9734_v52 = vmov %v9733_v14  ;;  %v9735_v19 = vstv %s9721_s25  ;;  %s9773_s25 = sld [smem:[#allocation32_spill]] }
 0x18a   :  { %v729_v36 = vmul.f32 %v9734_v52, %v719_v1  ;;  %v734_v49 = vmul.f32 %v9735_v19, %v718_v45  ;;  %v9736_v21 = vmov %v9735_v19  ;;  %v9737_v56 = vstv %s9724_s30  ;;  %s9775_s30 = sld [smem:[#allocation115_spill]] }
 0x18b   :  { %v735_v62 = vmul.f32 %v9736_v21, %v719_v1  ;;  %v740_v23 = vmul.f32 %v9737_v56, %v718_v45  ;;  %v9738_v51 = vmov %v9737_v56  ;;  %v724_v9 = vadd.f32 %v722_v53, %v692_v35  ;;  %v841_v53 = vpop.permute.xlu0 %840  ;;  %2364 = vrot.lane.b32.xlu1 %v5818_v47, %s9577_s3  ;;  %v9753_v21 = vld [vmem:[#allocation94_spill] sm:$0xff]  ;;  %v9754_v56 = vld [vmem:[#allocation92_spill] sm:$0xff] }
 0x18c   :  { %v741_v55 = vmul.f32 %v9738_v51, %v719_v1  ;;  %v725_v11 = vadd.f32 %v723_v42, %v693_v29  ;;  %v730_v4 = vadd.f32 %v728_v54, %v698_v0  ;;  %v731_v15 = vadd.f32 %v729_v36, %v699_v18  ;;  %2362 = vrot.lane.b32.xlu0 %v5830_v28, %s9577_s3  ;;  %v9756_v51 = vld [vmem:[#allocation96_spill] sm:$0xff] }
 0x18d   :  { %v736_v24 = vadd.f32 %v734_v49, %v704_v32  ;;  %v737_v46 = vadd.f32 %v735_v62, %v705_v27  ;;  %v742_v7 = vadd.f32 %v740_v23, %v710_v31  ;;  %v752_v45 = vsel %vm306_vm5, %v749_v63, %v751_v3 }
 0x18e   :  { %v743_v43 = vadd.f32 %v741_v55, %v711_v38  ;;  %v753_v1 = vsel %vm306_vm5, %v751_v3, %v749_v63  ;;  %v808_v48 = vsel %vm175_vm4, %v805_v61, %v807_v60  ;;  %v809_v59 = vsel %vm175_vm4, %v807_v60, %v805_v61  ;;  %v9757_v60 = vld [vmem:[#allocation93_spill] sm:$0xff] }
 0x18f   :  { %v754_v12 = vsel %vm173_vm7, %v753_v1, 0.0  ;;  %v755_v34 = vsel %vm174_vm8, %v752_v45, 0.0  ;;  %v810_v3 = vsel %vm175_vm4, %v808_v48, 0.0  ;;  %v811_v63 = vsel %vm176_vm6, %v809_v59, 0.0 }
 0x190   :  { %v9743_v13 = vstv %s9739_s15  ;;  %v9745_v17 = vstv %s9740_s2  ;;  %v9747_v39 = vstv %s9741_s4  ;;  %v9749_v58 = vstv %s9742_s20  ;;  %s9785_s15 = sld [smem:[#allocation125_spill]] }
 0x191   :  { %v758_v35 = vmul.f32 %v9743_v13, %v754_v12  ;;  %v9744_v26 = vmov %v9743_v13  ;;  %v764_v0 = vmul.f32 %v9745_v17, %v754_v12  ;;  %v9746_v41 = vmov %v9745_v17  ;;  %s9786_s2 = sld [smem:[#allocation129_spill]] }
 0x192   :  { %v759_v29 = vmul.f32 %v9744_v26, %v755_v34  ;;  %v765_v18 = vmul.f32 %v9746_v41, %v755_v34  ;;  %v770_v32 = vmul.f32 %v9747_v39, %v754_v12  ;;  %v9748_v57 = vmov %v9747_v39  ;;  %s6148_s4 = sld [smem:[#allocation9 + $0x8c]] }
 0x193   :  { %v771_v27 = vmul.f32 %v9748_v57, %v755_v34  ;;  %v776_v31 = vmul.f32 %v9749_v58, %v754_v12  ;;  %v9750_v2 = vmov %v9749_v58  ;;  %v760_v37 = vadd.f32 %v758_v35, %v724_v9  ;;  %v9758_v9 = vld [vmem:[#allocation101_spill] sm:$0xff]  ;;  %v899_v58 = vpop.permute.xlu1 %898  ;;  %s6155_s20 = sld [smem:[#allocation9 + $0x21]] }
 0x194   :  { %v777_v38 = vmul.f32 %v9750_v2, %v755_v34  ;;  %v761_v42 = vadd.f32 %v759_v29, %v725_v11  ;;  %v766_v14 = vadd.f32 %v764_v0, %v730_v4  ;;  %v767_v54 = vadd.f32 %v765_v18, %v731_v15  ;;  %v9759_v4 = vld [vmem:[#allocation99_spill] sm:$0xff]  ;;  %v9767_v29 = vld [vmem:[#allocation149_spill] sm:$0xff] }
 0x195   :  { %v772_v52 = vadd.f32 %v770_v32, %v736_v24  ;;  %v773_v36 = vadd.f32 %v771_v27, %v737_v46  ;;  %v778_v19 = vadd.f32 %v776_v31, %v742_v7  ;;  %v784_v62 = vadd.f32 %v9753_v21, %v760_v37  ;;  %v9760_v24 = vld [vmem:[#allocation103_spill] sm:$0xff]  ;;  %v9761_v7 = vld [vmem:[#allocation100_spill] sm:$0xff]  ;;  %2398 = vrot.lane.b32.xlu0 %v9767_v29, %s9563_s23  ;;  %v897_v31 = vpop.permute.xlu0 %896 }
 0x196   :  { %v779_v49 = vadd.f32 %v777_v38, %v743_v43  ;;  %v785_v23 = vadd.f32 %v9754_v56, %v761_v42  ;;  %v790_v55 = vadd.f32 %v9756_v51, %v766_v14  ;;  %v791_v61 = vadd.f32 %v9757_v60, %v767_v54  ;;  %v9762_v43 = vld [vmem:[#allocation148_spill] sm:$0xff] }
 0x197   :  { %v796_v11 = vadd.f32 %v9758_v9, %v772_v52  ;;  %v797_v15 = vadd.f32 %v9759_v4, %v773_v36  ;;  %v802_v46 = vadd.f32 %v9760_v24, %v778_v19  ;;  %2400 = vrot.lane.b32.xlu1 %v9762_v43, %s9563_s23  ;;  %v9763_v1 = vstv %s9554_s8  ;;  %s9772_s8 = sld [smem:[#allocation31_spill]] }
 0x198   :  { %v803_v45 = vadd.f32 %v9761_v7, %v779_v49  ;;  %v814_v48 = vmul.f32 %v9763_v1, %v810_v3  ;;  %v9764_v59 = vmov %v9763_v1  ;;  %v9765_v34 = vstv %s9751_s1  ;;  %s9774_s23 = sld [smem:[#allocation112_spill]] }
 0x199   :  { %v815_v12 = vmul.f32 %v9764_v59, %v811_v63  ;;  %v820_v13 = vmul.f32 %v9765_v34, %v810_v3  ;;  %v9766_v35 = vmov %v9765_v34  ;;  %v9768_v17 = vstv %s9752_s29  ;;  %2454 = vrot.lane.b32.xlu0 %v9767_v29, %s9577_s3  ;;  %v931_v59 = vpop.permute.xlu1 %930  ;;  %s6163_s1 = sld [smem:[#allocation9 + $0x45]] }
 0x19a   :  { %v821_v26 = vmul.f32 %v9766_v35, %v811_v63  ;;  %v826_v0 = vmul.f32 %v9768_v17, %v810_v3  ;;  %v9769_v41 = vmov %v9768_v17  ;;  %v9770_v39 = vstv %s9755_s14  ;;  %s6166_s29 = sld [smem:[#allocation9 + $0x69]] }
 0x19b   :  { %v827_v18 = vmul.f32 %v9769_v41, %v811_v63  ;;  %v832_v32 = vmul.f32 %v9770_v39, %v810_v3  ;;  %v9771_v57 = vmov %v9770_v39  ;;  %v816_v2 = vadd.f32 %v814_v48, %v784_v62  ;;  %2456 = vrot.lane.b32.xlu1 %v9762_v43, %s9577_s3  ;;  %s9784_s3 = sld [smem:[#allocation122_spill]]  ;;  %v9787_v39 = vld [vmem:[#allocation106_spill] sm:$0xff] }
 0x19c   :  { %v833_v27 = vmul.f32 %v9771_v57, %v811_v63  ;;  %v817_v38 = vadd.f32 %v815_v12, %v785_v23  ;;  %v822_v37 = vadd.f32 %v820_v13, %v790_v55  ;;  %v823_v42 = vadd.f32 %v821_v26, %v791_v61  ;;  %v929_v12 = vpop.permute.xlu0 %928  ;;  %v9788_v57 = vld [vmem:[#allocation104_spill] sm:$0xff]  ;;  %s6177_s14 = sld [smem:[#allocation9 + $0x8d]] }
 0x19d   :  { %v828_v14 = vadd.f32 %v826_v0, %v796_v11  ;;  %v829_v54 = vadd.f32 %v827_v18, %v797_v15  ;;  %v834_v52 = vadd.f32 %v832_v32, %v802_v46  ;;  %v844_v3 = vsel %vm306_vm5, %v841_v53, %v843_v30 }
 0x19e   :  { %v835_v36 = vadd.f32 %v833_v27, %v803_v45  ;;  %v845_v63 = vsel %vm306_vm5, %v843_v30, %v841_v53  ;;  %v900_v19 = vsel %vm175_vm4, %v897_v31, %v899_v58  ;;  %v901_v49 = vsel %vm175_vm4, %v899_v58, %v897_v31  ;;  %v9789_v58 = vld [vmem:[#allocation109_spill] sm:$0xff] }
 0x19f   :  { %v846_v21 = vsel %vm173_vm7, %v845_v63, 0.0  ;;  %v847_v62 = vsel %vm174_vm8, %v844_v3, 0.0  ;;  %v902_v56 = vsel %vm175_vm4, %v900_v19, 0.0  ;;  %v903_v30 = vsel %vm176_vm6, %v901_v49, 0.0 }
 0x1a0   :  { %v9776_v53 = vstv %s9772_s8  ;;  %v9778_v60 = vstv %s9773_s25  ;;  %v9780_v4 = vstv %s9774_s23  ;;  %v9782_v7 = vstv %s9775_s30  ;;  %s6181_s8 = sld [smem:[#allocation9 + $0x22]] }
 0x1a1   :  { %v850_v23 = vmul.f32 %v9776_v53, %v846_v21  ;;  %v9777_v51 = vmov %v9776_v53  ;;  %v856_v61 = vmul.f32 %v9778_v60, %v846_v21  ;;  %v9779_v9 = vmov %v9778_v60  ;;  %s6187_s25 = sld [smem:[#allocation9 + $0x46]] }
 0x1a2   :  { %v851_v55 = vmul.f32 %v9777_v51, %v847_v62  ;;  %v857_v11 = vmul.f32 %v9779_v9, %v847_v62  ;;  %v862_v15 = vmul.f32 %v9780_v4, %v846_v21  ;;  %v9781_v24 = vmov %v9780_v4  ;;  %s6189_s23 = sld [smem:[#allocation9 + $0x6a]] }
 0x1a3   :  { %v863_v46 = vmul.f32 %v9781_v24, %v847_v62  ;;  %v868_v45 = vmul.f32 %v9782_v7, %v846_v21  ;;  %v9783_v1 = vmov %v9782_v7  ;;  %v852_v34 = vadd.f32 %v850_v23, %v816_v2  ;;  %v9790_v2 = vld [vmem:[#allocation105_spill] sm:$0xff]  ;;  %v987_v7 = vpop.permute.xlu1 %986  ;;  %s6198_s30 = sld [smem:[#allocation9 + $0x8e]] }
 0x1a4   :  { %v869_v48 = vmul.f32 %v9783_v1, %v847_v62  ;;  %v853_v13 = vadd.f32 %v851_v55, %v817_v38  ;;  %v858_v35 = vadd.f32 %v856_v61, %v822_v37  ;;  %v859_v26 = vadd.f32 %v857_v11, %v823_v42  ;;  %v9791_v37 = vld [vmem:[#allocation111_spill] sm:$0xff]  ;;  %v9792_v42 = vld [vmem:[#allocation108_spill] sm:$0xff] }
 0x1a5   :  { %v864_v17 = vadd.f32 %v862_v15, %v828_v14  ;;  %v865_v0 = vadd.f32 %v863_v46, %v829_v54  ;;  %v870_v41 = vadd.f32 %v868_v45, %v834_v52  ;;  %v876_v32 = vadd.f32 %v9787_v39, %v852_v34  ;;  %v9793_v14 = vld [vmem:[#allocation113_spill] sm:$0xff]  ;;  %v9794_v54 = vld [vmem:[#allocation110_spill] sm:$0xff]  ;;  %v985_v45 = vpop.permute.xlu0 %984 }
 0x1a6   :  { %v871_v18 = vadd.f32 %v869_v48, %v835_v36  ;;  %v877_v27 = vadd.f32 %v9788_v57, %v853_v13  ;;  %v882_v31 = vadd.f32 %v9789_v58, %v858_v35  ;;  %v883_v38 = vadd.f32 %v9790_v2, %v859_v26 }
 0x1a7   :  { %v888_v3 = vadd.f32 %v9791_v37, %v864_v17  ;;  %v889_v63 = vadd.f32 %v9792_v42, %v865_v0  ;;  %v894_v19 = vadd.f32 %v9793_v14, %v870_v41  ;;  %v9795_v52 = vstv %s9564_s11  ;;  %s6102_s11 = sld [smem:[#allocation9 + $0x89]] }
 0x1a8   :  { %v895_v49 = vadd.f32 %v9794_v54, %v871_v18  ;;  %v906_v21 = vmul.f32 %v9795_v52, %v902_v56  ;;  %v9796_v36 = vmov %v9795_v52  ;;  %v9797_v53 = vstv %s9784_s3  ;;  %s6200_s3 = sld [smem:[#allocation9 + $0x23]] }
 0x1a9   :  { %v907_v62 = vmul.f32 %v9796_v36, %v903_v30  ;;  %v912_v23 = vmul.f32 %v9797_v53, %v902_v56  ;;  %v9798_v51 = vmov %v9797_v53  ;;  %v9799_v60 = vstv %s9785_s15  ;;  %v1023_v36 = vpop.permute.xlu1 %1022  ;;  %s6203_s15 = sld [smem:[#allocation9 + $0x47]] }
 0x1aa   :  { %v913_v55 = vmul.f32 %v9798_v51, %v903_v30  ;;  %v918_v61 = vmul.f32 %v9799_v60, %v902_v56  ;;  %v9800_v9 = vmov %v9799_v60  ;;  %v9801_v4 = vstv %s9786_s2  ;;  %s6206_s2 = sld [smem:[#allocation9 + $0x6b]] }
 0x1ab   :  { %v919_v11 = vmul.f32 %v9800_v9, %v903_v30  ;;  %v924_v15 = vmul.f32 %v9801_v4, %v902_v56  ;;  %v9802_v24 = vmov %v9801_v4  ;;  %v908_v1 = vadd.f32 %v906_v21, %v876_v32  ;;  %v9811_v4 = vld [vmem:[#allocation147_spill] sm:$0xff] }
 0x1ac   :  { %v925_v46 = vmul.f32 %v9802_v24, %v903_v30  ;;  %v909_v48 = vadd.f32 %v907_v62, %v877_v27  ;;  %v914_v34 = vadd.f32 %v912_v23, %v882_v31  ;;  %v915_v13 = vadd.f32 %v913_v55, %v883_v38  ;;  %v1021_v62 = vpop.permute.xlu0 %1020  ;;  %v9812_v24 = vld [vmem:[#allocation150_spill] sm:$0xff] }
 0x1ad   :  { %v920_v35 = vadd.f32 %v918_v61, %v888_v3  ;;  %v921_v26 = vadd.f32 %v919_v11, %v889_v63  ;;  %v926_v17 = vadd.f32 %v924_v15, %v894_v19  ;;  %v932_v56 = vsel %vm306_vm5, %v929_v12, %v931_v59 }
 0x1ae   :  { %v927_v0 = vadd.f32 %v925_v46, %v895_v49  ;;  %v933_v30 = vsel %vm306_vm5, %v931_v59, %v929_v12  ;;  %v988_v41 = vsel %vm175_vm4, %v985_v45, %v987_v7  ;;  %v989_v18 = vsel %vm175_vm4, %v987_v7, %v985_v45  ;;  %v9813_v7 = vld [vmem:[#allocation151_spill] sm:$0xff] }
 0x1af   :  { %v934_v39 = vsel %vm173_vm7, %v933_v30, 0.0  ;;  %v935_v32 = vsel %vm174_vm8, %v932_v56, 0.0  ;;  %v990_v57 = vsel %vm175_vm4, %v988_v41, 0.0  ;;  %v991_v27 = vsel %vm176_vm6, %v989_v18, 0.0 }
 0x1b0   :  { %v9803_v58 = vstv %s9574_s0  ;;  %v9805_v2 = vstv %s9575_s5  ;;  %v9807_v42 = vstv %s9576_s6  ;;  %v9809_v54 = vstv %s9579_s26  ;;  %s9859_s6 = sld [smem:[#allocation132_spill]] }
 0x1b1   :  { %v938_v59 = vmul.f32 %v9803_v58, %v934_v39  ;;  %v9804_v12 = vmov %v9803_v58  ;;  %v944_v38 = vmul.f32 %v9805_v2, %v934_v39  ;;  %v9806_v37 = vmov %v9805_v2  ;;  %s6112_s0 = sld [smem:[#allocation9 + $0x66]] }
 0x1b2   :  { %v939_v31 = vmul.f32 %v9804_v12, %v935_v32  ;;  %v945_v3 = vmul.f32 %v9806_v37, %v935_v32  ;;  %v950_v63 = vmul.f32 %v9807_v42, %v934_v39  ;;  %v9808_v14 = vmov %v9807_v42  ;;  %s6127_s5 = sld [smem:[#allocation9 + $0x43]] }
 0x1b3   :  { %v951_v19 = vmul.f32 %v9808_v14, %v935_v32  ;;  %v956_v49 = vmul.f32 %v9809_v54, %v934_v39  ;;  %v9810_v52 = vmov %v9809_v54  ;;  %v940_v53 = vadd.f32 %v938_v59, %v908_v1  ;;  %v9814_v1 = vld [vmem:[#allocation152_spill] sm:$0xff]  ;;  %v1079_v54 = vpop.permute.xlu1 %1078  ;;  %s6143_s26 = sld [smem:[#allocation9 + $0x44]] }
 0x1b4   :  { %v957_v21 = vmul.f32 %v9810_v52, %v935_v32  ;;  %v941_v23 = vadd.f32 %v939_v31, %v909_v48  ;;  %v946_v51 = vadd.f32 %v944_v38, %v914_v34  ;;  %v947_v55 = vadd.f32 %v945_v3, %v915_v13  ;;  %v9815_v34 = vld [vmem:[#allocation153_spill] sm:$0xff]  ;;  %v9816_v13 = vld [vmem:[#allocation154_spill] sm:$0xff] }
 0x1b5   :  { %v952_v60 = vadd.f32 %v950_v63, %v920_v35  ;;  %v953_v61 = vadd.f32 %v951_v19, %v921_v26  ;;  %v958_v9 = vadd.f32 %v956_v49, %v926_v17  ;;  %v964_v15 = vadd.f32 %v9811_v4, %v940_v53  ;;  %v9817_v35 = vld [vmem:[#allocation155_spill] sm:$0xff]  ;;  %v9818_v26 = vld [vmem:[#allocation156_spill] sm:$0xff]  ;;  %v1077_v49 = vpop.permute.xlu0 %1076 }
 0x1b6   :  { %v959_v11 = vadd.f32 %v957_v21, %v927_v0  ;;  %v965_v46 = vadd.f32 %v9812_v24, %v941_v23  ;;  %v970_v45 = vadd.f32 %v9813_v7, %v946_v51  ;;  %v971_v48 = vadd.f32 %v9814_v1, %v947_v55 }
 0x1b7   :  { %v976_v56 = vadd.f32 %v9815_v34, %v952_v60  ;;  %v977_v30 = vadd.f32 %v9816_v13, %v953_v61  ;;  %v982_v41 = vadd.f32 %v9817_v35, %v958_v9  ;;  %v9819_v17 = vstv %s5239_s18  ;;  %s6120_s18 = sld [smem:[#allocation9 + $0x1f]] }
 0x1b8   :  { %v983_v18 = vadd.f32 %v9818_v26, %v959_v11  ;;  %v994_v39 = vmul.f32 %v9819_v17, %v990_v57  ;;  %v9820_v0 = vmov %v9819_v17  ;;  %v9821_v58 = vstv %s9583_s12  ;;  %s6104_s12 = sld [smem:[#allocation9 + $0x1e]] }
 0x1b9   :  { %v995_v32 = vmul.f32 %v9820_v0, %v991_v27  ;;  %v1000_v59 = vmul.f32 %v9821_v58, %v990_v57  ;;  %v9822_v12 = vmov %v9821_v58  ;;  %v9823_v2 = vstv %s9584_s10  ;;  %s3940_s10 = sld [smem:[#allocation9 + $0x65]] }
 0x1ba   :  { %v1001_v31 = vmul.f32 %v9822_v12, %v991_v27  ;;  %v1006_v38 = vmul.f32 %v9823_v2, %v990_v57  ;;  %v9824_v37 = vmov %v9823_v2  ;;  %v9825_v42 = vstv %s5265_s9  ;;  %s9855_s9 = sld [smem:[#allocation95_spill]] }
 0x1bb   :  { %v1007_v3 = vmul.f32 %v9824_v37, %v991_v27  ;;  %v1012_v63 = vmul.f32 %v9825_v42, %v990_v57  ;;  %v9826_v14 = vmov %v9825_v42  ;;  %v996_v52 = vadd.f32 %v994_v39, %v964_v15  ;;  %v9835_v37 = vld [vmem:[#allocation119_spill] sm:$0xff]  ;;  %v9836_v42 = vld [vmem:[#allocation116_spill] sm:$0xff] }
 0x1bc   :  { %v1013_v19 = vmul.f32 %v9826_v14, %v991_v27  ;;  %v997_v21 = vadd.f32 %v995_v32, %v965_v46  ;;  %v1002_v53 = vadd.f32 %v1000_v59, %v970_v45  ;;  %v1003_v23 = vadd.f32 %v1001_v31, %v971_v48  ;;  %v9837_v14 = vld [vmem:[#allocation120_spill] sm:$0xff] }
 0x1bd   :  { %v1008_v51 = vadd.f32 %v1006_v38, %v976_v56  ;;  %v1009_v55 = vadd.f32 %v1007_v3, %v977_v30  ;;  %v1014_v60 = vadd.f32 %v1012_v63, %v982_v41  ;;  %v1024_v57 = vsel %vm306_vm5, %v1021_v62, %v1023_v36 }
 0x1be   :  { %v1015_v61 = vadd.f32 %v1013_v19, %v983_v18  ;;  %v1025_v27 = vsel %vm306_vm5, %v1023_v36, %v1021_v62  ;;  %v1080_v9 = vsel %vm175_vm4, %v1077_v49, %v1079_v54  ;;  %v1081_v11 = vsel %vm175_vm4, %v1079_v54, %v1077_v49  ;;  %v9838_v54 = vld [vmem:[#allocation118_spill] sm:$0xff] }
 0x1bf   :  { %v1026_v4 = vsel %vm173_vm7, %v1025_v27, 0.0  ;;  %v1027_v15 = vsel %vm174_vm8, %v1024_v57, 0.0  ;;  %v1082_v24 = vsel %vm175_vm4, %v1080_v9, 0.0  ;;  %v1083_v46 = vsel %vm176_vm6, %v1081_v11, 0.0 }
 0x1c0   :  { %v9827_v7 = vstv %s5271_s17  ;;  %v9829_v1 = vstv %s5285_s28  ;;  %v9831_v13 = vstv %s5297_s21  ;;  %v9833_v26 = vstv %s5303_s16  ;;  %s9858_s28 = sld [smem:[#allocation117_spill]] }
 0x1c1   :  { %v1030_v36 = vmul.f32 %v9827_v7, %v1026_v4  ;;  %v9828_v62 = vmov %v9827_v7  ;;  %v1036_v48 = vmul.f32 %v9829_v1, %v1026_v4  ;;  %v9830_v34 = vmov %v9829_v1  ;;  %s9860_s21 = sld [smem:[#allocation48_spill]] }
 0x1c2   :  { %v1031_v45 = vmul.f32 %v9828_v62, %v1027_v15  ;;  %v1037_v56 = vmul.f32 %v9830_v34, %v1027_v15  ;;  %v1042_v30 = vmul.f32 %v9831_v13, %v1026_v4  ;;  %v9832_v35 = vmov %v9831_v13  ;;  %s6118_s17 = sld [smem:[#allocation9 + $0x8a]] }
 0x1c3   :  { %v1043_v41 = vmul.f32 %v9832_v35, %v1027_v15  ;;  %v1048_v18 = vmul.f32 %v9833_v26, %v1026_v4  ;;  %v9834_v17 = vmov %v9833_v26  ;;  %v1032_v0 = vadd.f32 %v1030_v36, %v996_v52  ;;  %v9839_v52 = vld [vmem:[#allocation124_spill] sm:$0xff]  ;;  %v1115_v35 = vpop.permute.xlu1 %1114  ;;  %s6129_s16 = sld [smem:[#allocation9 + $0x67]] }
 0x1c4   :  { %v1049_v39 = vmul.f32 %v9834_v17, %v1027_v15  ;;  %v1033_v32 = vadd.f32 %v1031_v45, %v997_v21  ;;  %v1038_v58 = vadd.f32 %v1036_v48, %v1002_v53  ;;  %v1039_v59 = vadd.f32 %v1037_v56, %v1003_v23  ;;  %v9840_v53 = vld [vmem:[#allocation123_spill] sm:$0xff]  ;;  %v9851_v26 = vld [vmem:[#allocation87_spill] sm:$0xff] }
 0x1c5   :  { %v1044_v12 = vadd.f32 %v1042_v30, %v1008_v51  ;;  %v1045_v31 = vadd.f32 %v1043_v41, %v1009_v55  ;;  %v1050_v2 = vadd.f32 %v1048_v18, %v1014_v60  ;;  %v1056_v3 = vadd.f32 %v9835_v37, %v1032_v0  ;;  %v9841_v51 = vld [vmem:[#allocation127_spill] sm:$0xff]  ;;  %v9842_v60 = vld [vmem:[#allocation126_spill] sm:$0xff]  ;;  %v1113_v41 = vpop.permute.xlu0 %1112 }
 0x1c6   :  { %v1051_v38 = vadd.f32 %v1049_v39, %v1015_v61  ;;  %v1057_v63 = vadd.f32 %v9836_v42, %v1033_v32  ;;  %v1062_v19 = vadd.f32 %v9837_v14, %v1038_v58  ;;  %v1063_v49 = vadd.f32 %v9838_v54, %v1039_v59  ;;  %v9853_v39 = vld [vmem:[#allocation86_spill] sm:$0xff] }
 0x1c7   :  { %v1068_v21 = vadd.f32 %v9839_v52, %v1044_v12  ;;  %v1069_v23 = vadd.f32 %v9840_v53, %v1045_v31  ;;  %v1074_v55 = vadd.f32 %v9841_v51, %v1050_v2  ;;  %v9843_v57 = vstv %s5311_s27  ;;  %s6140_s27 = sld [smem:[#allocation9 + $0x20]] }
 0x1c8   :  { %v1075_v61 = vadd.f32 %v9842_v60, %v1051_v38  ;;  %v1086_v27 = vmul.f32 %v9843_v57, %v1082_v24  ;;  %v9844_v9 = vmov %v9843_v57  ;;  %v9845_v4 = vstv %s5327_s22  ;;  %s3938_s22 = sld [smem:[#allocation9 + $0x1d]] }
 0x1c9   :  { %v1087_v11 = vmul.f32 %v9844_v9, %v1083_v46  ;;  %v1092_v15 = vmul.f32 %v9845_v4, %v1082_v24  ;;  %v9846_v7 = vmov %v9845_v4  ;;  %v9847_v62 = vstv %s5337_s24  ;;  %s3939_s24 = sld [smem:[#allocation9 + $0x41]] }
 0x1ca   :  { %v1093_v36 = vmul.f32 %v9846_v7, %v1083_v46  ;;  %v1098_v45 = vmul.f32 %v9847_v62, %v1082_v24  ;;  %v9848_v1 = vmov %v9847_v62  ;;  %v9849_v34 = vstv %s5343_s19  ;;  %s6136_s19 = sld [smem:[#allocation9 + $0x8b]] }
 0x1cb   :  { %v1099_v48 = vmul.f32 %v9848_v1, %v1083_v46  ;;  %v1104_v56 = vmul.f32 %v9849_v34, %v1082_v24  ;;  %v9850_v13 = vmov %v9849_v34  ;;  %v9852_v18 = vstv %s5408_s13  ;;  %s6110_s13 = sld [smem:[#allocation9 + $0x42]] }
 0x1cc   :  { %v1105_v30 = vmul.f32 %v9850_v13, %v1083_v46  ;;  %v1158_v17 = vmul.f32 %v9852_v18, %v9851_v26  ;;  %v9854_v0 = vmov %v9852_v18  ;;  %v9856_v58 = vstv %s5422_s7  ;;  %s6146_s7 = sld [smem:[#allocation9 + $0x68]] }
 0x1cd   :  { %v1159_v32 = vmul.f32 %v9854_v0, %v9853_v39  ;;  %v1164_v59 = vmul.f32 %v9856_v58, %v9851_v26  ;;  %v9857_v12 = vmov %v9856_v58  ;;  %v1088_v24 = vadd.f32 %v1086_v27, %v1056_v3  ;;  %v9870_v26 = vld [vmem:[#allocation160_spill] sm:$0xff]  ;;  %v9872_v58 = vld [vmem:[#allocation159_spill] sm:$0xff] }
 0x1ce   :  { %v1165_v31 = vmul.f32 %v9857_v12, %v9853_v39  ;;  %v1089_v46 = vadd.f32 %v1087_v11, %v1057_v63  ;;  %v1094_v2 = vadd.f32 %v1092_v15, %v1062_v19  ;;  %v1095_v38 = vadd.f32 %v1093_v36, %v1063_v49  ;;  %v9871_v39 = vld [vmem:[#allocation157_spill] sm:$0xff] }
 0x1cf   :  { %v1100_v37 = vadd.f32 %v1098_v45, %v1068_v21  ;;  %v1101_v42 = vadd.f32 %v1099_v48, %v1069_v23  ;;  %v1116_v14 = vsel %vm306_vm5, %v1113_v41, %v1115_v35  ;;  %v1117_v54 = vsel %vm306_vm5, %v1115_v35, %v1113_v41  ;;  %v9869_v35 = vld [vmem:[#allocation158_spill] sm:$0xff] }
 0x1d0   :  { %v1106_v52 = vadd.f32 %v1104_v56, %v1074_v55  ;;  %v1107_v53 = vadd.f32 %v1105_v30, %v1075_v61  ;;  %v1118_v3 = vsel %vm173_vm7, %v1117_v54, 0.0  ;;  %v1119_v63 = vsel %vm174_vm8, %v1116_v14, 0.0 }
 0x1d1   :  { %v9861_v19 = vstv %s9855_s9  ;;  %v9863_v21 = vstv %s9858_s28  ;;  %v9865_v9 = vstv %s9859_s6  ;;  %v9867_v55 = vstv %s9860_s21  ;;  %s6208_s9 = sld [smem:[#allocation9 + $0x8f]] }
 0x1d2   :  { %v1122_v51 = vmul.f32 %v9861_v19, %v1118_v3  ;;  %v9862_v49 = vmov %v9861_v19  ;;  %v1128_v23 = vmul.f32 %v9863_v21, %v1118_v3  ;;  %v9864_v57 = vmov %v9863_v21  ;;  %s6218_s28 = sld [smem:[#allocation11]] }
 0x1d3   :  { %v1123_v60 = vmul.f32 %v9862_v49, %v1119_v63  ;;  %v1129_v27 = vmul.f32 %v9864_v57, %v1119_v63  ;;  %v1134_v11 = vmul.f32 %v9865_v9, %v1118_v3  ;;  %v9866_v4 = vmov %v9865_v9  ;;  %s6223_s6 = sld [smem:[#allocation11 + $0x1]] }
 0x1d4   :  { %v1135_v15 = vmul.f32 %v9866_v4, %v1119_v63  ;;  %v1140_v61 = vmul.f32 %v9867_v55, %v1118_v3  ;;  %v9868_v7 = vmov %v9867_v55  ;;  %v1124_v62 = vadd.f32 %v1122_v51, %v1088_v24  ;;  %v1171_v24 = vpop.permute.xlu1 %1170  ;;  %s6226_s21 = sld [smem:[#allocation11 + $0x2]] }
 0x1d5   :  { %v1141_v36 = vmul.f32 %v9868_v7, %v1119_v63  ;;  %v1125_v45 = vadd.f32 %v1123_v60, %v1089_v46  ;;  %v1130_v1 = vadd.f32 %v1128_v23, %v1094_v2  ;;  %v1131_v48 = vadd.f32 %v1129_v27, %v1095_v38  ;;  %v1169_v46 = vpop.permute.xlu0 %1168 }
 0x1d6   :  { %v1136_v34 = vadd.f32 %v1134_v11, %v1100_v37  ;;  %v1137_v56 = vadd.f32 %v1135_v15, %v1101_v42  ;;  %v1142_v13 = vadd.f32 %v1140_v61, %v1106_v52  ;;  %v1148_v0 = vadd.f32 %v9871_v39, %v1124_v62 }
 0x1d7   :  { %v1143_v30 = vadd.f32 %v1141_v36, %v1107_v53  ;;  %v1149_v41 = vadd.f32 %v9869_v35, %v1125_v45  ;;  %v1155_v18 = vadd.f32 %v9870_v26, %v1131_v48  ;;  %v1154_v12 = vadd.f32 %v9872_v58, %v1130_v1 }
 0x1d8   :  { %v1161_v14 = vadd.f32 %v1159_v32, %v1137_v56  ;;  %v1160_v3 = vadd.f32 %v1158_v17, %v1136_v34  ;;  %v1166_v63 = vadd.f32 %v1164_v59, %v1142_v13  ;;  %v1172_v2 = vsel %vm175_vm4, %v1169_v46, %v1171_v24  ;;  %v1203_v32 = vpop.permute.xlu1 %1202 }
 0x1d9   :  { %v1167_v54 = vadd.f32 %v1165_v31, %v1143_v30  ;;  %v1173_v38 = vsel %vm175_vm4, %v1171_v24, %v1169_v46  ;;  %v1177_v17 = vstv %s3938_s22  ;;  %v1201_v59 = vpop.permute.xlu0 %1200  ;;  %v1183_v31 = vstv %s3939_s24  ;;  %s6233_s22 = sld [smem:[#allocation11 + $0x3]] }
 0x1da   :  { %v1189_v37 = vstv %s3940_s10  ;;  %v1174_v42 = vsel %vm175_vm4, %v1172_v2, 0.0  ;;  %v1175_v52 = vsel %vm176_vm6, %v1173_v38, 0.0  ;;  %v1195_v53 = vstv %s6102_s11  ;;  %s6239_s24 = sld [smem:[#allocation9 + $0x90]] }
 0x1db   :  { %v1204_v19 = vsel %vm306_vm5, %v1201_v59, %v1203_v32  ;;  %v1205_v51 = vsel %vm306_vm5, %v1203_v32, %v1201_v59  ;;  %v1178_v49 = vmul.f32 %v1177_v17, %v1174_v42  ;;  %v1179_v60 = vmul.f32 %v1177_v17, %v1175_v52  ;;  %s6243_s10 = sld [smem:[#allocation9 + $0xb4]] }
 0x1dc   :  { %v1184_v21 = vmul.f32 %v1183_v31, %v1174_v42  ;;  %v1190_v23 = vmul.f32 %v1189_v37, %v1174_v42  ;;  %v1185_v57 = vmul.f32 %v1183_v31, %v1175_v52  ;;  %v1191_v27 = vmul.f32 %v1189_v37, %v1175_v52  ;;  %s6245_s11 = sld [smem:[#allocation9 + $0xd8]] }
 0x1dd   :  { %v1209_v9 = vstv %s6104_s12  ;;  %v1206_v11 = vsel %vm173_vm7, %v1205_v51, 0.0  ;;  %v1207_v4 = vsel %vm174_vm8, %v1204_v19, 0.0  ;;  %v1196_v15 = vmul.f32 %v1195_v53, %v1174_v42  ;;  %s6248_s12 = sld [smem:[#allocation9 + $0xfc]] }
 0x1de   :  { %v1197_v55 = vmul.f32 %v1195_v53, %v1175_v52  ;;  %v1215_v61 = vstv %s6110_s13  ;;  %v1221_v7 = vstv %s6112_s0  ;;  %v1180_v36 = vadd.f32 %v1178_v49, %v1148_v0  ;;  %s6257_s13 = sld [smem:[#allocation9 + $0x91]] }
 0x1df   :  { %v1181_v62 = vadd.f32 %v1179_v60, %v1149_v41  ;;  %v1186_v45 = vadd.f32 %v1184_v21, %v1154_v12  ;;  %v1192_v1 = vadd.f32 %v1190_v23, %v1160_v3  ;;  %v1187_v48 = vadd.f32 %v1185_v57, %v1155_v18  ;;  %v1259_v3 = vpop.permute.xlu1 %1258  ;;  %v1257_v18 = vpop.permute.xlu0 %1256  ;;  %s6259_s0 = sld [smem:[#allocation9 + $0xb5]] }
 0x1e0   :  { %v1227_v34 = vstv %s6118_s17  ;;  %v1210_v56 = vmul.f32 %v1209_v9, %v1206_v11  ;;  %v1211_v13 = vmul.f32 %v1209_v9, %v1207_v4  ;;  %v1216_v30 = vmul.f32 %v1215_v61, %v1206_v11  ;;  %s6263_s17 = sld [smem:[#allocation9 + $0xd9]] }
 0x1e1   :  { %v1217_v35 = vmul.f32 %v1215_v61, %v1207_v4  ;;  %v1223_v26 = vmul.f32 %v1221_v7, %v1207_v4  ;;  %v1233_v39 = vstv %s6120_s18  ;;  %v1193_v0 = vadd.f32 %v1191_v27, %v1161_v14  ;;  %s6273_s18 = sld [smem:[#allocation9 + $0xfd]] }
 0x1e2   :  { %v1198_v41 = vadd.f32 %v1196_v15, %v1166_v63  ;;  %v1199_v58 = vadd.f32 %v1197_v55, %v1167_v54  ;;  %v1222_v12 = vmul.f32 %v1221_v7, %v1206_v11  ;;  %v1228_v24 = vmul.f32 %v1227_v34, %v1206_v11 }
 0x1e3   :  { %v1229_v46 = vmul.f32 %v1227_v34, %v1207_v4  ;;  %v1239_v2 = vstv %s6127_s5  ;;  %v1245_v38 = vstv %s6129_s16  ;;  %v1212_v17 = vadd.f32 %v1210_v56, %v1180_v36  ;;  %v1295_v11 = vpop.permute.xlu1 %1294  ;;  %v1293_v4 = vpop.permute.xlu0 %1292  ;;  %s6276_s5 = sld [smem:[#allocation9 + $0x92]] }
 0x1e4   :  { %v1213_v32 = vadd.f32 %v1211_v13, %v1181_v62  ;;  %v1234_v59 = vmul.f32 %v5830_v28, %v1233_v39  ;;  %v1235_v31 = vmul.f32 %v5818_v47, %v1233_v39  ;;  %v1218_v37 = vadd.f32 %v1216_v30, %v1186_v45  ;;  %s6278_s16 = sld [smem:[#allocation9 + $0xb6]] }
 0x1e5   :  { %v1219_v14 = vadd.f32 %v1217_v35, %v1187_v48  ;;  %v1225_v63 = vadd.f32 %v1223_v26, %v1193_v0  ;;  %v1251_v54 = vstv %s6136_s19  ;;  %v1241_v42 = vmul.f32 %v5818_v47, %v1239_v2  ;;  %s6280_s19 = sld [smem:[#allocation9 + $0xda]] }
 0x1e6   :  { %v1247_v52 = vmul.f32 %v5818_v47, %v1245_v38  ;;  %v1260_v53 = vsel %vm175_vm4, %v1257_v18, %v1259_v3  ;;  %v1261_v19 = vsel %vm175_vm4, %v1259_v3, %v1257_v18  ;;  %v1224_v51 = vadd.f32 %v1222_v12, %v1192_v1 }
 0x1e7   :  { %v1230_v49 = vadd.f32 %v1228_v24, %v1198_v41  ;;  %v1231_v60 = vadd.f32 %v1229_v46, %v1199_v58  ;;  %v1240_v21 = vmul.f32 %v5830_v28, %v1239_v2  ;;  %v1237_v23 = vadd.f32 %v1235_v31, %v1213_v32 }
 0x1e8   :  { %v1246_v57 = vmul.f32 %v5830_v28, %v1245_v38  ;;  %v1252_v27 = vmul.f32 %v5830_v28, %v1251_v54  ;;  %v1253_v9 = vmul.f32 %v5818_v47, %v1251_v54  ;;  %v1265_v15 = vstv %s6140_s27  ;;  %s6284_s27 = sld [smem:[#allocation9 + $0xfe]] }
 0x1e9   :  { %v1271_v55 = vstv %s6143_s26  ;;  %v1262_v61 = vsel %vm175_vm4, %v1260_v53, 0.0  ;;  %v1263_v7 = vsel %vm176_vm6, %v1261_v19, 0.0  ;;  %v1243_v36 = vadd.f32 %v1241_v42, %v1219_v14  ;;  %s6290_s26 = sld [smem:[#allocation9 + $0x93]] }
 0x1ea   :  { %v1249_v62 = vadd.f32 %v1247_v52, %v1225_v63  ;;  %v1277_v45 = vstv %s6146_s7  ;;  %v1283_v1 = vstv %s6148_s4  ;;  %v1236_v47 = vadd.f32 %v1234_v59, %v1212_v17  ;;  %s6298_s7 = sld [smem:[#allocation9 + $0xb7]] }
 0x1eb   :  { %v1242_v28 = vadd.f32 %v1240_v21, %v1218_v37  ;;  %v1296_v48 = vsel %vm306_vm5, %v1293_v4, %v1295_v11  ;;  %v1297_v34 = vsel %vm306_vm5, %v1295_v11, %v1293_v4  ;;  %v1266_v56 = vmul.f32 %v1265_v15, %v1262_v61  ;;  %s6302_s4 = sld [smem:[#allocation9 + $0xdb]] }
 0x1ec   :  { %v1267_v13 = vmul.f32 %v1265_v15, %v1263_v7  ;;  %v1272_v30 = vmul.f32 %v1271_v55, %v1262_v61  ;;  %v1273_v35 = vmul.f32 %v1271_v55, %v1263_v7  ;;  %v1255_v26 = vadd.f32 %v1253_v9, %v1231_v60 }
 0x1ed   :  { %v1248_v39 = vadd.f32 %v1246_v57, %v1224_v51  ;;  %v1254_v0 = vadd.f32 %v1252_v27, %v1230_v49  ;;  %v1278_v41 = vmul.f32 %v1277_v45, %v1262_v61  ;;  %v1279_v58 = vmul.f32 %v1277_v45, %v1263_v7  ;;  %v1349_v57 = vpop.permute.xlu0 %1348 }
 0x1ee   :  { %v1301_v12 = vstv %s6155_s20  ;;  %v1298_v3 = vsel %vm173_vm7, %v1297_v34, 0.0  ;;  %v1299_v18 = vsel %vm174_vm8, %v1296_v48, 0.0  ;;  %v1284_v24 = vmul.f32 %v1283_v1, %v1262_v61  ;;  %v9873_v61 = vld [vmem:[#allocation107_spill] sm:$0xff]  ;;  %s6314_s20 = sld [smem:[#allocation9 + $0xff]] }
 0x1ef   :  { %v1285_v46 = vmul.f32 %v1283_v1, %v1263_v7  ;;  %v1307_v2 = vstv %s6163_s1  ;;  %v1313_v38 = vstv %s6166_s29  ;;  %v1268_v17 = vadd.f32 %v1266_v56, %v1236_v47  ;;  %s6322_s1 = sld [smem:[#allocation9 + $0x94]] }
 0x1f0   :  { %v1269_v32 = vadd.f32 %v1267_v13, %v1237_v23  ;;  %v1274_v59 = vadd.f32 %v1272_v30, %v1242_v28  ;;  %v1275_v31 = vadd.f32 %v1273_v35, %v1243_v36  ;;  %v1280_v37 = vadd.f32 %v1278_v41, %v1248_v39  ;;  %v1351_v23 = vpop.permute.xlu1 %1350  ;;  %v9874_v36 = vld [vmem:[#allocation97_spill] sm:$0xff]  ;;  %s6324_s29 = sld [smem:[#allocation9 + $0xb8]] }
 0x1f1   :  { %v1319_v14 = vstv %s6177_s14  ;;  %v1302_v63 = vmul.f32 %v1301_v12, %v1298_v3  ;;  %v1303_v54 = vmul.f32 %v1301_v12, %v1299_v18  ;;  %v1281_v42 = vadd.f32 %v1279_v58, %v1249_v62  ;;  %s6327_s14 = sld [smem:[#allocation9 + $0xdc]] }
 0x1f2   :  { %v1308_v52 = vmul.f32 %v1307_v2, %v1298_v3  ;;  %v1309_v53 = vmul.f32 %v1307_v2, %v1299_v18  ;;  %v1325_v19 = vstv %s6181_s8  ;;  %v1286_v51 = vadd.f32 %v1284_v24, %v1254_v0  ;;  %s6335_s8 = sld [smem:[#allocation9 + $0x100]] }
 0x1f3   :  { %v1287_v49 = vadd.f32 %v1285_v46, %v1255_v26  ;;  %v1314_v60 = vmul.f32 %v1313_v38, %v1298_v3  ;;  %v1315_v21 = vmul.f32 %v1313_v38, %v1299_v18  ;;  %v1320_v27 = vmul.f32 %v1319_v14, %v1298_v3 }
 0x1f4   :  { %v1321_v9 = vmul.f32 %v1319_v14, %v1299_v18  ;;  %v1331_v11 = vstv %s6187_s25  ;;  %v1337_v4 = vstv %s6189_s23  ;;  %v1304_v15 = vadd.f32 %v1302_v63, %v1268_v17  ;;  %s6337_s25 = sld [smem:[#allocation9 + $0x95]] }
 0x1f5   :  { %v1305_v55 = vadd.f32 %v1303_v54, %v1269_v32  ;;  %v1326_v7 = vmul.f32 %v1325_v19, %v9873_v61  ;;  %v1327_v62 = vmul.f32 %v1325_v19, %v9874_v36  ;;  %v1310_v45 = vadd.f32 %v1308_v52, %v1274_v59  ;;  %v1403_v52 = vpop.permute.xlu1 %1402  ;;  %s6340_s23 = sld [smem:[#allocation9 + $0xb9]] }
 0x1f6   :  { %v1311_v1 = vadd.f32 %v1309_v53, %v1275_v31  ;;  %v1352_v47 = vsel %vm175_vm4, %v1349_v57, %v1351_v23  ;;  %v1353_v28 = vsel %vm175_vm4, %v1351_v23, %v1349_v57  ;;  %v1317_v48 = vadd.f32 %v1315_v21, %v1281_v42  ;;  %v1401_v53 = vpop.permute.xlu0 %1400 }
 0x1f7   :  { %v1333_v34 = vmul.f32 %v1331_v11, %v9874_v36  ;;  %v1339_v56 = vmul.f32 %v1337_v4, %v9874_v36  ;;  %v1343_v13 = vstv %s6198_s30  ;;  %v1316_v30 = vadd.f32 %v1314_v60, %v1280_v37  ;;  %s6342_s30 = sld [smem:[#allocation9 + $0xdd]] }
 0x1f8   :  { %v1322_v35 = vadd.f32 %v1320_v27, %v1286_v51  ;;  %v1323_v26 = vadd.f32 %v1321_v9, %v1287_v49  ;;  %v1332_v39 = vmul.f32 %v1331_v11, %v9873_v61  ;;  %v1329_v0 = vadd.f32 %v1327_v62, %v1305_v55 }
 0x1f9   :  { %v1357_v41 = vstv %s6200_s3  ;;  %v1354_v58 = vsel %vm175_vm4, %v1352_v47, 0.0  ;;  %v1355_v12 = vsel %vm176_vm6, %v1353_v28, 0.0  ;;  %v1338_v3 = vmul.f32 %v1337_v4, %v9873_v61  ;;  %s6345_s3 = sld [smem:[#allocation9 + $0x101]] }
 0x1fa   :  { %v1344_v18 = vmul.f32 %v1343_v13, %v9873_v61  ;;  %v1363_v24 = vstv %s6203_s15  ;;  %v1369_v46 = vstv %s6206_s2  ;;  %v1335_v2 = vadd.f32 %v1333_v34, %v1311_v1  ;;  %s6349_s15 = sld [smem:[#allocation9 + $0x96]] }
 0x1fb   :  { %v1341_v38 = vadd.f32 %v1339_v56, %v1317_v48  ;;  %v1345_v17 = vmul.f32 %v1343_v13, %v9874_v36  ;;  %v1375_v32 = vstv %s6208_s9  ;;  %v1328_v59 = vadd.f32 %v1326_v7, %v1304_v15  ;;  %s6356_s2 = sld [smem:[#allocation9 + $0xba]] }
 0x1fc   :  { %v1334_v31 = vadd.f32 %v1332_v39, %v1310_v45  ;;  %v1358_v37 = vmul.f32 %v1357_v41, %v1354_v58  ;;  %v1359_v14 = vmul.f32 %v1357_v41, %v1355_v12  ;;  %v1364_v63 = vmul.f32 %v1363_v24, %v1354_v58  ;;  %s6358_s9 = sld [smem:[#allocation9 + $0xde]] }
 0x1fd   :  { %v1365_v54 = vmul.f32 %v1363_v24, %v1355_v12  ;;  %v1371_v42 = vmul.f32 %v1369_v46, %v1355_v12  ;;  %v1340_v19 = vadd.f32 %v1338_v3, %v1316_v30  ;;  %v1346_v51 = vadd.f32 %v1344_v18, %v1322_v35 }
 0x1fe   :  { %v1370_v49 = vmul.f32 %v1369_v46, %v1354_v58  ;;  %v1376_v60 = vmul.f32 %v1375_v32, %v1354_v58  ;;  %v1347_v21 = vadd.f32 %v1345_v17, %v1323_v26  ;;  %v1381_v23 = vstv %s6218_s28  ;;  %s6366_s28 = sld [smem:[#allocation9 + $0x102]] }
 0x1ff   :  { %v1361_v57 = vadd.f32 %v1359_v14, %v1329_v0  ;;  %v1377_v27 = vmul.f32 %v1375_v32, %v1355_v12  ;;  %v1405_v9 = vsel %vm1404_vm9, %v1401_v53, %v1403_v52  ;;  %v1406_v11 = vsel %vm1404_vm9, %v1403_v52, %v1401_v53  ;;  %v1460_v32 = vpop.permute.xlu1 %1459 }
 0x200   :  { %v1360_v4 = vadd.f32 %v1358_v37, %v1328_v59  ;;  %v1366_v15 = vadd.f32 %v1364_v63, %v1334_v31  ;;  %v1367_v55 = vadd.f32 %v1365_v54, %v1335_v2  ;;  %v1373_v61 = vadd.f32 %v1371_v42, %v1341_v38  ;;  %v1458_v31 = vpop.permute.xlu0 %1457 }
 0x201   :  { %v1372_v7 = vadd.f32 %v1370_v49, %v1340_v19  ;;  %v1378_v36 = vadd.f32 %v1376_v60, %v1346_v51  ;;  %v1385_v62 = vstv %s6223_s6  ;;  %v1389_v45 = vstv %s6226_s21  ;;  %v9875_v60 = vld [vmem:[#allocation114_spill] sm:$0xff]  ;;  %s6374_s6 = sld [smem:[#allocation9 + $0x97]] }
 0x202   :  { %v1410_v1 = vstv %s6239_s24  ;;  %v1416_v47 = vstv %s6243_s10  ;;  %v1407_v28 = vsel %vm179_vm10, %v1406_v11, 0.0  ;;  %v1408_v48 = vsel %vm180_vm11, %v1405_v9, 0.0  ;;  %s6376_s21 = sld [smem:[#allocation9 + $0xbb]] }
 0x203   :  { %v1379_v34 = vadd.f32 %v1377_v27, %v1347_v21  ;;  %v1383_v56 = vadd.f32 %v1381_v23, %v1361_v57  ;;  %v1393_v13 = vstv %s6233_s22  ;;  %v1422_v30 = vstv %s6245_s11  ;;  %s6379_s22 = sld [smem:[#allocation9 + $0xdf]] }
 0x204   :  { %v1387_v35 = vadd.f32 %v1385_v62, %v1367_v55  ;;  %v1391_v26 = vadd.f32 %v1389_v45, %v1373_v61  ;;  %v1428_v39 = vstv %s6248_s12  ;;  %v1382_v0 = vadd.f32 %v1381_v23, %v1360_v4  ;;  %s6387_s24 = sld [smem:[#allocation9 + $0x103]] }
 0x205   :  { %v1386_v41 = vadd.f32 %v1385_v62, %v1366_v15  ;;  %v1411_v58 = vmul.f32 %v1410_v1, %v1407_v28  ;;  %v1412_v12 = vmul.f32 %v1410_v1, %v1408_v48  ;;  %v1417_v3 = vmul.f32 %v1416_v47, %v1407_v28  ;;  %v9876_v15 = vld [vmem:[#allocation121_spill] sm:$0xff]  ;;  %v1493_v1 = vpop.permute.xlu1 %1492  ;;  %s6389_s10 = sld [smem:[#allocation9 + $0x98]] }
 0x206   :  { %v1390_v18 = vadd.f32 %v1389_v45, %v1372_v7  ;;  %v1418_v24 = vmul.f32 %v1416_v47, %v1408_v48  ;;  %v1423_v46 = vmul.f32 %v1422_v30, %v1407_v28  ;;  %v1424_v2 = vmul.f32 %v1422_v30, %v1408_v48  ;;  %v1491_v47 = vpop.permute.xlu0 %1490  ;;  %s6392_s11 = sld [smem:[#allocation9 + $0xbc]] }
 0x207   :  { %v1395_v38 = vadd.f32 %v1393_v13, %v1379_v34  ;;  %v1394_v17 = vadd.f32 %v1393_v13, %v1378_v36  ;;  %v1434_v59 = vstv %s6257_s13  ;;  %v1429_v37 = vmul.f32 %v1428_v39, %v1407_v28  ;;  %s6394_s12 = sld [smem:[#allocation9 + $0xe0]] }
 0x208   :  { %v1430_v14 = vmul.f32 %v1428_v39, %v1408_v48  ;;  %v1440_v63 = vstv %s6259_s0  ;;  %v1413_v54 = vadd.f32 %v1411_v58, %v1382_v0  ;;  %v1414_v42 = vadd.f32 %v1412_v12, %v1383_v56  ;;  %s6397_s13 = sld [smem:[#allocation9 + $0x104]] }
 0x209   :  { %v1419_v52 = vadd.f32 %v1417_v3, %v1386_v41  ;;  %v1446_v53 = vstv %s6263_s17  ;;  %v1420_v19 = vadd.f32 %v1418_v24, %v1387_v35  ;;  %v1425_v51 = vadd.f32 %v1423_v46, %v1390_v18  ;;  %s6402_s0 = sld [smem:[#allocation9 + $0x99]] }
 0x20a   :  { %v1426_v49 = vadd.f32 %v1424_v2, %v1391_v26  ;;  %v1436_v21 = vmul.f32 %v1434_v59, %v9875_v60  ;;  %v1442_v23 = vmul.f32 %v1440_v63, %v9875_v60  ;;  %v1452_v57 = vstv %s6273_s18  ;;  %s6410_s17 = sld [smem:[#allocation9 + $0xbd]] }
 0x20b   :  { %v1462_v27 = vsel %vm181_vm12, %v1458_v31, %v1460_v32  ;;  %v1463_v9 = vsel %vm181_vm12, %v1460_v32, %v1458_v31  ;;  %v1431_v11 = vadd.f32 %v1429_v37, %v1394_v17  ;;  %v1432_v4 = vadd.f32 %v1430_v14, %v1395_v38  ;;  %s6414_s18 = sld [smem:[#allocation9 + $0xe1]] }
 0x20c   :  { %v1435_v55 = vmul.f32 %v1434_v59, %v9876_v15  ;;  %v1448_v61 = vmul.f32 %v1446_v53, %v9875_v60  ;;  %v1441_v7 = vmul.f32 %v1440_v63, %v9876_v15  ;;  %v1447_v36 = vmul.f32 %v1446_v53, %v9876_v15 }
 0x20d   :  { %v1467_v62 = vstv %s6276_s5  ;;  %v1473_v45 = vstv %s6278_s16  ;;  %v1453_v28 = vmul.f32 %v1452_v57, %v9876_v15  ;;  %v1454_v48 = vmul.f32 %v1452_v57, %v9875_v60  ;;  %s6426_s5 = sld [smem:[#allocation9 + $0x105]] }
 0x20e   :  { %v1464_v34 = vsel %vm181_vm12, %v1462_v27, 0.0  ;;  %v1465_v56 = vsel %vm182_vm13, %v1463_v9, 0.0  ;;  %v1438_v13 = vadd.f32 %v1436_v21, %v1414_v42  ;;  %v1444_v30 = vadd.f32 %v1442_v23, %v1420_v19  ;;  %s6434_s16 = sld [smem:[#allocation9 + $0x9a]] }
 0x20f   :  { %v1479_v35 = vstv %s6280_s19  ;;  %v1485_v26 = vstv %s6284_s27  ;;  %v1450_v39 = vadd.f32 %v1448_v61, %v1426_v49  ;;  %v1437_v0 = vadd.f32 %v1435_v55, %v1413_v54  ;;  %v1549_v61 = vpop.permute.xlu1 %1548  ;;  %s6436_s19 = sld [smem:[#allocation9 + $0xbe]] }
 0x210   :  { %v1494_v41 = vsel %vm1404_vm9, %v1491_v47, %v1493_v1  ;;  %v1495_v58 = vsel %vm1404_vm9, %v1493_v1, %v1491_v47  ;;  %v1443_v12 = vadd.f32 %v1441_v7, %v1419_v52  ;;  %v1468_v3 = vmul.f32 %v1467_v62, %v1464_v34  ;;  %s6439_s27 = sld [smem:[#allocation9 + $0xe2]] }
 0x211   :  { %v1469_v18 = vmul.f32 %v1467_v62, %v1465_v56  ;;  %v1474_v24 = vmul.f32 %v1473_v45, %v1464_v34  ;;  %v1456_v46 = vadd.f32 %v1454_v48, %v1432_v4  ;;  %v1449_v2 = vadd.f32 %v1447_v36, %v1425_v51  ;;  %v1547_v36 = vpop.permute.xlu0 %1546 }
 0x212   :  { %v1455_v38 = vadd.f32 %v1453_v28, %v1431_v11  ;;  %v1499_v17 = vstv %s6290_s26  ;;  %v1475_v32 = vmul.f32 %v1473_v45, %v1465_v56  ;;  %v1505_v59 = vstv %s6298_s7  ;;  %s6447_s26 = sld [smem:[#allocation9 + $0x106]] }
 0x213   :  { %v1496_v31 = vsel %vm179_vm10, %v1495_v58, 0.0  ;;  %v1497_v37 = vsel %vm180_vm11, %v1494_v41, 0.0  ;;  %v1480_v14 = vmul.f32 %v1479_v35, %v1464_v34  ;;  %v1481_v63 = vmul.f32 %v1479_v35, %v1465_v56  ;;  %s6449_s7 = sld [smem:[#allocation9 + $0x9b]] }
 0x214   :  { %v1486_v54 = vmul.f32 %v1485_v26, %v1464_v34  ;;  %v1511_v42 = vstv %s6302_s4  ;;  %v1470_v52 = vadd.f32 %v1468_v3, %v1437_v0  ;;  %v1471_v53 = vadd.f32 %v1469_v18, %v1438_v13  ;;  %s6452_s4 = sld [smem:[#allocation9 + $0xbf]] }
 0x215   :  { %v1476_v19 = vadd.f32 %v1474_v24, %v1443_v12  ;;  %v1487_v51 = vmul.f32 %v1485_v26, %v1465_v56  ;;  %v1517_v49 = vstv %s6314_s20  ;;  %v1500_v60 = vmul.f32 %v1499_v17, %v1496_v31  ;;  %v4318_v26 = vld [vmem:[#allocation2 + $0x8] sm:$0xff]  ;;  %v4319_v24 = vld [vmem:[#allocation2] sm:$0xff]  ;;  %s6454_s20 = sld [smem:[#allocation9 + $0xe3]] }
 0x216   :  { %v1501_v21 = vmul.f32 %v1499_v17, %v1497_v37  ;;  %v1506_v23 = vmul.f32 %v1505_v59, %v1496_v31  ;;  %v1477_v57 = vadd.f32 %v1475_v32, %v1444_v30  ;;  %v1507_v27 = vmul.f32 %v1505_v59, %v1497_v37 }
 0x217   :  { %v1512_v9 = vmul.f32 %v1511_v42, %v1496_v31  ;;  %v1513_v11 = vmul.f32 %v1511_v42, %v1497_v37  ;;  %v1482_v4 = vadd.f32 %v1480_v14, %v1449_v2  ;;  %v1483_v15 = vadd.f32 %v1481_v63, %v1450_v39 }
 0x218   :  { %v1488_v55 = vadd.f32 %v1486_v54, %v1455_v38  ;;  %v1523_v7 = vstv %s6322_s1  ;;  %v1489_v62 = vadd.f32 %v1487_v51, %v1456_v46  ;;  %v1518_v45 = vmul.f32 %v1517_v49, %v1496_v31  ;;  %v1585_v31 = vpop.permute.xlu1 %1584  ;;  %s6457_s1 = sld [smem:[#allocation9 + $0x107]] }
 0x219   :  { %v1519_v1 = vmul.f32 %v1517_v49, %v1497_v37  ;;  %v1529_v47 = vstv %s6324_s29  ;;  %v1502_v28 = vadd.f32 %v1500_v60, %v1470_v52  ;;  %v1503_v48 = vadd.f32 %v1501_v21, %v1471_v53  ;;  %v1583_v37 = vpop.permute.xlu0 %1582  ;;  %s6462_s29 = sld [smem:[#allocation9 + $0x9c]] }
 0x21a   :  { %v1508_v34 = vadd.f32 %v1506_v23, %v1476_v19  ;;  %v1535_v56 = vstv %s6327_s14  ;;  %v1509_v13 = vadd.f32 %v1507_v27, %v1477_v57  ;;  %v1514_v30 = vadd.f32 %v1512_v9, %v1482_v4  ;;  %s6470_s14 = sld [smem:[#allocation9 + $0xc0]] }
 0x21b   :  { %v1515_v35 = vadd.f32 %v1513_v11, %v1483_v15  ;;  %v1525_v39 = vmul.f32 %v4318_v26, %v1523_v7  ;;  %v1531_v0 = vmul.f32 %v4318_v26, %v1529_v47  ;;  %v1541_v41 = vstv %s6335_s8  ;;  %s6474_s8 = sld [smem:[#allocation9 + $0xe4]] }
 0x21c   :  { %v1550_v58 = vsel %vm181_vm12, %v1547_v36, %v1549_v61  ;;  %v1551_v12 = vsel %vm181_vm12, %v1549_v61, %v1547_v36  ;;  %v1520_v3 = vadd.f32 %v1518_v45, %v1488_v55  ;;  %v1521_v18 = vadd.f32 %v1519_v1, %v1489_v62 }
 0x21d   :  { %v1524_v46 = vmul.f32 %v4319_v24, %v1523_v7  ;;  %v1537_v2 = vmul.f32 %v4318_v26, %v1535_v56  ;;  %v1530_v38 = vmul.f32 %v4319_v24, %v1529_v47  ;;  %v1536_v17 = vmul.f32 %v4319_v24, %v1535_v56 }
 0x21e   :  { %v1555_v32 = vstv %s6337_s25  ;;  %v1561_v59 = vstv %s6340_s23  ;;  %v1542_v14 = vmul.f32 %v4319_v24, %v1541_v41  ;;  %v1543_v63 = vmul.f32 %v4318_v26, %v1541_v41  ;;  %s6486_s25 = sld [smem:[#allocation9 + $0x108]] }
 0x21f   :  { %v1552_v54 = vsel %vm181_vm12, %v1550_v58, 0.0  ;;  %v1553_v42 = vsel %vm182_vm13, %v1551_v12, 0.0  ;;  %v1527_v52 = vadd.f32 %v1525_v39, %v1503_v48  ;;  %v1533_v53 = vadd.f32 %v1531_v0, %v1509_v13  ;;  %s6494_s23 = sld [smem:[#allocation9 + $0x9d]] }
 0x220   :  { %v1567_v19 = vstv %s6342_s30  ;;  %v1573_v51 = vstv %s6345_s3  ;;  %v1539_v49 = vadd.f32 %v1537_v2, %v1515_v35  ;;  %v1526_v60 = vadd.f32 %v1524_v46, %v1502_v28  ;;  %v1641_v2 = vpop.permute.xlu1 %1640  ;;  %s6496_s30 = sld [smem:[#allocation9 + $0xc1]] }
 0x221   :  { %v1586_v21 = vsel %vm1404_vm9, %v1583_v37, %v1585_v31  ;;  %v1587_v23 = vsel %vm1404_vm9, %v1585_v31, %v1583_v37  ;;  %v1532_v57 = vadd.f32 %v1530_v38, %v1508_v34  ;;  %v1556_v27 = vmul.f32 %v1555_v32, %v1552_v54  ;;  %s6499_s3 = sld [smem:[#allocation9 + $0xe5]] }
 0x222   :  { %v1557_v9 = vmul.f32 %v1555_v32, %v1553_v42  ;;  %v1562_v11 = vmul.f32 %v1561_v59, %v1552_v54  ;;  %v1545_v4 = vadd.f32 %v1543_v63, %v1521_v18  ;;  %v1538_v15 = vadd.f32 %v1536_v17, %v1514_v30  ;;  %v1639_v17 = vpop.permute.xlu0 %1638 }
 0x223   :  { %v1544_v55 = vadd.f32 %v1542_v14, %v1520_v3  ;;  %v1591_v61 = vstv %s6349_s15  ;;  %v1563_v7 = vmul.f32 %v1561_v59, %v1553_v42  ;;  %v1597_v36 = vstv %s6356_s2  ;;  %s6507_s15 = sld [smem:[#allocation9 + $0x109]] }
 0x224   :  { %v1588_v62 = vsel %vm179_vm10, %v1587_v23, 0.0  ;;  %v1589_v45 = vsel %vm180_vm11, %v1586_v21, 0.0  ;;  %v1568_v1 = vmul.f32 %v1567_v19, %v1552_v54  ;;  %v1569_v47 = vmul.f32 %v1567_v19, %v1553_v42  ;;  %s6509_s2 = sld [smem:[#allocation9 + $0x9e]] }
 0x225   :  { %v1574_v28 = vmul.f32 %v1573_v51, %v1552_v54  ;;  %v1603_v48 = vstv %s6358_s9  ;;  %v1558_v34 = vadd.f32 %v1556_v27, %v1526_v60  ;;  %v1559_v56 = vadd.f32 %v1557_v9, %v1527_v52  ;;  %s6512_s9 = sld [smem:[#allocation9 + $0xc2]] }
 0x226   :  { %v1564_v13 = vadd.f32 %v1562_v11, %v1532_v57  ;;  %v1575_v30 = vmul.f32 %v1573_v51, %v1553_v42  ;;  %v1609_v35 = vstv %s6366_s28  ;;  %v1592_v26 = vmul.f32 %v1591_v61, %v1588_v62  ;;  %v9877_v51 = vld [vmem:[#allocation128_spill] sm:$0xff]  ;;  %v9878_v11 = vld [vmem:[#allocation130_spill] sm:$0xff]  ;;  %s6514_s28 = sld [smem:[#allocation9 + $0xe6]] }
 0x227   :  { %v1593_v39 = vmul.f32 %v1591_v61, %v1589_v45  ;;  %v1598_v0 = vmul.f32 %v1597_v36, %v1588_v62  ;;  %v1565_v41 = vadd.f32 %v1563_v7, %v1533_v53  ;;  %v1599_v58 = vmul.f32 %v1597_v36, %v1589_v45 }
 0x228   :  { %v1604_v12 = vmul.f32 %v1603_v48, %v1588_v62  ;;  %v1605_v3 = vmul.f32 %v1603_v48, %v1589_v45  ;;  %v1570_v18 = vadd.f32 %v1568_v1, %v1538_v15  ;;  %v1571_v24 = vadd.f32 %v1569_v47, %v1539_v49 }
 0x229   :  { %v1576_v46 = vadd.f32 %v1574_v28, %v1544_v55  ;;  %v1615_v38 = vstv %s6374_s6  ;;  %v1577_v32 = vadd.f32 %v1575_v30, %v1545_v4  ;;  %v1610_v59 = vmul.f32 %v1609_v35, %v1588_v62  ;;  %v1677_v62 = vpop.permute.xlu1 %1676  ;;  %s6517_s6 = sld [smem:[#allocation9 + $0x10a]] }
 0x22a   :  { %v1611_v31 = vmul.f32 %v1609_v35, %v1589_v45  ;;  %v1621_v37 = vstv %s6376_s21  ;;  %v1594_v14 = vadd.f32 %v1592_v26, %v1558_v34  ;;  %v1595_v63 = vadd.f32 %v1593_v39, %v1559_v56  ;;  %v1675_v45 = vpop.permute.xlu0 %1674  ;;  %s6521_s21 = sld [smem:[#allocation9 + $0x9f]] }
 0x22b   :  { %v1600_v54 = vadd.f32 %v1598_v0, %v1564_v13  ;;  %v1627_v42 = vstv %s6379_s22  ;;  %v1601_v52 = vadd.f32 %v1599_v58, %v1565_v41  ;;  %v1606_v53 = vadd.f32 %v1604_v12, %v1570_v18  ;;  %s6528_s22 = sld [smem:[#allocation9 + $0xc3]] }
 0x22c   :  { %v1607_v19 = vadd.f32 %v1605_v3, %v1571_v24  ;;  %v1617_v49 = vmul.f32 %v1615_v38, %v9877_v51  ;;  %v1623_v60 = vmul.f32 %v1621_v37, %v9877_v51  ;;  %v1633_v21 = vstv %s6387_s24  ;;  %s6530_s24 = sld [smem:[#allocation9 + $0xe7]] }
 0x22d   :  { %v1642_v23 = vsel %vm181_vm12, %v1639_v17, %v1641_v2  ;;  %v1643_v57 = vsel %vm181_vm12, %v1641_v2, %v1639_v17  ;;  %v1612_v27 = vadd.f32 %v1610_v59, %v1576_v46  ;;  %v1613_v9 = vadd.f32 %v1611_v31, %v1577_v32 }
 0x22e   :  { %v1616_v4 = vmul.f32 %v1615_v38, %v9878_v11  ;;  %v1629_v15 = vmul.f32 %v1627_v42, %v9877_v51  ;;  %v1622_v55 = vmul.f32 %v1621_v37, %v9878_v11  ;;  %v1628_v61 = vmul.f32 %v1627_v42, %v9878_v11 }
 0x22f   :  { %v1647_v7 = vstv %s6389_s10  ;;  %v1653_v36 = vstv %s6392_s11  ;;  %v1634_v1 = vmul.f32 %v1633_v21, %v9878_v11  ;;  %v1635_v47 = vmul.f32 %v1633_v21, %v9877_v51  ;;  %s6538_s10 = sld [smem:[#allocation9 + $0x10b]] }
 0x230   :  { %v1644_v28 = vsel %vm181_vm12, %v1642_v23, 0.0  ;;  %v1645_v48 = vsel %vm182_vm13, %v1643_v57, 0.0  ;;  %v1619_v34 = vadd.f32 %v1617_v49, %v1595_v63  ;;  %v1625_v56 = vadd.f32 %v1623_v60, %v1601_v52  ;;  %s6546_s11 = sld [smem:[#allocation9 + $0xa0]] }
 0x231   :  { %v1659_v13 = vstv %s6394_s12  ;;  %v1665_v30 = vstv %s6397_s13  ;;  %v1631_v35 = vadd.f32 %v1629_v15, %v1607_v19  ;;  %v1618_v26 = vadd.f32 %v1616_v4, %v1594_v14  ;;  %v1733_v15 = vpop.permute.xlu1 %1732  ;;  %s6548_s12 = sld [smem:[#allocation9 + $0xc4]] }
 0x232   :  { %v1678_v39 = vsel %vm1404_vm9, %v1675_v45, %v1677_v62  ;;  %v1679_v0 = vsel %vm1404_vm9, %v1677_v62, %v1675_v45  ;;  %v1624_v41 = vadd.f32 %v1622_v55, %v1600_v54  ;;  %v1648_v58 = vmul.f32 %v1647_v7, %v1644_v28  ;;  %s6551_s13 = sld [smem:[#allocation9 + $0xe8]] }
 0x233   :  { %v1649_v12 = vmul.f32 %v1647_v7, %v1645_v48  ;;  %v1654_v3 = vmul.f32 %v1653_v36, %v1644_v28  ;;  %v1637_v18 = vadd.f32 %v1635_v47, %v1613_v9  ;;  %v1630_v24 = vadd.f32 %v1628_v61, %v1606_v53  ;;  %v1731_v61 = vpop.permute.xlu0 %1730 }
 0x234   :  { %v1636_v46 = vadd.f32 %v1634_v1, %v1612_v27  ;;  %v1683_v2 = vstv %s6402_s0  ;;  %v1655_v38 = vmul.f32 %v1653_v36, %v1645_v48  ;;  %v1689_v17 = vstv %s6410_s17  ;;  %s6559_s0 = sld [smem:[#allocation9 + $0x10c]] }
 0x235   :  { %v1680_v32 = vsel %vm179_vm10, %v1679_v0, 0.0  ;;  %v1681_v59 = vsel %vm180_vm11, %v1678_v39, 0.0  ;;  %v1660_v31 = vmul.f32 %v1659_v13, %v1644_v28  ;;  %v1661_v37 = vmul.f32 %v1659_v13, %v1645_v48  ;;  %s6561_s17 = sld [smem:[#allocation9 + $0xa1]] }
 0x236   :  { %v1666_v14 = vmul.f32 %v1665_v30, %v1644_v28  ;;  %v1695_v63 = vstv %s6414_s18  ;;  %v1650_v54 = vadd.f32 %v1648_v58, %v1618_v26  ;;  %v1651_v42 = vadd.f32 %v1649_v12, %v1619_v34  ;;  %s6564_s18 = sld [smem:[#allocation9 + $0xc5]] }
 0x237   :  { %v1656_v52 = vadd.f32 %v1654_v3, %v1624_v41  ;;  %v1667_v53 = vmul.f32 %v1665_v30, %v1645_v48  ;;  %v1701_v19 = vstv %s6426_s5  ;;  %v1684_v51 = vmul.f32 %v1683_v2, %v1680_v32  ;;  %s6566_s5 = sld [smem:[#allocation9 + $0xe9]] }
 0x238   :  { %v1685_v49 = vmul.f32 %v1683_v2, %v1681_v59  ;;  %v1690_v60 = vmul.f32 %v1689_v17, %v1680_v32  ;;  %v1657_v21 = vadd.f32 %v1655_v38, %v1625_v56  ;;  %v1691_v23 = vmul.f32 %v1689_v17, %v1681_v59  ;;  %v1765_v38 = vpop.permute.xlu1 %1764  ;;  %v1763_v17 = vpop.permute.xlu0 %1762 }
 0x239   :  { %v1696_v57 = vmul.f32 %v1695_v63, %v1680_v32  ;;  %v1697_v27 = vmul.f32 %v1695_v63, %v1681_v59  ;;  %v1662_v9 = vadd.f32 %v1660_v31, %v1630_v24  ;;  %v1663_v11 = vadd.f32 %v1661_v37, %v1631_v35 }
 0x23a   :  { %v1668_v4 = vadd.f32 %v1666_v14, %v1636_v46  ;;  %v1707_v55 = vstv %s6434_s16  ;;  %v1669_v7 = vadd.f32 %v1667_v53, %v1637_v18  ;;  %v1702_v36 = vmul.f32 %v1701_v19, %v1680_v32  ;;  %s6569_s16 = sld [smem:[#allocation9 + $0x10d]] }
 0x23b   :  { %v1703_v62 = vmul.f32 %v1701_v19, %v1681_v59  ;;  %v1713_v45 = vstv %s6436_s19  ;;  %v1686_v1 = vadd.f32 %v1684_v51, %v1650_v54  ;;  %v1687_v47 = vadd.f32 %v1685_v49, %v1651_v42  ;;  %s6574_s19 = sld [smem:[#allocation9 + $0xa2]] }
 0x23c   :  { %v1692_v28 = vadd.f32 %v1690_v60, %v1656_v52  ;;  %v1719_v48 = vstv %s6439_s27  ;;  %v1693_v34 = vadd.f32 %v1691_v23, %v1657_v21  ;;  %v1698_v56 = vadd.f32 %v1696_v57, %v1662_v9  ;;  %s6582_s27 = sld [smem:[#allocation9 + $0xc6]] }
 0x23d   :  { %v1699_v13 = vadd.f32 %v1697_v27, %v1663_v11  ;;  %v1709_v30 = vmul.f32 %v1707_v55, %v5173_v25  ;;  %v1715_v35 = vmul.f32 %v1713_v45, %v5173_v25  ;;  %v1725_v26 = vstv %s6447_s26  ;;  %s6586_s26 = sld [smem:[#allocation9 + $0xea]] }
 0x23e   :  { %v1734_v39 = vsel %vm181_vm12, %v1731_v61, %v1733_v15  ;;  %v1735_v0 = vsel %vm181_vm12, %v1733_v15, %v1731_v61  ;;  %v1704_v41 = vadd.f32 %v1702_v36, %v1668_v4  ;;  %v1705_v58 = vadd.f32 %v1703_v62, %v1669_v7 }
 0x23f   :  { %v1708_v12 = vmul.f32 %v1707_v55, %v5182_v20  ;;  %v1721_v3 = vmul.f32 %v1719_v48, %v5173_v25  ;;  %v1714_v18 = vmul.f32 %v1713_v45, %v5182_v20  ;;  %v1720_v24 = vmul.f32 %v1719_v48, %v5182_v20 }
 0x240   :  { %v1739_v46 = vstv %s6449_s7  ;;  %v1745_v2 = vstv %s6452_s4  ;;  %v1726_v32 = vmul.f32 %v1725_v26, %v5182_v20  ;;  %v1727_v59 = vmul.f32 %v1725_v26, %v5173_v25  ;;  %s6598_s7 = sld [smem:[#allocation9 + $0x10e]] }
 0x241   :  { %v1736_v31 = vsel %vm181_vm12, %v1734_v39, 0.0  ;;  %v1737_v37 = vsel %vm182_vm13, %v1735_v0, 0.0  ;;  %v1711_v14 = vadd.f32 %v1709_v30, %v1687_v47  ;;  %v1717_v63 = vadd.f32 %v1715_v35, %v1693_v34  ;;  %s6606_s4 = sld [smem:[#allocation9 + $0xa3]] }
 0x242   :  { %v1751_v54 = vstv %s6454_s20  ;;  %v1757_v42 = vstv %s6457_s1  ;;  %v1723_v52 = vadd.f32 %v1721_v3, %v1699_v13  ;;  %v1710_v53 = vadd.f32 %v1708_v12, %v1686_v1  ;;  %v1819_v3 = vpop.permute.xlu0 %1818  ;;  %s6608_s20 = sld [smem:[#allocation9 + $0xc7]] }
 0x243   :  { %v1766_v20 = vsel %vm1404_vm9, %v1763_v17, %v1765_v38  ;;  %v1767_v25 = vsel %vm1404_vm9, %v1765_v38, %v1763_v17  ;;  %v1716_v19 = vadd.f32 %v1714_v18, %v1692_v28  ;;  %v1740_v51 = vmul.f32 %v1739_v46, %v1736_v31  ;;  %s6611_s1 = sld [smem:[#allocation9 + $0xeb]] }
 0x244   :  { %v1741_v49 = vmul.f32 %v1739_v46, %v1737_v37  ;;  %v1746_v60 = vmul.f32 %v1745_v2, %v1736_v31  ;;  %v1729_v21 = vadd.f32 %v1727_v59, %v1705_v58  ;;  %v1722_v23 = vadd.f32 %v1720_v24, %v1698_v56  ;;  %v1821_v58 = vpop.permute.xlu1 %1820 }
 0x245   :  { %v1728_v57 = vadd.f32 %v1726_v32, %v1704_v41  ;;  %v1771_v27 = vstv %s6462_s29  ;;  %v1747_v9 = vmul.f32 %v1745_v2, %v1737_v37  ;;  %v1777_v11 = vstv %s6470_s14  ;;  %s6619_s29 = sld [smem:[#allocation9 + $0x10f]] }
 0x246   :  { %v1768_v4 = vsel %vm179_vm10, %v1767_v25, 0.0  ;;  %v1769_v15 = vsel %vm180_vm11, %v1766_v20, 0.0  ;;  %v1752_v55 = vmul.f32 %v1751_v54, %v1736_v31  ;;  %v1753_v61 = vmul.f32 %v1751_v54, %v1737_v37  ;;  %s6621_s14 = sld [smem:[#allocation9 + $0xa4]] }
 0x247   :  { %v1758_v7 = vmul.f32 %v1757_v42, %v1736_v31  ;;  %v1783_v36 = vstv %s6474_s8  ;;  %v1742_v62 = vadd.f32 %v1740_v51, %v1710_v53  ;;  %v1743_v45 = vadd.f32 %v1741_v49, %v1711_v14  ;;  %v4321_v51 = vld [vmem:[#allocation2 + $0x10] sm:$0xff]  ;;  %s6624_s8 = sld [smem:[#allocation9 + $0xc8]] }
 0x248   :  { %v1748_v1 = vadd.f32 %v1746_v60, %v1716_v19  ;;  %v1759_v47 = vmul.f32 %v1757_v42, %v1737_v37  ;;  %v1789_v28 = vstv %s6486_s25  ;;  %v1772_v48 = vmul.f32 %v1771_v27, %v1768_v4  ;;  %s6626_s25 = sld [smem:[#allocation9 + $0xec]] }
 0x249   :  { %v1773_v34 = vmul.f32 %v1771_v27, %v1769_v15  ;;  %v1778_v56 = vmul.f32 %v1777_v11, %v1768_v4  ;;  %v1749_v13 = vadd.f32 %v1747_v9, %v1717_v63  ;;  %v1779_v30 = vmul.f32 %v1777_v11, %v1769_v15  ;;  %v4320_v63 = vld [vmem:[#allocation2 + $0x18] sm:$0xff]  ;;  %v1857_v9 = vpop.permute.xlu1 %1856  ;;  %v1855_v11 = vpop.permute.xlu0 %1854 }
 0x24a   :  { %v1784_v35 = vmul.f32 %v1783_v36, %v1768_v4  ;;  %v1785_v26 = vmul.f32 %v1783_v36, %v1769_v15  ;;  %v1754_v39 = vadd.f32 %v1752_v55, %v1722_v23  ;;  %v1755_v0 = vadd.f32 %v1753_v61, %v1723_v52 }
 0x24b   :  { %v1760_v41 = vadd.f32 %v1758_v7, %v1728_v57  ;;  %v1795_v12 = vstv %s6494_s23  ;;  %v1761_v18 = vadd.f32 %v1759_v47, %v1729_v21  ;;  %v1790_v24 = vmul.f32 %v1789_v28, %v1768_v4  ;;  %s6629_s23 = sld [smem:[#allocation9 + $0x110]] }
 0x24c   :  { %v1791_v46 = vmul.f32 %v1789_v28, %v1769_v15  ;;  %v1801_v2 = vstv %s6496_s30  ;;  %v1774_v38 = vadd.f32 %v1772_v48, %v1742_v62  ;;  %v1775_v17 = vadd.f32 %v1773_v34, %v1743_v45  ;;  %s6634_s30 = sld [smem:[#allocation9 + $0xa5]] }
 0x24d   :  { %v1780_v32 = vadd.f32 %v1778_v56, %v1748_v1  ;;  %v1807_v59 = vstv %s6499_s3  ;;  %v1781_v31 = vadd.f32 %v1779_v30, %v1749_v13  ;;  %v1786_v37 = vadd.f32 %v1784_v35, %v1754_v39  ;;  %s6642_s3 = sld [smem:[#allocation9 + $0xc9]] }
 0x24e   :  { %v1787_v14 = vadd.f32 %v1785_v26, %v1755_v0  ;;  %v1797_v54 = vmul.f32 %v4320_v63, %v1795_v12  ;;  %v1803_v42 = vmul.f32 %v4320_v63, %v1801_v2  ;;  %v1813_v52 = vstv %s6507_s15  ;;  %s6646_s15 = sld [smem:[#allocation9 + $0xed]] }
 0x24f   :  { %v1822_v53 = vsel %vm181_vm12, %v1819_v3, %v1821_v58  ;;  %v1823_v20 = vsel %vm181_vm12, %v1821_v58, %v1819_v3  ;;  %v1792_v25 = vadd.f32 %v1790_v24, %v1760_v41  ;;  %v1793_v19 = vadd.f32 %v1791_v46, %v1761_v18 }
 0x250   :  { %v1796_v49 = vmul.f32 %v4321_v51, %v1795_v12  ;;  %v1809_v60 = vmul.f32 %v4320_v63, %v1807_v59  ;;  %v1802_v21 = vmul.f32 %v4321_v51, %v1801_v2  ;;  %v1808_v23 = vmul.f32 %v4321_v51, %v1807_v59 }
 0x251   :  { %v1827_v57 = vstv %s6509_s2  ;;  %v1833_v27 = vstv %s6512_s9  ;;  %v1814_v4 = vmul.f32 %v4321_v51, %v1813_v52  ;;  %v1815_v15 = vmul.f32 %v4320_v63, %v1813_v52  ;;  %v1913_v51 = vpop.permute.xlu1 %1912  ;;  %s6658_s2 = sld [smem:[#allocation9 + $0x111]] }
 0x252   :  { %v1824_v55 = vsel %vm181_vm12, %v1822_v53, 0.0  ;;  %v1825_v61 = vsel %vm182_vm13, %v1823_v20, 0.0  ;;  %v1799_v7 = vadd.f32 %v1797_v54, %v1775_v17  ;;  %v1805_v36 = vadd.f32 %v1803_v42, %v1781_v31  ;;  %s6666_s9 = sld [smem:[#allocation9 + $0xa6]] }
 0x253   :  { %v1839_v62 = vstv %s6514_s28  ;;  %v1845_v45 = vstv %s6517_s6  ;;  %v1811_v1 = vadd.f32 %v1809_v60, %v1787_v14  ;;  %v1798_v47 = vadd.f32 %v1796_v49, %v1774_v38  ;;  %v1911_v60 = vpop.permute.xlu0 %1910  ;;  %s6668_s28 = sld [smem:[#allocation9 + $0xca]] }
 0x254   :  { %v1858_v28 = vsel %vm1404_vm9, %v1855_v11, %v1857_v9  ;;  %v1859_v48 = vsel %vm1404_vm9, %v1857_v9, %v1855_v11  ;;  %v1804_v34 = vadd.f32 %v1802_v21, %v1780_v32  ;;  %v1828_v56 = vmul.f32 %v1827_v57, %v1824_v55  ;;  %s6671_s6 = sld [smem:[#allocation9 + $0xee]] }
 0x255   :  { %v1829_v13 = vmul.f32 %v1827_v57, %v1825_v61  ;;  %v1834_v30 = vmul.f32 %v1833_v27, %v1824_v55  ;;  %v1817_v35 = vadd.f32 %v1815_v15, %v1793_v19  ;;  %v1810_v26 = vadd.f32 %v1808_v23, %v1786_v37 }
 0x256   :  { %v1816_v39 = vadd.f32 %v1814_v4, %v1792_v25  ;;  %v1863_v0 = vstv %s6521_s21  ;;  %v1835_v41 = vmul.f32 %v1833_v27, %v1825_v61  ;;  %v1869_v58 = vstv %s6528_s22  ;;  %s6679_s21 = sld [smem:[#allocation9 + $0x112]] }
 0x257   :  { %v1860_v12 = vsel %vm179_vm10, %v1859_v48, 0.0  ;;  %v1861_v3 = vsel %vm180_vm11, %v1858_v28, 0.0  ;;  %v1840_v18 = vmul.f32 %v1839_v62, %v1824_v55  ;;  %v1841_v24 = vmul.f32 %v1839_v62, %v1825_v61  ;;  %s6681_s22 = sld [smem:[#allocation9 + $0xa7]] }
 0x258   :  { %v1846_v46 = vmul.f32 %v1845_v45, %v1824_v55  ;;  %v1875_v2 = vstv %s6530_s24  ;;  %v1830_v38 = vadd.f32 %v1828_v56, %v1798_v47  ;;  %v1831_v17 = vadd.f32 %v1829_v13, %v1799_v7  ;;  %s6684_s24 = sld [smem:[#allocation9 + $0xcb]] }
 0x259   :  { %v1836_v32 = vadd.f32 %v1834_v30, %v1804_v34  ;;  %v1847_v59 = vmul.f32 %v1845_v45, %v1825_v61  ;;  %v1881_v31 = vstv %s6538_s10  ;;  %v1864_v37 = vmul.f32 %v1863_v0, %v1860_v12  ;;  %s6686_s10 = sld [smem:[#allocation9 + $0xef]] }
 0x25a   :  { %v1865_v14 = vmul.f32 %v1863_v0, %v1861_v3  ;;  %v1870_v63 = vmul.f32 %v1869_v58, %v1860_v12  ;;  %v1837_v54 = vadd.f32 %v1835_v41, %v1805_v36  ;;  %v1871_v42 = vmul.f32 %v1869_v58, %v1861_v3  ;;  %v1947_v0 = vpop.permute.xlu0 %1946 }
 0x25b   :  { %v1876_v52 = vmul.f32 %v1875_v2, %v1860_v12  ;;  %v1877_v53 = vmul.f32 %v1875_v2, %v1861_v3  ;;  %v1842_v20 = vadd.f32 %v1840_v18, %v1810_v26  ;;  %v1843_v25 = vadd.f32 %v1841_v24, %v1811_v1 }
 0x25c   :  { %v1848_v19 = vadd.f32 %v1846_v46, %v1816_v39  ;;  %v1887_v49 = vstv %s6546_s11  ;;  %v1849_v21 = vadd.f32 %v1847_v59, %v1817_v35  ;;  %v1882_v23 = vmul.f32 %v1881_v31, %v1860_v12  ;;  %v1949_v39 = vpop.permute.xlu1 %1948  ;;  %s6689_s11 = sld [smem:[#allocation9 + $0x113]] }
 0x25d   :  { %v1883_v57 = vmul.f32 %v1881_v31, %v1861_v3  ;;  %v1893_v27 = vstv %s6548_s12  ;;  %v1866_v9 = vadd.f32 %v1864_v37, %v1830_v38  ;;  %v1867_v11 = vadd.f32 %v1865_v14, %v1831_v17  ;;  %s6696_s12 = sld [smem:[#allocation9 + $0xa8]] }
 0x25e   :  { %v1872_v4 = vadd.f32 %v1870_v63, %v1836_v32  ;;  %v1899_v15 = vstv %s6551_s13  ;;  %v1873_v55 = vadd.f32 %v1871_v42, %v1837_v54  ;;  %v1878_v61 = vadd.f32 %v1876_v52, %v1842_v20  ;;  %s6704_s13 = sld [smem:[#allocation9 + $0xcc]] }
 0x25f   :  { %v1879_v7 = vadd.f32 %v1877_v53, %v1843_v25  ;;  %v1889_v36 = vmul.f32 %v1887_v49, %v5192_v44  ;;  %v1895_v62 = vmul.f32 %v1893_v27, %v5192_v44  ;;  %v1905_v45 = vstv %s6559_s0  ;;  %s6710_s0 = sld [smem:[#allocation9 + $0xf0]] }
 0x260   :  { %v1914_v1 = vsel %vm181_vm12, %v1911_v60, %v1913_v51  ;;  %v1915_v47 = vsel %vm181_vm12, %v1913_v51, %v1911_v60  ;;  %v1884_v28 = vadd.f32 %v1882_v23, %v1848_v19  ;;  %v1885_v48 = vadd.f32 %v1883_v57, %v1849_v21 }
 0x261   :  { %v1888_v34 = vmul.f32 %v1887_v49, %v5204_v5  ;;  %v1901_v56 = vmul.f32 %v1899_v15, %v5192_v44  ;;  %v1894_v13 = vmul.f32 %v1893_v27, %v5204_v5  ;;  %v1900_v30 = vmul.f32 %v1899_v15, %v5204_v5 }
 0x262   :  { %v1919_v35 = vstv %s6561_s17  ;;  %v1925_v26 = vstv %s6564_s18  ;;  %v1906_v41 = vmul.f32 %v1905_v45, %v5204_v5  ;;  %v1907_v58 = vmul.f32 %v1905_v45, %v5192_v44  ;;  %s6722_s17 = sld [smem:[#allocation9 + $0x114]] }
 0x263   :  { %v1916_v12 = vsel %vm181_vm12, %v1914_v1, 0.0  ;;  %v1917_v3 = vsel %vm182_vm13, %v1915_v47, 0.0  ;;  %v1891_v18 = vadd.f32 %v1889_v36, %v1867_v11  ;;  %v1897_v24 = vadd.f32 %v1895_v62, %v1873_v55  ;;  %v2005_v47 = vpop.permute.xlu1 %2004  ;;  %s6730_s18 = sld [smem:[#allocation9 + $0xa9]] }
 0x264   :  { %v1931_v46 = vstv %s6566_s5  ;;  %v1937_v2 = vstv %s6569_s16  ;;  %v1903_v38 = vadd.f32 %v1901_v56, %v1879_v7  ;;  %v1890_v17 = vadd.f32 %v1888_v34, %v1866_v9  ;;  %s6732_s5 = sld [smem:[#allocation9 + $0xcd]] }
 0x265   :  { %v1950_v5 = vsel %vm1404_vm9, %v1947_v0, %v1949_v39  ;;  %v1951_v44 = vsel %vm1404_vm9, %v1949_v39, %v1947_v0  ;;  %v1896_v32 = vadd.f32 %v1894_v13, %v1872_v4  ;;  %v1920_v59 = vmul.f32 %v1919_v35, %v1916_v12  ;;  %s6735_s16 = sld [smem:[#allocation9 + $0xf1]] }
 0x266   :  { %v1921_v31 = vmul.f32 %v1919_v35, %v1917_v3  ;;  %v1926_v37 = vmul.f32 %v1925_v26, %v1916_v12  ;;  %v1909_v14 = vadd.f32 %v1907_v58, %v1885_v48  ;;  %v1902_v63 = vadd.f32 %v1900_v30, %v1878_v61  ;;  %v2003_v48 = vpop.permute.xlu0 %2002 }
 0x267   :  { %v1908_v54 = vadd.f32 %v1906_v41, %v1884_v28  ;;  %v1955_v42 = vstv %s6574_s19  ;;  %v1927_v52 = vmul.f32 %v1925_v26, %v1917_v3  ;;  %v1961_v53 = vstv %s6582_s27  ;;  %s6743_s19 = sld [smem:[#allocation9 + $0x115]] }
 0x268   :  { %v1952_v20 = vsel %vm179_vm10, %v1951_v44, 0.0  ;;  %v1953_v25 = vsel %vm180_vm11, %v1950_v5, 0.0  ;;  %v1932_v19 = vmul.f32 %v1931_v46, %v1916_v12  ;;  %v1933_v51 = vmul.f32 %v1931_v46, %v1917_v3  ;;  %s6745_s27 = sld [smem:[#allocation9 + $0xaa]] }
 0x269   :  { %v1938_v49 = vmul.f32 %v1937_v2, %v1916_v12  ;;  %v1967_v60 = vstv %s6586_s26  ;;  %v1922_v21 = vadd.f32 %v1920_v59, %v1890_v17  ;;  %v1923_v23 = vadd.f32 %v1921_v31, %v1891_v18  ;;  %s6748_s26 = sld [smem:[#allocation9 + $0xce]] }
 0x26a   :  { %v1928_v57 = vadd.f32 %v1926_v37, %v1896_v32  ;;  %v1939_v27 = vmul.f32 %v1937_v2, %v1917_v3  ;;  %v1973_v9 = vstv %s6598_s7  ;;  %v1956_v11 = vmul.f32 %v1955_v42, %v1952_v20  ;;  %s6750_s7 = sld [smem:[#allocation9 + $0xf2]] }
 0x26b   :  { %v1957_v4 = vmul.f32 %v1955_v42, %v1953_v25  ;;  %v1962_v15 = vmul.f32 %v1961_v53, %v1952_v20  ;;  %v1929_v55 = vadd.f32 %v1927_v52, %v1897_v24  ;;  %v1963_v61 = vmul.f32 %v1961_v53, %v1953_v25 }
 0x26c   :  { %v1968_v7 = vmul.f32 %v1967_v60, %v1952_v20  ;;  %v1969_v36 = vmul.f32 %v1967_v60, %v1953_v25  ;;  %v1934_v62 = vadd.f32 %v1932_v19, %v1902_v63  ;;  %v1935_v45 = vadd.f32 %v1933_v51, %v1903_v38  ;;  %v2035_v63 = vpop.permute.xlu0 %2034 }
 0x26d   :  { %v1940_v1 = vadd.f32 %v1938_v49, %v1908_v54  ;;  %v1979_v28 = vstv %s6606_s4  ;;  %v1941_v34 = vadd.f32 %v1939_v27, %v1909_v14  ;;  %v1974_v56 = vmul.f32 %v1973_v9, %v1952_v20  ;;  %v2037_v14 = vpop.permute.xlu1 %2036  ;;  %s6753_s4 = sld [smem:[#allocation9 + $0x116]] }
 0x26e   :  { %v1975_v13 = vmul.f32 %v1973_v9, %v1953_v25  ;;  %v1985_v30 = vstv %s6608_s20  ;;  %v1958_v35 = vadd.f32 %v1956_v11, %v1922_v21  ;;  %v1959_v26 = vadd.f32 %v1957_v4, %v1923_v23  ;;  %s6758_s20 = sld [smem:[#allocation9 + $0xab]] }
 0x26f   :  { %v1964_v39 = vadd.f32 %v1962_v15, %v1928_v57  ;;  %v1991_v0 = vstv %s6611_s1  ;;  %v1965_v41 = vadd.f32 %v1963_v61, %v1929_v55  ;;  %v1970_v58 = vadd.f32 %v1968_v7, %v1934_v62  ;;  %s6766_s1 = sld [smem:[#allocation9 + $0xcf]] }
 0x270   :  { %v1971_v12 = vadd.f32 %v1969_v36, %v1935_v45  ;;  %v1981_v3 = vmul.f32 %v1979_v28, %v5208_v40  ;;  %v1987_v18 = vmul.f32 %v1985_v30, %v5208_v40  ;;  %v1997_v24 = vstv %s6619_s29  ;;  %s6770_s29 = sld [smem:[#allocation9 + $0xf3]] }
 0x271   :  { %v2006_v46 = vsel %vm181_vm12, %v2003_v48, %v2005_v47  ;;  %v2007_v2 = vsel %vm181_vm12, %v2005_v47, %v2003_v48  ;;  %v1976_v38 = vadd.f32 %v1974_v56, %v1940_v1  ;;  %v1977_v17 = vadd.f32 %v1975_v13, %v1941_v34 }
 0x272   :  { %v1980_v5 = vmul.f32 %v1979_v28, %v5219_v16  ;;  %v1993_v44 = vmul.f32 %v1991_v0, %v5208_v40  ;;  %v1986_v32 = vmul.f32 %v1985_v30, %v5219_v16  ;;  %v1992_v59 = vmul.f32 %v1991_v0, %v5219_v16 }
 0x273   :  { %v2011_v31 = vstv %s6621_s14  ;;  %v2017_v37 = vstv %s6624_s8  ;;  %v1998_v54 = vmul.f32 %v1997_v24, %v5219_v16  ;;  %v1999_v42 = vmul.f32 %v1997_v24, %v5208_v40  ;;  %v2093_v24 = vpop.permute.xlu1 %2092  ;;  %s6782_s14 = sld [smem:[#allocation9 + $0x117]] }
 0x274   :  { %v2008_v52 = vsel %vm181_vm12, %v2006_v46, 0.0  ;;  %v2009_v53 = vsel %vm182_vm13, %v2007_v2, 0.0  ;;  %v1983_v20 = vadd.f32 %v1981_v3, %v1959_v26  ;;  %v1989_v25 = vadd.f32 %v1987_v18, %v1965_v41  ;;  %v2091_v2 = vpop.permute.xlu0 %2090  ;;  %s6790_s8 = sld [smem:[#allocation9 + $0xac]] }
 0x275   :  { %v2023_v19 = vstv %s6626_s25  ;;  %v2029_v51 = vstv %s6629_s23  ;;  %v1995_v49 = vadd.f32 %v1993_v44, %v1971_v12  ;;  %v1982_v60 = vadd.f32 %v1980_v5, %v1958_v35  ;;  %s6792_s25 = sld [smem:[#allocation9 + $0xd0]] }
 0x276   :  { %v2038_v16 = vsel %vm1404_vm9, %v2035_v63, %v2037_v14  ;;  %v2039_v40 = vsel %vm1404_vm9, %v2037_v14, %v2035_v63  ;;  %v1988_v21 = vadd.f32 %v1986_v32, %v1964_v39  ;;  %v2012_v23 = vmul.f32 %v2011_v31, %v2008_v52  ;;  %s6795_s23 = sld [smem:[#allocation9 + $0xf4]] }
 0x277   :  { %v2013_v57 = vmul.f32 %v2011_v31, %v2009_v53  ;;  %v2018_v27 = vmul.f32 %v2017_v37, %v2008_v52  ;;  %v2001_v9 = vadd.f32 %v1999_v42, %v1977_v17  ;;  %v1994_v11 = vadd.f32 %v1992_v59, %v1970_v58  ;;  %v6693_v42 = vld [vmem:[#allocation2 + $0x28] sm:$0xff] }
 0x278   :  { %v2000_v4 = vadd.f32 %v1998_v54, %v1976_v38  ;;  %v2043_v15 = vstv %s6634_s30  ;;  %v2019_v55 = vmul.f32 %v2017_v37, %v2009_v53  ;;  %v2049_v61 = vstv %s6642_s3  ;;  %s6803_s30 = sld [smem:[#allocation9 + $0x118]] }
 0x279   :  { %v2040_v7 = vsel %vm179_vm10, %v2039_v40, 0.0  ;;  %v2041_v36 = vsel %vm180_vm11, %v2038_v16, 0.0  ;;  %v2024_v62 = vmul.f32 %v2023_v19, %v2008_v52  ;;  %v2025_v45 = vmul.f32 %v2023_v19, %v2009_v53  ;;  %s6805_s3 = sld [smem:[#allocation9 + $0xad]] }
 0x27a   :  { %v2030_v1 = vmul.f32 %v2029_v51, %v2008_v52  ;;  %v2055_v47 = vstv %s6646_s15  ;;  %v2014_v28 = vadd.f32 %v2012_v23, %v1982_v60  ;;  %v2015_v48 = vadd.f32 %v2013_v57, %v1983_v20  ;;  %v6706_v60 = vld [vmem:[#allocation2 + $0x20] sm:$0xff]  ;;  %s6808_s15 = sld [smem:[#allocation9 + $0xd1]] }
 0x27b   :  { %v2020_v34 = vadd.f32 %v2018_v27, %v1988_v21  ;;  %v2031_v56 = vmul.f32 %v2029_v51, %v2009_v53  ;;  %v2061_v13 = vstv %s6658_s2  ;;  %v2044_v30 = vmul.f32 %v2043_v15, %v2040_v7  ;;  %s6810_s2 = sld [smem:[#allocation9 + $0xf5]] }
 0x27c   :  { %v2045_v35 = vmul.f32 %v2043_v15, %v2041_v36  ;;  %v2050_v26 = vmul.f32 %v2049_v61, %v2040_v7  ;;  %v2021_v39 = vadd.f32 %v2019_v55, %v1989_v25  ;;  %v2051_v0 = vmul.f32 %v2049_v61, %v2041_v36 }
 0x27d   :  { %v2056_v41 = vmul.f32 %v2055_v47, %v2040_v7  ;;  %v2057_v58 = vmul.f32 %v2055_v47, %v2041_v36  ;;  %v2026_v12 = vadd.f32 %v2024_v62, %v1994_v11  ;;  %v2027_v3 = vadd.f32 %v2025_v45, %v1995_v49  ;;  %v2127_v11 = vpop.permute.xlu0 %2126 }
 0x27e   :  { %v2032_v18 = vadd.f32 %v2030_v1, %v2000_v4  ;;  %v2067_v46 = vstv %s6666_s9  ;;  %v2033_v38 = vadd.f32 %v2031_v56, %v2001_v9  ;;  %v2062_v17 = vmul.f32 %v2061_v13, %v2040_v7  ;;  %v2129_v9 = vpop.permute.xlu1 %2128  ;;  %s6813_s9 = sld [smem:[#allocation9 + $0x119]] }
 0x27f   :  { %v2063_v5 = vmul.f32 %v2061_v13, %v2041_v36  ;;  %v2073_v44 = vstv %s6668_s28  ;;  %v2046_v32 = vadd.f32 %v2044_v30, %v2014_v28  ;;  %v2047_v59 = vadd.f32 %v2045_v35, %v2015_v48  ;;  %s6817_s28 = sld [smem:[#allocation9 + $0xae]] }
 0x280   :  { %v2052_v31 = vadd.f32 %v2050_v26, %v2020_v34  ;;  %v2079_v37 = vstv %s6671_s6  ;;  %v2053_v14 = vadd.f32 %v2051_v0, %v2021_v39  ;;  %v2058_v63 = vadd.f32 %v2056_v41, %v2026_v12  ;;  %s6820_s6 = sld [smem:[#allocation9 + $0xd2]] }
 0x281   :  { %v2059_v54 = vadd.f32 %v2057_v58, %v2027_v3  ;;  %v2069_v52 = vmul.f32 %v6693_v42, %v2067_v46  ;;  %v2075_v53 = vmul.f32 %v6693_v42, %v2073_v44  ;;  %v2085_v20 = vstv %s6679_s21  ;;  %s6830_s21 = sld [smem:[#allocation9 + $0xf6]] }
 0x282   :  { %v2094_v25 = vsel %vm181_vm12, %v2091_v2, %v2093_v24  ;;  %v2095_v19 = vsel %vm181_vm12, %v2093_v24, %v2091_v2  ;;  %v2064_v51 = vadd.f32 %v2062_v17, %v2032_v18  ;;  %v2065_v49 = vadd.f32 %v2063_v5, %v2033_v38 }
 0x283   :  { %v2068_v16 = vmul.f32 %v6706_v60, %v2067_v46  ;;  %v2081_v40 = vmul.f32 %v6693_v42, %v2079_v37  ;;  %v2074_v21 = vmul.f32 %v6706_v60, %v2073_v44  ;;  %v2080_v23 = vmul.f32 %v6706_v60, %v2079_v37 }
 0x284   :  { %v2099_v57 = vstv %s6681_s22  ;;  %v2105_v27 = vstv %s6684_s24  ;;  %v2086_v4 = vmul.f32 %v6706_v60, %v2085_v20  ;;  %v2087_v15 = vmul.f32 %v6693_v42, %v2085_v20  ;;  %s6836_s22 = sld [smem:[#allocation9 + $0x11a]] }
 0x285   :  { %v2096_v55 = vsel %vm181_vm12, %v2094_v25, 0.0  ;;  %v2097_v61 = vsel %vm182_vm13, %v2095_v19, 0.0  ;;  %v2071_v7 = vadd.f32 %v2069_v52, %v2047_v59  ;;  %v2077_v36 = vadd.f32 %v2075_v53, %v2053_v14  ;;  %v2185_v19 = vpop.permute.xlu1 %2184  ;;  %s6850_s24 = sld [smem:[#allocation9 + $0xaf]] }
 0x286   :  { %v2111_v62 = vstv %s6686_s10  ;;  %v2117_v45 = vstv %s6689_s11  ;;  %v2083_v1 = vadd.f32 %v2081_v40, %v2059_v54  ;;  %v2070_v47 = vadd.f32 %v2068_v16, %v2046_v32  ;;  %s6852_s10 = sld [smem:[#allocation9 + $0xd3]] }
 0x287   :  { %v2130_v28 = vsel %vm1404_vm9, %v2127_v11, %v2129_v9  ;;  %v2131_v48 = vsel %vm1404_vm9, %v2129_v9, %v2127_v11  ;;  %v2076_v34 = vadd.f32 %v2074_v21, %v2052_v31  ;;  %v2100_v56 = vmul.f32 %v2099_v57, %v2096_v55  ;;  %s6856_s11 = sld [smem:[#allocation9 + $0xf7]] }
 0x288   :  { %v2101_v13 = vmul.f32 %v2099_v57, %v2097_v61  ;;  %v2106_v30 = vmul.f32 %v2105_v27, %v2096_v55  ;;  %v2089_v35 = vadd.f32 %v2087_v15, %v2065_v49  ;;  %v2082_v26 = vadd.f32 %v2080_v23, %v2058_v63  ;;  %v2183_v49 = vpop.permute.xlu0 %2182 }
 0x289   :  { %v2088_v39 = vadd.f32 %v2086_v4, %v2064_v51  ;;  %v2135_v0 = vstv %s6696_s12  ;;  %v2107_v41 = vmul.f32 %v2105_v27, %v2097_v61  ;;  %v2141_v58 = vstv %s6704_s13  ;;  %s6862_s12 = sld [smem:[#allocation9 + $0x11b]] }
 0x28a   :  { %v2132_v12 = vsel %vm179_vm10, %v2131_v48, 0.0  ;;  %v2133_v3 = vsel %vm180_vm11, %v2130_v28, 0.0  ;;  %v2112_v18 = vmul.f32 %v2111_v62, %v2096_v55  ;;  %v2113_v24 = vmul.f32 %v2111_v62, %v2097_v61  ;;  %s6866_s13 = sld [smem:[#allocation9 + $0xb0]] }
 0x28b   :  { %v2118_v46 = vmul.f32 %v2117_v45, %v2096_v55  ;;  %v2147_v2 = vstv %s6710_s0  ;;  %v2102_v38 = vadd.f32 %v2100_v56, %v2070_v47  ;;  %v2103_v17 = vadd.f32 %v2101_v13, %v2071_v7  ;;  %s6868_s0 = sld [smem:[#allocation9 + $0xd4]] }
 0x28c   :  { %v2108_v5 = vadd.f32 %v2106_v30, %v2076_v34  ;;  %v2119_v44 = vmul.f32 %v2117_v45, %v2097_v61  ;;  %v2153_v32 = vstv %s6722_s17  ;;  %v2136_v59 = vmul.f32 %v2135_v0, %v2132_v12  ;;  %s6870_s17 = sld [smem:[#allocation9 + $0xf8]] }
 0x28d   :  { %v2137_v31 = vmul.f32 %v2135_v0, %v2133_v3  ;;  %v2142_v37 = vmul.f32 %v2141_v58, %v2132_v12  ;;  %v2109_v14 = vadd.f32 %v2107_v41, %v2077_v36  ;;  %v2143_v63 = vmul.f32 %v2141_v58, %v2133_v3 }
 0x28e   :  { %v2148_v54 = vmul.f32 %v2147_v2, %v2132_v12  ;;  %v2149_v52 = vmul.f32 %v2147_v2, %v2133_v3  ;;  %v2114_v53 = vadd.f32 %v2112_v18, %v2082_v26  ;;  %v2115_v20 = vadd.f32 %v2113_v24, %v2083_v1  ;;  %v2219_v26 = vpop.permute.xlu0 %2218 }
 0x28f   :  { %v2120_v25 = vadd.f32 %v2118_v46, %v2088_v39  ;;  %v2159_v51 = vstv %s6730_s18  ;;  %v2121_v16 = vadd.f32 %v2119_v44, %v2089_v35  ;;  %v2154_v40 = vmul.f32 %v2153_v32, %v2132_v12  ;;  %v2221_v35 = vpop.permute.xlu1 %2220  ;;  %s6873_s18 = sld [smem:[#allocation9 + $0x11c]] }
 0x290   :  { %v2155_v21 = vmul.f32 %v2153_v32, %v2133_v3  ;;  %v2165_v23 = vstv %s6732_s5  ;;  %v2138_v57 = vadd.f32 %v2136_v59, %v2102_v38  ;;  %v2139_v27 = vadd.f32 %v2137_v31, %v2103_v17  ;;  %s6877_s5 = sld [smem:[#allocation9 + $0xb1]] }
 0x291   :  { %v2144_v9 = vadd.f32 %v2142_v37, %v2108_v5  ;;  %v2171_v11 = vstv %s6735_s16  ;;  %v2145_v4 = vadd.f32 %v2143_v63, %v2109_v14  ;;  %v2150_v15 = vadd.f32 %v2148_v54, %v2114_v53  ;;  %s6883_s16 = sld [smem:[#allocation9 + $0xd5]] }
 0x292   :  { %v2151_v55 = vadd.f32 %v2149_v52, %v2115_v20  ;;  %v2161_v61 = vmul.f32 %v2159_v51, %v9695_v22  ;;  %v2167_v7 = vmul.f32 %v2165_v23, %v9695_v22  ;;  %v2177_v36 = vstv %s6743_s19  ;;  %s6895_s19 = sld [smem:[#allocation9 + $0xf9]] }
 0x293   :  { %v2186_v62 = vsel %vm181_vm12, %v2183_v49, %v2185_v19  ;;  %v2187_v45 = vsel %vm181_vm12, %v2185_v19, %v2183_v49  ;;  %v2156_v1 = vadd.f32 %v2154_v40, %v2120_v25  ;;  %v2157_v47 = vadd.f32 %v2155_v21, %v2121_v16 }
 0x294   :  { %v2160_v28 = vmul.f32 %v2159_v51, %v9700_v50  ;;  %v2173_v48 = vmul.f32 %v2171_v11, %v9695_v22  ;;  %v2166_v34 = vmul.f32 %v2165_v23, %v9700_v50  ;;  %v2172_v56 = vmul.f32 %v2171_v11, %v9700_v50 }
 0x295   :  { %v2191_v13 = vstv %s6745_s27  ;;  %v2197_v30 = vstv %s6748_s26  ;;  %v2178_v39 = vmul.f32 %v2177_v36, %v9700_v50  ;;  %v2179_v0 = vmul.f32 %v2177_v36, %v9695_v22  ;;  %v2277_v36 = vpop.permute.xlu1 %2276  ;;  %s6900_s27 = sld [smem:[#allocation9 + $0x11d]] }
 0x296   :  { %v2188_v41 = vsel %vm181_vm12, %v2186_v62, 0.0  ;;  %v2189_v58 = vsel %vm182_vm13, %v2187_v45, 0.0  ;;  %v2163_v12 = vadd.f32 %v2161_v61, %v2139_v27  ;;  %v2169_v3 = vadd.f32 %v2167_v7, %v2145_v4  ;;  %v2275_v45 = vpop.permute.xlu0 %2274  ;;  %s6910_s26 = sld [smem:[#allocation9 + $0xb2]] }
 0x297   :  { %v2203_v18 = vstv %s6750_s7  ;;  %v2209_v24 = vstv %s6753_s4  ;;  %v2175_v46 = vadd.f32 %v2173_v48, %v2151_v55  ;;  %v2162_v2 = vadd.f32 %v2160_v28, %v2138_v57  ;;  %s6914_s7 = sld [smem:[#allocation9 + $0xd6]] }
 0x298   :  { %v2222_v50 = vsel %vm1404_vm9, %v2219_v26, %v2221_v35  ;;  %v2223_v22 = vsel %vm1404_vm9, %v2221_v35, %v2219_v26  ;;  %v2168_v38 = vadd.f32 %v2166_v34, %v2144_v9  ;;  %v2192_v17 = vmul.f32 %v2191_v13, %v2188_v41  ;;  %s6916_s4 = sld [smem:[#allocation9 + $0xfa]] }
 0x299   :  { %v2193_v5 = vmul.f32 %v2191_v13, %v2189_v58  ;;  %v2198_v44 = vmul.f32 %v2197_v30, %v2188_v41  ;;  %v2181_v32 = vadd.f32 %v2179_v0, %v2157_v47  ;;  %v2174_v59 = vadd.f32 %v2172_v56, %v2150_v15 }
 0x29a   :  { %v2180_v31 = vadd.f32 %v2178_v39, %v2156_v1  ;;  %v2227_v37 = vstv %s6758_s20  ;;  %v2199_v14 = vmul.f32 %v2197_v30, %v2189_v58  ;;  %v2233_v63 = vstv %s6766_s1  ;;  %s6920_s20 = sld [smem:[#allocation9 + $0x11e]] }
 0x29b   :  { %v2224_v54 = vsel %vm179_vm10, %v2223_v22, 0.0  ;;  %v2225_v52 = vsel %vm180_vm11, %v2222_v50, 0.0  ;;  %v2204_v53 = vmul.f32 %v2203_v18, %v2188_v41  ;;  %v2205_v20 = vmul.f32 %v2203_v18, %v2189_v58  ;;  %s6926_s1 = sld [smem:[#allocation9 + $0xb3]] }
 0x29c   :  { %v2210_v25 = vmul.f32 %v2209_v24, %v2188_v41  ;;  %v2239_v19 = vstv %s6770_s29  ;;  %v2194_v51 = vadd.f32 %v2192_v17, %v2162_v2  ;;  %v2195_v49 = vadd.f32 %v2193_v5, %v2163_v12  ;;  %v2309_v5 = vpop.permute.xlu1 %2308  ;;  %s6929_s29 = sld [smem:[#allocation9 + $0xd7]] }
 0x29d   :  { %v2200_v16 = vadd.f32 %v2198_v44, %v2168_v38  ;;  %v2211_v40 = vmul.f32 %v2209_v24, %v2189_v58  ;;  %v2245_v21 = vstv %s6782_s14  ;;  %v2228_v23 = vmul.f32 %v2227_v37, %v2224_v54  ;;  %v2307_v44 = vpop.permute.xlu0 %2306  ;;  %s6932_s14 = sld [smem:[#allocation9 + $0xfb]] }
 0x29e   :  { %v2229_v57 = vmul.f32 %v2227_v37, %v2225_v52  ;;  %v2234_v27 = vmul.f32 %v2233_v63, %v2224_v54  ;;  %v2201_v9 = vadd.f32 %v2199_v14, %v2169_v3  ;;  %v2235_v11 = vmul.f32 %v2233_v63, %v2225_v52 }
 0x29f   :  { %v2240_v4 = vmul.f32 %v2239_v19, %v2224_v54  ;;  %v2241_v15 = vmul.f32 %v2239_v19, %v2225_v52  ;;  %v2206_v55 = vadd.f32 %v2204_v53, %v2174_v59  ;;  %v2207_v61 = vadd.f32 %v2205_v20, %v2175_v46 }
 0x2a0   :  { %v2212_v7 = vadd.f32 %v2210_v25, %v2180_v31  ;;  %v2251_v62 = vstv %s6790_s8  ;;  %v2213_v1 = vadd.f32 %v2211_v40, %v2181_v32  ;;  %v2246_v47 = vmul.f32 %v2245_v21, %v2224_v54  ;;  %s6936_s8 = sld [smem:[#allocation9 + $0x11f]] }
 0x2a1   :  { %v2247_v28 = vmul.f32 %v2245_v21, %v2225_v52  ;;  %v2257_v48 = vstv %s6792_s25  ;;  %v2230_v34 = vadd.f32 %v2228_v23, %v2194_v51  ;;  %v2231_v56 = vadd.f32 %v2229_v57, %v2195_v49  ;;  %s6938_s25 = sld [smem:[#allocation11 + $0x4]] }
 0x2a2   :  { %v2236_v13 = vadd.f32 %v2234_v27, %v2200_v16  ;;  %v2263_v30 = vstv %s6795_s23  ;;  %v2237_v35 = vadd.f32 %v2235_v11, %v2201_v9  ;;  %v2242_v26 = vadd.f32 %v2240_v4, %v2206_v55  ;;  %s6940_s23 = sld [smem:[#allocation11 + $0x5]] }
 0x2a3   :  { %v2243_v39 = vadd.f32 %v2241_v15, %v2207_v61  ;;  %v2253_v0 = vmul.f32 %v2251_v62, %v9717_v6  ;;  %v2259_v41 = vmul.f32 %v2257_v48, %v9717_v6  ;;  %v2269_v58 = vstv %s6803_s30  ;;  %s6942_s30 = sld [smem:[#allocation11 + $0x6]] }
 0x2a4   :  { %v2278_v12 = vsel %vm181_vm12, %v2275_v45, %v2277_v36  ;;  %v2279_v3 = vsel %vm181_vm12, %v2277_v36, %v2275_v45  ;;  %v2248_v18 = vadd.f32 %v2246_v47, %v2212_v7  ;;  %v2249_v24 = vadd.f32 %v2247_v28, %v2213_v1 }
 0x2a5   :  { %v2252_v46 = vmul.f32 %v2251_v62, %v9719_v10  ;;  %v2265_v2 = vmul.f32 %v2263_v30, %v9717_v6  ;;  %v2258_v50 = vmul.f32 %v2257_v48, %v9719_v10  ;;  %v2264_v22 = vmul.f32 %v2263_v30, %v9719_v10 }
 0x2a6   :  { %v2283_v38 = vstv %s6805_s3  ;;  %v2289_v17 = vstv %s6808_s15  ;;  %v2255_v32 = vadd.f32 %v2253_v0, %v2231_v56  ;;  %v2271_v59 = vmul.f32 %v2269_v58, %v9717_v6  ;;  %v2365_v0 = vpop.permute.xlu1 %2364  ;;  %s6963_s3 = sld [smem:[#allocation11 + $0x7]] }
 0x2a7   :  { %v2280_v31 = vsel %vm181_vm12, %v2278_v12, 0.0  ;;  %v2281_v37 = vsel %vm182_vm13, %v2279_v3, 0.0  ;;  %v2261_v14 = vadd.f32 %v2259_v41, %v2237_v35  ;;  %v2270_v63 = vmul.f32 %v2269_v58, %v9719_v10  ;;  %v2363_v58 = vpop.permute.xlu0 %2362  ;;  %s6974_s15 = sld [smem:[#allocation7]] }
 0x2a8   :  { %v2295_v54 = vstv %s6810_s2  ;;  %v2301_v52 = vstv %s6813_s9  ;;  %v2267_v53 = vadd.f32 %v2265_v2, %v2243_v39  ;;  %v2254_v20 = vadd.f32 %v2252_v46, %v2230_v34  ;;  %s6976_s2 = sld [smem:[#allocation7 + $0x1]] }
 0x2a9   :  { %v2310_v25 = vsel %vm1404_vm9, %v2307_v44, %v2309_v5  ;;  %v2311_v6 = vsel %vm1404_vm9, %v2309_v5, %v2307_v44  ;;  %v2260_v19 = vadd.f32 %v2258_v50, %v2236_v13  ;;  %v2266_v51 = vadd.f32 %v2264_v22, %v2242_v26  ;;  %v6879_v5 = vld [vmem:[#allocation2 + $0x38] sm:$0xff]  ;;  %s6978_s9 = sld [smem:[#allocation7 + $0x2]] }
 0x2aa   :  { %v2284_v49 = vmul.f32 %v2283_v38, %v2280_v31  ;;  %v2285_v16 = vmul.f32 %v2283_v38, %v2281_v37  ;;  %v2273_v10 = vadd.f32 %v2271_v59, %v2249_v24  ;;  %v2290_v40 = vmul.f32 %v2289_v17, %v2280_v31 }
 0x2ab   :  { %v2315_v21 = vstv %s6817_s28  ;;  %v2321_v23 = vstv %s6820_s6  ;;  %v2291_v57 = vmul.f32 %v2289_v17, %v2281_v37  ;;  %v2296_v27 = vmul.f32 %v2295_v54, %v2280_v31  ;;  %s6980_s28 = sld [smem:[#allocation7 + $0x3]] }
 0x2ac   :  { %v2312_v9 = vsel %vm179_vm10, %v2311_v6, 0.0  ;;  %v2313_v11 = vsel %vm180_vm11, %v2310_v25, 0.0  ;;  %v2272_v4 = vadd.f32 %v2270_v63, %v2248_v18  ;;  %v2297_v15 = vmul.f32 %v2295_v54, %v2281_v37  ;;  %v6888_v63 = vld [vmem:[#allocation2 + $0x30] sm:$0xff]  ;;  %s6982_s6 = sld [smem:[#allocation8]] }
 0x2ad   :  { %v2302_v55 = vmul.f32 %v2301_v52, %v2280_v31  ;;  %v2327_v61 = vstv %s6830_s21  ;;  %v2286_v7 = vadd.f32 %v2284_v49, %v2254_v20  ;;  %v2287_v36 = vadd.f32 %v2285_v16, %v2255_v32  ;;  %v2401_v49 = vpop.permute.xlu1 %2400  ;;  %v2399_v16 = vpop.permute.xlu0 %2398  ;;  %s6984_s21 = sld [smem:[#allocation7 + $0x4]] }
 0x2ae   :  { %v2303_v62 = vmul.f32 %v2301_v52, %v2281_v37  ;;  %v2333_v45 = vstv %s6836_s22  ;;  %v2292_v1 = vadd.f32 %v2290_v40, %v2260_v19  ;;  %v2316_v47 = vmul.f32 %v2315_v21, %v2312_v9  ;;  %s6986_s22 = sld [smem:[#allocation7 + $0x5]] }
 0x2af   :  { %v2317_v28 = vmul.f32 %v2315_v21, %v2313_v11  ;;  %v2322_v48 = vmul.f32 %v2321_v23, %v2312_v9  ;;  %v2293_v34 = vadd.f32 %v2291_v57, %v2261_v14  ;;  %v2298_v56 = vadd.f32 %v2296_v27, %v2266_v51 }
 0x2b0   :  { %v2323_v13 = vmul.f32 %v2321_v23, %v2313_v11  ;;  %v2328_v30 = vmul.f32 %v2327_v61, %v2312_v9  ;;  %v2299_v35 = vadd.f32 %v2297_v15, %v2267_v53  ;;  %v2329_v26 = vmul.f32 %v2327_v61, %v2313_v11 }
 0x2b1   :  { %v2334_v39 = vmul.f32 %v2333_v45, %v2312_v9  ;;  %v2339_v41 = vstv %s6850_s24  ;;  %v2304_v12 = vadd.f32 %v2302_v55, %v2272_v4  ;;  %v2305_v3 = vadd.f32 %v2303_v62, %v2273_v10  ;;  %s6988_s24 = sld [smem:[#allocation7 + $0x6]] }
 0x2b2   :  { %v2335_v18 = vmul.f32 %v2333_v45, %v2313_v11  ;;  %v2345_v24 = vstv %s6852_s10  ;;  %v2318_v46 = vadd.f32 %v2316_v47, %v2286_v7  ;;  %v2319_v2 = vadd.f32 %v2317_v28, %v2287_v36  ;;  %s6990_s10 = sld [smem:[#allocation7 + $0x7]] }
 0x2b3   :  { %v2324_v50 = vadd.f32 %v2322_v48, %v2292_v1  ;;  %v2351_v22 = vstv %s6856_s11  ;;  %v2325_v38 = vadd.f32 %v2323_v13, %v2293_v34  ;;  %v2330_v17 = vadd.f32 %v2328_v30, %v2298_v56  ;;  %s6992_s11 = sld [smem:[#allocation8 + $0x1]] }
 0x2b4   :  { %v2341_v44 = vmul.f32 %v6879_v5, %v2339_v41  ;;  %v2357_v32 = vstv %s6862_s12  ;;  %v2331_v59 = vadd.f32 %v2329_v26, %v2299_v35  ;;  %v2336_v31 = vadd.f32 %v2334_v39, %v2304_v12  ;;  %s6994_s12 = sld [smem:[#allocation7 + $0x8]] }
 0x2b5   :  { %v2347_v37 = vmul.f32 %v6879_v5, %v2345_v24  ;;  %v2366_v14 = vsel %vm181_vm12, %v2363_v58, %v2365_v0  ;;  %v2340_v54 = vmul.f32 %v6888_v63, %v2339_v41  ;;  %v2346_v52 = vmul.f32 %v6888_v63, %v2345_v24 }
 0x2b6   :  { %v2353_v53 = vmul.f32 %v6879_v5, %v2351_v22  ;;  %v2367_v20 = vsel %vm181_vm12, %v2365_v0, %v2363_v58  ;;  %v2337_v25 = vadd.f32 %v2335_v18, %v2305_v3  ;;  %v2352_v6 = vmul.f32 %v6888_v63, %v2351_v22 }
 0x2b7   :  { %v2358_v19 = vmul.f32 %v6888_v63, %v2357_v32  ;;  %v2359_v51 = vmul.f32 %v6879_v5, %v2357_v32  ;;  %v2343_v10 = vadd.f32 %v2341_v44, %v2319_v2  ;;  %v2371_v40 = vstv %s6866_s13  ;;  %s6998_s13 = sld [smem:[#allocation7 + $0x9]] }
 0x2b8   :  { %v2377_v21 = vstv %s6868_s0  ;;  %v2368_v23 = vsel %vm181_vm12, %v2366_v14, 0.0  ;;  %v2349_v57 = vadd.f32 %v2347_v37, %v2325_v38  ;;  %v2383_v27 = vstv %s6870_s17  ;;  %s7004_s0 = sld [smem:[#allocation7 + $0xa]] }
 0x2b9   :  { %v2389_v9 = vstv %s6873_s18  ;;  %v2369_v11 = vsel %vm182_vm13, %v2367_v20, 0.0  ;;  %v2355_v4 = vadd.f32 %v2353_v53, %v2331_v59  ;;  %v2342_v15 = vadd.f32 %v2340_v54, %v2318_v46  ;;  %s7008_s17 = sld [smem:[#allocation7 + $0xb]] }
 0x2ba   :  { %v2348_v55 = vadd.f32 %v2346_v52, %v2324_v50  ;;  %v2402_v61 = vsel %vm1404_vm9, %v2399_v16, %v2401_v49  ;;  %v2361_v7 = vadd.f32 %v2359_v51, %v2337_v25  ;;  %v2354_v36 = vadd.f32 %v2352_v6, %v2330_v17  ;;  %s7012_s18 = sld [smem:[#allocation8 + $0x2]] }
 0x2bb   :  { %v2360_v62 = vadd.f32 %v2358_v19, %v2336_v31  ;;  %v2372_v45 = vmul.f32 %v2371_v40, %v2368_v23  ;;  %v2373_v1 = vmul.f32 %v2371_v40, %v2369_v11  ;;  %v2378_v47 = vmul.f32 %v2377_v21, %v2368_v23 }
 0x2bc   :  { %v2407_v28 = vstv %s6877_s5  ;;  %v2413_v48 = vstv %s6883_s16  ;;  %v2379_v34 = vmul.f32 %v2377_v21, %v2369_v11  ;;  %v2384_v56 = vmul.f32 %v2383_v27, %v2368_v23  ;;  %s7024_s5 = sld [smem:[#allocation7 + $0xc]] }
 0x2bd   :  { %v2403_v13 = vsel %vm1404_vm9, %v2401_v49, %v2399_v16  ;;  %v2405_v30 = vsel %vm180_vm11, %v2402_v61, 0.0  ;;  %v2385_v35 = vmul.f32 %v2383_v27, %v2369_v11  ;;  %v2390_v26 = vmul.f32 %v2389_v9, %v2368_v23  ;;  %s7037_s16 = sld [smem:[#allocation7 + $0xd]] }
 0x2be   :  { %v2391_v39 = vmul.f32 %v2389_v9, %v2369_v11  ;;  %v2419_v0 = vstv %s6895_s19  ;;  %v2374_v41 = vadd.f32 %v2372_v45, %v2342_v15  ;;  %v2425_v58 = vstv %s6900_s27  ;;  %v2457_v15 = vpop.permute.xlu1 %2456  ;;  %s7042_s19 = sld [smem:[#allocation7 + $0xe]] }
 0x2bf   :  { %v2375_v12 = vadd.f32 %v2373_v1, %v2343_v10  ;;  %v2380_v3 = vadd.f32 %v2378_v47, %v2348_v55  ;;  %v2404_v18 = vsel %vm179_vm10, %v2403_v13, 0.0  ;;  %v2409_v24 = vmul.f32 %v2407_v28, %v2405_v30  ;;  %s7047_s27 = sld [smem:[#allocation7 + $0xf]] }
 0x2c0   :  { %v2381_v46 = vadd.f32 %v2379_v34, %v2349_v57  ;;  %v2386_v2 = vadd.f32 %v2384_v56, %v2354_v36  ;;  %v2415_v50 = vmul.f32 %v2413_v48, %v2405_v30  ;;  %v2421_v22 = vmul.f32 %v2419_v0, %v2405_v30 }
 0x2c1   :  { %v2387_v38 = vadd.f32 %v2385_v35, %v2355_v4  ;;  %v2392_v17 = vadd.f32 %v2390_v26, %v2360_v62  ;;  %v2393_v44 = vadd.f32 %v2391_v39, %v2361_v7  ;;  %v2427_v32 = vmul.f32 %v2425_v58, %v2405_v30  ;;  %v2455_v62 = vpop.permute.xlu0 %2454 }
 0x2c2   :  { %v2408_v59 = vmul.f32 %v2407_v28, %v2404_v18  ;;  %v2414_v31 = vmul.f32 %v2413_v48, %v2404_v18  ;;  %v2420_v37 = vmul.f32 %v2419_v0, %v2404_v18  ;;  %v2426_v14 = vmul.f32 %v2425_v58, %v2404_v18 }
 0x2c3   :  { %v2411_v54 = vadd.f32 %v2409_v24, %v2375_v12  ;;  %v2431_v52 = vstv %s6910_s26  ;;  %v2437_v53 = vstv %s6914_s7  ;;  %v2443_v20 = vstv %s6916_s4  ;;  %s7052_s26 = sld [smem:[#allocation8 + $0x3]] }
 0x2c4   :  { %v2417_v25 = vadd.f32 %v2415_v50, %v2381_v46  ;;  %v2423_v6 = vadd.f32 %v2421_v22, %v2387_v38  ;;  %v2433_v19 = vmul.f32 %v2431_v52, %v9762_v43  ;;  %v2449_v51 = vstv %s6920_s20  ;;  %s7057_s7 = sld [smem:[#allocation13 + $0x1]] }
 0x2c5   :  { %v2429_v49 = vadd.f32 %v2427_v32, %v2393_v44  ;;  %v2439_v16 = vmul.f32 %v2437_v53, %v9762_v43  ;;  %v2445_v10 = vmul.f32 %v2443_v20, %v9762_v43  ;;  %v2410_v40 = vadd.f32 %v2408_v59, %v2374_v41  ;;  %s7060_s4 = sld [smem:[#allocation13 + $0x25]] }
 0x2c6   :  { %v2416_v21 = vadd.f32 %v2414_v31, %v2380_v3  ;;  %v2422_v23 = vadd.f32 %v2420_v37, %v2386_v2  ;;  %v2428_v57 = vadd.f32 %v2426_v14, %v2392_v17  ;;  %v2432_v27 = vmul.f32 %v2431_v52, %v9767_v29  ;;  %s7063_s20 = sld [smem:[#allocation13 + $0x49]] }
 0x2c7   :  { %v2438_v9 = vmul.f32 %v2437_v53, %v9767_v29  ;;  %v2444_v11 = vmul.f32 %v2443_v20, %v9767_v29  ;;  %v2451_v4 = vmul.f32 %v2449_v51, %v9762_v43  ;;  %v2435_v55 = vadd.f32 %v2433_v19, %v2411_v54 }
 0x2c8   :  { %v2441_v61 = vadd.f32 %v2439_v16, %v2417_v25  ;;  %v2447_v7 = vadd.f32 %v2445_v10, %v2423_v6  ;;  %v2450_v36 = vmul.f32 %v2449_v51, %v9767_v29  ;;  %v2463_v1 = vstv %s6926_s1  ;;  %s7068_s1 = sld [smem:[#allocation13 + $0x6d]] }
 0x2c9   :  { %v2453_v45 = vadd.f32 %v2451_v4, %v2429_v49  ;;  %v2469_v47 = vstv %s6929_s29  ;;  %v2475_v28 = vstv %s6932_s14  ;;  %v2481_v48 = vstv %s6936_s8  ;;  %s7073_s29 = sld [smem:[#allocation13 + $0x4]] }
 0x2ca   :  { %v2487_v34 = vstv %s6938_s25  ;;  %v2491_v56 = vstv %s6940_s23  ;;  %v2495_v13 = vstv %s6942_s30  ;;  %v2434_v30 = vadd.f32 %v2432_v27, %v2410_v40  ;;  %s7075_s14 = sld [smem:[#allocation13 + $0x28]] }
 0x2cb   :  { %v2440_v35 = vadd.f32 %v2438_v9, %v2416_v21  ;;  %v2458_v43 = vsel %vm181_vm12, %v2455_v62, %v2457_v15  ;;  %v2459_v26 = vsel %vm181_vm12, %v2457_v15, %v2455_v62  ;;  %v2446_v29 = vadd.f32 %v2444_v11, %v2422_v23  ;;  %s7077_s8 = sld [smem:[#allocation13 + $0x4c]] }
 0x2cc   :  { %v2452_v39 = vadd.f32 %v2450_v36, %v2428_v57  ;;  %v2460_v0 = vsel %vm181_vm12, %v2458_v43, 0.0  ;;  %v2461_v41 = vsel %vm182_vm13, %v2459_v26, 0.0  ;;  %v2499_v20 = vstv %s6963_s3  ;;  %s7082_s25 = sld [smem:[#allocation13 + $0x70]] }
 0x2cd   :  { %v2464_v58 = vmul.f32 %v2463_v1, %v2460_v0  ;;  %v2465_v12 = vmul.f32 %v2463_v1, %v2461_v41  ;;  %v2470_v3 = vmul.f32 %v2469_v47, %v2460_v0  ;;  %v2471_v18 = vmul.f32 %v2469_v47, %v2461_v41  ;;  %s7085_s23 = sld [smem:[#allocation13 + $0xd]] }
 0x2ce   :  { %v2476_v24 = vmul.f32 %v2475_v28, %v2460_v0  ;;  %v2477_v46 = vmul.f32 %v2475_v28, %v2461_v41  ;;  %v2482_v2 = vmul.f32 %v2481_v48, %v2460_v0  ;;  %v2483_v50 = vmul.f32 %v2481_v48, %v2461_v41  ;;  %v7021_v41 = vld [vmem:[#allocation2 + $0x10] sm:$0xff]  ;;  %9879 = sst [smem:[#allocation131_spill]] %s7068_s1 }
 0x2cf   :  { %v2466_v22 = vadd.f32 %v2464_v58, %v2434_v30  ;;  %v2467_v38 = vadd.f32 %v2465_v12, %v2435_v55  ;;  %v2472_v17 = vadd.f32 %v2470_v3, %v2440_v35  ;;  %v2473_v44 = vadd.f32 %v2471_v18, %v2441_v61  ;;  %v7030_v18 = vld [vmem:[#allocation2 + $0x8] sm:$0xff]  ;;  %9880 = sst [smem:[#allocation45_spill]] %s7073_s29 }
 0x2d0   :  { %v2478_v32 = vadd.f32 %v2476_v24, %v2446_v29  ;;  %v2479_v59 = vadd.f32 %v2477_v46, %v2447_v7  ;;  %v2484_v31 = vadd.f32 %v2482_v2, %v2452_v39  ;;  %v2485_v37 = vadd.f32 %v2483_v50, %v2453_v45  ;;  %v7018_v39 = vld [vmem:[#allocation2] sm:$0xff]  ;;  %v7033_v46 = vld [vmem:[#allocation2 + $0x18] sm:$0xff]  ;;  %9881 = sst [smem:[#allocation46_spill]] %s7075_s14 }
 0x2d1   :  { %v2488_v14 = vadd.f32 %v2487_v34, %v2466_v22  ;;  %v2489_v54 = vadd.f32 %v2487_v34, %v2467_v38  ;;  %v2492_v52 = vadd.f32 %v2491_v56, %v2472_v17  ;;  %v2493_v53 = vadd.f32 %v2491_v56, %v2473_v44  ;;  %9882 = sst [smem:[#allocation133_spill]] %s7077_s8 }
 0x2d2   :  { %v2496_v25 = vadd.f32 %v2495_v13, %v2478_v32  ;;  %v2497_v6 = vadd.f32 %v2495_v13, %v2479_v59  ;;  %v2500_v49 = vadd.f32 %v2499_v20, %v2484_v31  ;;  %v2501_v16 = vadd.f32 %v2499_v20, %v2485_v37  ;;  %9883 = sst [smem:[#allocation47_spill]] %s7082_s25 }
 0x2d3   :  { %v2502_v19 = vmax.f32 %v2488_v14, %v2492_v52  ;;  %v2503_v51 = vmax.f32 %v2489_v54, %v2493_v53  ;;  %v195_v13 = vstv %s6974_s15  ;;  %v199_v30 = vstv %s6976_s2  ;;  %9884 = sst [smem:[#allocation57_spill]] %s7085_s23 }
 0x2d4   :  { %v196_v0 = vmul.f32 %v7018_v39, %v195_v13  ;;  %v200_v58 = vmul.f32 %v7021_v41, %v199_v30  ;;  %v197_v24 = vmul.f32 %v7030_v18, %v195_v13  ;;  %v201_v2 = vmul.f32 %v7033_v46, %v199_v30  ;;  %s7088_s30 = sld [smem:[#allocation13 + $0x7]] }
 0x2d5   :  { %v2504_v10 = vmax.f32 %v2502_v19, %v2496_v25  ;;  %v2505_v40 = vmax.f32 %v2503_v51, %v2497_v6  ;;  %v205_v50 = vstv %s6978_s9  ;;  %v211_v37 = vstv %s6980_s28  ;;  %s7091_s3 = sld [smem:[#allocation13 + $0x2b]] }
 0x2d6   :  { %v202_v59 = vadd.f32 %v200_v58, %v196_v0  ;;  %v206_v31 = vmul.f32 %v6706_v60, %v205_v50  ;;  %v225_v20 = vstv %s6986_s22  ;;  %v213_v19 = vmul.f32 %v6879_v5, %v211_v37  ;;  %s7095_s15 = sld [smem:[#allocation13 + $0x4f]] }
 0x2d7   :  { %v2506_v21 = vmax.f32 %v2504_v10, %v2500_v49  ;;  %v2507_v23 = vmax.f32 %v2505_v40, %v2501_v16  ;;  %v226_v10 = vmul.f32 %v7021_v41, %v225_v20  ;;  %v227_v40 = vmul.f32 %v7033_v46, %v225_v20  ;;  %s7098_s2 = sld [smem:[#allocation13 + $0x73]] }
 0x2d8   :  { %s7104_s9 = sld [smem:[#allocation13 + $0xa]] }
 0x2d9   :  { %v2508_v57 = vsub.f32 %v2488_v14, %v2506_v21  ;;  %v2509_v27 = vsub.f32 %v2489_v54, %v2507_v23  ;;  %v2514_v9 = vsub.f32 %v2492_v52, %v2506_v21  ;;  %v2515_v11 = vsub.f32 %v2493_v53, %v2507_v23  ;;  %s7112_s28 = sld [smem:[#allocation13 + $0x2e]] }
 0x2da   :  { %v2520_v4 = vsub.f32 %v2496_v25, %v2506_v21  ;;  %v2521_v15 = vsub.f32 %v2497_v6, %v2507_v23  ;;  %v2526_v55 = vsub.f32 %v2500_v49, %v2506_v21  ;;  %v2527_v61 = vsub.f32 %v2501_v16, %v2507_v23  ;;  %9885 = sst [smem:[#allocation134_spill]] %s7088_s30 }
 0x2db   :  { %v2510_v7 = vmul.f32 1.442695, %v2508_v57  ;;  %v2512_v36 = vmul.f32 1.442695, %v2509_v27  ;;  %v2516_v62 = vmul.f32 1.442695, %v2514_v9  ;;  %v203_v54 = vadd.f32 %v201_v2, %v197_v24 }
 0x2dc   :  { %v2518_v45 = vmul.f32 1.442695, %v2515_v11  ;;  %v2522_v1 = vmul.f32 1.442695, %v2520_v4  ;;  %v2524_v47 = vmul.f32 1.442695, %v2521_v15  ;;  %v207_v52 = vmul.f32 %v6693_v42, %v205_v50 }
 0x2dd   :  { %4294 = vpow2.f32 %v2510_v7  ;;  %v2528_v28 = vmul.f32 1.442695, %v2526_v55  ;;  %v2530_v48 = vmul.f32 1.442695, %v2527_v61  ;;  %v221_v53 = vstv %s6984_s21  ;;  %9886 = sst [smem:[#allocation33_spill]] %s7091_s3 }
 0x2de   :  { %4296 = vpow2.f32 %v2512_v36  ;;  %v212_v25 = vmul.f32 %v6888_v63, %v211_v37  ;;  %v208_v6 = vadd.f32 %v206_v31, %v202_v59  ;;  %v222_v51 = vmul.f32 %v7018_v39, %v221_v53  ;;  %9887 = sst [smem:[#allocation34_spill]] %s7095_s15 }
 0x2df   :  { %4298 = vpow2.f32 %v2516_v62  ;;  %v223_v49 = vmul.f32 %v7030_v18, %v221_v53  ;;  %v209_v16 = vadd.f32 %v207_v52, %v203_v54  ;;  %v231_v21 = vstv %s6988_s24  ;;  %9888 = sst [smem:[#allocation35_spill]] %s7098_s2 }
 0x2e0   :  { %4300 = vpow2.f32 %v2518_v45  ;;  %v214_v23 = vadd.f32 %v212_v25, %v208_v6  ;;  %v217_v57 = vstv %s6982_s6  ;;  %v232_v27 = vmul.f32 %v6706_v60, %v231_v21  ;;  %9889 = sst [smem:[#allocation36_spill]] %s7104_s9 }
 0x2e1   :  { %4302 = vpow2.f32 %v2522_v1  ;;  %v233_v9 = vmul.f32 %v6693_v42, %v231_v21  ;;  %v215_v11 = vadd.f32 %v213_v19, %v209_v16  ;;  %v228_v4 = vadd.f32 %v226_v10, %v222_v51  ;;  %9890 = sst [smem:[#allocation37_spill]] %s7112_s28 }
 0x2e2   :  { %4304 = vpow2.f32 %v2524_v47  ;;  %v229_v15 = vadd.f32 %v227_v40, %v223_v49  ;;  %v237_v55 = vstv %s6990_s10  ;;  %v247_v61 = vstv %s6994_s12  ;;  %s7120_s6 = sld [smem:[#allocation13 + $0x52]] }
 0x2e3   :  { %4306 = vpow2.f32 %v2528_v28  ;;  %v251_v7 = vstv %s6998_s13  ;;  %v218_v36 = vadd.f32 %v217_v57, %v214_v23  ;;  %v238_v60 = vmul.f32 %v6888_v63, %v237_v55  ;;  %s7122_s21 = sld [smem:[#allocation13 + $0x76]] }
 0x2e4   :  { %4308 = vpow2.f32 %v2530_v48  ;;  %v239_v42 = vmul.f32 %v6879_v5, %v237_v55  ;;  %v219_v62 = vadd.f32 %v217_v57, %v215_v11  ;;  %v234_v45 = vadd.f32 %v232_v27, %v228_v4  ;;  %s7126_s22 = sld [smem:[#allocation13 + $0x31]] }
 0x2e5   :  { %v235_v1 = vadd.f32 %v233_v9, %v229_v15  ;;  %v248_v47 = vmul.f32 %v7018_v39, %v247_v61  ;;  %v249_v48 = vmul.f32 %v7030_v18, %v247_v61  ;;  %v252_v13 = vmul.f32 %v7021_v41, %v251_v7  ;;  %s7133_s24 = sld [smem:[#allocation13 + $0x55]] }
 0x2e6   :  { %v253_v30 = vmul.f32 %v7033_v46, %v251_v7  ;;  %v240_v59 = vadd.f32 %v238_v60, %v234_v45  ;;  %s7140_s10 = sld [smem:[#allocation13 + $0x79]]  ;;  %v269_v23 = vstv %s7012_s18 }
 0x2e7   :  { %v254_v31 = vadd.f32 %v252_v13, %v248_v47  ;;  %s7144_s12 = sld [smem:[#allocation13 + $0x10]]  ;;  %v273_v13 = vstv %s7024_s5 }
 0x2e8   :  { %9891 = sst [smem:[#allocation38_spill]] %s7120_s6  ;;  %v255_v37 = vadd.f32 %v253_v30, %v249_v48  ;;  %v277_v30 = vstv %s7037_s16 }
 0x2e9   :  { %9892 = sst [smem:[#allocation39_spill]] %s7122_s21 }
 0x2ea   :  { %v6996_v34 = vpop.eup %4294  ;;  %9893 = sst [smem:[#allocation40_spill]] %s7126_s22 }
 0x2eb   :  { %v7000_v56 = vpop.eup %4296  ;;  %9894 = sst [smem:[#allocation41_spill]] %s7133_s24 }
 0x2ec   :  { %v7006_v35 = vpop.eup %4298  ;;  %9895 = sst [smem:[#allocation42_spill]] %s7140_s10 }
 0x2ed   :  { %v7010_v43 = vpop.eup %4300  ;;  %v2532_v26 = vadd.f32 %v7006_v35, %v6996_v34  ;;  %9897 = sst [smem:[#allocation43_spill]] %s7144_s12  ;;  %s9901_s12 = smov 127  }
 0x2ee   :  { %v7016_v29 = vpop.eup %4302  ;;  %v2533_v12 = vadd.f32 %v7010_v43, %v7000_v56  ;;  %s7148_s13 = sld [smem:[#allocation13 + $0x34]] }
 0x2ef   :  { %v7028_v3 = vpop.eup %4304  ;;  %v2534_v22 = vadd.f32 %v7016_v29, %v2532_v26  ;;  %v257_v26 = vstv %s7004_s0  ;;  %s7151_s0 = sld [smem:[#allocation13 + $0x58]] }
 0x2f0   :  { %v7040_v38 = vpop.eup %4306  ;;  %v2535_v17 = vadd.f32 %v7028_v3, %v2533_v12  ;;  %s7158_s10 = sld [smem:[#allocation13 + $0x13]] }
 0x2f1   :  { %v7045_v44 = vpop.eup %4308  ;;  %v2536_v32 = vadd.f32 %v7040_v38, %v2534_v22  ;;  %s7181_s24 = sld [smem:[#allocation13 + $0x5e]] }
 0x2f2   :  { %v2537_v14 = vadd.f32 %v7045_v44, %v2535_v17  ;;  %s7183_s18 = sld [smem:[#allocation13 + $0x82]] }
 0x2f3   :  { %4310 = vrcp.f32 %v2536_v32  ;;  %s7246_s22 = sld [smem:[#allocation13 + $0x22]] }
 0x2f4   :  { %4312 = vrcp.f32 %v2537_v14  ;;  %v7135_v14 = vld [vmem:[#allocation2 + $0x28] sm:$0xff]  ;;  %9898 = sst [smem:[#allocation44_spill]] %s7148_s13 }
 0x2f5   :  { %v259_v54 = vmul.f32 %v7135_v14, %v257_v26  ;;  %9899 = sst [smem:[#allocation49_spill]] %s7151_s0 }
 0x2f6   :  { %9902 = sst [smem:[#allocation51_spill]] %s7158_s10 }
 0x2f7   :  { %v261_v51 = vadd.f32 %v259_v54, %v255_v37  ;;  %s7162_s13 = sld [smem:[#allocation13 + $0x37]] }
 0x2f8   :  { %s7166_s0 = sld [smem:[#allocation13 + $0x5b]] }
 0x2f9   :  { %s7175_s10 = sld [smem:[#allocation13 + $0x16]] }
 0x2fa   :  { %9908 = sst [smem:[#allocation58_spill]] %s7181_s24 }
 0x2fb   :  { %9909 = sst [smem:[#allocation59_spill]] %s7183_s18 }
 0x2fc   :  { %s7200_s24 = sld [smem:[#allocation13 + $0x85]] }
 0x2fd   :  { %9903 = sst [smem:[#allocation52_spill]] %s7162_s13 }
 0x2fe   :  { %9904 = sst [smem:[#allocation53_spill]] %s7166_s0 }
 0x2ff   :  { %9906 = sst [smem:[#allocation55_spill]] %s7175_s10 }
 0x300   :  { %v4311_v28 = vpop.eup %4310  ;;  %s7179_s13 = sld [smem:[#allocation13 + $0x3a]] }
 0x301   :  { %v4313_v0 = vpop.eup %4312  ;;  %v2540_v58 = vmul.f32 %v4311_v28, %v6996_v34  ;;  %v2546_v12 = vmul.f32 %v4311_v28, %v7006_v35  ;;  %v2552_v24 = vmul.f32 %v4311_v28, %v7016_v29  ;;  %v7110_v2 = vmul.f32 %v4311_v28, %v7040_v38  ;;  %s7191_s10 = sld [smem:[#allocation13 + $0x3d]] }
 0x302   :  { %v2541_v50 = vmul.f32 %v4313_v0, %v7000_v56  ;;  %v2547_v22 = vmul.f32 %v4313_v0, %v7010_v43  ;;  %v2553_v17 = vmul.f32 %v4313_v0, %v7028_v3  ;;  %v7118_v32 = vmul.f32 %v4313_v0, %v7045_v44  ;;  %v7128_v56 = vld [vmem:[#allocation2 + $0x20] sm:$0xff]  ;;  %9913 = sst [smem:[#allocation63_spill]] %s7200_s24 }
 0x303   :  { %v2542_v34 = vadd.f32 1.0, %v2540_v58  ;;  %v243_v35 = vstv %s6992_s11  ;;  %v263_v29 = vstv %s7008_s17  ;;  %v258_v43 = vmul.f32 %v7128_v56, %v257_v26  ;;  %s9896_s11 = smov 1   ;;  %s7154_s17 = sld [smem:[#allocation13 + $0x7c]] }
 0x304   :  { %v2543_v38 = vadd.f32 1.0, %v2541_v50  ;;  %v241_v44 = vadd.f32 %v239_v42, %v235_v1  ;;  %v244_v53 = vadd.f32 %v243_v35, %v240_v59  ;;  %v264_v25 = vmul.f32 %v6888_v63, %v263_v29  ;;  %s7211_s18 = sld [smem:[#allocation13 + $0x64]] }
 0x305   :  { %v7131_v3 = vmul.f32 %v2542_v34, %v218_v36  ;;  %v260_v20 = vadd.f32 %v258_v43, %v254_v31  ;;  %v2548_v6 = vadd.f32 1.0, %v2546_v12  ;;  %v265_v49 = vmul.f32 %v6879_v5, %v263_v29  ;;  %s7233_s24 = sld [smem:[#allocation13 + $0x8b]] }
 0x306   :  { %v7138_v52 = vmul.f32 %v2543_v38, %v219_v62  ;;  %v245_v19 = vadd.f32 %v243_v35, %v241_v44  ;;  %v2549_v16 = vadd.f32 1.0, %v2547_v22  ;;  %9907 = sst [smem:[#allocation56_spill]] %s7179_s13  ;;  %v2554_v9 = vadd.f32 1.0, %v2552_v24 }
 0x307   :  { %2648 = vrot.lane.b32.xlu0 %v7131_v3, %s9896_s11  ;;  %v266_v10 = vadd.f32 %v264_v25, %v260_v20  ;;  %v7164_v40 = vmul.f32 %v2548_v6, %v244_v53  ;;  %v267_v21 = vadd.f32 %v265_v49, %v261_v51  ;;  %v2555_v4 = vadd.f32 1.0, %v2553_v17  ;;  %9911 = sst [smem:[#allocation61_spill]] %s7191_s10 }
 0x308   :  { %2650 = vrot.lane.b32.xlu1 %v7138_v52, %s9896_s11  ;;  %v7169_v57 = vmul.f32 %v2549_v16, %v245_v19  ;;  %s7195_s13 = sld [smem:[#allocation13 + $0x61]]  ;;  %v2564_v61 = vrot.slane %v7131_v3, 7  ;;  %v2565_v7 = vrot.slane %v7138_v52, 7  ;;  %v2736_v62 = vrot.slane %v7131_v3, 1 }
 0x309   :  { %9900 = sst [smem:[#allocation50_spill]] %s7154_s17  ;;  %v270_v27 = vadd.f32 %v269_v23, %v266_v10  ;;  %v271_v11 = vadd.f32 %v269_v23, %v267_v21  ;;  %v2737_v45 = vrot.slane %v7138_v52, 1  ;;  %v2828_v28 = vrot.slane %v7164_v40, 7 }
 0x30a   :  { %s7171_s17 = sld [smem:[#allocation13 + $0x7f]]  ;;  %v7215_v60 = vsel %vm171_vm0, %v2564_v61, 0.0  ;;  %v7221_v42 = vsel %vm171_vm0, %v2565_v7, 0.0  ;;  %v7261_v1 = vsel %vm172_vm1, %v2736_v62, 0.0  ;;  %v2829_v48 = vrot.slane %v7169_v57, 7 }
 0x30b   :  { %2704 = vrot.lane.b32.xlu0 %v7131_v3, %s9901_s12  ;;  %v7193_v15 = vmul.f32 %v2554_v9, %v270_v27  ;;  %v7197_v55 = vmul.f32 %v2555_v4, %v271_v11  ;;  %s7209_s10 = sld [smem:[#allocation13 + $0x40]]  ;;  %v7267_v47 = vsel %vm172_vm1, %v2737_v45, 0.0  ;;  %v7297_v26 = vsel %vm171_vm0, %v2828_v28, 0.0 }
 0x30c   :  { %2706 = vrot.lane.b32.xlu1 %v7138_v52, %s9901_s12  ;;  %9916 = sst [smem:[#allocation66_spill]] %s7211_s18  ;;  %v7303_v0 = vsel %vm171_vm0, %v2829_v48, 0.0  ;;  %v274_v58 = vmul.f32 %v7018_v39, %v273_v13  ;;  %v275_v12 = vmul.f32 %v7030_v18, %v273_v13  ;;  %v278_v24 = vmul.f32 %v7021_v41, %v277_v30 }
 0x30d   :  { %s7231_s18 = sld [smem:[#allocation13 + $0x67]]  ;;  %v279_v50 = vmul.f32 %v7033_v46, %v277_v30  ;;  %v283_v22 = vstv %s7042_s19  ;;  %v3008_v17 = vrot.slane %v7164_v40, 1  ;;  %v3009_v39 = vrot.slane %v7169_v57, 1 }
 0x30e   :  { %9912 = sst [smem:[#allocation62_spill]] %s7195_s13  ;;  %v280_v41 = vadd.f32 %v278_v24, %v274_v58  ;;  %v284_v46 = vmul.f32 %v7128_v56, %v283_v22  ;;  %v285_v34 = vmul.f32 %v7135_v14, %v283_v22  ;;  %v289_v35 = vstv %s7047_s27 }
 0x30f   :  { %2920 = vrot.lane.b32.xlu0 %v7164_v40, %s9896_s11  ;;  %s7217_s13 = sld [smem:[#allocation13 + $0x88]]  ;;  %v281_v18 = vadd.f32 %v279_v50, %v275_v12  ;;  %v7339_v29 = vsel %vm172_vm1, %v3008_v17, 0.0  ;;  %v7345_v38 = vsel %vm172_vm1, %v3009_v39, 0.0  ;;  %v290_v56 = vmul.f32 %v6888_v63, %v289_v35 }
 0x310   :  { %9905 = sst [smem:[#allocation54_spill]] %s7171_s17  ;;  %2922 = vrot.lane.b32.xlu1 %v7169_v57, %s9896_s11  ;;  %v286_v59 = vadd.f32 %v284_v46, %v280_v41  ;;  %v291_v43 = vmul.f32 %v6879_v5, %v289_v35  ;;  %v3100_v44 = vrot.slane %v7193_v15, 7  ;;  %v3101_v37 = vrot.slane %v7197_v55, 7 }
 0x311   :  { %s7187_s17 = sld [smem:[#allocation13 + $0x19]]  ;;  %v287_v31 = vadd.f32 %v285_v34, %v281_v18  ;;  %v295_v14 = vstv %s7052_s26  ;;  %v2593_v6 = vstv %s7057_s7  ;;  %v2599_v19 = vstv %s7060_s4 }
 0x312   :  { %9915 = sst [smem:[#allocation65_spill]] %s7209_s10  ;;  %v292_v5 = vadd.f32 %v290_v56, %v286_v59  ;;  %v7376_v54 = vsel %vm171_vm0, %v3100_v44, 0.0  ;;  %v7382_v53 = vsel %vm171_vm0, %v3101_v37, 0.0  ;;  %v2560_v51 = vadd.f32 1.0, %v7110_v2 }
 0x313   :  { %2976 = vrot.lane.b32.xlu0 %v7164_v40, %s9901_s12  ;;  %s7229_s10 = sld [smem:[#allocation13 + $0x43]]  ;;  %v293_v63 = vadd.f32 %v291_v43, %v287_v31  ;;  %v2605_v49 = vstv %s7063_s20  ;;  %v2611_v16 = vstv %s7068_s1  ;;  %v2681_v10 = vstv %s7073_s29 }
 0x314   :  { %2978 = vrot.lane.b32.xlu1 %v7169_v57, %s9901_s12  ;;  %9921 = sst [smem:[#allocation70_spill]] %s7231_s18  ;;  %v296_v20 = vadd.f32 %v295_v14, %v292_v5  ;;  %v2561_v21 = vadd.f32 1.0, %v7118_v32  ;;  %v2687_v23 = vstv %s7075_s14  ;;  %v2693_v27 = vstv %s7077_s8 }
 0x315   :  { %9918 = sst [smem:[#allocation67_spill]] %s7217_s13  ;;  %v297_v25 = vadd.f32 %v295_v14, %v293_v63  ;;  %v2699_v9 = vstv %s7082_s25  ;;  %v2773_v2 = vstv %s7088_s30  ;;  %v2779_v11 = vstv %s7091_s3 }
 0x316   :  { %9922 = sst [smem:[#allocation71_spill]] %s7233_s24  ;;  %v2785_v4 = vstv %s7095_s15  ;;  %v2791_v32 = vstv %s7098_s2  ;;  %v2865_v61 = vstv %s7104_s9  ;;  %v2871_v7 = vstv %s7112_s28 }
 0x317   :  { %9910 = sst [smem:[#allocation60_spill]] %s7187_s17  ;;  %3192 = vrot.lane.b32.xlu0 %v7193_v15, %s9896_s11  ;;  %v7420_v62 = vmul.f32 %v2560_v51, %v296_v20  ;;  %v2877_v45 = vstv %s7120_s6  ;;  %v2883_v28 = vstv %s7122_s21  ;;  %v2953_v48 = vstv %s7085_s23 }
 0x318   :  { %s7205_s17 = sld [smem:[#allocation13 + $0x1c]]  ;;  %3194 = vrot.lane.b32.xlu1 %v7197_v55, %s9896_s11  ;;  %v7427_v13 = vmul.f32 %v2561_v21, %v297_v25  ;;  %v3280_v30 = vrot.slane %v7193_v15, 1  ;;  %v3281_v24 = vrot.slane %v7197_v55, 1  ;;  %v7542_v25 = vmul.f32 %v2593_v6, %v7221_v42 }
 0x319   :  { %9920 = sst [smem:[#allocation69_spill]] %s7229_s10  ;;  %v3552_v14 = vrot.slane %v7420_v62, 1  ;;  %v7570_v59 = vmul.f32 %v2605_v49, %v7221_v42  ;;  %v7582_v5 = vmul.f32 %v2611_v16, %v7221_v42  ;;  %v7592_v56 = vmul.f32 %v2593_v6, %v7215_v60 }
 0x31a   :  { %s7237_s13 = sld [smem:[#allocation13 + $0x8e]]  ;;  %v7457_v31 = vsel %vm172_vm1, %v3280_v30, 0.0  ;;  %v7466_v37 = vsel %vm172_vm1, %v3281_v24, 0.0  ;;  %v3373_v20 = vrot.slane %v7427_v13, 7  ;;  %v3372_v30 = vrot.slane %v7420_v62, 7 }
 0x31b   :  { %2568 = vrot.lane.b32.xlu0 %v7215_v60, %s9896_s11  ;;  %s7241_s0 = sld [smem:[#allocation13 + $0x6a]]  ;;  %v3553_v24 = vrot.slane %v7427_v13, 1  ;;  %v7610_v36 = vmul.f32 %v2611_v16, %v7215_v60  ;;  %v7615_v6 = vmul.f32 %v2681_v10, %v7131_v3  ;;  %v7637_v16 = vmul.f32 %v2693_v27, %v7131_v3 }
 0x31c   :  { %2570 = vrot.lane.b32.xlu1 %v7221_v42, %s9896_s11  ;;  %9926 = sst [smem:[#allocation75_spill]] %s7246_s22  ;;  %v7506_v44 = vsel %vm171_vm0, %v3373_v20, 0.0  ;;  %v7515_v43 = vsel %vm171_vm0, %v3372_v30, 0.0  ;;  %v7523_v20 = vsel %vm172_vm1, %v3552_v14, 0.0  ;;  %v7597_v30 = vmul.f32 %v2599_v19, %v7215_v60 }
 0x31d   :  { %s7251_s24 = sld [smem:[#allocation13 + $0x3]]  ;;  %v7519_v63 = vsel %vm172_vm1, %v3553_v24, 0.0  ;;  %v7554_v24 = vmul.f32 %v2599_v19, %v7221_v42  ;;  %v7620_v19 = vmul.f32 %v2681_v10, %v7138_v52  ;;  %v7642_v10 = vmul.f32 %v2693_v27, %v7138_v52 }
 0x31e   :  { %9914 = sst [smem:[#allocation64_spill]] %s7205_s17  ;;  %v7656_v51 = vmul.f32 %v2699_v9, %v7138_v52  ;;  %v7661_v27 = vmul.f32 %v2773_v2, %v7261_v1  ;;  %v7666_v21 = vmul.f32 %v2773_v2, %v7267_v47  ;;  %v7686_v2 = vmul.f32 %v2785_v4, %v7261_v1 }
 0x31f   :  { %s7225_s17 = sld [smem:[#allocation13 + $0x1f]]  ;;  %2616 = vrot.lane.b32.xlu0 %v7215_v60, %s9901_s12  ;;  %v7699_v35 = vmul.f32 %v2791_v32, %v7261_v1  ;;  %v7712_v14 = vmul.f32 %v2865_v61, %v7297_v26  ;;  %v7742_v34 = vmul.f32 %v2877_v45, %v7303_v0  ;;  %v7766_v46 = vmul.f32 %v2953_v48, %v7169_v57 }
 0x320   :  { %9923 = sst [smem:[#allocation72_spill]] %s7237_s13  ;;  %2618 = vrot.lane.b32.xlu1 %v7221_v42, %s9901_s12  ;;  %v7602_v42 = vmul.f32 %v2605_v49, %v7215_v60  ;;  %v7627_v49 = vmul.f32 %v2687_v23, %v7131_v3  ;;  %v7632_v60 = vmul.f32 %v2687_v23, %v7138_v52  ;;  %v7651_v23 = vmul.f32 %v2699_v9, %v7131_v3 }
 0x321   :  { %9924 = sst [smem:[#allocation73_spill]] %s7241_s0  ;;  %v7676_v52 = vmul.f32 %v2779_v11, %v7261_v1  ;;  %v7681_v9 = vmul.f32 %v2779_v11, %v7267_v47  ;;  %10048 = vst [vmem:[#allocation80_spill] sm:$0xff] %v7686_v2  ;;  %v7694_v3 = vmul.f32 %v2785_v4, %v7267_v47  ;;  %10051 = vst [vmem:[#allocation82_spill] sm:$0xff] %v7699_v35 }
 0x322   :  { %s7255_s13 = sld [smem:[#allocation13 + $0x27]]  ;;  %v7704_v11 = vmul.f32 %v2791_v32, %v7267_v47  ;;  %10055 = vst [vmem:[#allocation85_spill] sm:$0xff] %v7712_v14  ;;  %v7717_v4 = vmul.f32 %v2865_v61, %v7303_v0  ;;  %v7732_v32 = vmul.f32 %v2871_v7, %v7303_v0  ;;  %v7737_v61 = vmul.f32 %v2877_v45, %v7297_v26 }
 0x323   :  { %3248 = vrot.lane.b32.xlu0 %v7193_v15, %s9901_s12  ;;  %9927 = sst [smem:[#allocation77_spill]] %s7251_s24  ;;  %10046 = vst [vmem:[#allocation76_spill] sm:$0xff] %v7676_v52  ;;  %10049 = vst [vmem:[#allocation78_spill] sm:$0xff] %v7694_v3  ;;  %v7761_v45 = vmul.f32 %v2953_v48, %v7164_v40 }
 0x324   :  { %3250 = vrot.lane.b32.xlu1 %v7197_v55, %s9901_s12  ;;  %s7257_s18 = sld [smem:[#allocation13 + $0x4b]]  ;;  %10052 = vst [vmem:[#allocation79_spill] sm:$0xff] %v7704_v11  ;;  %10057 = vst [vmem:[#allocation84_spill] sm:$0xff] %v7717_v4 }
 0x325   :  { %9919 = sst [smem:[#allocation68_spill]] %s7225_s17  ;;  %10060 = vst [vmem:[#allocation89_spill] sm:$0xff] %v7732_v32  ;;  %10061 = vst [vmem:[#allocation135_spill] sm:$0xff] %v7737_v61 }
 0x326   :  { %s7243_s17 = sld [smem:[#allocation13 + $0x46]]  ;;  %10063 = vst [vmem:[#allocation136_spill] sm:$0xff] %v7742_v34  ;;  %10068 = vst [vmem:[#allocation137_spill] sm:$0xff] %v7761_v45 }
 0x327   :  { %s7263_s22 = sld [smem:[#allocation13 + $0x6f]]  ;;  %2740 = vrot.lane.b32.xlu0 %v7261_v1, %s9896_s11  ;;  %10069 = vst [vmem:[#allocation138_spill] sm:$0xff] %v7766_v46 }
 0x328   :  { %9928 = sst [smem:[#allocation81_spill]] %s7255_s13  ;;  %2742 = vrot.lane.b32.xlu1 %v7267_v47, %s9896_s11 }
 0x329   :  { %s7277_s13 = sld [smem:[#allocation13 + $0x4d]] }
 0x32a   :  { %9929 = sst [smem:[#allocation83_spill]] %s7257_s18 }
 0x32b   :  { %s7275_s18 = sld [smem:[#allocation13 + $0x29]]  ;;  %2796 = vrot.lane.b32.xlu0 %v7261_v1, %s9901_s12  ;;  %v7722_v1 = vmul.f32 %v2871_v7, %v7297_v26  ;;  %v7751_v7 = vmul.f32 %v2883_v28, %v7297_v26 }
 0x32c   :  { %9925 = sst [smem:[#allocation74_spill]] %s7243_s17  ;;  %2798 = vrot.lane.b32.xlu1 %v7267_v47, %s9901_s12  ;;  %v7756_v47 = vmul.f32 %v2883_v28, %v7303_v0 }
 0x32d   :  { %9930 = sst [smem:[#allocation88_spill]] %s7263_s22  ;;  %10058 = vst [vmem:[#allocation90_spill] sm:$0xff] %v7722_v1  ;;  %10065 = vst [vmem:[#allocation145_spill] sm:$0xff] %v7751_v7 }
 0x32e   :  { %s7271_s17 = sld [smem:[#allocation13 + $0x5]]  ;;  %10067 = vst [vmem:[#allocation146_spill] sm:$0xff] %v7756_v47 }
 0x32f   :  { %9933 = sst [smem:[#allocation102_spill]] %s7277_s13  ;;  %2832 = vrot.lane.b32.xlu0 %v7297_v26, %s9896_s11 }
 0x330   :  { %s7280_s24 = sld [smem:[#allocation13 + $0x71]]  ;;  %2834 = vrot.lane.b32.xlu1 %v7303_v0, %s9896_s11 }
 0x331   :  { %9932 = sst [smem:[#allocation98_spill]] %s7275_s18 }
 0x332   :  { %s7285_s22 = sld [smem:[#allocation13 + $0xc]] }
 0x333   :  { %s7293_s13 = sld [smem:[#allocation13 + $0x54]]  ;;  %2888 = vrot.lane.b32.xlu0 %v7297_v26, %s9901_s12 }
 0x334   :  { %9931 = sst [smem:[#allocation91_spill]] %s7271_s17  ;;  %2890 = vrot.lane.b32.xlu1 %v7303_v0, %s9901_s12 }
 0x335   :  { %s7289_s17 = sld [smem:[#allocation13 + $0x30]] }
 0x336   :  { %9934 = sst [smem:[#allocation30_spill]] %s7280_s24 }
 0x337   :  { %s7299_s24 = sld [smem:[#allocation13 + $0x78]]  ;;  %3012 = vrot.lane.b32.xlu0 %v7339_v29, %s9896_s11 }
 0x338   :  { %9935 = sst [smem:[#allocation31_spill]] %s7285_s22  ;;  %3014 = vrot.lane.b32.xlu1 %v7345_v38, %s9896_s11 }
 0x339   :  { %9937 = sst [smem:[#allocation112_spill]] %s7293_s13 }
 0x33a   :  { %s7307_s22 = sld [smem:[#allocation13 + $0xe]] }
 0x33b   :  { %9936 = sst [smem:[#allocation32_spill]] %s7289_s17  ;;  %3068 = vrot.lane.b32.xlu0 %v7339_v29, %s9901_s12 }
 0x33c   :  { %s7315_s5 = sld [smem:[#allocation13 + $0x32]]  ;;  %3070 = vrot.lane.b32.xlu1 %v7345_v38, %s9901_s12 }
 0x33d   :  { %9938 = sst [smem:[#allocation115_spill]] %s7299_s24 }
 0x33e   :  { %s7318_s16 = sld [smem:[#allocation13 + $0x56]] }
 0x33f   :  { %s7326_s24 = sld [smem:[#allocation13 + $0x15]]  ;;  %3104 = vrot.lane.b32.xlu0 %v7376_v54, %s9896_s11 }
 0x340   :  { %9939 = sst [smem:[#allocation122_spill]] %s7307_s22  ;;  %3106 = vrot.lane.b32.xlu1 %v7382_v53, %s9896_s11 }
 0x341   :  { %s7321_s22 = sld [smem:[#allocation13 + $0x7a]] }
 0x342   :  { %9940 = sst [smem:[#allocation125_spill]] %s7315_s5 }
 0x343   :  { %s7332_s19 = sld [smem:[#allocation13 + $0x39]]  ;;  %3160 = vrot.lane.b32.xlu0 %v7376_v54, %s9901_s12 }
 0x344   :  { %9941 = sst [smem:[#allocation129_spill]] %s7318_s16  ;;  %3162 = vrot.lane.b32.xlu1 %v7382_v53, %s9901_s12 }
 0x345   :  { %9943 = sst [smem:[#allocation117_spill]] %s7326_s24 }
 0x346   :  { %s7341_s16 = sld [smem:[#allocation13 + $0x81]] }
 0x347   :  { %9942 = sst [smem:[#allocation95_spill]] %s7321_s22  ;;  %3464 = vrot.lane.b32.xlu0 %v7420_v62, %s9896_s11 }
 0x348   :  { %s7335_s22 = sld [smem:[#allocation13 + $0x5d]]  ;;  %3466 = vrot.lane.b32.xlu1 %v7427_v13, %s9896_s11 }
 0x349   :  { %9944 = sst [smem:[#allocation132_spill]] %s7332_s19 }
 0x34a   :  { %s7349_s24 = sld [smem:[#allocation13]] }
 0x34b   :  { %s7355_s27 = sld [smem:[#allocation13 + $0x24]]  ;;  %3284 = vrot.lane.b32.xlu0 %v7457_v31, %s9896_s11 }
 0x34c   :  { %9946 = sst [smem:[#allocation161_spill]] %s7341_s16  ;;  %3286 = vrot.lane.b32.xlu1 %v7466_v37, %s9896_s11 }
 0x34d   :  { %s7357_s16 = sld [smem:[#allocation13 + $0x48]] }
 0x34e   :  { %9945 = sst [smem:[#allocation48_spill]] %s7335_s22 }
 0x34f   :  { %s7360_s22 = sld [smem:[#allocation13 + $0x6c]]  ;;  %3340 = vrot.lane.b32.xlu0 %v7457_v31, %s9901_s12 }
 0x350   :  { %9947 = sst [smem:[#allocation162_spill]] %s7349_s24  ;;  %3342 = vrot.lane.b32.xlu1 %v7466_v37, %s9901_s12 }
 0x351   :  { %9948 = sst [smem:[#allocation163_spill]] %s7355_s27 }
 0x352   :  { %s7365_s24 = sld [smem:[#allocation13 + $0x2]] }
 0x353   :  { %9949 = sst [smem:[#allocation164_spill]] %s7357_s16  ;;  %3376 = vrot.lane.b32.xlu0 %v7515_v43, %s9896_s11 }
 0x354   :  { %s7369_s16 = sld [smem:[#allocation13 + $0x26]]  ;;  %3378 = vrot.lane.b32.xlu1 %v7506_v44, %s9896_s11 }
 0x355   :  { %9950 = sst [smem:[#allocation165_spill]] %s7360_s22 }
 0x356   :  { %s7372_s22 = sld [smem:[#allocation13 + $0x4a]] }
 0x357   :  { %s7378_s27 = sld [smem:[#allocation13 + $0x6e]]  ;;  %3432 = vrot.lane.b32.xlu0 %v7515_v43, %s9901_s12 }
 0x358   :  { %9951 = sst [smem:[#allocation166_spill]] %s7365_s24  ;;  %3434 = vrot.lane.b32.xlu1 %v7506_v44, %s9901_s12 }
 0x359   :  { %s7392_s26 = sld [smem:[#allocation13 + $0x3b]] }
 0x35a   :  { %9952 = sst [smem:[#allocation167_spill]] %s7369_s16 }
 0x35b   :  { %s7386_s16 = sld [smem:[#allocation13 + $0x17]]  ;;  %3520 = vrot.lane.b32.xlu0 %v7420_v62, %s9901_s12 }
 0x35c   :  { %9953 = sst [smem:[#allocation168_spill]] %s7372_s22  ;;  %3522 = vrot.lane.b32.xlu1 %v7427_v13, %s9901_s12 }
 0x35d   :  { %9954 = sst [smem:[#allocation169_spill]] %s7378_s27 }
 0x35e   :  { %s7401_s27 = sld [smem:[#allocation13 + $0x83]] }
 0x35f   :  { %9956 = sst [smem:[#allocation171_spill]] %s7392_s26  ;;  %3556 = vrot.lane.b32.xlu0 %v7523_v20, %s9896_s11 }
 0x360   :  { %s7408_s26 = sld [smem:[#allocation13 + $0x6]]  ;;  %3558 = vrot.lane.b32.xlu1 %v7519_v63, %s9896_s11 }
 0x361   :  { %9955 = sst [smem:[#allocation170_spill]] %s7386_s16 }
 0x362   :  { %s7397_s16 = sld [smem:[#allocation13 + $0x5f]] }
 0x363   :  { %s9960_s22 = sld [smem:[#allocation40_spill]]  ;;  %3612 = vrot.lane.b32.xlu0 %v7523_v20, %s9901_s12 }
 0x364   :  { %9958 = sst [smem:[#allocation173_spill]] %s7401_s27  ;;  %3614 = vrot.lane.b32.xlu1 %v7519_v63, %s9901_s12 }
 0x365   :  { %s7415_s27 = sld [smem:[#allocation13 + $0x2a]] }
 0x366   :  { %9959 = sst [smem:[#allocation174_spill]] %s7408_s26 }
 0x367   :  { %s9963_s24 = sld [smem:[#allocation42_spill]] }
 0x368   :  { %9957 = sst [smem:[#allocation172_spill]] %s7397_s16 }
 0x369   :  { %s9961_s16 = sld [smem:[#allocation41_spill]]  ;;  %v2959_v58 = vstv %s9960_s22 }
 0x36a   :  { %s9964_s8 = sld [smem:[#allocation43_spill]]  ;;  %v7773_v26 = vmul.f32 %v2959_v58, %v7164_v40  ;;  %v7778_v0 = vmul.f32 %v2959_v58, %v7169_v57 }
 0x36b   :  { %9962 = sst [smem:[#allocation175_spill]] %s7415_s27 }
 0x36c   :  { %s9965_s25 = sld [smem:[#allocation44_spill]]  ;;  %10071 = vst [vmem:[#allocation139_spill] sm:$0xff] %v7773_v26  ;;  %10072 = vst [vmem:[#allocation140_spill] sm:$0xff] %v7778_v0 }
 0x36d   :  { %s7422_s14 = sld [smem:[#allocation13 + $0x4e]]  ;;  %v2971_v50 = vstv %s9963_s24 }
 0x36e   :  { %s9967_s26 = sld [smem:[#allocation49_spill]]  ;;  %v7795_v18 = vmul.f32 %v2971_v50, %v7164_v40  ;;  %v7800_v58 = vmul.f32 %v2971_v50, %v7169_v57 }
 0x36f   :  { %s9968_s3 = sld [smem:[#allocation50_spill]]  ;;  %v2965_v12 = vstv %s9961_s16 }
 0x370   :  { %s7430_s2 = sld [smem:[#allocation13 + $0x72]]  ;;  %v3045_v22 = vstv %s9964_s8  ;;  %v7783_v28 = vmul.f32 %v2965_v12, %v7164_v40  ;;  %v7788_v48 = vmul.f32 %v2965_v12, %v7169_v57  ;;  %10078 = vst [vmem:[#allocation143_spill] sm:$0xff] %v7795_v18  ;;  %10079 = vst [vmem:[#allocation144_spill] sm:$0xff] %v7800_v58 }
 0x371   :  { %s7437_s21 = sld [smem:[#allocation13 + $0x8]]  ;;  %v7805_v41 = vmul.f32 %v3045_v22, %v7339_v29  ;;  %v7810_v12 = vmul.f32 %v3045_v22, %v7345_v38 }
 0x372   :  { %v3051_v17 = vstv %s9965_s25  ;;  %s7449_s1 = sld [smem:[#allocation13 + $0x50]]  ;;  %10074 = vst [vmem:[#allocation141_spill] sm:$0xff] %v7783_v28  ;;  %10075 = vst [vmem:[#allocation142_spill] sm:$0xff] %v7788_v48 }
 0x373   :  { %9966 = sst [smem:[#allocation42_spill]] %s7422_s14  ;;  %10081 = vst [vmem:[#allocation94_spill] sm:$0xff] %v7805_v41  ;;  %10082 = vst [vmem:[#allocation92_spill] sm:$0xff] %v7810_v12  ;;  %v7819_v40 = vmul.f32 %v3051_v17, %v7339_v29  ;;  %v7824_v57 = vmul.f32 %v3051_v17, %v7345_v38 }
 0x374   :  { %v3057_v39 = vstv %s9967_s26  ;;  %s7470_s14 = sld [smem:[#allocation13 + $0x9]] }
 0x375   :  { %s9990_s28 = sld [smem:[#allocation67_spill]]  ;;  %10085 = vst [vmem:[#allocation96_spill] sm:$0xff] %v7819_v40  ;;  %10087 = vst [vmem:[#allocation93_spill] sm:$0xff] %v7824_v57  ;;  %v7829_v50 = vmul.f32 %v3057_v39, %v7339_v29  ;;  %v7834_v22 = vmul.f32 %v3057_v39, %v7345_v38  ;;  %v10094_v17 = vstv %s9968_s3 }
 0x376   :  { %9971 = sst [smem:[#allocation49_spill]] %s7430_s2  ;;  %v7844_v41 = vmul.f32 %v10094_v17, %v7339_v29 }
 0x377   :  { %9975 = sst [smem:[#allocation50_spill]] %s7437_s21  ;;  %10089 = vst [vmem:[#allocation101_spill] sm:$0xff] %v7829_v50  ;;  %10090 = vst [vmem:[#allocation99_spill] sm:$0xff] %v7834_v22  ;;  %v10096_v50 = vmov %v10094_v17 }
 0x378   :  { %s7444_s2 = sld [smem:[#allocation13 + $0x2c]]  ;;  %10095 = vst [vmem:[#allocation103_spill] sm:$0xff] %v7844_v41  ;;  %v7849_v57 = vmul.f32 %v10096_v50, %v7345_v38 }
 0x379   :  { %9983 = sst [smem:[#allocation177_spill]] %s7449_s1 }
 0x37a   :  { %s9988_s1 = sld [smem:[#allocation66_spill]]  ;;  %10098 = vst [vmem:[#allocation100_spill] sm:$0xff] %v7849_v57 }
 0x37b   :  { %9989 = sst [smem:[#allocation66_spill]] %s7470_s14 }
 0x37c   :  { %s9991_s9 = sld [smem:[#allocation68_spill]] }
 0x37d   :  { %s7478_s30 = sld [smem:[#allocation13 + $0x2d]] }
 0x37e   :  { %9979 = sst [smem:[#allocation176_spill]] %s7444_s2 }
 0x37f   :  { %s7459_s2 = sld [smem:[#allocation13 + $0x74]] }
 0x380   :  { %s9994_s6 = sld [smem:[#allocation71_spill]] }
 0x381   :  { %s7486_s29 = sld [smem:[#allocation13 + $0x51]] }
 0x382   :  { %s7489_s27 = sld [smem:[#allocation13 + $0x75]] }
 0x383   :  { %9993 = sst [smem:[#allocation67_spill]] %s7478_s30 }
 0x384   :  { %s7497_s25 = sld [smem:[#allocation13 + $0xb]] }
 0x385   :  { %9987 = sst [smem:[#allocation178_spill]] %s7459_s2 }
 0x386   :  { %s7509_s2 = sld [smem:[#allocation13 + $0x2f]] }
 0x387   :  { %9997 = sst [smem:[#allocation68_spill]] %s7486_s29 }
 0x388   :  { %10000 = sst [smem:[#allocation71_spill]] %s7489_s27 }
 0x389   :  { %s7532_s22 = sld [smem:[#allocation13 + $0x77]] }
 0x38a   :  { %10003 = sst [smem:[#allocation179_spill]] %s7497_s25 }
 0x38b   :  { %s7544_s15 = sld [smem:[#allocation13 + $0xf]] }
 0x38c   :  { %10008 = sst [smem:[#allocation180_spill]] %s7509_s2 }
 0x38d   :  { %s7526_s2 = sld [smem:[#allocation13 + $0x53]] }
 0x38e   :  { %s7556_s27 = sld [smem:[#allocation13 + $0x33]] }
 0x38f   :  { %10014 = sst [smem:[#allocation182_spill]] %s7532_s22 }
 0x390   :  { %s7562_s17 = sld [smem:[#allocation13 + $0x57]] }
 0x391   :  { %10018 = sst [smem:[#allocation183_spill]] %s7544_s15 }
 0x392   :  { %s7572_s25 = sld [smem:[#allocation13 + $0x7b]] }
 0x393   :  { %10011 = sst [smem:[#allocation181_spill]] %s7526_s2 }
 0x394   :  { %10023 = sst [smem:[#allocation131_spill]] %s7556_s27 }
 0x395   :  { %s7584_s19 = sld [smem:[#allocation13 + $0x11]] }
 0x396   :  { %s7604_s29 = sld [smem:[#allocation13 + $0x35]] }
 0x397   :  { %s7622_s20 = sld [smem:[#allocation13 + $0x59]] }
 0x398   :  { %10027 = sst [smem:[#allocation45_spill]] %s7572_s25 }
 0x399   :  { %s7644_s30 = sld [smem:[#allocation13 + $0x7d]] }
 0x39a   :  { %s7668_s16 = sld [smem:[#allocation13 + $0x12]] }
 0x39b   :  { %10030 = sst [smem:[#allocation46_spill]] %s7584_s19 }
 0x39c   :  { %10033 = sst [smem:[#allocation133_spill]] %s7604_s29 }
 0x39d   :  { %10036 = sst [smem:[#allocation47_spill]] %s7622_s20 }
 0x39e   :  { %s7688_s5 = sld [smem:[#allocation13 + $0x36]] }
 0x39f   :  { %10040 = sst [smem:[#allocation134_spill]] %s7644_s30 }
 0x3a0   :  { %10044 = sst [smem:[#allocation33_spill]] %s7668_s16 }
 0x3a1   :  { %s7706_s16 = sld [smem:[#allocation13 + $0x5a]] }
 0x3a2   :  { %s7724_s10 = sld [smem:[#allocation13 + $0x7e]] }
 0x3a3   :  { %s7744_s0 = sld [smem:[#allocation13 + $0x14]] }
 0x3a4   :  { %s7768_s11 = sld [smem:[#allocation13 + $0x38]] }
 0x3a5   :  { %s7790_s18 = sld [smem:[#allocation13 + $0x5c]] }
 0x3a6   :  { %s10077_s4 = sld [smem:[#allocation51_spill]] }
 0x3a7   :  { %10054 = sst [smem:[#allocation34_spill]] %s7706_s16 }
 0x3a8   :  { %s10083_s13 = sld [smem:[#allocation52_spill]] }
 0x3a9   :  { %10064 = sst [smem:[#allocation35_spill]] %s7744_s0 }
 0x3aa   :  { %10070 = sst [smem:[#allocation36_spill]] %s7768_s11 }
 0x3ab   :  { %10076 = sst [smem:[#allocation37_spill]] %s7790_s18 }
 0x3ac   :  { %s7812_s23 = sld [smem:[#allocation13 + $0x80]]  ;;  %v10099_v39 = vstv %s10077_s4 }
 0x3ad   :  { %s10088_s8 = sld [smem:[#allocation53_spill]]  ;;  %v7854_v22 = vmul.f32 %v10099_v39, %v7376_v54  ;;  %v10103_v40 = vmov %v10099_v39 }
 0x3ae   :  { %s7836_s18 = sld [smem:[#allocation13 + $0x1e]]  ;;  %v7862_v18 = vmul.f32 %v10103_v40, %v7382_v53  ;;  %v10105_v29 = vstv %s10083_s13 }
 0x3af   :  { %s10097_s11 = sld [smem:[#allocation55_spill]]  ;;  %10100 = vst [vmem:[#allocation148_spill] sm:$0xff] %v7854_v22  ;;  %v7867_v17 = vmul.f32 %v10105_v29, %v7376_v54  ;;  %v10108_v38 = vmov %v10105_v29 }
 0x3b0   :  { %s7856_s26 = sld [smem:[#allocation13 + $0x42]]  ;;  %10104 = vst [vmem:[#allocation149_spill] sm:$0xff] %v7862_v18  ;;  %v7872_v50 = vmul.f32 %v10108_v38, %v7382_v53 }
 0x3b1   :  { %s10102_s12 = sld [smem:[#allocation56_spill]]  ;;  %10107 = vst [vmem:[#allocation106_spill] sm:$0xff] %v7867_v17 }
 0x3b2   :  { %10084 = sst [smem:[#allocation38_spill]] %s7812_s23  ;;  %10109 = vst [vmem:[#allocation104_spill] sm:$0xff] %v7872_v50 }
 0x3b3   :  { %s10091_s23 = sld [smem:[#allocation54_spill]]  ;;  %v10112_v12 = vstv %s10088_s8 }
 0x3b4   :  { %10092 = sst [smem:[#allocation39_spill]] %s7836_s18  ;;  %v7880_v22 = vmul.f32 %v10112_v12, %v7376_v54  ;;  %v10115_v40 = vmov %v10112_v12 }
 0x3b5   :  { %s10106_s3 = sld [smem:[#allocation58_spill]]  ;;  %v7885_v18 = vmul.f32 %v10115_v40, %v7382_v53  ;;  %v10124_v12 = vstv %s10097_s11 }
 0x3b6   :  { %10101 = sst [smem:[#allocation57_spill]] %s7856_s26  ;;  %10114 = vst [vmem:[#allocation109_spill] sm:$0xff] %v7880_v22  ;;  %v7903_v22 = vmul.f32 %v10124_v12, %v7193_v15  ;;  %v10126_v40 = vmov %v10124_v12 }
 0x3b7   :  { %s7874_s7 = sld [smem:[#allocation13 + $0x66]]  ;;  %10116 = vst [vmem:[#allocation105_spill] sm:$0xff] %v7885_v18  ;;  %v7908_v18 = vmul.f32 %v10126_v40, %v7197_v55 }
 0x3b8   :  { %s10113_s4 = sld [smem:[#allocation59_spill]]  ;;  %10125 = vst [vmem:[#allocation113_spill] sm:$0xff] %v7903_v22 }
 0x3b9   :  { %v10117_v29 = vstv %s10091_s23  ;;  %s10119_s13 = sld [smem:[#allocation60_spill]]  ;;  %10128 = vst [vmem:[#allocation110_spill] sm:$0xff] %v7908_v18 }
 0x3ba   :  { %v7890_v17 = vmul.f32 %v10117_v29, %v7376_v54  ;;  %s7892_s14 = sld [smem:[#allocation13 + $0x8a]]  ;;  %v10122_v39 = vmov %v10117_v29  ;;  %v10130_v54 = vstv %s10102_s12 }
 0x3bb   :  { %v7898_v50 = vmul.f32 %v10122_v39, %v7382_v53  ;;  %s10127_s8 = sld [smem:[#allocation61_spill]]  ;;  %v7915_v29 = vmul.f32 %v10130_v54, %v7193_v15  ;;  %v10133_v53 = vmov %v10130_v54  ;;  %v10136_v12 = vstv %s10106_s3 }
 0x3bc   :  { %10118 = vst [vmem:[#allocation111_spill] sm:$0xff] %v7890_v17  ;;  %s7910_s24 = sld [smem:[#allocation13 + $0x18]]  ;;  %v7920_v39 = vmul.f32 %v10133_v53, %v7197_v55  ;;  %v7925_v38 = vmul.f32 %v10136_v12, %v7193_v15  ;;  %v10138_v40 = vmov %v10136_v12 }
 0x3bd   :  { %10110 = sst [smem:[#allocation40_spill]] %s7874_s7  ;;  %10123 = vst [vmem:[#allocation108_spill] sm:$0xff] %v7898_v50  ;;  %10132 = vst [vmem:[#allocation147_spill] sm:$0xff] %v7915_v29  ;;  %v7930_v22 = vmul.f32 %v10138_v40, %v7197_v55 }
 0x3be   :  { %s10134_s23 = sld [smem:[#allocation62_spill]]  ;;  %10135 = vst [vmem:[#allocation150_spill] sm:$0xff] %v7920_v39  ;;  %10137 = vst [vmem:[#allocation151_spill] sm:$0xff] %v7925_v38  ;;  %v10143_v29 = vstv %s10113_s4 }
 0x3bf   :  { %s10139_s11 = sld [smem:[#allocation63_spill]]  ;;  %10140 = vst [vmem:[#allocation152_spill] sm:$0xff] %v7930_v22  ;;  %v7938_v18 = vmul.f32 %v10143_v29, %v7193_v15  ;;  %v10145_v53 = vmov %v10143_v29  ;;  %v10148_v12 = vstv %s10119_s13 }
 0x3c0   :  { %10120 = sst [smem:[#allocation41_spill]] %s7892_s14  ;;  %v7943_v39 = vmul.f32 %v10145_v53, %v7197_v55  ;;  %v7950_v40 = vmul.f32 %v10148_v12, %v7457_v31  ;;  %v10152_v54 = vmov %v10148_v12 }
 0x3c1   :  { %10144 = vst [vmem:[#allocation153_spill] sm:$0xff] %v7938_v18  ;;  %s10147_s12 = sld [smem:[#allocation64_spill]]  ;;  %v7958_v15 = vmul.f32 %v10152_v54, %v7466_v37  ;;  %v10154_v55 = vstv %s10127_s8 }
 0x3c2   :  { %10129 = sst [smem:[#allocation43_spill]] %s7910_s24  ;;  %10146 = vst [vmem:[#allocation154_spill] sm:$0xff] %v7943_v39  ;;  %10149 = vst [vmem:[#allocation155_spill] sm:$0xff] %v7950_v40  ;;  %v7963_v29 = vmul.f32 %v10154_v55, %v7457_v31  ;;  %v10156_v53 = vmov %v10154_v55 }
 0x3c3   :  { %s7932_s24 = sld [smem:[#allocation13 + $0x3c]]  ;;  %10153 = vst [vmem:[#allocation156_spill] sm:$0xff] %v7958_v15  ;;  %v7968_v18 = vmul.f32 %v10156_v53, %v7466_v37 }
 0x3c4   :  { %s7945_s18 = sld [smem:[#allocation13 + $0x60]]  ;;  %10155 = vst [vmem:[#allocation119_spill] sm:$0xff] %v7963_v29  ;;  %v10158_v38 = vstv %s10134_s23 }
 0x3c5   :  { %s10150_s3 = sld [smem:[#allocation65_spill]]  ;;  %10157 = vst [vmem:[#allocation116_spill] sm:$0xff] %v7968_v18  ;;  %v7974_v40 = vmul.f32 %v10158_v38, %v7457_v31  ;;  %v10160_v39 = vmov %v10158_v38  ;;  %v10162_v15 = vstv %s10139_s11 }
 0x3c6   :  { %s7953_s26 = sld [smem:[#allocation13 + $0x84]]  ;;  %v7979_v54 = vmul.f32 %v10160_v39, %v7466_v37  ;;  %v7984_v55 = vmul.f32 %v10162_v15, %v7457_v31  ;;  %v10165_v12 = vmov %v10162_v15 }
 0x3c7   :  { %10159 = vst [vmem:[#allocation120_spill] sm:$0xff] %v7974_v40  ;;  %s7986_s4 = sld [smem:[#allocation13 + $0x1a]]  ;;  %v7992_v29 = vmul.f32 %v10165_v12, %v7466_v37  ;;  %v10169_v38 = vstv %s10147_s12 }
 0x3c8   :  { %10161 = vst [vmem:[#allocation118_spill] sm:$0xff] %v7979_v54  ;;  %10163 = vst [vmem:[#allocation124_spill] sm:$0xff] %v7984_v55  ;;  %s10166_s13 = sld [smem:[#allocation69_spill]]  ;;  %v7999_v39 = vmul.f32 %v10169_v38, %v7515_v43  ;;  %v10172_v31 = vmov %v10169_v38  ;;  %v10179_v38 = vstv %s9988_s1 }
 0x3c9   :  { %10141 = sst [smem:[#allocation44_spill]] %s7932_s24  ;;  %10167 = vst [vmem:[#allocation123_spill] sm:$0xff] %v7992_v29  ;;  %v8004_v15 = vmul.f32 %v10172_v31, %v7506_v44  ;;  %v10182_v31 = vmov %v10179_v38 }
 0x3ca   :  { %s7994_s8 = sld [smem:[#allocation13 + $0x3e]]  ;;  %10171 = vst [vmem:[#allocation127_spill] sm:$0xff] %v7999_v39  ;;  %v8021_v39 = vmul.f32 %v10179_v38, %v7515_v43  ;;  %v10190_v38 = vstv %s9991_s9 }
 0x3cb   :  { %s10170_s23 = sld [smem:[#allocation70_spill]]  ;;  %10173 = vst [vmem:[#allocation126_spill] sm:$0xff] %v8004_v15  ;;  %v10175_v53 = vstv %s10150_s3  ;;  %v8026_v15 = vmul.f32 %v10182_v31, %v7506_v44  ;;  %v10193_v31 = vmov %v10190_v38 }
 0x3cc   :  { %10151 = sst [smem:[#allocation51_spill]] %s7953_s26  ;;  %v8011_v37 = vmul.f32 %v10175_v53, %v7515_v43  ;;  %v10177_v12 = vmov %v10175_v53  ;;  %10181 = vst [vmem:[#allocation158_spill] sm:$0xff] %v8021_v39  ;;  %v10185_v53 = vstv %s9990_s28  ;;  %v8043_v39 = vmul.f32 %v10190_v38, %v7420_v62 }
 0x3cd   :  { %10164 = sst [smem:[#allocation52_spill]] %s7986_s4  ;;  %v8016_v55 = vmul.f32 %v10177_v12, %v7506_v44  ;;  %10183 = vst [vmem:[#allocation160_spill] sm:$0xff] %v8026_v15  ;;  %v10188_v12 = vmov %v10185_v53  ;;  %v8048_v15 = vmul.f32 %v10193_v31, %v7427_v13 }
 0x3ce   :  { %s8006_s21 = sld [smem:[#allocation13 + $0x62]]  ;;  %10176 = vst [vmem:[#allocation87_spill] sm:$0xff] %v8011_v37  ;;  %v8033_v37 = vmul.f32 %v10185_v53, %v7515_v43  ;;  %10192 = vst [vmem:[#allocation107_spill] sm:$0xff] %v8043_v39  ;;  %v10197_v43 = vstv %s10166_s13 }
 0x3cf   :  { %10178 = vst [vmem:[#allocation86_spill] sm:$0xff] %v8016_v55  ;;  %s10180_s11 = sld [smem:[#allocation72_spill]]  ;;  %v8038_v55 = vmul.f32 %v10188_v12, %v7506_v44  ;;  %10194 = vst [vmem:[#allocation97_spill] sm:$0xff] %v8048_v15  ;;  %v8055_v53 = vmul.f32 %v10197_v43, %v7420_v62  ;;  %v10200_v44 = vmov %v10197_v43  ;;  %v10209_v43 = vstv %s9994_s6 }
 0x3d0   :  { %10168 = sst [smem:[#allocation53_spill]] %s7994_s8  ;;  %10187 = vst [vmem:[#allocation157_spill] sm:$0xff] %v8033_v37  ;;  %v8060_v12 = vmul.f32 %v10200_v44, %v7427_v13  ;;  %v10212_v44 = vmov %v10209_v43 }
 0x3d1   :  { %s8028_s12 = sld [smem:[#allocation13 + $0x86]]  ;;  %10189 = vst [vmem:[#allocation159_spill] sm:$0xff] %v8038_v55  ;;  %10199 = vst [vmem:[#allocation114_spill] sm:$0xff] %v8055_v53  ;;  %v10202_v38 = vstv %s10170_s23  ;;  %v8077_v53 = vmul.f32 %v10209_v43, %v7420_v62 }
 0x3d2   :  { %s10186_s14 = sld [smem:[#allocation73_spill]]  ;;  %10201 = vst [vmem:[#allocation121_spill] sm:$0xff] %v8060_v12  ;;  %v8065_v39 = vmul.f32 %v10202_v38, %v7420_v62  ;;  %v10205_v31 = vmov %v10202_v38  ;;  %v8082_v12 = vmul.f32 %v10212_v44, %v7427_v13 }
 0x3d3   :  { %s10191_s3 = sld [smem:[#allocation74_spill]]  ;;  %v8070_v15 = vmul.f32 %v10205_v31, %v7427_v13  ;;  %10211 = vst [vmem:[#allocation29_spill] sm:$0xff] %v8077_v53 }
 0x3d4   :  { %10174 = sst [smem:[#allocation54_spill]] %s8006_s21  ;;  %10204 = vst [vmem:[#allocation128_spill] sm:$0xff] %v8065_v39  ;;  %10214 = vst [vmem:[#allocation184_spill] sm:$0xff] %v8082_v12 }
 0x3d5   :  { %s10195_s1 = sld [smem:[#allocation50_spill]]  ;;  %10206 = vst [vmem:[#allocation130_spill] sm:$0xff] %v8070_v15  ;;  %v10215_v38 = vstv %s10180_s11 }
 0x3d6   :  { %s8050_s7 = sld [smem:[#allocation13 + $0x1b]]  ;;  %v8087_v39 = vmul.f32 %v10215_v38, %v7519_v63  ;;  %v10218_v31 = vmov %v10215_v38 }
 0x3d7   :  { %10184 = sst [smem:[#allocation55_spill]] %s8028_s12  ;;  %v8092_v15 = vmul.f32 %v10218_v31, %v7523_v20 }
 0x3d8   :  { %s10198_s12 = sld [smem:[#allocation176_spill]]  ;;  %10217 = vst [vmem:[#allocation185_spill] sm:$0xff] %v8087_v39  ;;  %v10221_v62 = vstv %s10186_s14 }
 0x3d9   :  { %s10203_s28 = sld [smem:[#allocation75_spill]]  ;;  %10219 = vst [vmem:[#allocation186_spill] sm:$0xff] %v8092_v15  ;;  %v8099_v43 = vmul.f32 %v10221_v62, %v7519_v63  ;;  %v10224_v13 = vmov %v10221_v62  ;;  %v10227_v38 = vstv %s10191_s3 }
 0x3da   :  { %s10207_s9 = sld [smem:[#allocation177_spill]]  ;;  %v8104_v44 = vmul.f32 %v10224_v13, %v7523_v20  ;;  %v8109_v39 = vmul.f32 %v10227_v38, %v7519_v63  ;;  %v10230_v31 = vmov %v10227_v38 }
 0x3db   :  { %10223 = vst [vmem:[#allocation187_spill] sm:$0xff] %v8099_v43  ;;  %v8114_v15 = vmul.f32 %v10230_v31, %v7523_v20  ;;  %s8118_s11 = sld [smem:[#allocation13 + $0x87]] }
 0x3dc   :  { %10196 = sst [smem:[#allocation56_spill]] %s8050_s7  ;;  %10226 = vst [vmem:[#allocation188_spill] sm:$0xff] %v8104_v44  ;;  %10229 = vst [vmem:[#allocation189_spill] sm:$0xff] %v8109_v39  ;;  %v2651_v39 = vpop.permute.xlu1 %2650 }
 0x3dd   :  { %s8072_s7 = sld [smem:[#allocation13 + $0x3f]]  ;;  %10231 = vst [vmem:[#allocation190_spill] sm:$0xff] %v8114_v15 }
 0x3de   :  { %s8134_s14 = sld [smem:[#allocation13 + $0x1d]] }
 0x3df   :  { %v10233_v62 = vstv %s10203_s28  ;;  %s8140_s28 = sld [smem:[#allocation13 + $0x41]] }
 0x3e0   :  { %v8123_v13 = vmul.f32 %v10233_v62, %v7519_v63  ;;  %v10235_v44 = vmov %v10233_v62  ;;  %s8146_s8 = sld [smem:[#allocation13 + $0x65]]  ;;  %v2649_v63 = vpop.permute.xlu0 %2648 }
 0x3e1   :  { %10232 = sst [smem:[#allocation59_spill]] %s8118_s11  ;;  %v8128_v38 = vmul.f32 %v10235_v44, %v7523_v20  ;;  %v2652_v43 = vsel %vm306_vm5, %v2649_v63, %v2651_v39  ;;  %v2653_v20 = vsel %vm306_vm5, %v2651_v39, %v2649_v63 }
 0x3e2   :  { %10234 = vst [vmem:[#allocation191_spill] sm:$0xff] %v8123_v13  ;;  %s10242_s23 = sld [smem:[#allocation37_spill]]  ;;  %v2654_v62 = vsel %vm173_vm7, %v2653_v20, 0.0  ;;  %v2655_v39 = vsel %vm174_vm8, %v2652_v43, 0.0  ;;  %v2707_v13 = vpop.permute.xlu1 %2706 }
 0x3e3   :  { %10208 = sst [smem:[#allocation58_spill]] %s8072_s7  ;;  %10236 = vst [vmem:[#allocation192_spill] sm:$0xff] %v8128_v38 }
 0x3e4   :  { %s8094_s7 = sld [smem:[#allocation13 + $0x63]]  ;;  %v2705_v63 = vpop.permute.xlu0 %2704 }
 0x3e5   :  { %10237 = sst [smem:[#allocation60_spill]] %s8134_s14  ;;  %v2708_v37 = vsel %vm175_vm4, %v2705_v63, %v2707_v13  ;;  %v2709_v20 = vsel %vm175_vm4, %v2707_v13, %v2705_v63 }
 0x3e6   :  { %10239 = sst [smem:[#allocation61_spill]] %s8140_s28 }
 0x3e7   :  { %10241 = sst [smem:[#allocation62_spill]] %s8146_s8 }
 0x3e8   :  { %s10243_s4 = sld [smem:[#allocation38_spill]]  ;;  %v2921_v38 = vpop.permute.xlu0 %2920 }
 0x3e9   :  { %s10244_s6 = sld [smem:[#allocation39_spill]] }
 0x3ea   :  { %s10245_s26 = sld [smem:[#allocation57_spill]] }
 0x3eb   :  { %s8152_s21 = sld [smem:[#allocation13 + $0x89]] }
 0x3ec   :  { %s10248_s22 = sld [smem:[#allocation41_spill]] }
 0x3ed   :  { %s10249_s15 = sld [smem:[#allocation43_spill]] }
 0x3ee   :  { %s8158_s27 = sld [smem:[#allocation13 + $0x20]] }
 0x3ef   :  { %s8164_s29 = sld [smem:[#allocation13 + $0x44]] }
 0x3f0   :  { %s10253_s25 = sld [smem:[#allocation52_spill]] }
 0x3f1   :  { %10246 = sst [smem:[#allocation63_spill]] %s8152_s21 }
 0x3f2   :  { %s10254_s20 = sld [smem:[#allocation53_spill]] }
 0x3f3   :  { %s10257_s16 = sld [smem:[#allocation56_spill]] }
 0x3f4   :  { %10250 = sst [smem:[#allocation64_spill]] %s8158_s27 }
 0x3f5   :  { %10252 = sst [smem:[#allocation65_spill]] %s8164_s29 }
 0x3f6   :  { %s8174_s13 = sld [smem:[#allocation13 + $0x68]] }
 0x3f7   :  { %s8182_s2 = sld [smem:[#allocation13 + $0x8c]] }
 0x3f8   :  { %s10261_s24 = sld [smem:[#allocation77_spill]] }
 0x3f9   :  { %s10262_s19 = sld [smem:[#allocation81_spill]] }
 0x3fa   :  { %s10263_s3 = sld [smem:[#allocation83_spill]] }
 0x3fb   :  { %s10264_s30 = sld [smem:[#allocation88_spill]] }
 0x3fc   :  { %10259 = sst [smem:[#allocation69_spill]] %s8174_s13 }
 0x3fd   :  { %10260 = sst [smem:[#allocation70_spill]] %s8182_s2 }
 0x3fe   :  { %s8204_s0 = sld [smem:[#allocation13 + $0x21]]  ;;  %v10265_v44 = vstv %s10261_s24 }
 0x3ff   :  { %v8208_v53 = vmul.f32 %v10265_v44, %v2654_v62  ;;  %v10266_v31 = vmov %v10265_v44  ;;  %s8216_s28 = sld [smem:[#allocation13 + $0x45]]  ;;  %v10268_v40 = vstv %s10262_s19  ;;  %v2710_v44 = vsel %vm175_vm4, %v2708_v37, 0.0 }
 0x400   :  { %v8212_v15 = vmul.f32 %v10266_v31, %v2655_v39  ;;  %v8220_v13 = vmul.f32 %v10268_v40, %v2654_v62  ;;  %v10269_v63 = vmov %v10268_v40  ;;  %s10270_s21 = sld [smem:[#allocation91_spill]]  ;;  %v2711_v31 = vsel %vm176_vm6, %v2709_v20, 0.0  ;;  %v2923_v20 = vpop.permute.xlu1 %2922 }
 0x401   :  { %v8224_v55 = vmul.f32 %v10269_v63, %v2655_v39  ;;  %s8230_s24 = sld [smem:[#allocation13 + $0x69]]  ;;  %v10272_v12 = vstv %s10263_s3  ;;  %v10275_v63 = vstv %s10264_s30 }
 0x402   :  { %v8234_v43 = vmul.f32 %v10272_v12, %v2654_v62  ;;  %v10273_v29 = vmov %v10272_v12  ;;  %s10274_s29 = sld [smem:[#allocation98_spill]]  ;;  %v8242_v54 = vmul.f32 %v10275_v63, %v2654_v62  ;;  %v10276_v18 = vmov %v10275_v63 }
 0x403   :  { %v8238_v40 = vmul.f32 %v10273_v29, %v2655_v39  ;;  %s10277_s19 = sld [smem:[#allocation102_spill]]  ;;  %v8246_v37 = vmul.f32 %v10276_v18, %v2655_v39  ;;  %v2924_v12 = vsel %vm306_vm5, %v2921_v38, %v2923_v20  ;;  %v2925_v29 = vsel %vm306_vm5, %v2923_v20, %v2921_v38 }
 0x404   :  { %s8248_s27 = sld [smem:[#allocation13 + $0x8d]]  ;;  %v2926_v50 = vsel %vm173_vm7, %v2925_v29, 0.0  ;;  %v2927_v38 = vsel %vm174_vm8, %v2924_v12, 0.0  ;;  %v2977_v29 = vpop.permute.xlu0 %2976 }
 0x405   :  { %10267 = sst [smem:[#allocation72_spill]] %s8216_s28 }
 0x406   :  { %s10279_s3 = sld [smem:[#allocation30_spill]]  ;;  %v10281_v18 = vstv %s10270_s21 }
 0x407   :  { %10271 = sst [smem:[#allocation73_spill]] %s8230_s24  ;;  %v8260_v39 = vmul.f32 %v10281_v18, %v2710_v44  ;;  %v10282_v63 = vmov %v10281_v18 }
 0x408   :  { %s10280_s8 = sld [smem:[#allocation31_spill]]  ;;  %v8264_v17 = vmul.f32 %v10282_v63, %v2711_v31  ;;  %v10284_v20 = vstv %s10274_s29 }
 0x409   :  { %s8256_s30 = sld [smem:[#allocation13 + $0x23]]  ;;  %v8274_v62 = vmul.f32 %v10284_v20, %v2710_v44  ;;  %v10285_v22 = vmov %v10284_v20  ;;  %v10287_v41 = vstv %s10277_s19 }
 0x40a   :  { %10278 = sst [smem:[#allocation74_spill]] %s8248_s27  ;;  %v8278_v18 = vmul.f32 %v10285_v22, %v2711_v31  ;;  %v8282_v63 = vmul.f32 %v10287_v41, %v2710_v44  ;;  %v10288_v57 = vmov %v10287_v41 }
 0x40b   :  { %s10283_s14 = sld [smem:[#allocation32_spill]]  ;;  %v8286_v28 = vmul.f32 %v10288_v57, %v2711_v31  ;;  %v2979_v57 = vpop.permute.xlu1 %2978 }
 0x40c   :  { %s8270_s13 = sld [smem:[#allocation13 + $0x47]]  ;;  %v10290_v12 = vstv %s10279_s3 }
 0x40d   :  { %s10286_s2 = sld [smem:[#allocation112_spill]]  ;;  %v8292_v58 = vmul.f32 %v10290_v12, %v2710_v44  ;;  %v10291_v20 = vmov %v10290_v12  ;;  %v2980_v12 = vsel %vm175_vm4, %v2977_v29, %v2979_v57 }
 0x40e   :  { %s10289_s21 = sld [smem:[#allocation115_spill]]  ;;  %v8296_v48 = vmul.f32 %v10291_v20, %v2711_v31  ;;  %v10292_v22 = vstv %s10280_s8  ;;  %v2981_v20 = vsel %vm175_vm4, %v2979_v57, %v2977_v29  ;;  %v3193_v57 = vpop.permute.xlu0 %3192 }
 0x40f   :  { %s8288_s11 = sld [smem:[#allocation13 + $0x6b]]  ;;  %v8300_v26 = vmul.f32 %v10292_v22, %v2926_v50  ;;  %v10294_v41 = vmov %v10292_v22 }
 0x410   :  { %v8304_v45 = vmul.f32 %v10294_v41, %v2927_v38  ;;  %s10296_s29 = sld [smem:[#allocation122_spill]] }
 0x411   :  { %10293 = vst [vmem:[#allocation193_spill] sm:$0xff] %v8300_v26  ;;  %s8306_s19 = sld [smem:[#allocation13 + $0x8f]]  ;;  %v10297_v0 = vstv %s10283_s14 }
 0x412   :  { %10295 = vst [vmem:[#allocation194_spill] sm:$0xff] %v8304_v45  ;;  %v8310_v46 = vmul.f32 %v10297_v0, %v2926_v50  ;;  %v10299_v44 = vmov %v10297_v0  ;;  %s10302_s8 = sld [smem:[#allocation125_spill]]  ;;  %v2982_v0 = vsel %vm175_vm4, %v2980_v12, 0.0 }
 0x413   :  { %v8314_v31 = vmul.f32 %v10299_v44, %v2927_v38  ;;  %v10301_v22 = vstv %s10286_s2  ;;  %v2983_v44 = vsel %vm176_vm6, %v2981_v20, 0.0  ;;  %s10309_s14 = sld [smem:[#allocation129_spill]]  ;;  %v3195_v20 = vpop.permute.xlu1 %3194 }
 0x414   :  { %10298 = vst [vmem:[#allocation195_spill] sm:$0xff] %v8310_v46  ;;  %v8322_v41 = vmul.f32 %v10301_v22, %v2926_v50  ;;  %v10304_v45 = vmov %v10301_v22  ;;  %s10312_s2 = sld [smem:[#allocation95_spill]] }
 0x415   :  { %10300 = vst [vmem:[#allocation196_spill] sm:$0xff] %v8314_v31  ;;  %v8326_v26 = vmul.f32 %v10304_v45, %v2927_v38  ;;  %v10306_v31 = vstv %s10289_s21  ;;  %s10316_s3 = sld [smem:[#allocation117_spill]] }
 0x416   :  { %10303 = vst [vmem:[#allocation197_spill] sm:$0xff] %v8322_v41  ;;  %v8334_v46 = vmul.f32 %v10306_v31, %v2926_v50  ;;  %v10308_v7 = vmov %v10306_v31  ;;  %v10311_v61 = vstv %s10296_s29  ;;  %s8352_s21 = sld [smem:[#allocation14 + $0x3]] }
 0x417   :  { %10305 = vst [vmem:[#allocation198_spill] sm:$0xff] %v8326_v26  ;;  %v8338_v29 = vmul.f32 %v10308_v7, %v2927_v38  ;;  %v8344_v45 = vmul.f32 %v10311_v61, %v2982_v0  ;;  %v10314_v26 = vmov %v10311_v61  ;;  %v3196_v61 = vsel %vm306_vm5, %v3193_v57, %v3195_v20  ;;  %s10321_s29 = sld [smem:[#allocation132_spill]] }
 0x418   :  { %10307 = vst [vmem:[#allocation199_spill] sm:$0xff] %v8334_v46  ;;  %v8348_v12 = vmul.f32 %v10314_v26, %v2983_v44  ;;  %v10317_v7 = vstv %s10302_s8  ;;  %v3197_v26 = vsel %vm306_vm5, %v3195_v20, %v3193_v57  ;;  %s8366_s27 = sld [smem:[#allocation14 + $0x2]] }
 0x419   :  { %10310 = vst [vmem:[#allocation200_spill] sm:$0xff] %v8338_v29  ;;  %10313 = vst [vmem:[#allocation201_spill] sm:$0xff] %v8344_v45  ;;  %v8356_v38 = vmul.f32 %v10317_v7, %v2982_v0  ;;  %v10319_v41 = vmov %v10317_v7  ;;  %v10322_v31 = vstv %s10309_s14  ;;  %s10326_s8 = sld [smem:[#allocation48_spill]]  ;;  %v3199_v45 = vsel %vm174_vm8, %v3196_v61, 0.0  ;;  %v2569_v29 = vpop.permute.xlu0 %2568  ;;  %v2571_v61 = vpop.permute.xlu1 %2570 }
 0x41a   :  { %10315 = vst [vmem:[#allocation202_spill] sm:$0xff] %v8348_v12  ;;  %v8360_v22 = vmul.f32 %v10319_v41, %v2983_v44  ;;  %v8370_v50 = vmul.f32 %v10322_v31, %v2982_v0  ;;  %v10324_v7 = vmov %v10322_v31  ;;  %v3198_v41 = vsel %vm173_vm7, %v3197_v26, 0.0  ;;  %s10331_s24 = sld [smem:[#allocation162_spill]] }
 0x41b   :  { %10318 = vst [vmem:[#allocation203_spill] sm:$0xff] %v8356_v38  ;;  %v8374_v38 = vmul.f32 %v10324_v7, %v2983_v44  ;;  %s10333_s14 = sld [smem:[#allocation163_spill]] }
 0x41c   :  { %10320 = vst [vmem:[#allocation204_spill] sm:$0xff] %v8360_v22  ;;  %10323 = vst [vmem:[#allocation205_spill] sm:$0xff] %v8370_v50  ;;  %v10327_v22 = vstv %s10312_s2  ;;  %v10332_v50 = vstv %s10316_s3  ;;  %s10337_s28 = sld [smem:[#allocation164_spill]] }
 0x41d   :  { %10325 = vst [vmem:[#allocation206_spill] sm:$0xff] %v8374_v38  ;;  %v8382_v57 = vmul.f32 %v10327_v22, %v2982_v0  ;;  %v10329_v20 = vmov %v10327_v22  ;;  %v8392_v38 = vmul.f32 %v10332_v50, %v3198_v41  ;;  %v10335_v26 = vmov %v10332_v50  ;;  %s10339_s2 = sld [smem:[#allocation165_spill]]  ;;  %v2619_v35 = vpop.permute.xlu1 %2618 }
 0x41e   :  { %v8386_v12 = vmul.f32 %v10329_v20, %v2983_v44  ;;  %v8396_v46 = vmul.f32 %v10335_v26, %v3199_v45  ;;  %v10338_v44 = vstv %s10321_s29  ;;  %v2572_v50 = vsel %vm306_vm5, %v2569_v29, %v2571_v61  ;;  %s10343_s3 = sld [smem:[#allocation161_spill]] }
 0x41f   :  { %10328 = vst [vmem:[#allocation207_spill] sm:$0xff] %v8382_v57  ;;  %10334 = vst [vmem:[#allocation209_spill] sm:$0xff] %v8392_v38  ;;  %v8402_v20 = vmul.f32 %v10338_v44, %v3198_v41  ;;  %v10341_v31 = vmov %v10338_v44  ;;  %v2573_v26 = vsel %vm306_vm5, %v2571_v61, %v2569_v29  ;;  %v2575_v44 = vsel %vm174_vm8, %v2572_v50, 0.0  ;;  %s10362_s29 = sld [smem:[#allocation168_spill]] }
 0x420   :  { %10330 = vst [vmem:[#allocation208_spill] sm:$0xff] %v8386_v12  ;;  %10336 = vst [vmem:[#allocation210_spill] sm:$0xff] %v8396_v46  ;;  %v8406_v7 = vmul.f32 %v10341_v31, %v3199_v45  ;;  %v10344_v46 = vstv %s10326_s8  ;;  %v2574_v31 = vsel %vm173_vm7, %v2573_v26, 0.0  ;;  %s10363_s8 = sld [smem:[#allocation169_spill]] }
 0x421   :  { %10340 = vst [vmem:[#allocation211_spill] sm:$0xff] %v8402_v20  ;;  %v8414_v0 = vmul.f32 %v10344_v46, %v3198_v41  ;;  %v10346_v22 = vmov %v10344_v46  ;;  %v10350_v29 = vstv %s10333_s14  ;;  %s10372_s14 = sld [smem:[#allocation170_spill]] }
 0x422   :  { %10342 = vst [vmem:[#allocation212_spill] sm:$0xff] %v8406_v7  ;;  %v8418_v38 = vmul.f32 %v10346_v22, %v3199_v45  ;;  %v10348_v7 = vstv %s10331_s24  ;;  %v2582_v61 = vmul.f32 %v10350_v29, %v2574_v31  ;;  %v10351_v47 = vmov %v10350_v29  ;;  %s10360_s24 = sld [smem:[#allocation166_spill]] }
 0x423   :  { %10345 = vst [vmem:[#allocation213_spill] sm:$0xff] %v8414_v0  ;;  %v2578_v20 = vmul.f32 %v10348_v7, %v2574_v31  ;;  %v10349_v57 = vmov %v10348_v7  ;;  %v2583_v46 = vmul.f32 %v10351_v47, %v2575_v44  ;;  %v2617_v0 = vpop.permute.xlu0 %2616  ;;  %v10352_v34 = vstv %s10337_s28  ;;  %s10361_s28 = sld [smem:[#allocation167_spill]] }
 0x424   :  { %10347 = vst [vmem:[#allocation214_spill] sm:$0xff] %v8418_v38  ;;  %v2579_v12 = vmul.f32 %v10349_v57, %v2575_v44  ;;  %v2586_v1 = vmul.f32 %v10352_v34, %v2574_v31  ;;  %v10353_v22 = vmov %v10352_v34  ;;  %v10354_v14 = vstv %s10339_s2  ;;  %s10373_s2 = sld [smem:[#allocation171_spill]] }
 0x425   :  { %v2587_v38 = vmul.f32 %v10353_v22, %v2575_v44  ;;  %v2590_v32 = vmul.f32 %v10354_v14, %v2574_v31  ;;  %v10355_v4 = vmov %v10354_v14  ;;  %v10356_v2 = vstv %s10343_s3  ;;  %s10374_s3 = sld [smem:[#allocation172_spill]] }
 0x426   :  { %v2591_v26 = vmul.f32 %v10355_v4, %v2575_v44  ;;  %v8442_v50 = vmul.f32 %v10356_v2, %v3198_v41  ;;  %v10358_v7 = vmov %v10356_v2  ;;  %v2596_v47 = vadd.f32 %v7592_v56, %v2578_v20 }
 0x427   :  { %v8446_v11 = vmul.f32 %v10358_v7, %v3199_v45  ;;  %v2597_v34 = vadd.f32 %v7542_v25, %v2579_v12  ;;  %v2602_v14 = vadd.f32 %v7597_v30, %v2582_v61  ;;  %v2603_v4 = vadd.f32 %v7554_v24, %v2583_v46  ;;  %v3249_v25 = vpop.permute.xlu0 %3248 }
 0x428   :  { %10357 = vst [vmem:[#allocation215_spill] sm:$0xff] %v8442_v50  ;;  %v2608_v2 = vadd.f32 %v7602_v42, %v2586_v1  ;;  %v2609_v45 = vadd.f32 %v7570_v59, %v2587_v38  ;;  %v2620_v41 = vsel %vm175_vm4, %v2617_v0, %v2619_v35  ;;  %v2621_v56 = vsel %vm175_vm4, %v2619_v35, %v2617_v0  ;;  %v3251_v1 = vpop.permute.xlu1 %3250 }
 0x429   :  { %10359 = vst [vmem:[#allocation216_spill] sm:$0xff] %v8446_v11  ;;  %v2614_v12 = vadd.f32 %v7610_v36, %v2590_v32  ;;  %v2615_v30 = vadd.f32 %v7582_v5, %v2591_v26  ;;  %v2622_v24 = vsel %vm175_vm4, %v2620_v41, 0.0  ;;  %v2623_v42 = vsel %vm176_vm6, %v2621_v56, 0.0 }
 0x42a   :  { %v10364_v59 = vstv %s10360_s24  ;;  %v10366_v44 = vstv %s10361_s28  ;;  %v10368_v0 = vstv %s10362_s29  ;;  %v10370_v5 = vstv %s10363_s8  ;;  %s10375_s24 = sld [smem:[#allocation173_spill]] }
 0x42b   :  { %v2626_v38 = vmul.f32 %v10364_v59, %v2622_v24  ;;  %v10365_v20 = vmov %v10364_v59  ;;  %v2632_v61 = vmul.f32 %v10366_v44, %v2622_v24  ;;  %v10367_v46 = vmov %v10366_v44  ;;  %v2741_v44 = vpop.permute.xlu0 %2740  ;;  %s10384_s28 = sld [smem:[#allocation174_spill]] }
 0x42c   :  { %v2627_v31 = vmul.f32 %v10365_v20, %v2623_v42  ;;  %v2633_v35 = vmul.f32 %v10367_v46, %v2623_v42  ;;  %v2638_v22 = vmul.f32 %v10368_v0, %v2622_v24  ;;  %v10369_v36 = vmov %v10368_v0  ;;  %v2743_v52 = vpop.permute.xlu1 %2742  ;;  %s10385_s29 = sld [smem:[#allocation175_spill]] }
 0x42d   :  { %v2639_v32 = vmul.f32 %v10369_v36, %v2623_v42  ;;  %v2644_v26 = vmul.f32 %v10370_v5, %v2622_v24  ;;  %v10371_v7 = vmov %v10370_v5  ;;  %v2628_v29 = vadd.f32 %v2626_v38, %v2596_v47  ;;  %s10386_s8 = sld [smem:[#allocation42_spill]] }
 0x42e   :  { %v2645_v41 = vmul.f32 %v10371_v7, %v2623_v42  ;;  %v2629_v57 = vadd.f32 %v2627_v31, %v2597_v34  ;;  %v2634_v56 = vadd.f32 %v2632_v61, %v2602_v14  ;;  %v2635_v11 = vadd.f32 %v2633_v35, %v2603_v4 }
 0x42f   :  { %v2640_v50 = vadd.f32 %v2638_v22, %v2608_v2  ;;  %v2641_v59 = vadd.f32 %v2639_v32, %v2609_v45  ;;  %v2646_v3 = vadd.f32 %v2644_v26, %v2614_v12  ;;  %v2660_v46 = vadd.f32 %v8208_v53, %v2628_v29  ;;  %v2797_v61 = vpop.permute.xlu0 %2796 }
 0x430   :  { %v2647_v20 = vadd.f32 %v2645_v41, %v2615_v30  ;;  %v2661_v0 = vadd.f32 %v8212_v15, %v2629_v57  ;;  %v2666_v24 = vadd.f32 %v8220_v13, %v2634_v56  ;;  %v2667_v47 = vadd.f32 %v8224_v55, %v2635_v11  ;;  %v2799_v31 = vpop.permute.xlu1 %2798 }
 0x431   :  { %v2672_v34 = vadd.f32 %v8234_v43, %v2640_v50  ;;  %v2673_v14 = vadd.f32 %v8238_v40, %v2641_v59  ;;  %v2678_v4 = vadd.f32 %v8242_v54, %v2646_v3  ;;  %v3252_v15 = vsel %vm175_vm4, %v3249_v25, %v3251_v1 }
 0x432   :  { %v2679_v53 = vadd.f32 %v8246_v37, %v2647_v20  ;;  %v3253_v13 = vsel %vm175_vm4, %v3251_v1, %v3249_v25  ;;  %v2685_v11 = vadd.f32 %v7620_v19, %v2661_v0  ;;  %v2691_v55 = vadd.f32 %v7632_v60, %v2667_v47 }
 0x433   :  { %v3254_v43 = vsel %vm175_vm4, %v3252_v15, 0.0  ;;  %v3255_v3 = vsel %vm176_vm6, %v3253_v13, 0.0  ;;  %v2697_v54 = vadd.f32 %v7642_v10, %v2673_v14  ;;  %v10376_v37 = vstv %s10372_s14  ;;  %s10387_s14 = sld [smem:[#allocation49_spill]] }
 0x434   :  { %v2703_v40 = vadd.f32 %v7656_v51, %v2679_v53  ;;  %v8504_v50 = vmul.f32 %v10376_v37, %v3254_v43  ;;  %v10377_v57 = vmov %v10376_v37  ;;  %v10378_v2 = vstv %s10373_s2  ;;  %s10396_s2 = sld [smem:[#allocation178_spill]] }
 0x435   :  { %v8508_v29 = vmul.f32 %v10377_v57, %v3255_v3  ;;  %v8512_v19 = vmul.f32 %v10378_v2, %v3254_v43  ;;  %v10379_v60 = vmov %v10378_v2  ;;  %v10380_v25 = vstv %s10374_s3  ;;  %s10410_s3 = sld [smem:[#allocation66_spill]] }
 0x436   :  { %v8516_v45 = vmul.f32 %v10379_v60, %v3255_v3  ;;  %v8520_v12 = vmul.f32 %v10380_v25, %v3254_v43  ;;  %v10381_v30 = vmov %v10380_v25  ;;  %v10382_v10 = vstv %s10375_s24  ;;  %s10422_s24 = sld [smem:[#allocation179_spill]] }
 0x437   :  { %v8524_v42 = vmul.f32 %v10381_v30, %v3255_v3  ;;  %v8528_v51 = vmul.f32 %v10382_v10, %v3254_v43  ;;  %v10383_v1 = vmov %v10382_v10  ;;  %v2717_v35 = vadd.f32 %v8264_v17, %v2685_v11  ;;  %v2833_v43 = vpop.permute.xlu0 %2832 }
 0x438   :  { %v8532_v38 = vmul.f32 %v10383_v1, %v3255_v3  ;;  %v2723_v22 = vadd.f32 %v8278_v18, %v2691_v55  ;;  %v2729_v36 = vadd.f32 %v8286_v28, %v2697_v54  ;;  %v2735_v32 = vadd.f32 %v8296_v48, %v2703_v40  ;;  %v2835_v55 = vpop.permute.xlu1 %2834 }
 0x439   :  { %v2684_v5 = vadd.f32 %v7615_v6, %v2660_v46  ;;  %v2690_v26 = vadd.f32 %v7627_v49, %v2666_v24  ;;  %v2696_v7 = vadd.f32 %v7637_v16, %v2672_v34  ;;  %v2702_v41 = vadd.f32 %v7651_v23, %v2678_v4 }
 0x43a   :  { %v2744_v17 = vsel %vm306_vm5, %v2741_v44, %v2743_v52  ;;  %v2745_v28 = vsel %vm306_vm5, %v2743_v52, %v2741_v44  ;;  %v2800_v6 = vsel %vm175_vm4, %v2797_v61, %v2799_v31  ;;  %v2801_v49 = vsel %vm175_vm4, %v2799_v31, %v2797_v61  ;;  %v10397_v31 = vld [vmem:[#allocation76_spill] sm:$0xff] }
 0x43b   :  { %v2716_v16 = vadd.f32 %v8260_v39, %v2684_v5  ;;  %v2722_v23 = vadd.f32 %v8274_v62, %v2690_v26  ;;  %v2728_v48 = vadd.f32 %v8282_v63, %v2696_v7  ;;  %v2734_v18 = vadd.f32 %v8292_v58, %v2702_v41  ;;  %v10400_v7 = vld [vmem:[#allocation80_spill] sm:$0xff] }
 0x43c   :  { %v2746_v52 = vsel %vm173_vm7, %v2745_v28, 0.0  ;;  %v2747_v56 = vsel %vm174_vm8, %v2744_v17, 0.0  ;;  %v2802_v59 = vsel %vm175_vm4, %v2800_v6, 0.0  ;;  %v2803_v20 = vsel %vm176_vm6, %v2801_v49, 0.0 }
 0x43d   :  { %v10388_v44 = vstv %s10384_s28  ;;  %v10390_v0 = vstv %s10385_s29  ;;  %v10392_v47 = vstv %s10386_s8  ;;  %v10394_v53 = vstv %s10387_s14  ;;  %s10423_s28 = sld [smem:[#allocation180_spill]] }
 0x43e   :  { %v2750_v39 = vmul.f32 %v10388_v44, %v2746_v52  ;;  %v10389_v46 = vmov %v10388_v44  ;;  %v2756_v63 = vmul.f32 %v10390_v0, %v2746_v52  ;;  %v10391_v24 = vmov %v10390_v0  ;;  %v2889_v0 = vpop.permute.xlu0 %2888  ;;  %s10424_s29 = sld [smem:[#allocation181_spill]] }
 0x43f   :  { %v2751_v62 = vmul.f32 %v10389_v46, %v2747_v56  ;;  %v2757_v58 = vmul.f32 %v10391_v24, %v2747_v56  ;;  %v2762_v34 = vmul.f32 %v10392_v47, %v2746_v52  ;;  %v10393_v14 = vmov %v10392_v47  ;;  %s10425_s8 = sld [smem:[#allocation182_spill]] }
 0x440   :  { %v2763_v4 = vmul.f32 %v10393_v14, %v2747_v56  ;;  %v2768_v15 = vmul.f32 %v10394_v53, %v2746_v52  ;;  %v10395_v13 = vmov %v10394_v53  ;;  %v2752_v3 = vadd.f32 %v2750_v39, %v2716_v16  ;;  %s10460_s14 = sld [smem:[#allocation183_spill]] }
 0x441   :  { %v2769_v11 = vmul.f32 %v10395_v13, %v2747_v56  ;;  %v2753_v54 = vadd.f32 %v2751_v62, %v2717_v35  ;;  %v2758_v40 = vadd.f32 %v2756_v63, %v2722_v23  ;;  %v2759_v37 = vadd.f32 %v2757_v58, %v2723_v22  ;;  %v10398_v35 = vld [vmem:[#allocation78_spill] sm:$0xff]  ;;  %v10399_v22 = vld [vmem:[#allocation79_spill] sm:$0xff]  ;;  %v2891_v62 = vpop.permute.xlu1 %2890 }
 0x442   :  { %v2764_v57 = vadd.f32 %v2762_v34, %v2728_v48  ;;  %v2765_v2 = vadd.f32 %v2763_v4, %v2729_v36  ;;  %v2770_v60 = vadd.f32 %v2768_v15, %v2734_v18  ;;  %v2776_v1 = vadd.f32 %v7661_v27, %v2752_v3  ;;  %v10401_v36 = vld [vmem:[#allocation82_spill] sm:$0xff] }
 0x443   :  { %v2771_v25 = vadd.f32 %v2769_v11, %v2735_v32  ;;  %v2777_v30 = vadd.f32 %v7666_v21, %v2753_v54  ;;  %v2783_v10 = vadd.f32 %v7681_v9, %v2759_v37  ;;  %v2782_v61 = vadd.f32 %v10397_v31, %v2758_v40 }
 0x444   :  { %v2789_v5 = vadd.f32 %v10398_v35, %v2765_v2  ;;  %v2788_v41 = vadd.f32 %v10400_v7, %v2764_v57  ;;  %v2794_v17 = vadd.f32 %v10401_v36, %v2770_v60  ;;  %v10402_v28 = vstv %s10195_s1  ;;  %s10411_s1 = sld [smem:[#allocation67_spill]] }
 0x445   :  { %v2795_v26 = vadd.f32 %v10399_v22, %v2771_v25  ;;  %v2806_v6 = vmul.f32 %v10402_v28, %v2802_v59  ;;  %v10403_v32 = vmov %v10402_v28  ;;  %v10404_v16 = vstv %s10198_s12  ;;  %s10412_s12 = sld [smem:[#allocation68_spill]] }
 0x446   :  { %v2807_v49 = vmul.f32 %v10403_v32, %v2803_v20  ;;  %v2812_v21 = vmul.f32 %v10404_v16, %v2802_v59  ;;  %v10405_v23 = vmov %v10404_v16  ;;  %v10406_v48 = vstv %s10207_s9  ;;  %s10413_s9 = sld [smem:[#allocation71_spill]]  ;;  %v10426_v16 = vld [vmem:[#allocation84_spill] sm:$0xff] }
 0x447   :  { %v2813_v9 = vmul.f32 %v10405_v23, %v2803_v20  ;;  %v2818_v27 = vmul.f32 %v10406_v48, %v2802_v59  ;;  %v10407_v18 = vmov %v10406_v48  ;;  %v10408_v56 = vstv %s10396_s2  ;;  %v10427_v23 = vld [vmem:[#allocation89_spill] sm:$0xff]  ;;  %v10428_v48 = vld [vmem:[#allocation85_spill] sm:$0xff]  ;;  %s10463_s2 = sld [smem:[#allocation131_spill]] }
 0x448   :  { %v2819_v52 = vmul.f32 %v10407_v18, %v2803_v20  ;;  %v2824_v44 = vmul.f32 %v10408_v56, %v2802_v59  ;;  %v10409_v39 = vmov %v10408_v56  ;;  %v2808_v63 = vadd.f32 %v2806_v6, %v2776_v1  ;;  %v10429_v18 = vld [vmem:[#allocation90_spill] sm:$0xff] }
 0x449   :  { %v2825_v46 = vmul.f32 %v10409_v39, %v2803_v20  ;;  %v2809_v24 = vadd.f32 %v2807_v49, %v2777_v30  ;;  %v2814_v58 = vadd.f32 %v2812_v21, %v2782_v61  ;;  %v2815_v47 = vadd.f32 %v2813_v9, %v2783_v10  ;;  %v10430_v56 = vld [vmem:[#allocation136_spill] sm:$0xff]  ;;  %v10431_v39 = vld [vmem:[#allocation146_spill] sm:$0xff] }
 0x44a   :  { %v2820_v34 = vadd.f32 %v2818_v27, %v2788_v41  ;;  %v2821_v14 = vadd.f32 %v2819_v52, %v2789_v5  ;;  %v2826_v4 = vadd.f32 %v2824_v44, %v2794_v17  ;;  %v2836_v59 = vsel %vm306_vm5, %v2833_v43, %v2835_v55 }
 0x44b   :  { %v2827_v53 = vadd.f32 %v2825_v46, %v2795_v26  ;;  %v2837_v20 = vsel %vm306_vm5, %v2835_v55, %v2833_v43  ;;  %v2892_v15 = vsel %vm175_vm4, %v2889_v0, %v2891_v62  ;;  %v2893_v13 = vsel %vm175_vm4, %v2891_v62, %v2889_v0  ;;  %v10432_v62 = vld [vmem:[#allocation135_spill] sm:$0xff] }
 0x44c   :  { %v2838_v11 = vsel %vm173_vm7, %v2837_v20, 0.0  ;;  %v2839_v3 = vsel %vm174_vm8, %v2836_v59, 0.0  ;;  %v2894_v54 = vsel %vm175_vm4, %v2892_v15, 0.0  ;;  %v2895_v40 = vsel %vm176_vm6, %v2893_v13, 0.0 }
 0x44d   :  { %v10414_v37 = vstv %s10410_s3  ;;  %v10416_v2 = vstv %s10411_s1  ;;  %v10418_v10 = vstv %s10412_s12  ;;  %v10420_v35 = vstv %s10413_s9  ;;  %s10468_s3 = sld [smem:[#allocation45_spill]] }
 0x44e   :  { %v2842_v55 = vmul.f32 %v10414_v37, %v2838_v11  ;;  %v10415_v43 = vmov %v10414_v37  ;;  %v2848_v60 = vmul.f32 %v10416_v2, %v2838_v11  ;;  %v10417_v25 = vmov %v10416_v2  ;;  %v3015_v2 = vpop.permute.xlu1 %3014  ;;  %s10477_s1 = sld [smem:[#allocation46_spill]] }
 0x44f   :  { %v2843_v57 = vmul.f32 %v10415_v43, %v2839_v3  ;;  %v2849_v30 = vmul.f32 %v10417_v25, %v2839_v3  ;;  %v2854_v1 = vmul.f32 %v10418_v10, %v2838_v11  ;;  %v10419_v31 = vmov %v10418_v10  ;;  %s10478_s12 = sld [smem:[#allocation133_spill]] }
 0x450   :  { %v2855_v61 = vmul.f32 %v10419_v31, %v2839_v3  ;;  %v2860_v5 = vmul.f32 %v10420_v35, %v2838_v11  ;;  %v10421_v22 = vmov %v10420_v35  ;;  %v2844_v7 = vadd.f32 %v2842_v55, %v2808_v63  ;;  %v10433_v63 = vld [vmem:[#allocation145_spill] sm:$0xff]  ;;  %s10479_s9 = sld [smem:[#allocation47_spill]] }
 0x451   :  { %v2861_v26 = vmul.f32 %v10421_v22, %v2839_v3  ;;  %v2845_v41 = vadd.f32 %v2843_v57, %v2809_v24  ;;  %v2850_v36 = vadd.f32 %v2848_v60, %v2814_v58  ;;  %v2851_v17 = vadd.f32 %v2849_v30, %v2815_v47  ;;  %v3013_v60 = vpop.permute.xlu0 %3012  ;;  %v10442_v22 = vld [vmem:[#allocation193_spill] sm:$0xff] }
 0x452   :  { %v2856_v28 = vadd.f32 %v2854_v1, %v2820_v34  ;;  %v2857_v6 = vadd.f32 %v2855_v61, %v2821_v14  ;;  %v2862_v32 = vadd.f32 %v2860_v5, %v2826_v4  ;;  %v2868_v27 = vadd.f32 %v10428_v48, %v2844_v7  ;;  %v10443_v7 = vld [vmem:[#allocation194_spill] sm:$0xff]  ;;  %v10450_v48 = vld [vmem:[#allocation138_spill] sm:$0xff] }
 0x453   :  { %v2863_v49 = vadd.f32 %v2861_v26, %v2827_v53  ;;  %v2869_v21 = vadd.f32 %v10426_v16, %v2845_v41  ;;  %v2875_v9 = vadd.f32 %v10427_v23, %v2851_v17  ;;  %v2874_v52 = vadd.f32 %v10429_v18, %v2850_v36  ;;  %v10444_v36 = vld [vmem:[#allocation195_spill] sm:$0xff]  ;;  %v10449_v23 = vld [vmem:[#allocation200_spill] sm:$0xff] }
 0x454   :  { %v2881_v44 = vadd.f32 %v10430_v56, %v2857_v6  ;;  %v2880_v0 = vadd.f32 %v10432_v62, %v2856_v28  ;;  %v2886_v24 = vadd.f32 %v10433_v63, %v2862_v32  ;;  %v10434_v58 = vstv %s10422_s24  ;;  %v10445_v28 = vld [vmem:[#allocation196_spill] sm:$0xff]  ;;  %v10446_v6 = vld [vmem:[#allocation197_spill] sm:$0xff]  ;;  %v10447_v32 = vld [vmem:[#allocation198_spill] sm:$0xff]  ;;  %s10497_s24 = sld [smem:[#allocation33_spill]] }
 0x455   :  { %v2887_v46 = vadd.f32 %v10431_v39, %v2863_v49  ;;  %v2898_v47 = vmul.f32 %v10434_v58, %v2894_v54  ;;  %v10435_v34 = vmov %v10434_v58  ;;  %v10436_v4 = vstv %s10423_s28  ;;  %v10448_v16 = vld [vmem:[#allocation199_spill] sm:$0xff]  ;;  %v10452_v56 = vld [vmem:[#allocation137_spill] sm:$0xff]  ;;  %v10453_v39 = vld [vmem:[#allocation139_spill] sm:$0xff]  ;;  %s10498_s28 = sld [smem:[#allocation34_spill]] }
 0x456   :  { %v2899_v14 = vmul.f32 %v10435_v34, %v2895_v40  ;;  %v2904_v53 = vmul.f32 %v10436_v4, %v2894_v54  ;;  %v10437_v59 = vmov %v10436_v4  ;;  %v10438_v15 = vstv %s10424_s29  ;;  %v10451_v18 = vld [vmem:[#allocation140_spill] sm:$0xff]  ;;  %v10454_v62 = vld [vmem:[#allocation142_spill] sm:$0xff]  ;;  %v10456_v58 = vld [vmem:[#allocation141_spill] sm:$0xff]  ;;  %v3071_v4 = vpop.permute.xlu1 %3070  ;;  %s10507_s29 = sld [smem:[#allocation35_spill]] }
 0x457   :  { %v2905_v20 = vmul.f32 %v10437_v59, %v2895_v40  ;;  %v2910_v13 = vmul.f32 %v10438_v15, %v2894_v54  ;;  %v10439_v11 = vmov %v10438_v15  ;;  %v10440_v37 = vstv %s10425_s8  ;;  %v10455_v63 = vld [vmem:[#allocation144_spill] sm:$0xff]  ;;  %v10457_v34 = vld [vmem:[#allocation143_spill] sm:$0xff]  ;;  %v10459_v15 = vld [vmem:[#allocation204_spill] sm:$0xff]  ;;  %s10508_s8 = sld [smem:[#allocation36_spill]] }
 0x458   :  { %v2911_v3 = vmul.f32 %v10439_v11, %v2895_v40  ;;  %v2916_v55 = vmul.f32 %v10440_v37, %v2894_v54  ;;  %v10441_v43 = vmov %v10440_v37  ;;  %v2900_v25 = vadd.f32 %v2898_v47, %v2868_v27  ;;  %v10458_v59 = vld [vmem:[#allocation202_spill] sm:$0xff]  ;;  %v10461_v11 = vld [vmem:[#allocation201_spill] sm:$0xff]  ;;  %v10462_v37 = vld [vmem:[#allocation203_spill] sm:$0xff] }
 0x459   :  { %v2917_v57 = vmul.f32 %v10441_v43, %v2895_v40  ;;  %v2901_v30 = vadd.f32 %v2899_v14, %v2869_v21  ;;  %v2906_v10 = vadd.f32 %v2904_v53, %v2874_v52  ;;  %v2907_v1 = vadd.f32 %v2905_v20, %v2875_v9  ;;  %v3069_v53 = vpop.permute.xlu0 %3068  ;;  %v10464_v43 = vld [vmem:[#allocation206_spill] sm:$0xff] }
 0x45a   :  { %v2912_v31 = vadd.f32 %v2910_v13, %v2880_v0  ;;  %v2913_v61 = vadd.f32 %v2911_v3, %v2881_v44  ;;  %v2918_v35 = vadd.f32 %v2916_v55, %v2886_v24  ;;  %v2932_v26 = vadd.f32 %v10442_v22, %v2900_v25  ;;  %v10465_v25 = vld [vmem:[#allocation208_spill] sm:$0xff] }
 0x45b   :  { %v2919_v5 = vadd.f32 %v2917_v57, %v2887_v46  ;;  %v2933_v41 = vadd.f32 %v10443_v7, %v2901_v30  ;;  %v2938_v17 = vadd.f32 %v10444_v36, %v2906_v10  ;;  %v2939_v54 = vadd.f32 %v10445_v28, %v2907_v1  ;;  %v10466_v10 = vld [vmem:[#allocation205_spill] sm:$0xff] }
 0x45c   :  { %v2944_v40 = vadd.f32 %v10446_v6, %v2912_v31  ;;  %v2945_v49 = vadd.f32 %v10447_v32, %v2913_v61  ;;  %v2950_v21 = vadd.f32 %v10448_v16, %v2918_v35  ;;  %v2956_v44 = vadd.f32 %v10452_v56, %v2932_v26  ;;  %v10467_v31 = vld [vmem:[#allocation207_spill] sm:$0xff]  ;;  %v3107_v56 = vpop.permute.xlu1 %3106 }
 0x45d   :  { %v2951_v9 = vadd.f32 %v10449_v23, %v2919_v5  ;;  %v2957_v27 = vadd.f32 %v10450_v48, %v2933_v41  ;;  %v2963_v52 = vadd.f32 %v10451_v18, %v2939_v54  ;;  %v2962_v46 = vadd.f32 %v10453_v39, %v2938_v17 }
 0x45e   :  { %v2969_v0 = vadd.f32 %v10454_v62, %v2945_v49  ;;  %v2968_v47 = vadd.f32 %v10456_v58, %v2944_v40  ;;  %v2974_v14 = vadd.f32 %v10457_v34, %v2950_v21  ;;  %v2988_v3 = vadd.f32 %v10461_v11, %v2956_v44  ;;  %v3105_v44 = vpop.permute.xlu0 %3104  ;;  %v10481_v34 = vld [vmem:[#allocation92_spill] sm:$0xff] }
 0x45f   :  { %v2975_v24 = vadd.f32 %v10455_v63, %v2951_v9  ;;  %v2989_v20 = vadd.f32 %v10458_v59, %v2957_v27  ;;  %v2995_v13 = vadd.f32 %v10459_v15, %v2963_v52  ;;  %v2994_v55 = vadd.f32 %v10462_v37, %v2962_v46  ;;  %v10483_v59 = vld [vmem:[#allocation94_spill] sm:$0xff] }
 0x460   :  { %v3001_v57 = vadd.f32 %v10464_v43, %v2969_v0  ;;  %v3000_v1 = vadd.f32 %v10466_v10, %v2968_v47  ;;  %v3006_v61 = vadd.f32 %v10467_v31, %v2974_v14  ;;  %v3016_v35 = vsel %vm306_vm5, %v3013_v60, %v3015_v2  ;;  %v10487_v43 = vld [vmem:[#allocation101_spill] sm:$0xff] }
 0x461   :  { %v3007_v30 = vadd.f32 %v10465_v25, %v2975_v24  ;;  %v3017_v5 = vsel %vm306_vm5, %v3015_v2, %v3013_v60  ;;  %v3072_v22 = vsel %vm175_vm4, %v3069_v53, %v3071_v4  ;;  %v3073_v26 = vsel %vm175_vm4, %v3071_v4, %v3069_v53  ;;  %v10482_v4 = vld [vmem:[#allocation93_spill] sm:$0xff] }
 0x462   :  { %v3018_v7 = vsel %vm173_vm7, %v3017_v5, 0.0  ;;  %v3019_v41 = vsel %vm174_vm8, %v3016_v35, 0.0  ;;  %v3074_v36 = vsel %vm175_vm4, %v3072_v22, 0.0  ;;  %v3075_v17 = vsel %vm176_vm6, %v3073_v26, 0.0 }
 0x463   :  { %v10469_v28 = vstv %s10460_s14  ;;  %v10471_v6 = vstv %s10463_s2  ;;  %v10473_v16 = vstv %s7562_s17  ;;  %v10475_v48 = vstv %s10468_s3  ;;  %s10480_s17 = sld [smem:[#allocation134_spill]] }
 0x464   :  { %v3022_v2 = vmul.f32 %v10469_v28, %v3018_v7  ;;  %v10470_v60 = vmov %v10469_v28  ;;  %v3028_v40 = vmul.f32 %v10471_v6, %v3018_v7  ;;  %v10472_v32 = vmov %v10471_v6  ;;  %s10616_s14 = sld [smem:[#allocation69_spill]] }
 0x465   :  { %v3023_v54 = vmul.f32 %v10470_v60, %v3019_v41  ;;  %v3029_v49 = vmul.f32 %v10472_v32, %v3019_v41  ;;  %v3034_v21 = vmul.f32 %v10473_v16, %v3018_v7  ;;  %v10474_v23 = vmov %v10473_v16  ;;  %v3163_v32 = vpop.permute.xlu1 %3162  ;;  %s10619_s2 = sld [smem:[#allocation70_spill]] }
 0x466   :  { %v3035_v9 = vmul.f32 %v10474_v23, %v3019_v41  ;;  %v3040_v27 = vmul.f32 %v10475_v48, %v3018_v7  ;;  %v10476_v18 = vmov %v10475_v48  ;;  %v3024_v39 = vadd.f32 %v3022_v2, %v2988_v3  ;;  %v10485_v3 = vld [vmem:[#allocation99_spill] sm:$0xff]  ;;  %s10624_s3 = sld [smem:[#allocation72_spill]] }
 0x467   :  { %v3041_v52 = vmul.f32 %v10476_v18, %v3019_v41  ;;  %v3025_v46 = vadd.f32 %v3023_v54, %v2989_v20  ;;  %v3030_v62 = vadd.f32 %v3028_v40, %v2994_v55  ;;  %v3031_v0 = vadd.f32 %v3029_v49, %v2995_v13  ;;  %v10484_v20 = vld [vmem:[#allocation96_spill] sm:$0xff]  ;;  %v10486_v13 = vld [vmem:[#allocation100_spill] sm:$0xff]  ;;  %v3161_v49 = vpop.permute.xlu0 %3160 }
 0x468   :  { %v3036_v63 = vadd.f32 %v3034_v21, %v3000_v1  ;;  %v3037_v24 = vadd.f32 %v3035_v9, %v3001_v57  ;;  %v3042_v58 = vadd.f32 %v3040_v27, %v3006_v61  ;;  %v3048_v15 = vadd.f32 %v10483_v59, %v3024_v39  ;;  %v10488_v57 = vld [vmem:[#allocation103_spill] sm:$0xff] }
 0x469   :  { %v3043_v47 = vadd.f32 %v3041_v52, %v3007_v30  ;;  %v3049_v14 = vadd.f32 %v10481_v34, %v3025_v46  ;;  %v3055_v53 = vadd.f32 %v10482_v4, %v3031_v0  ;;  %v3054_v11 = vadd.f32 %v10484_v20, %v3030_v62 }
 0x46a   :  { %v3061_v37 = vadd.f32 %v10485_v3, %v3037_v24  ;;  %v3060_v25 = vadd.f32 %v10487_v43, %v3036_v63  ;;  %v3066_v10 = vadd.f32 %v10488_v57, %v3042_v58  ;;  %v10489_v1 = vstv %s10477_s1  ;;  %s10629_s1 = sld [smem:[#allocation73_spill]] }
 0x46b   :  { %v3067_v55 = vadd.f32 %v10486_v13, %v3043_v47  ;;  %v3078_v31 = vmul.f32 %v10489_v1, %v3074_v36  ;;  %v10490_v30 = vmov %v10489_v1  ;;  %v10491_v35 = vstv %s10478_s12  ;;  %s10630_s12 = sld [smem:[#allocation74_spill]] }
 0x46c   :  { %v3079_v61 = vmul.f32 %v10490_v30, %v3075_v17  ;;  %v3084_v5 = vmul.f32 %v10491_v35, %v3074_v36  ;;  %v10492_v22 = vmov %v10491_v35  ;;  %v10493_v7 = vstv %s10479_s9  ;;  %v3467_v35 = vpop.permute.xlu1 %3466  ;;  %s9052_s9 = sld [smem:[#allocation14]] }
 0x46d   :  { %v3085_v26 = vmul.f32 %v10492_v22, %v3075_v17  ;;  %v3090_v41 = vmul.f32 %v10493_v7, %v3074_v36  ;;  %v10494_v28 = vmov %v10493_v7  ;;  %v10495_v60 = vstv %s10480_s17  ;;  %v10509_v22 = vld [vmem:[#allocation149_spill] sm:$0xff]  ;;  %v10510_v7 = vld [vmem:[#allocation104_spill] sm:$0xff] }
 0x46e   :  { %v3091_v2 = vmul.f32 %v10494_v28, %v3075_v17  ;;  %v3096_v54 = vmul.f32 %v10495_v60, %v3074_v36  ;;  %v10496_v6 = vmov %v10495_v60  ;;  %v3080_v16 = vadd.f32 %v3078_v31, %v3048_v15  ;;  %v10511_v28 = vld [vmem:[#allocation148_spill] sm:$0xff] }
 0x46f   :  { %v3097_v40 = vmul.f32 %v10496_v6, %v3075_v17  ;;  %v3081_v21 = vadd.f32 %v3079_v61, %v3049_v14  ;;  %v3086_v23 = vadd.f32 %v3084_v5, %v3054_v11  ;;  %v3087_v9 = vadd.f32 %v3085_v26, %v3055_v53  ;;  %v3465_v5 = vpop.permute.xlu0 %3464  ;;  %v10512_v60 = vld [vmem:[#allocation106_spill] sm:$0xff]  ;;  %v10513_v6 = vld [vmem:[#allocation105_spill] sm:$0xff] }
 0x470   :  { %v3092_v48 = vadd.f32 %v3090_v41, %v3060_v25  ;;  %v3093_v27 = vadd.f32 %v3091_v2, %v3061_v37  ;;  %v3098_v18 = vadd.f32 %v3096_v54, %v3066_v10  ;;  %v3108_v36 = vsel %vm306_vm5, %v3105_v44, %v3107_v56 }
 0x471   :  { %v3099_v52 = vadd.f32 %v3097_v40, %v3067_v55  ;;  %v3109_v17 = vsel %vm306_vm5, %v3107_v56, %v3105_v44  ;;  %v3164_v39 = vsel %vm175_vm4, %v3161_v49, %v3163_v32  ;;  %v3165_v46 = vsel %vm175_vm4, %v3163_v32, %v3161_v49  ;;  %v10514_v32 = vld [vmem:[#allocation108_spill] sm:$0xff] }
 0x472   :  { %v3110_v62 = vsel %vm173_vm7, %v3109_v17, 0.0  ;;  %v3111_v0 = vsel %vm174_vm8, %v3108_v36, 0.0  ;;  %v3166_v63 = vsel %vm175_vm4, %v3164_v39, 0.0  ;;  %v3167_v24 = vsel %vm176_vm6, %v3165_v46, 0.0 }
 0x473   :  { %v10499_v58 = vstv %s10497_s24  ;;  %v10501_v34 = vstv %s7688_s5  ;;  %v10503_v59 = vstv %s10498_s28  ;;  %v10505_v3 = vstv %s7724_s10  ;;  %s10531_s5 = sld [smem:[#allocation40_spill]] }
 0x474   :  { %v3114_v56 = vmul.f32 %v10499_v58, %v3110_v62  ;;  %v10500_v44 = vmov %v10499_v58  ;;  %v3120_v14 = vmul.f32 %v10501_v34, %v3110_v62  ;;  %v10502_v4 = vmov %v10501_v34  ;;  %s10551_s10 = sld [smem:[#allocation51_spill]] }
 0x475   :  { %v3115_v47 = vmul.f32 %v10500_v44, %v3111_v0  ;;  %v3121_v53 = vmul.f32 %v10502_v4, %v3111_v0  ;;  %v3126_v15 = vmul.f32 %v10503_v59, %v3110_v62  ;;  %v10504_v20 = vmov %v10503_v59 }
 0x476   :  { %v3127_v11 = vmul.f32 %v10504_v20, %v3111_v0  ;;  %v3132_v37 = vmul.f32 %v10505_v3, %v3110_v62  ;;  %v10506_v13 = vmov %v10505_v3  ;;  %v3116_v43 = vadd.f32 %v3114_v56, %v3080_v16  ;;  %v10515_v16 = vld [vmem:[#allocation109_spill] sm:$0xff] }
 0x477   :  { %v3133_v55 = vmul.f32 %v10506_v13, %v3111_v0  ;;  %v3117_v25 = vadd.f32 %v3115_v47, %v3081_v21  ;;  %v3122_v57 = vadd.f32 %v3120_v14, %v3086_v23  ;;  %v3123_v10 = vadd.f32 %v3121_v53, %v3087_v9  ;;  %v10516_v23 = vld [vmem:[#allocation111_spill] sm:$0xff]  ;;  %v3287_v13 = vpop.permute.xlu1 %3286 }
 0x478   :  { %v3128_v1 = vadd.f32 %v3126_v15, %v3092_v48  ;;  %v3129_v31 = vadd.f32 %v3127_v11, %v3093_v27  ;;  %v3134_v30 = vadd.f32 %v3132_v37, %v3098_v18  ;;  %v3140_v2 = vadd.f32 %v10511_v28, %v3116_v43  ;;  %v10525_v43 = vld [vmem:[#allocation209_spill] sm:$0xff]  ;;  %v10533_v28 = vld [vmem:[#allocation216_spill] sm:$0xff] }
 0x479   :  { %v3135_v61 = vadd.f32 %v3133_v55, %v3099_v52  ;;  %v3141_v26 = vadd.f32 %v10509_v22, %v3117_v25  ;;  %v3147_v41 = vadd.f32 %v10510_v7, %v3123_v10  ;;  %v3146_v54 = vadd.f32 %v10512_v60, %v3122_v57  ;;  %v3285_v55 = vpop.permute.xlu0 %3284  ;;  %v10526_v57 = vld [vmem:[#allocation210_spill] sm:$0xff]  ;;  %v10532_v7 = vld [vmem:[#allocation215_spill] sm:$0xff] }
 0x47a   :  { %v3153_v40 = vadd.f32 %v10513_v6, %v3129_v31  ;;  %v3152_v21 = vadd.f32 %v10515_v16, %v3128_v1  ;;  %v3158_v9 = vadd.f32 %v10516_v23, %v3134_v30  ;;  %v10517_v48 = vstv %s10507_s29  ;;  %v10527_v1 = vld [vmem:[#allocation211_spill] sm:$0xff]  ;;  %v10528_v31 = vld [vmem:[#allocation212_spill] sm:$0xff]  ;;  %v10529_v30 = vld [vmem:[#allocation213_spill] sm:$0xff] }
 0x47b   :  { %v3159_v49 = vadd.f32 %v10514_v32, %v3135_v61  ;;  %v3170_v27 = vmul.f32 %v10517_v48, %v3166_v63  ;;  %v10518_v18 = vmov %v10517_v48  ;;  %v10519_v36 = vstv %s10508_s8  ;;  %v10530_v22 = vld [vmem:[#allocation214_spill] sm:$0xff]  ;;  %v10534_v6 = vld [vmem:[#allocation110_spill] sm:$0xff]  ;;  %v10535_v32 = vld [vmem:[#allocation150_spill] sm:$0xff] }
 0x47c   :  { %v3171_v52 = vmul.f32 %v10518_v18, %v3167_v24  ;;  %v3176_v17 = vmul.f32 %v10519_v36, %v3166_v63  ;;  %v10520_v39 = vmov %v10519_v36  ;;  %v10521_v62 = vstv %s10242_s23  ;;  %v10536_v23 = vld [vmem:[#allocation152_spill] sm:$0xff]  ;;  %v10537_v48 = vld [vmem:[#allocation154_spill] sm:$0xff]  ;;  %s10610_s23 = sld [smem:[#allocation64_spill]] }
 0x47d   :  { %v3177_v46 = vmul.f32 %v10520_v39, %v3167_v24  ;;  %v3182_v0 = vmul.f32 %v10521_v62, %v3166_v63  ;;  %v10522_v58 = vmov %v10521_v62  ;;  %v10523_v44 = vstv %s10243_s4  ;;  %s10590_s4 = sld [smem:[#allocation62_spill]] }
 0x47e   :  { %v3183_v56 = vmul.f32 %v10522_v58, %v3167_v24  ;;  %v3188_v47 = vmul.f32 %v10523_v44, %v3166_v63  ;;  %v10524_v34 = vmov %v10523_v44  ;;  %v3172_v4 = vadd.f32 %v3170_v27, %v3140_v2 }
 0x47f   :  { %v3189_v14 = vmul.f32 %v10524_v34, %v3167_v24  ;;  %v3173_v53 = vadd.f32 %v3171_v52, %v3141_v26  ;;  %v3178_v59 = vadd.f32 %v3176_v17, %v3146_v54  ;;  %v3179_v15 = vadd.f32 %v3177_v46, %v3147_v41 }
 0x480   :  { %v3184_v20 = vadd.f32 %v3182_v0, %v3152_v21  ;;  %v3185_v11 = vadd.f32 %v3183_v56, %v3153_v40  ;;  %v3190_v3 = vadd.f32 %v3188_v47, %v3158_v9  ;;  %v3204_v25 = vadd.f32 %v10525_v43, %v3172_v4  ;;  %v3343_v4 = vpop.permute.xlu1 %3342  ;;  %v10547_v43 = vld [vmem:[#allocation147_spill] sm:$0xff] }
 0x481   :  { %v3191_v37 = vadd.f32 %v3189_v14, %v3159_v49  ;;  %v3205_v10 = vadd.f32 %v10526_v57, %v3173_v53  ;;  %v3210_v63 = vadd.f32 %v10527_v1, %v3178_v59  ;;  %v3211_v24 = vadd.f32 %v10528_v31, %v3179_v15  ;;  %v3341_v53 = vpop.permute.xlu0 %3340  ;;  %v10549_v31 = vld [vmem:[#allocation153_spill] sm:$0xff] }
 0x482   :  { %v3216_v61 = vadd.f32 %v10529_v30, %v3184_v20  ;;  %v3217_v26 = vadd.f32 %v10530_v22, %v3185_v11  ;;  %v3222_v41 = vadd.f32 %v10532_v7, %v3190_v3  ;;  %v3468_v60 = vsel %vm306_vm5, %v3465_v5, %v3467_v35  ;;  %v10546_v3 = vld [vmem:[#allocation113_spill] sm:$0xff] }
 0x483   :  { %v3223_v2 = vadd.f32 %v10533_v28, %v3191_v37  ;;  %v3469_v54 = vsel %vm306_vm5, %v3467_v35, %v3465_v5  ;;  %v3229_v40 = vadd.f32 %v10534_v6, %v3205_v10  ;;  %v3235_v49 = vadd.f32 %v10535_v32, %v3211_v24  ;;  %v10548_v10 = vld [vmem:[#allocation151_spill] sm:$0xff] }
 0x484   :  { %v3470_v16 = vsel %vm173_vm7, %v3469_v54, 0.0  ;;  %v3471_v21 = vsel %vm174_vm8, %v3468_v60, 0.0  ;;  %v3241_v9 = vadd.f32 %v10536_v23, %v3217_v26  ;;  %v10538_v18 = vstv %s10244_s6  ;;  %v3379_v23 = vpop.permute.xlu1 %3378  ;;  %s10613_s6 = sld [smem:[#allocation65_spill]] }
 0x485   :  { %v3247_v27 = vadd.f32 %v10537_v48, %v3223_v2  ;;  %v8816_v52 = vmul.f32 %v10538_v18, %v3470_v16  ;;  %v10539_v36 = vmov %v10538_v18  ;;  %v10540_v35 = vstv %s10245_s26  ;;  %s10588_s26 = sld [smem:[#allocation60_spill]] }
 0x486   :  { %v8820_v17 = vmul.f32 %v10539_v36, %v3471_v21  ;;  %v8824_v5 = vmul.f32 %v10540_v35, %v3470_v16  ;;  %v10541_v39 = vmov %v10540_v35  ;;  %v10542_v62 = vstv %s10531_s5 }
 0x487   :  { %v8828_v46 = vmul.f32 %v10541_v39, %v3471_v21  ;;  %v8832_v0 = vmul.f32 %v10542_v62, %v3470_v16  ;;  %v10543_v58 = vmov %v10542_v62  ;;  %v10544_v44 = vstv %s10248_s22  ;;  %s10550_s22 = sld [smem:[#allocation44_spill]] }
 0x488   :  { %v8836_v56 = vmul.f32 %v10543_v58, %v3471_v21  ;;  %v8840_v47 = vmul.f32 %v10544_v44, %v3470_v16  ;;  %v10545_v34 = vmov %v10544_v44  ;;  %v3261_v59 = vadd.f32 %v8508_v29, %v3229_v40  ;;  %v10562_v44 = vld [vmem:[#allocation156_spill] sm:$0xff] }
 0x489   :  { %v8844_v14 = vmul.f32 %v10545_v34, %v3471_v21  ;;  %v3267_v15 = vadd.f32 %v8516_v45, %v3235_v49  ;;  %v3273_v20 = vadd.f32 %v8524_v42, %v3241_v9  ;;  %v3279_v11 = vadd.f32 %v8532_v38, %v3247_v27  ;;  %v3377_v9 = vpop.permute.xlu0 %3376 }
 0x48a   :  { %v3228_v37 = vadd.f32 %v10546_v3, %v3204_v25  ;;  %v3234_v57 = vadd.f32 %v10547_v43, %v3210_v63  ;;  %v3240_v1 = vadd.f32 %v10548_v10, %v3216_v61  ;;  %v3246_v24 = vadd.f32 %v10549_v31, %v3222_v41  ;;  %v10564_v3 = vld [vmem:[#allocation155_spill] sm:$0xff] }
 0x48b   :  { %v3288_v29 = vsel %vm306_vm5, %v3285_v55, %v3287_v13  ;;  %v3289_v45 = vsel %vm306_vm5, %v3287_v13, %v3285_v55  ;;  %v3344_v42 = vsel %vm175_vm4, %v3341_v53, %v3343_v4  ;;  %v3345_v38 = vsel %vm175_vm4, %v3343_v4, %v3341_v53  ;;  %v10563_v4 = vld [vmem:[#allocation116_spill] sm:$0xff]  ;;  %v10568_v31 = vld [vmem:[#allocation120_spill] sm:$0xff] }
 0x48c   :  { %v3260_v25 = vadd.f32 %v8504_v50, %v3228_v37  ;;  %v3266_v63 = vadd.f32 %v8512_v19, %v3234_v57  ;;  %v3272_v30 = vadd.f32 %v8520_v12, %v3240_v1  ;;  %v3278_v61 = vadd.f32 %v8528_v51, %v3246_v24  ;;  %v10566_v57 = vld [vmem:[#allocation118_spill] sm:$0xff] }
 0x48d   :  { %v3290_v13 = vsel %vm173_vm7, %v3289_v45, 0.0  ;;  %v3291_v55 = vsel %vm174_vm8, %v3288_v29, 0.0  ;;  %v3346_v22 = vsel %vm175_vm4, %v3344_v42, 0.0  ;;  %v3347_v26 = vsel %vm176_vm6, %v3345_v38, 0.0 }
 0x48e   :  { %v10552_v7 = vstv %s10249_s15  ;;  %v10554_v28 = vstv %s10550_s22  ;;  %v10556_v60 = vstv %s7945_s18  ;;  %v10558_v32 = vstv %s10551_s10  ;;  %s10560_s15 = sld [smem:[#allocation54_spill]] }
 0x48f   :  { %v3294_v50 = vmul.f32 %v10552_v7, %v3290_v13  ;;  %v10553_v41 = vmov %v10552_v7  ;;  %v3300_v12 = vmul.f32 %v10554_v28, %v3290_v13  ;;  %v10555_v2 = vmov %v10554_v28  ;;  %s10561_s18 = sld [smem:[#allocation55_spill]] }
 0x490   :  { %v3295_v19 = vmul.f32 %v10553_v41, %v3291_v55  ;;  %v3301_v51 = vmul.f32 %v10555_v2, %v3291_v55  ;;  %v3306_v54 = vmul.f32 %v10556_v60, %v3290_v13  ;;  %v10557_v6 = vmov %v10556_v60  ;;  %v3435_v2 = vpop.permute.xlu1 %3434 }
 0x491   :  { %v3307_v40 = vmul.f32 %v10557_v6, %v3291_v55  ;;  %v3312_v49 = vmul.f32 %v10558_v32, %v3290_v13  ;;  %v10559_v16 = vmov %v10558_v32  ;;  %v3296_v48 = vadd.f32 %v3294_v50, %v3260_v25 }
 0x492   :  { %v3313_v21 = vmul.f32 %v10559_v16, %v3291_v55  ;;  %v3297_v27 = vadd.f32 %v3295_v19, %v3261_v59  ;;  %v3302_v18 = vadd.f32 %v3300_v12, %v3266_v63  ;;  %v3303_v36 = vadd.f32 %v3301_v51, %v3267_v15  ;;  %v10565_v59 = vld [vmem:[#allocation119_spill] sm:$0xff]  ;;  %v10567_v15 = vld [vmem:[#allocation123_spill] sm:$0xff]  ;;  %v3433_v51 = vpop.permute.xlu0 %3432 }
 0x493   :  { %v3308_v35 = vadd.f32 %v3306_v54, %v3272_v30  ;;  %v3309_v39 = vadd.f32 %v3307_v40, %v3273_v20  ;;  %v3314_v62 = vadd.f32 %v3312_v49, %v3278_v61  ;;  %v3320_v37 = vadd.f32 %v10564_v3, %v3296_v48  ;;  %v10569_v20 = vld [vmem:[#allocation124_spill] sm:$0xff] }
 0x494   :  { %v3315_v58 = vadd.f32 %v3313_v21, %v3279_v11  ;;  %v3321_v34 = vadd.f32 %v10562_v44, %v3297_v27  ;;  %v3327_v53 = vadd.f32 %v10563_v4, %v3303_v36  ;;  %v3326_v43 = vadd.f32 %v10565_v59, %v3302_v18 }
 0x495   :  { %v3333_v10 = vadd.f32 %v10566_v57, %v3309_v39  ;;  %v3332_v24 = vadd.f32 %v10568_v31, %v3308_v35  ;;  %v3338_v29 = vadd.f32 %v10569_v20, %v3314_v62  ;;  %v10570_v45 = vstv %s10253_s25  ;;  %s10578_s25 = sld [smem:[#allocation58_spill]] }
 0x496   :  { %v3339_v1 = vadd.f32 %v10567_v15, %v3315_v58  ;;  %v3350_v42 = vmul.f32 %v10570_v45, %v3346_v22  ;;  %v10571_v11 = vmov %v10570_v45  ;;  %v10572_v25 = vstv %s10254_s20  ;;  %s10579_s20 = sld [smem:[#allocation59_spill]] }
 0x497   :  { %v3351_v38 = vmul.f32 %v10571_v11, %v3347_v26  ;;  %v3356_v63 = vmul.f32 %v10572_v25, %v3346_v22  ;;  %v10573_v30 = vmov %v10572_v25  ;;  %v10574_v13 = vstv %s10560_s15  ;;  %v10591_v25 = vld [vmem:[#allocation126_spill] sm:$0xff] }
 0x498   :  { %v3357_v61 = vmul.f32 %v10573_v30, %v3347_v26  ;;  %v3362_v55 = vmul.f32 %v10574_v13, %v3346_v22  ;;  %v10575_v7 = vmov %v10574_v13  ;;  %v10576_v41 = vstv %s10561_s18  ;;  %v10592_v30 = vld [vmem:[#allocation86_spill] sm:$0xff]  ;;  %v10594_v13 = vld [vmem:[#allocation127_spill] sm:$0xff] }
 0x499   :  { %v3363_v50 = vmul.f32 %v10575_v7, %v3347_v26  ;;  %v3368_v19 = vmul.f32 %v10576_v41, %v3346_v22  ;;  %v10577_v28 = vmov %v10576_v41  ;;  %v3352_v60 = vadd.f32 %v3350_v42, %v3320_v37  ;;  %v10595_v7 = vld [vmem:[#allocation87_spill] sm:$0xff]  ;;  %v10596_v41 = vld [vmem:[#allocation160_spill] sm:$0xff] }
 0x49a   :  { %v3369_v12 = vmul.f32 %v10577_v28, %v3347_v26  ;;  %v3353_v54 = vadd.f32 %v3351_v38, %v3321_v34  ;;  %v3358_v6 = vadd.f32 %v3356_v63, %v3326_v43  ;;  %v3359_v40 = vadd.f32 %v3357_v61, %v3327_v53  ;;  %v10597_v28 = vld [vmem:[#allocation159_spill] sm:$0xff] }
 0x49b   :  { %v3364_v32 = vadd.f32 %v3362_v55, %v3332_v24  ;;  %v3365_v49 = vadd.f32 %v3363_v50, %v3333_v10  ;;  %v3370_v16 = vadd.f32 %v3368_v19, %v3338_v29  ;;  %v3380_v22 = vsel %vm306_vm5, %v3377_v9, %v3379_v23 }
 0x49c   :  { %v3371_v21 = vadd.f32 %v3369_v12, %v3339_v1  ;;  %v3381_v26 = vsel %vm306_vm5, %v3379_v23, %v3377_v9  ;;  %v3436_v48 = vsel %vm175_vm4, %v3433_v51, %v3435_v2  ;;  %v3437_v27 = vsel %vm175_vm4, %v3435_v2, %v3433_v51  ;;  %v10598_v2 = vld [vmem:[#allocation158_spill] sm:$0xff] }
 0x49d   :  { %v3382_v18 = vsel %vm173_vm7, %v3381_v26, 0.0  ;;  %v3383_v36 = vsel %vm174_vm8, %v3380_v22, 0.0  ;;  %v3438_v35 = vsel %vm175_vm4, %v3436_v48, 0.0  ;;  %v3439_v39 = vsel %vm176_vm6, %v3437_v27, 0.0 }
 0x49e   :  { %v10580_v62 = vstv %s10257_s16  ;;  %v10582_v44 = vstv %s10578_s25  ;;  %v10584_v3 = vstv %s8094_s7  ;;  %v10586_v57 = vstv %s10579_s20  ;;  %s10589_s16 = sld [smem:[#allocation61_spill]] }
 0x49f   :  { %v3386_v23 = vmul.f32 %v10580_v62, %v3382_v18  ;;  %v10581_v9 = vmov %v10580_v62  ;;  %v3392_v34 = vmul.f32 %v10582_v44, %v3382_v18  ;;  %v10583_v4 = vmov %v10582_v44  ;;  %s10593_s7 = sld [smem:[#allocation63_spill]] }
 0x4a0   :  { %v3387_v58 = vmul.f32 %v10581_v9, %v3383_v36  ;;  %v3393_v53 = vmul.f32 %v10583_v4, %v3383_v36  ;;  %v3398_v37 = vmul.f32 %v10584_v3, %v3382_v18  ;;  %v10585_v59 = vmov %v10584_v3 }
 0x4a1   :  { %v3399_v43 = vmul.f32 %v10585_v59, %v3383_v36  ;;  %v3404_v10 = vmul.f32 %v10586_v57, %v3382_v18  ;;  %v10587_v15 = vmov %v10586_v57  ;;  %v3388_v31 = vadd.f32 %v3386_v23, %v3352_v60  ;;  %v10599_v60 = vld [vmem:[#allocation157_spill] sm:$0xff] }
 0x4a2   :  { %v3405_v1 = vmul.f32 %v10587_v15, %v3383_v36  ;;  %v3389_v24 = vadd.f32 %v3387_v58, %v3353_v54  ;;  %v3394_v20 = vadd.f32 %v3392_v34, %v3358_v6  ;;  %v3395_v29 = vadd.f32 %v3393_v53, %v3359_v40  ;;  %v3523_v6 = vpop.permute.xlu1 %3522  ;;  %v3521_v40 = vpop.permute.xlu0 %3520 }
 0x4a3   :  { %v3400_v45 = vadd.f32 %v3398_v37, %v3364_v32  ;;  %v3401_v42 = vadd.f32 %v3399_v43, %v3365_v49  ;;  %v3406_v11 = vadd.f32 %v3404_v10, %v3370_v16  ;;  %v3412_v55 = vadd.f32 %v10594_v13, %v3388_v31  ;;  %v10618_v13 = vld [vmem:[#allocation29_spill] sm:$0xff] }
 0x4a4   :  { %v3407_v38 = vadd.f32 %v3405_v1, %v3371_v21  ;;  %v3413_v63 = vadd.f32 %v10591_v25, %v3389_v24  ;;  %v3419_v61 = vadd.f32 %v10592_v30, %v3395_v29  ;;  %v3418_v50 = vadd.f32 %v10595_v7, %v3394_v20  ;;  %v10609_v25 = vld [vmem:[#allocation121_spill] sm:$0xff]  ;;  %v10615_v30 = vld [vmem:[#allocation184_spill] sm:$0xff] }
 0x4a5   :  { %v3425_v19 = vadd.f32 %v10596_v41, %v3401_v42  ;;  %v3424_v51 = vadd.f32 %v10598_v2, %v3400_v45  ;;  %v3430_v54 = vadd.f32 %v10599_v60, %v3406_v11  ;;  %v10600_v32 = vstv %s10588_s26  ;;  %v10608_v11 = vld [vmem:[#allocation97_spill] sm:$0xff] }
 0x4a6   :  { %v3431_v12 = vadd.f32 %v10597_v28, %v3407_v38  ;;  %v3442_v49 = vmul.f32 %v10600_v32, %v3438_v35  ;;  %v10601_v16 = vmov %v10600_v32  ;;  %v10602_v22 = vstv %s10589_s16  ;;  %v3559_v45 = vpop.permute.xlu1 %3558  ;;  %v3557_v42 = vpop.permute.xlu0 %3556 }
 0x4a7   :  { %v3443_v21 = vmul.f32 %v10601_v16, %v3439_v39  ;;  %v3448_v26 = vmul.f32 %v10602_v22, %v3438_v35  ;;  %v10603_v48 = vmov %v10602_v22  ;;  %v10604_v18 = vstv %s10590_s4 }
 0x4a8   :  { %v3449_v27 = vmul.f32 %v10603_v48, %v3439_v39  ;;  %v3454_v36 = vmul.f32 %v10604_v18, %v3438_v35  ;;  %v10605_v62 = vmov %v10604_v18  ;;  %v10606_v9 = vstv %s10593_s7 }
 0x4a9   :  { %v3455_v23 = vmul.f32 %v10605_v62, %v3439_v39  ;;  %v3460_v58 = vmul.f32 %v10606_v9, %v3438_v35  ;;  %v10607_v44 = vmov %v10606_v9  ;;  %v3444_v4 = vadd.f32 %v3442_v49, %v3412_v55 }
 0x4aa   :  { %v3461_v34 = vmul.f32 %v10607_v44, %v3439_v39  ;;  %v3445_v53 = vadd.f32 %v3443_v21, %v3413_v63  ;;  %v3450_v3 = vadd.f32 %v3448_v26, %v3418_v50  ;;  %v3451_v37 = vadd.f32 %v3449_v27, %v3419_v61  ;;  %v10612_v63 = vld [vmem:[#allocation114_spill] sm:$0xff] }
 0x4ab   :  { %v3456_v59 = vadd.f32 %v3454_v36, %v3424_v51  ;;  %v3457_v43 = vadd.f32 %v3455_v23, %v3425_v19  ;;  %v3462_v57 = vadd.f32 %v3460_v58, %v3430_v54  ;;  %v3476_v15 = vadd.f32 %v8816_v52, %v3444_v4 }
 0x4ac   :  { %v3463_v10 = vadd.f32 %v3461_v34, %v3431_v12  ;;  %v3477_v1 = vadd.f32 %v8820_v17, %v3445_v53  ;;  %v3482_v31 = vadd.f32 %v8824_v5, %v3450_v3  ;;  %v3483_v24 = vadd.f32 %v8828_v46, %v3451_v37  ;;  %v10611_v17 = vld [vmem:[#allocation107_spill] sm:$0xff] }
 0x4ad   :  { %v3488_v35 = vadd.f32 %v8832_v0, %v3456_v59  ;;  %v3489_v39 = vadd.f32 %v8836_v56, %v3457_v43  ;;  %v3494_v20 = vadd.f32 %v8840_v47, %v3462_v57  ;;  %v3500_v5 = vadd.f32 %v10611_v17, %v3476_v15  ;;  %v10614_v0 = vld [vmem:[#allocation130_spill] sm:$0xff] }
 0x4ae   :  { %v3495_v29 = vadd.f32 %v8844_v14, %v3463_v10  ;;  %v3501_v38 = vadd.f32 %v10608_v11, %v3477_v1  ;;  %v3507_v52 = vadd.f32 %v10609_v25, %v3483_v24  ;;  %v3506_v46 = vadd.f32 %v10612_v63, %v3482_v31  ;;  %v10617_v14 = vld [vmem:[#allocation128_spill] sm:$0xff] }
 0x4af   :  { %v3513_v56 = vadd.f32 %v10614_v0, %v3489_v39  ;;  %v3512_v61 = vadd.f32 %v10617_v14, %v3488_v35  ;;  %v3518_v55 = vadd.f32 %v10618_v13, %v3494_v20  ;;  %v3524_v7 = vsel %vm175_vm4, %v3521_v40, %v3523_v6  ;;  %v3615_v35 = vpop.permute.xlu1 %3614  ;;  %v3613_v39 = vpop.permute.xlu0 %3612 }
 0x4b0   :  { %v3519_v47 = vadd.f32 %v10615_v30, %v3495_v29  ;;  %v3525_v50 = vsel %vm175_vm4, %v3523_v6, %v3521_v40  ;;  %v3560_v41 = vsel %vm306_vm5, %v3557_v42, %v3559_v45  ;;  %v3561_v19 = vsel %vm306_vm5, %v3559_v45, %v3557_v42 }
 0x4b1   :  { %v3526_v28 = vsel %vm175_vm4, %v3524_v7, 0.0  ;;  %v3527_v12 = vsel %vm176_vm6, %v3525_v50, 0.0  ;;  %v3562_v2 = vsel %vm173_vm7, %v3561_v19, 0.0  ;;  %v3563_v51 = vsel %vm174_vm8, %v3560_v41, 0.0 }
 0x4b2   :  { %v10620_v60 = vstv %s10610_s23  ;;  %v10622_v32 = vstv %s10613_s6  ;;  %v10625_v22 = vstv %s10616_s14  ;;  %v10627_v18 = vstv %s10619_s2 }
 0x4b3   :  { %v3530_v54 = vmul.f32 %v10620_v60, %v3526_v28  ;;  %v10621_v6 = vmov %v10620_v60  ;;  %v3536_v49 = vmul.f32 %v10622_v32, %v3526_v28  ;;  %v10623_v16 = vmov %v10622_v32 }
 0x4b4   :  { %v3531_v40 = vmul.f32 %v10621_v6, %v3527_v12  ;;  %v3537_v21 = vmul.f32 %v10623_v16, %v3527_v12  ;;  %v3542_v26 = vmul.f32 %v10625_v22, %v3526_v28  ;;  %v10626_v48 = vmov %v10625_v22  ;;  %v10647_v16 = vld [vmem:[#allocation186_spill] sm:$0xff] }
 0x4b5   :  { %v3543_v27 = vmul.f32 %v10626_v48, %v3527_v12  ;;  %v3548_v36 = vmul.f32 %v10627_v18, %v3526_v28  ;;  %v10628_v62 = vmov %v10627_v18  ;;  %v3532_v9 = vadd.f32 %v3530_v54, %v3500_v5  ;;  %v10649_v48 = vld [vmem:[#allocation187_spill] sm:$0xff]  ;;  %v10650_v18 = vld [vmem:[#allocation188_spill] sm:$0xff] }
 0x4b6   :  { %v3549_v23 = vmul.f32 %v10628_v62, %v3527_v12  ;;  %v3533_v58 = vadd.f32 %v3531_v40, %v3501_v38  ;;  %v3538_v44 = vadd.f32 %v3536_v49, %v3506_v46  ;;  %v3539_v34 = vadd.f32 %v3537_v21, %v3507_v52  ;;  %v10645_v40 = vld [vmem:[#allocation185_spill] sm:$0xff] }
 0x4b7   :  { %v3544_v4 = vadd.f32 %v3542_v26, %v3512_v61  ;;  %v3545_v53 = vadd.f32 %v3543_v27, %v3513_v56  ;;  %v3550_v3 = vadd.f32 %v3548_v36, %v3518_v55  ;;  %v10631_v59 = vstv %s8204_s0  ;;  %s9038_s0 = sld [smem:[#allocation14 + $0x1]] }
 0x4b8   :  { %v3551_v37 = vadd.f32 %v3549_v23, %v3519_v47  ;;  %v3566_v43 = vmul.f32 %v10631_v59, %v3562_v2  ;;  %v10632_v57 = vmov %v10631_v59  ;;  %v10633_v15 = vstv %s10624_s3  ;;  %v10651_v23 = vld [vmem:[#allocation189_spill] sm:$0xff]  ;;  %v10654_v59 = vld [vmem:[#allocation192_spill] sm:$0xff] }
 0x4b9   :  { %v3567_v10 = vmul.f32 %v10632_v57, %v3563_v51  ;;  %v3572_v1 = vmul.f32 %v10633_v15, %v3562_v2  ;;  %v10634_v31 = vmov %v10633_v15  ;;  %v10635_v20 = vstv %s10629_s1 }
 0x4ba   :  { %v3573_v24 = vmul.f32 %v10634_v31, %v3563_v51  ;;  %v3578_v29 = vmul.f32 %v10635_v20, %v3562_v2  ;;  %v10636_v45 = vmov %v10635_v20  ;;  %v10637_v11 = vstv %s10630_s12 }
 0x4bb   :  { %v3579_v42 = vmul.f32 %v10636_v45, %v3563_v51  ;;  %v3584_v38 = vmul.f32 %v10637_v11, %v3562_v2  ;;  %v10638_v25 = vmov %v10637_v11  ;;  %v3568_v17 = vadd.f32 %v3566_v43, %v3532_v9 }
 0x4bc   :  { %v3585_v52 = vmul.f32 %v10638_v25, %v3563_v51  ;;  %v3569_v5 = vadd.f32 %v3567_v10, %v3533_v58  ;;  %v3574_v63 = vadd.f32 %v3572_v1, %v3538_v44  ;;  %v3575_v46 = vadd.f32 %v3573_v24, %v3539_v34  ;;  %v10652_v58 = vld [vmem:[#allocation190_spill] sm:$0xff]  ;;  %v10653_v34 = vld [vmem:[#allocation191_spill] sm:$0xff] }
 0x4bd   :  { %v3580_v0 = vadd.f32 %v3578_v29, %v3544_v4  ;;  %v3581_v56 = vadd.f32 %v3579_v42, %v3545_v53  ;;  %v3616_v30 = vsel %vm175_vm4, %v3613_v39, %v3615_v35  ;;  %v3617_v47 = vsel %vm175_vm4, %v3615_v35, %v3613_v39 }
 0x4be   :  { %v3618_v14 = vsel %vm175_vm4, %v3616_v30, 0.0  ;;  %v3619_v61 = vsel %vm176_vm6, %v3617_v47, 0.0  ;;  %v3587_v13 = vadd.f32 %v3585_v52, %v3551_v37  ;;  %v3586_v55 = vadd.f32 %v3584_v38, %v3550_v3  ;;  %v3663_v30 = vld [vmem:[#allocation16 + $0x18] sm:$0xff]  ;;  %v3664_v47 = vld [vmem:[#allocation18] sm:$0xff] }
 0x4bf   :  { %v10639_v7 = vstv %s8256_s30  ;;  %v10641_v28 = vstv %s8270_s13  ;;  %v10643_v60 = vstv %s8288_s11  ;;  %v10646_v32 = vstv %s8306_s19 }
 0x4c0   :  { %v3622_v50 = vmul.f32 %v10639_v7, %v3618_v14  ;;  %v10640_v41 = vmov %v10639_v7  ;;  %v3628_v12 = vmul.f32 %v10641_v28, %v3618_v14  ;;  %v10642_v2 = vmov %v10641_v28  ;;  %v3669_v7 = vld [vmem:[#allocation18 + $0x28] sm:$0xff] }
 0x4c1   :  { %v3623_v19 = vmul.f32 %v10640_v41, %v3619_v61  ;;  %v3629_v51 = vmul.f32 %v10642_v2, %v3619_v61  ;;  %v3634_v54 = vmul.f32 %v10643_v60, %v3618_v14  ;;  %v10644_v6 = vmov %v10643_v60  ;;  %v3670_v2 = vld [vmem:[#allocation18 + $0x30] sm:$0xff] }
 0x4c2   :  { %v3635_v33 = vmul.f32 %v10644_v6, %v3619_v61  ;;  %v3611_v8 = vadd.f32 %v10645_v40, %v3587_v13  ;;  %v3641_v49 = vmul.f32 %v10646_v32, %v3619_v61  ;;  %v3610_v21 = vadd.f32 %v10647_v16, %v3586_v55  ;;  %v3665_v55 = vld [vmem:[#allocation18 + $0x8] sm:$0xff]  ;;  %v3671_v40 = vld [vmem:[#allocation18 + $0x38] sm:$0xff] }
 0x4c3   :  { %v10648_v22 = vmov %v10646_v32  ;;  %v3605_v27 = vadd.f32 %v10649_v48, %v3581_v56  ;;  %v3604_v36 = vadd.f32 %v10650_v18, %v3580_v0  ;;  %v3599_v9 = vadd.f32 %v10651_v23, %v3575_v46  ;;  %v3662_v46 = vld [vmem:[#allocation16 + $0x10] sm:$0xff]  ;;  %v3661_v56 = vld [vmem:[#allocation16 + $0x8] sm:$0xff] }
 0x4c4   :  { %v3640_v26 = vmul.f32 %v10648_v22, %v3618_v14  ;;  %v3643_v62 = vadd.f32 %v3641_v49, %v3611_v8  ;;  %v3598_v44 = vadd.f32 %v10652_v58, %v3574_v63  ;;  %v3593_v4 = vadd.f32 %v10653_v34, %v3569_v5  ;;  %v3660_v63 = vld [vmem:[#allocation16] sm:$0xff] }
 0x4c5   :  { %v3637_v3 = vadd.f32 %v3635_v33, %v3605_v27  ;;  %v3636_v37 = vadd.f32 %v3634_v54, %v3604_v36  ;;  %v3592_v43 = vadd.f32 %v10654_v59, %v3568_v17  ;;  %v10655_v57 = vstv %s8352_s21  ;;  %v3668_v14 = vld [vmem:[#allocation18 + $0x20] sm:$0xff]  ;;  %v3667_v33 = vld [vmem:[#allocation18 + $0x18] sm:$0xff] }
 0x4c6   :  { %v3642_v53 = vadd.f32 %v3640_v26, %v3610_v21  ;;  %v3659_v10 = vadd.f32 %v10655_v57, %v3643_v62  ;;  %v3631_v15 = vadd.f32 %v3629_v51, %v3599_v9  ;;  %v10656_v1 = vmov %v10655_v57 }
 0x4c7   :  { %v3649_v24 = vstv %s9038_s0  ;;  %v3630_v35 = vadd.f32 %v3628_v12, %v3598_v44  ;;  %v10657_v39 = vstv %s8366_s27  ;;  %v3625_v29 = vadd.f32 %v3623_v19, %v3593_v4  ;;  %v3666_v12 = vld [vmem:[#allocation18 + $0x10] sm:$0xff]  ;;  %s4512_s27 = smov [#allocation19]  }
 0x4c8   :  { %v3658_v31 = vadd.f32 %v10656_v1, %v3642_v53  ;;  %3709 = vmatprep.subr.mxu0 %v3659_v10  ;;  %4267 = vmatprep.subr.mxu1 %v3659_v10  ;;  %v3655_v20 = vadd.f32 %v10657_v39, %v3637_v3  ;;  %v10658_v45 = vmov %v10657_v39  ;;  %v3645_v11 = vstv %s9052_s9  ;;  %s3787_s13 = sshll.u32 %s4512_s27, 4  ;;  %s3788_s13 = int_to_ptr.vmem [resolvable:$true] %s3787_s13 }
 0x4c9   :  { %v3654_v42 = vadd.f32 %v10658_v45, %v3636_v37  ;;  %v3624_v38 = vadd.f32 %v3622_v50, %v3592_v43  ;;  %v3651_v25 = vadd.f32 %v3649_v24, %v3631_v15  ;;  %v3650_v52 = vadd.f32 %v3649_v24, %v3630_v35  ;;  %s4456_s11 = scalar_lea.vmem %s3788_s13, 1024  ;;  %p4461_p8 = scmp.lt.s32.totalorder %s3788_s13, %s3788_s13 }
 0x4ca   :  { %3710 = vmatpush1.msra.mxu0 %v3658_v31  ;;  %4271 = vmatpush1.msra.mxu1 %v3658_v31  ;;  %v3647_v17 = vadd.f32 %v3645_v11, %v3625_v29  ;;  %v4511_v0 = vmov 0.0   ;;  %p4457_p7 = scmp.ne.s32.totalorder %s3788_s13, %s4456_s11  ;;  %p4462_p9 = scmp.lt.s32.totalorder %s4456_s11, %s4456_s11 }
 0x4cb   :  { %3711 = vmatprep.subr.mxu0 %v3655_v20  ;;  %4268 = vmatprep.subr.mxu1 %v3655_v20  ;;  %v3646_v5 = vadd.f32 %v3645_v11, %v3624_v38 }
 0x4cc   :  { %3712 = vmatpush1.msra.mxu0 %v3654_v42  ;;  %4272 = vmatpush1.msra.mxu1 %v3654_v42  ;;  %p4463_p10 = por %p4462_p9, %p4461_p8 }
 0x4cd   :  { %3713 = vmatprep.subr.mxu0 %v3651_v25  ;;  %4269 = vmatprep.subr.mxu1 %v3651_v25 }
 0x4ce   :  { %3714 = vmatpush1.msra.mxu0 %v3650_v52  ;;  %4273 = vmatpush1.msra.mxu1 %v3650_v52  ;;  %p4464_p11 = pnand %p4463_p10, %p4457_p7 }
 0x4cf   :  { %3715 = vmatprep.subr.mxu0 %v3647_v17  ;;  %4270 = vmatprep.subr.mxu1 %v3647_v17 }
 0x4d0   :  { %3716 = vmatpush1.msra.mxu0 %v3646_v5  ;;  %4274 = vmatpush1.msra.mxu1 %v3646_v5 }
 0x4d1   :  { %3749 = vmatprep.mubr.f32.mxu0 %v4511_v0  ;;  %3761 = vmatprep.mubr.f32.mxu1 %v4511_v0 }
 0x4d2   :  { %4263 = vmatmul.mubr.msk.f32.vlgmr.msra.gmra.mxu0 %vm3672_vm14, %v3660_v63  ;;  %4265 = vmatmul.mubr.msk.f32.vlgmr.msra.gmra.mxu1 %vm3672_vm14, %v3662_v46 }
 0x4d3   :  { %3755 = vmatprep.mubr.f32.mxu0 %v4511_v0  ;;  %3767 = vmatprep.mubr.f32.mxu1 %v4511_v0 }
 0x4d6   :  { %4264 = vmatmul.mubr.msk.f32.gmra.mxu0 %vm3672_vm14, %v3661_v56  ;;  %4266 = vmatmul.mubr.msk.f32.gmra.mxu1 %vm3672_vm14, %v3663_v30 }
 0x592   :  { %v3751_v61 = vpop.f32.mrf.mxu0  ;;  %v3763_v13 = vpop.f32.mrf.mxu1 }
 0x593   :  { %v3752_v50 = vadd.f32 %v3751_v61, %v3664_v47  ;;  %v3764_v41 = vadd.f32 %v3763_v13, %v3668_v14 }
 0x594   :  { %v3753_v19 = vpop.f32.mrf.mxu0  ;;  %v3765_v28 = vpop.f32.mrf.mxu1 }
 0x595   :  { %3774 = vst [vmem:[#allocation19] sm:$0xff] %v3752_v50  ;;  %3778 = vst [vmem:[#allocation19 + $0x20] sm:$0xff] %v3764_v41  ;;  %v3754_v51 = vadd.f32 %v3753_v19, %v3665_v55  ;;  %v3766_v60 = vadd.f32 %v3765_v28, %v3669_v7 }
 0x596   :  { %v3757_v54 = vpop.f32.mrf.mxu0  ;;  %v3769_v6 = vpop.f32.mrf.mxu1 }
 0x597   :  { %3775 = vst [vmem:[#allocation19 + $0x8] sm:$0xff] %v3754_v51  ;;  %3779 = vst [vmem:[#allocation19 + $0x28] sm:$0xff] %v3766_v60  ;;  %v3758_v8 = vadd.f32 %v3757_v54, %v3666_v12  ;;  %v3770_v32 = vadd.f32 %v3769_v6, %v3670_v2 }
 0x598   :  { %v3759_v49 = vpop.f32.mrf.mxu0  ;;  %v3771_v16 = vpop.f32.mrf.mxu1 }
 0x599   :  { %3776 = vst [vmem:[#allocation19 + $0x10] sm:$0xff] %v3758_v8  ;;  %3780 = vst [vmem:[#allocation19 + $0x30] sm:$0xff] %v3770_v32  ;;  %v3760_v21 = vadd.f32 %v3759_v49, %v3667_v33  ;;  %v3772_v22 = vadd.f32 %v3771_v16, %v3671_v40 }
 0x59b   :  { %3777 = vst [vmem:[#allocation19 + $0x18] sm:$0xff] %v3760_v21  ;;  %3781 = vst [vmem:[#allocation19 + $0x38] sm:$0xff] %v3772_v22 }
 0x59c   :  { %4467 = shalt.err (!%p4464_p11)
}
 0x59d   :  { %s10659_s30 = smov 16   ;;  %s10660_s19 = smov 256  }
 0x59e   :  { %s10661_s24 = sld [smem:[#allocation217_spill]] }
 0x5a4   :  { %3793 = dma.vmem_to_hbm [thread:$0]  %s3788_s13, 1024, %s10661_s24, [#allocation4], %s10660_s19, %s10660_s19, %s10659_s30  }
 0x5a5   :  { %4492 = dma.done.wait [#allocation4], 1024  }
 0x5a6   :  { %4493 = vsyncadd [#allocation4], 4294966272 }
 0x5a7   :  { %3797 = vsyncpa [#allocation3], 1 }
 0x5a8   :  { %3798 = vsyncpa [#allocation17], 1 }
 0x5a9   :  { %3799 = vsyncpa [#allocation4], 1 }
 0x5aa   :  { %3800 = vsyncpa [#allocation5], 1 }
 0x5ab   :  { %3801 = vsyncpa [#allocation12], 1 }
 0x5ac   :  { %3802 = vsyncpa [#allocation6], 1 }
 0x5ad   :  { %3803 = vsyncpa [#allocation10], 1 }
 0x5ae   :  { %3804 = vsyncpa [#allocation15], 1 }

</bundles_post_ra>
